<compile_context>
chip_gen: v5e
topology: v5e:2x2
jax: 0.10.0
libtpu: 0.0.40
codegen_flags: <defaults>
</compile_context>

<pallas_src>
import functools

import numpy as np
import jax
import jax.numpy as jnp
from jax.experimental import pallas as pl
from jax.experimental.pallas import tpu as pltpu

EPS = 1e-5


# ----------------------------------------------------------------------------
# Pallas kernels
# ----------------------------------------------------------------------------
def _residual_block_kernel(*refs, H, has_ds):
    """Fused ResidualBlock for one batch element.

    Activation layout: (H, W*C), lane dim = W*C.
    conv(3x3) = sum over 3 vertical taps of (shifted rows) @ banded weight,
    where the banded weight folds the 3 horizontal taps, zero padding and the
    BatchNorm scale.  Pool(4x4) = 4 selection matmuls (horizontal) + max over
    4-row groups (vertical).
    """
    if has_ds:
        (x_ref, m1_ref, sh1_ref, m2_ref, sh2_ref,
         md_ref, shd_ref, p_ref, o_ref) = refs
    else:
        x_ref, m1_ref, sh1_ref, m2_ref, sh2_ref, p_ref, o_ref = refs
        md_ref = shd_ref = None

    x = x_ref[0]                                        # (H, W*Cin) f32

    def conv3x3(a, m_ref, sh_ref):
        # a: (H, W*Cin) f32 ; m_ref: (3, W*Cin, W*Cout) bf16 ; sh_ref: (1, W*Cout)
        zero = jnp.zeros((1, a.shape[1]), jnp.float32)
        ape = jnp.concatenate([zero, a, zero], axis=0)  # (H+2, W*Cin)
        acc = jnp.zeros((H, m_ref.shape[2]), jnp.float32)
        for dy in range(3):                             # 3 vertical taps
            rows = ape[dy:dy + H].astype(jnp.bfloat16)
            acc = acc + jnp.dot(rows, m_ref[dy],
                                preferred_element_type=jnp.float32)
        return acc + sh_ref[...]

    y = jnp.maximum(conv3x3(x, m1_ref, sh1_ref), 0.0)   # conv1 + BN + ReLU
    y = conv3x3(y, m2_ref, sh2_ref)                     # conv2 + BN
    if has_ds:                                          # 1x1 downsample + BN
        res = jnp.dot(x.astype(jnp.bfloat16), md_ref[...],
                      preferred_element_type=jnp.float32) + shd_ref[...]
    else:
        res = x
    z = jnp.maximum(y + res, 0.0)                       # add + ReLU, (H, W*Cout)

    # 4x4 max pool.  Horizontal: exact f32 selection matmuls per offset.
    h0 = jnp.dot(z, p_ref[0], preferred_element_type=jnp.float32)
    h1 = jnp.dot(z, p_ref[1], preferred_element_type=jnp.float32)
    h2 = jnp.dot(z, p_ref[2], preferred_element_type=jnp.float32)
    h3 = jnp.dot(z, p_ref[3], preferred_element_type=jnp.float32)
    hz = jnp.maximum(jnp.maximum(h0, h1), jnp.maximum(h2, h3))  # (H, Wo*Cout)
    # Vertical: max over each group of 4 rows.
    rows_out = []
    for i in range(H // 4):
        r = hz[4 * i:4 * i + 4]
        rows_out.append(jnp.maximum(jnp.maximum(r[0:1], r[1:2]),
                                    jnp.maximum(r[2:3], r[3:4])))
    o_ref[0] = jnp.concatenate(rows_out, axis=0)        # (Ho, Wo*Cout)


def _head_kernel(x_ref, woc_ref, shoc_ref, wfc1_ref, shfc1_ref, wh_ref,
                 bh_ref, o_ref, *, Hf):
    """Fused outconv(1x1)+BN+ReLU -> flatten -> fc1+BN1d+ReLU -> head linear.

    The NCHW flatten order of the PyTorch model is folded into the fc1 weight
    layout; the flatten itself becomes a sum over the Hf spatial rows.
    Dropout(0.5) is identity in eval mode.
    """
    # TODO(synk): training-mode Dropout / batch-statistics BatchNorm not implemented.
    x = x_ref[0].astype(jnp.bfloat16)                   # (Hf, Wf*Cl)
    oc = jnp.dot(x, woc_ref[...], preferred_element_type=jnp.float32)
    oc = jnp.maximum(oc + shoc_ref[...], 0.0)           # (Hf, Wf*256)

    acc = jnp.zeros((1, wfc1_ref.shape[2]), jnp.float32)
    for h in range(Hf):
        acc = acc + jnp.dot(oc[h:h + 1].astype(jnp.bfloat16), wfc1_ref[h],
                            preferred_element_type=jnp.float32)
    fc1 = jnp.maximum(acc + shfc1_ref[...], 0.0)        # (1, 1024)

    out = jnp.dot(fc1.astype(jnp.bfloat16), wh_ref[...],
                  preferred_element_type=jnp.float32) + bh_ref[...]
    o_ref[0] = out                                      # (1, 8)


# ----------------------------------------------------------------------------
# pallas_call wrappers
# ----------------------------------------------------------------------------
def _full_spec(a):
    shape = tuple(a.shape)
    ndim = len(shape)
    return pl.BlockSpec(shape, lambda n: (0,) * ndim)


def residual_block(x, blk):
    N, H, WCin = x.shape
    Ho = H // 4
    lane_out = blk["p"].shape[2]            # Wo * Cout
    has_ds = "md" in blk

    args = [x, blk["m1"], blk["sh1"], blk["m2"], blk["sh2"]]
    if has_ds:
        args += [blk["md"], blk["shd"]]
    args += [blk["p"]]

    in_specs = [pl.BlockSpec((1, H, WCin), lambda n: (n, 0, 0))]
    in_specs += [_full_spec(a) for a in args[1:]]

    return pl.pallas_call(
        functools.partial(_residual_block_kernel, H=H, has_ds=has_ds),
        out_shape=jax.ShapeDtypeStruct((N, Ho, lane_out), jnp.float32),
        grid=(N,),
        in_specs=in_specs,
        out_specs=pl.BlockSpec((1, Ho, lane_out), lambda n: (n, 0, 0)),
        compiler_params=pltpu.CompilerParams(dimension_semantics=("parallel",)),
    )(*args)


def head_stack(x, hp):
    N, Hf, WCl = x.shape
    n_out = hp["wh"].shape[1]
    args = [x, hp["woc"], hp["shoc"], hp["wfc1"], hp["shfc1"], hp["wh"], hp["bh"]]
    in_specs = [pl.BlockSpec((1, Hf, WCl), lambda n: (n, 0, 0))]
    in_specs += [_full_spec(a) for a in args[1:]]
    out = pl.pallas_call(
        functools.partial(_head_kernel, Hf=Hf),
        out_shape=jax.ShapeDtypeStruct((N, 1, n_out), jnp.float32),
        grid=(N,),
        in_specs=in_specs,
        out_specs=pl.BlockSpec((1, 1, n_out), lambda n: (n, 0, 0)),
        compiler_params=pltpu.CompilerParams(dimension_semantics=("parallel",)),
    )(*args)
    return out.reshape(N, n_out)


@jax.jit
def skip_network_forward(params, x_nchw):
    N, C, H, W = x_nchw.shape
    x = x_nchw.transpose(0, 2, 3, 1).reshape(N, H, W * C)   # (N, H, W*C)
    for blk in params["blocks"]:
        x = residual_block(x, blk)
    return head_stack(x, params["head"])


# ----------------------------------------------------------------------------
# Parameter construction (deterministic random weights, eval-mode BN folding)
# ----------------------------------------------------------------------------
class _Keys:
    def __init__(self, key):
        self.key = key

    def __call__(self):
        self.key, sub = jax.random.split(self.key)
        return sub


def _randn(key, shape, s):
    return np.asarray(s * jax.random.normal(key, shape, jnp.float32))


def _conv_raw(keys, cin, cout, k):
    return _randn(keys(), (cout, cin, k, k), 0.1), _randn(keys(), (cout,), 0.05)


def _bn_raw(keys, c):
    gamma = 1.0 + _randn(keys(), (c,), 0.1)
    beta = _randn(keys(), (c,), 0.05)
    mean = _randn(keys(), (c,), 0.05)
    var = 1.0 + np.asarray(jax.random.uniform(keys(), (c,), jnp.float32)) * 0.1
    return gamma, beta, mean, var


def _fold_bn(bias, gamma, beta, mean, var):
    scale = gamma / np.sqrt(var + EPS)
    shift = scale * (bias - mean) + beta
    return scale.astype(np.float32), shift.astype(np.float32)


def _banded_conv3x3(w_scaled, W):
    """(Cout, Cin, 3, 3) scale-folded conv weight -> (3, W*Cin, W*Cout) banded
    matrices; M[dy] applies all 3 horizontal taps (with zero padding) to a
    vertically shifted (H, W*Cin) row block."""
    cout, cin = w_scaled.shape[0], w_scaled.shape[1]
    m = np.zeros((3, W * cin, W * cout), np.float32)
    for dy in range(3):
        for dx in range(3):
            tap = w_scaled[:, :, dy, dx].T          # (Cin, Cout)
            for w in range(W):
                wp = w + dx - 1
                if 0 <= wp < W:
                    m[dy, wp * cin:(wp + 1) * cin, w * cout:(w + 1) * cout] += tap
    return m


def _pool_selectors(W, C):
    """0/1 selection matrices so that z @ P[dj] picks columns (4j+dj, c)."""
    Wo = W // 4
    p = np.zeros((4, W * C, Wo * C), np.float32)
    for dj in range(4):
        for j in range(Wo):
            for c in range(C):
                p[dj, (4 * j + dj) * C + c, j * C + c] = 1.0
    return p


def init_params(key, channels, input_shape, num_classes=8, fc_hidden=1024,
                out_conv_channels=256):
    keys = _Keys(key)
    in_c, h, w = input_shape
    params = {"blocks": []}
    for out_c in channels:
        w1, b1 = _conv_raw(keys, in_c, out_c, 3)
        bn1 = _bn_raw(keys, out_c)
        w2, b2 = _conv_raw(keys, out_c, out_c, 3)
        bn2 = _bn_raw(keys, out_c)
        s1, sh1 = _fold_bn(b1, *bn1)
        s2, sh2 = _fold_bn(b2, *bn2)
        blk = {
            "m1": jnp.asarray(_banded_conv3x3(w1 * s1[:, None, None, None], w), jnp.bfloat16),
            "sh1": jnp.asarray(np.tile(sh1, w)[None, :], jnp.float32),
            "m2": jnp.asarray(_banded_conv3x3(w2 * s2[:, None, None, None], w), jnp.bfloat16),
            "sh2": jnp.asarray(np.tile(sh2, w)[None, :], jnp.float32),
            "p": jnp.asarray(_pool_selectors(w, out_c), jnp.float32),
        }
        if in_c != out_c:   # torch adds a 1x1 conv + BN downsample in this case
            wd, bd = _conv_raw(keys, in_c, out_c, 1)
            bnd = _bn_raw(keys, out_c)
            sd, shd = _fold_bn(bd, *bnd)
            a = (wd[:, :, 0, 0] * sd[:, None]).T              # (Cin, Cout)
            blk["md"] = jnp.asarray(np.kron(np.eye(w, dtype=np.float32), a), jnp.bfloat16)
            blk["shd"] = jnp.asarray(np.tile(shd, w)[None, :], jnp.float32)
        params["blocks"].append(blk)
        in_c = out_c
        h, w = h // 4, w // 4                                 # MaxPool2d(4)

    # outconv (1x1 -> 256) + BN + ReLU
    woc, boc = _conv_raw(keys, in_c, out_conv_channels, 1)
    bnoc = _bn_raw(keys, out_conv_channels)
    soc, shoc = _fold_bn(boc, *bnoc)
    aoc = (woc[:, :, 0, 0] * soc[:, None]).T                  # (Cl, 256)

    # fc1 (Linear + BN1d + ReLU); fold BN scale into rows and the NCHW flatten
    # (torch x.view(N, -1)) into the weight layout consumed by the kernel.
    to_linear = out_conv_channels * h * w
    w_fc1 = _randn(keys(), (fc_hidden, to_linear), 0.05)
    b_fc1 = _randn(keys(), (fc_hidden,), 0.05)
    bnfc1 = _bn_raw(keys, fc_hidden)
    sfc1, shfc1 = _fold_bn(b_fc1, *bnfc1)
    w_fc1s = w_fc1 * sfc1[:, None]
    wfc1_k = w_fc1s.reshape(fc_hidden, out_conv_channels, h, w)
    wfc1_k = wfc1_k.transpose(2, 3, 1, 0).reshape(h, w * out_conv_channels, fc_hidden)

    # head Linear(1024, 8)
    w_head = _randn(keys(), (num_classes, fc_hidden), 0.05)
    b_head = _randn(keys(), (num_classes,), 0.05)

    params["head"] = {
        "woc": jnp.asarray(np.kron(np.eye(w, dtype=np.float32), aoc), jnp.bfloat16),
        "shoc": jnp.asarray(np.tile(shoc, w)[None, :], jnp.float32),
        "wfc1": jnp.asarray(wfc1_k, jnp.bfloat16),
        "shfc1": jnp.asarray(shfc1[None, :], jnp.float32),
        "wh": jnp.asarray(w_head.T, jnp.bfloat16),
        "bh": jnp.asarray(b_head[None, :], jnp.float32),
    }
    return params


# ----------------------------------------------------------------------------
if __name__ == "__main__":
    channels = (4, 8)
    input_shape = (1, 32, 32)   # (C, H, W) as passed to SkipNetwork
    batch = 2

    key = jax.random.PRNGKey(0)
    pkey, xkey = jax.random.split(key)
    params = init_params(pkey, channels, input_shape)
    x = jax.random.normal(xkey, (batch, *input_shape), jnp.float32)   # NCHW

    out = skip_network_forward(params, x)
    out = jax.block_until_ready(out)
    assert out.shape == (batch, 8), out.shape
    assert bool(jnp.all(jnp.isfinite(out)))
    print("KERNEL_OK")
</pallas_src>

<mosaic_0001>
module attributes {stable_mosaic.version = 11 : i64} {
  func.func @_residual_block_kernel(%arg0: i32, %arg1: memref<1x8x32xf32, #tpu.memory_space<vmem>>, %arg2: memref<3x32x64xbf16, #tpu.memory_space<vmem>>, %arg3: memref<1x64xf32, #tpu.memory_space<vmem>>, %arg4: memref<3x64x64xbf16, #tpu.memory_space<vmem>>, %arg5: memref<1x64xf32, #tpu.memory_space<vmem>>, %arg6: memref<32x64xbf16, #tpu.memory_space<vmem>>, %arg7: memref<1x64xf32, #tpu.memory_space<vmem>>, %arg8: memref<4x64x16xf32, #tpu.memory_space<vmem>>, %arg9: memref<1x2x16xf32, #tpu.memory_space<vmem>>) attributes {dimension_semantics = [#tpu.dimension_semantics<parallel>], iteration_bounds = array<i64: 2>, scalar_prefetch = 0 : i64, scratch_operands = 0 : i64, tpu.core_type = #tpu.core_type<tc>, window_params = [{transform_indices = @transform_0, window_bounds = array<i64: 1, 8, 32>}, {pipeline_mode = #tpu.pipeline_mode<synchronous>, transform_indices = @transform_1, window_bounds = array<i64: 3, 32, 64>}, {pipeline_mode = #tpu.pipeline_mode<synchronous>, transform_indices = @transform_2, window_bounds = array<i64: 1, 64>}, {pipeline_mode = #tpu.pipeline_mode<synchronous>, transform_indices = @transform_3, window_bounds = array<i64: 3, 64, 64>}, {pipeline_mode = #tpu.pipeline_mode<synchronous>, transform_indices = @transform_4, window_bounds = array<i64: 1, 64>}, {pipeline_mode = #tpu.pipeline_mode<synchronous>, transform_indices = @transform_5, window_bounds = array<i64: 32, 64>}, {pipeline_mode = #tpu.pipeline_mode<synchronous>, transform_indices = @transform_6, window_bounds = array<i64: 1, 64>}, {pipeline_mode = #tpu.pipeline_mode<synchronous>, transform_indices = @transform_7, window_bounds = array<i64: 4, 64, 16>}, {transform_indices = @transform_8, window_bounds = array<i64: 1, 2, 16>}]} {
    %c0 = arith.constant 0 : index
    %c0_0 = arith.constant 0 : index
    %c0_1 = arith.constant 0 : index
    %0 = vector.load %arg1[%c0, %c0_0, %c0_1] : memref<1x8x32xf32, #tpu.memory_space<vmem>>, vector<1x8x32xf32>
    %1 = vector.shape_cast %0 : vector<1x8x32xf32> to vector<8x32xf32>
    %cst = arith.constant 0.000000e+00 : f32
    %2 = vector.broadcast %cst : f32 to vector<1x32xf32>
    %3 = tpu.concatenate %2, %1, %2 in 0 : vector<1x32xf32>, vector<8x32xf32>, vector<1x32xf32> -> vector<10x32xf32>
    %cst_2 = arith.constant 0.000000e+00 : f32
    %4 = vector.broadcast %cst_2 : f32 to vector<8x64xf32>
    %5 = vector.extract_strided_slice %3 {offsets = [0, 0], sizes = [8, 32], strides = [1, 1]} : vector<10x32xf32> to vector<8x32xf32>
    %6 = arith.truncf %5 : vector<8x32xf32> to vector<8x32xbf16>
    %c0_3 = arith.constant 0 : index
    %c0_4 = arith.constant 0 : index
    %c0_5 = arith.constant 0 : index
    %7 = vector.load %arg2[%c0_3, %c0_4, %c0_5] : memref<3x32x64xbf16, #tpu.memory_space<vmem>>, vector<1x32x64xbf16>
    %8 = vector.shape_cast %7 : vector<1x32x64xbf16> to vector<32x64xbf16>
    %cst_6 = arith.constant dense<0.000000e+00> : vector<8x64xf32>
    %9 = tpu.matmul %6, %8, %cst_6 {dimension_numbers = #tpu.dot_dimension_numbers<[1], [0], [0], [1], [0, 0, 1, 1], [], []>} : vector<8x32xbf16>, vector<32x64xbf16>, vector<8x64xf32> -> vector<8x64xf32>
    %10 = arith.addf %4, %9 : vector<8x64xf32>
    %11 = vector.extract_strided_slice %3 {offsets = [1, 0], sizes = [8, 32], strides = [1, 1]} : vector<10x32xf32> to vector<8x32xf32>
    %12 = arith.truncf %11 : vector<8x32xf32> to vector<8x32xbf16>
    %c1 = arith.constant 1 : index
    %c0_7 = arith.constant 0 : index
    %c0_8 = arith.constant 0 : index
    %13 = vector.load %arg2[%c1, %c0_7, %c0_8] : memref<3x32x64xbf16, #tpu.memory_space<vmem>>, vector<1x32x64xbf16>
    %14 = vector.shape_cast %13 : vector<1x32x64xbf16> to vector<32x64xbf16>
    %cst_9 = arith.constant dense<0.000000e+00> : vector<8x64xf32>
    %15 = tpu.matmul %12, %14, %cst_9 {dimension_numbers = #tpu.dot_dimension_numbers<[1], [0], [0], [1], [0, 0, 1, 1], [], []>} : vector<8x32xbf16>, vector<32x64xbf16>, vector<8x64xf32> -> vector<8x64xf32>
    %16 = arith.addf %10, %15 : vector<8x64xf32>
    %17 = vector.extract_strided_slice %3 {offsets = [2, 0], sizes = [8, 32], strides = [1, 1]} : vector<10x32xf32> to vector<8x32xf32>
    %18 = arith.truncf %17 : vector<8x32xf32> to vector<8x32xbf16>
    %c2 = arith.constant 2 : index
    %c0_10 = arith.constant 0 : index
    %c0_11 = arith.constant 0 : index
    %19 = vector.load %arg2[%c2, %c0_10, %c0_11] : memref<3x32x64xbf16, #tpu.memory_space<vmem>>, vector<1x32x64xbf16>
    %20 = vector.shape_cast %19 : vector<1x32x64xbf16> to vector<32x64xbf16>
    %cst_12 = arith.constant dense<0.000000e+00> : vector<8x64xf32>
    %21 = tpu.matmul %18, %20, %cst_12 {dimension_numbers = #tpu.dot_dimension_numbers<[1], [0], [0], [1], [0, 0, 1, 1], [], []>} : vector<8x32xbf16>, vector<32x64xbf16>, vector<8x64xf32> -> vector<8x64xf32>
    %22 = arith.addf %16, %21 : vector<8x64xf32>
    %c0_13 = arith.constant 0 : index
    %c0_14 = arith.constant 0 : index
    %23 = vector.load %arg3[%c0_13, %c0_14] : memref<1x64xf32, #tpu.memory_space<vmem>>, vector<1x64xf32>
    %24 = vector.broadcast %23 : vector<1x64xf32> to vector<8x64xf32>
    %25 = arith.addf %22, %24 : vector<8x64xf32>
    %cst_15 = arith.constant 0.000000e+00 : f32
    %26 = vector.broadcast %cst_15 : f32 to vector<8x64xf32>
    %27 = arith.maximumf %25, %26 : vector<8x64xf32>
    %cst_16 = arith.constant 0.000000e+00 : f32
    %28 = vector.broadcast %cst_16 : f32 to vector<1x64xf32>
    %29 = tpu.concatenate %28, %27, %28 in 0 : vector<1x64xf32>, vector<8x64xf32>, vector<1x64xf32> -> vector<10x64xf32>
    %cst_17 = arith.constant 0.000000e+00 : f32
    %30 = vector.broadcast %cst_17 : f32 to vector<8x64xf32>
    %31 = vector.extract_strided_slice %29 {offsets = [0, 0], sizes = [8, 64], strides = [1, 1]} : vector<10x64xf32> to vector<8x64xf32>
    %32 = arith.truncf %31 : vector<8x64xf32> to vector<8x64xbf16>
    %c0_18 = arith.constant 0 : index
    %c0_19 = arith.constant 0 : index
    %c0_20 = arith.constant 0 : index
    %33 = vector.load %arg4[%c0_18, %c0_19, %c0_20] : memref<3x64x64xbf16, #tpu.memory_space<vmem>>, vector<1x64x64xbf16>
    %34 = vector.shape_cast %33 : vector<1x64x64xbf16> to vector<64x64xbf16>
    %cst_21 = arith.constant dense<0.000000e+00> : vector<8x64xf32>
    %35 = tpu.matmul %32, %34, %cst_21 {dimension_numbers = #tpu.dot_dimension_numbers<[1], [0], [0], [1], [0, 0, 1, 1], [], []>} : vector<8x64xbf16>, vector<64x64xbf16>, vector<8x64xf32> -> vector<8x64xf32>
    %36 = arith.addf %30, %35 : vector<8x64xf32>
    %37 = vector.extract_strided_slice %29 {offsets = [1, 0], sizes = [8, 64], strides = [1, 1]} : vector<10x64xf32> to vector<8x64xf32>
    %38 = arith.truncf %37 : vector<8x64xf32> to vector<8x64xbf16>
    %c1_22 = arith.constant 1 : index
    %c0_23 = arith.constant 0 : index
    %c0_24 = arith.constant 0 : index
    %39 = vector.load %arg4[%c1_22, %c0_23, %c0_24] : memref<3x64x64xbf16, #tpu.memory_space<vmem>>, vector<1x64x64xbf16>
    %40 = vector.shape_cast %39 : vector<1x64x64xbf16> to vector<64x64xbf16>
    %cst_25 = arith.constant dense<0.000000e+00> : vector<8x64xf32>
    %41 = tpu.matmul %38, %40, %cst_25 {dimension_numbers = #tpu.dot_dimension_numbers<[1], [0], [0], [1], [0, 0, 1, 1], [], []>} : vector<8x64xbf16>, vector<64x64xbf16>, vector<8x64xf32> -> vector<8x64xf32>
    %42 = arith.addf %36, %41 : vector<8x64xf32>
    %43 = vector.extract_strided_slice %29 {offsets = [2, 0], sizes = [8, 64], strides = [1, 1]} : vector<10x64xf32> to vector<8x64xf32>
    %44 = arith.truncf %43 : vector<8x64xf32> to vector<8x64xbf16>
    %c2_26 = arith.constant 2 : index
    %c0_27 = arith.constant 0 : index
    %c0_28 = arith.constant 0 : index
    %45 = vector.load %arg4[%c2_26, %c0_27, %c0_28] : memref<3x64x64xbf16, #tpu.memory_space<vmem>>, vector<1x64x64xbf16>
    %46 = vector.shape_cast %45 : vector<1x64x64xbf16> to vector<64x64xbf16>
    %cst_29 = arith.constant dense<0.000000e+00> : vector<8x64xf32>
    %47 = tpu.matmul %44, %46, %cst_29 {dimension_numbers = #tpu.dot_dimension_numbers<[1], [0], [0], [1], [0, 0, 1, 1], [], []>} : vector<8x64xbf16>, vector<64x64xbf16>, vector<8x64xf32> -> vector<8x64xf32>
    %48 = arith.addf %42, %47 : vector<8x64xf32>
    %c0_30 = arith.constant 0 : index
    %c0_31 = arith.constant 0 : index
    %49 = vector.load %arg5[%c0_30, %c0_31] : memref<1x64xf32, #tpu.memory_space<vmem>>, vector<1x64xf32>
    %50 = vector.broadcast %49 : vector<1x64xf32> to vector<8x64xf32>
    %51 = arith.addf %48, %50 : vector<8x64xf32>
    %52 = arith.truncf %1 : vector<8x32xf32> to vector<8x32xbf16>
    %c0_32 = arith.constant 0 : index
    %c0_33 = arith.constant 0 : index
    %53 = vector.load %arg6[%c0_32, %c0_33] : memref<32x64xbf16, #tpu.memory_space<vmem>>, vector<32x64xbf16>
    %cst_34 = arith.constant dense<0.000000e+00> : vector<8x64xf32>
    %54 = tpu.matmul %52, %53, %cst_34 {dimension_numbers = #tpu.dot_dimension_numbers<[1], [0], [0], [1], [0, 0, 1, 1], [], []>} : vector<8x32xbf16>, vector<32x64xbf16>, vector<8x64xf32> -> vector<8x64xf32>
    %c0_35 = arith.constant 0 : index
    %c0_36 = arith.constant 0 : index
    %55 = vector.load %arg7[%c0_35, %c0_36] : memref<1x64xf32, #tpu.memory_space<vmem>>, vector<1x64xf32>
    %56 = vector.broadcast %55 : vector<1x64xf32> to vector<8x64xf32>
    %57 = arith.addf %54, %56 : vector<8x64xf32>
    %58 = arith.addf %51, %57 : vector<8x64xf32>
    %cst_37 = arith.constant 0.000000e+00 : f32
    %59 = vector.broadcast %cst_37 : f32 to vector<8x64xf32>
    %60 = arith.maximumf %58, %59 : vector<8x64xf32>
    %c0_38 = arith.constant 0 : index
    %c0_39 = arith.constant 0 : index
    %c0_40 = arith.constant 0 : index
    %61 = vector.load %arg8[%c0_38, %c0_39, %c0_40] : memref<4x64x16xf32, #tpu.memory_space<vmem>>, vector<1x64x16xf32>
    %62 = vector.shape_cast %61 : vector<1x64x16xf32> to vector<64x16xf32>
    %cst_41 = arith.constant dense<0.000000e+00> : vector<8x16xf32>
    %63 = tpu.matmul %60, %62, %cst_41 {dimension_numbers = #tpu.dot_dimension_numbers<[1], [0], [0], [1], [0, 0, 1, 1], [], []>} : vector<8x64xf32>, vector<64x16xf32>, vector<8x16xf32> -> vector<8x16xf32>
    %c1_42 = arith.constant 1 : index
    %c0_43 = arith.constant 0 : index
    %c0_44 = arith.constant 0 : index
    %64 = vector.load %arg8[%c1_42, %c0_43, %c0_44] : memref<4x64x16xf32, #tpu.memory_space<vmem>>, vector<1x64x16xf32>
    %65 = vector.shape_cast %64 : vector<1x64x16xf32> to vector<64x16xf32>
    %cst_45 = arith.constant dense<0.000000e+00> : vector<8x16xf32>
    %66 = tpu.matmul %60, %65, %cst_45 {dimension_numbers = #tpu.dot_dimension_numbers<[1], [0], [0], [1], [0, 0, 1, 1], [], []>} : vector<8x64xf32>, vector<64x16xf32>, vector<8x16xf32> -> vector<8x16xf32>
    %c2_46 = arith.constant 2 : index
    %c0_47 = arith.constant 0 : index
    %c0_48 = arith.constant 0 : index
    %67 = vector.load %arg8[%c2_46, %c0_47, %c0_48] : memref<4x64x16xf32, #tpu.memory_space<vmem>>, vector<1x64x16xf32>
    %68 = vector.shape_cast %67 : vector<1x64x16xf32> to vector<64x16xf32>
    %cst_49 = arith.constant dense<0.000000e+00> : vector<8x16xf32>
    %69 = tpu.matmul %60, %68, %cst_49 {dimension_numbers = #tpu.dot_dimension_numbers<[1], [0], [0], [1], [0, 0, 1, 1], [], []>} : vector<8x64xf32>, vector<64x16xf32>, vector<8x16xf32> -> vector<8x16xf32>
    %c3 = arith.constant 3 : index
    %c0_50 = arith.constant 0 : index
    %c0_51 = arith.constant 0 : index
    %70 = vector.load %arg8[%c3, %c0_50, %c0_51] : memref<4x64x16xf32, #tpu.memory_space<vmem>>, vector<1x64x16xf32>
    %71 = vector.shape_cast %70 : vector<1x64x16xf32> to vector<64x16xf32>
    %cst_52 = arith.constant dense<0.000000e+00> : vector<8x16xf32>
    %72 = tpu.matmul %60, %71, %cst_52 {dimension_numbers = #tpu.dot_dimension_numbers<[1], [0], [0], [1], [0, 0, 1, 1], [], []>} : vector<8x64xf32>, vector<64x16xf32>, vector<8x16xf32> -> vector<8x16xf32>
    %73 = arith.maximumf %63, %66 : vector<8x16xf32>
    %74 = arith.maximumf %69, %72 : vector<8x16xf32>
    %75 = arith.maximumf %73, %74 : vector<8x16xf32>
    %76 = vector.extract_strided_slice %75 {offsets = [0, 0], sizes = [4, 16], strides = [1, 1]} : vector<8x16xf32> to vector<4x16xf32>
    %77 = vector.extract_strided_slice %76 {offsets = [0, 0], sizes = [1, 16], strides = [1, 1]} : vector<4x16xf32> to vector<1x16xf32>
    %78 = vector.extract_strided_slice %76 {offsets = [1, 0], sizes = [1, 16], strides = [1, 1]} : vector<4x16xf32> to vector<1x16xf32>
    %79 = arith.maximumf %77, %78 : vector<1x16xf32>
    %80 = vector.extract_strided_slice %76 {offsets = [2, 0], sizes = [1, 16], strides = [1, 1]} : vector<4x16xf32> to vector<1x16xf32>
    %81 = vector.extract_strided_slice %76 {offsets = [3, 0], sizes = [1, 16], strides = [1, 1]} : vector<4x16xf32> to vector<1x16xf32>
    %82 = arith.maximumf %80, %81 : vector<1x16xf32>
    %83 = arith.maximumf %79, %82 : vector<1x16xf32>
    %84 = vector.extract_strided_slice %75 {offsets = [4, 0], sizes = [4, 16], strides = [1, 1]} : vector<8x16xf32> to vector<4x16xf32>
    %85 = vector.extract_strided_slice %84 {offsets = [0, 0], sizes = [1, 16], strides = [1, 1]} : vector<4x16xf32> to vector<1x16xf32>
    %86 = vector.extract_strided_slice %84 {offsets = [1, 0], sizes = [1, 16], strides = [1, 1]} : vector<4x16xf32> to vector<1x16xf32>
    %87 = arith.maximumf %85, %86 : vector<1x16xf32>
    %88 = vector.extract_strided_slice %84 {offsets = [2, 0], sizes = [1, 16], strides = [1, 1]} : vector<4x16xf32> to vector<1x16xf32>
    %89 = vector.extract_strided_slice %84 {offsets = [3, 0], sizes = [1, 16], strides = [1, 1]} : vector<4x16xf32> to vector<1x16xf32>
    %90 = arith.maximumf %88, %89 : vector<1x16xf32>
    %91 = arith.maximumf %87, %90 : vector<1x16xf32>
    %92 = tpu.concatenate %83, %91 in 0 : vector<1x16xf32>, vector<1x16xf32> -> vector<2x16xf32>
    %c0_53 = arith.constant 0 : index
    %c0_54 = arith.constant 0 : index
    %c0_55 = arith.constant 0 : index
    %93 = vector.load %arg9[%c0_53, %c0_54, %c0_55] : memref<1x2x16xf32, #tpu.memory_space<vmem>>, vector<1x2x16xf32>
    %94 = vector.shape_cast %93 : vector<1x2x16xf32> to vector<2x16xf32>
    %95 = vector.shape_cast %92 : vector<2x16xf32> to vector<1x2x16xf32>
    tpu.vector_store %arg9[%c0_53, %c0_54, %c0_55], %95 {strides = array<i32>} : memref<1x2x16xf32, #tpu.memory_space<vmem>>, vector<1x2x16xf32>,
    return
  }
  func.func @transform_0(%arg0: i32) -> (i32, i32, i32) {
    %c0_i32 = arith.constant 0 : i32
    %c0_i32_0 = arith.constant 0 : i32
    %c0_i32_1 = arith.constant 0 : i32
    return %arg0, %c0_i32, %c0_i32_0 : i32, i32, i32
  }
  func.func @transform_1(%arg0: i32) -> (i32, i32, i32) {
    %c0_i32 = arith.constant 0 : i32
    %c0_i32_0 = arith.constant 0 : i32
    %c0_i32_1 = arith.constant 0 : i32
    %c0_i32_2 = arith.constant 0 : i32
    return %c0_i32, %c0_i32_0, %c0_i32_1 : i32, i32, i32
  }
  func.func @transform_2(%arg0: i32) -> (i32, i32) {
    %c0_i32 = arith.constant 0 : i32
    %c0_i32_0 = arith.constant 0 : i32
    %c0_i32_1 = arith.constant 0 : i32
    return %c0_i32, %c0_i32_0 : i32, i32
  }
  func.func @transform_3(%arg0: i32) -> (i32, i32, i32) {
    %c0_i32 = arith.constant 0 : i32
    %c0_i32_0 = arith.constant 0 : i32
    %c0_i32_1 = arith.constant 0 : i32
    %c0_i32_2 = arith.constant 0 : i32
    return %c0_i32, %c0_i32_0, %c0_i32_1 : i32, i32, i32
  }
  func.func @transform_4(%arg0: i32) -> (i32, i32) {
    %c0_i32 = arith.constant 0 : i32
    %c0_i32_0 = arith.constant 0 : i32
    %c0_i32_1 = arith.constant 0 : i32
    return %c0_i32, %c0_i32_0 : i32, i32
  }
  func.func @transform_5(%arg0: i32) -> (i32, i32) {
    %c0_i32 = arith.constant 0 : i32
    %c0_i32_0 = arith.constant 0 : i32
    %c0_i32_1 = arith.constant 0 : i32
    return %c0_i32, %c0_i32_0 : i32, i32
  }
  func.func @transform_6(%arg0: i32) -> (i32, i32) {
    %c0_i32 = arith.constant 0 : i32
    %c0_i32_0 = arith.constant 0 : i32
    %c0_i32_1 = arith.constant 0 : i32
    return %c0_i32, %c0_i32_0 : i32, i32
  }
  func.func @transform_7(%arg0: i32) -> (i32, i32, i32) {
    %c0_i32 = arith.constant 0 : i32
    %c0_i32_0 = arith.constant 0 : i32
    %c0_i32_1 = arith.constant 0 : i32
    %c0_i32_2 = arith.constant 0 : i32
    return %c0_i32, %c0_i32_0, %c0_i32_1 : i32, i32, i32
  }
  func.func @transform_8(%arg0: i32) -> (i32, i32, i32) {
    %c0_i32 = arith.constant 0 : i32
    %c0_i32_0 = arith.constant 0 : i32
    %c0_i32_1 = arith.constant 0 : i32
    return %arg0, %c0_i32, %c0_i32_0 : i32, i32, i32
  }
}

module attributes {stable_mosaic.version = 11 : i64} {
  func.func @_residual_block_kernel(%arg0: i32, %arg1: memref<1x32x32xf32, #tpu.memory_space<vmem>>, %arg2: memref<3x32x128xbf16, #tpu.memory_space<vmem>>, %arg3: memref<1x128xf32, #tpu.memory_space<vmem>>, %arg4: memref<3x128x128xbf16, #tpu.memory_space<vmem>>, %arg5: memref<1x128xf32, #tpu.memory_space<vmem>>, %arg6: memref<32x128xbf16, #tpu.memory_space<vmem>>, %arg7: memref<1x128xf32, #tpu.memory_space<vmem>>, %arg8: memref<4x128x32xf32, #tpu.memory_space<vmem>>, %arg9: memref<1x8x32xf32, #tpu.memory_space<vmem>>) attributes {dimension_semantics = [#tpu.dimension_semantics<parallel>], iteration_bounds = array<i64: 2>, scalar_prefetch = 0 : i64, scratch_operands = 0 : i64, tpu.core_type = #tpu.core_type<tc>, window_params = [{transform_indices = @transform_0, window_bounds = array<i64: 1, 32, 32>}, {pipeline_mode = #tpu.pipeline_mode<synchronous>, transform_indices = @transform_1, window_bounds = array<i64: 3, 32, 128>}, {pipeline_mode = #tpu.pipeline_mode<synchronous>, transform_indices = @transform_2, window_bounds = array<i64: 1, 128>}, {pipeline_mode = #tpu.pipeline_mode<synchronous>, transform_indices = @transform_3, window_bounds = array<i64: 3, 128, 128>}, {pipeline_mode = #tpu.pipeline_mode<synchronous>, transform_indices = @transform_4, window_bounds = array<i64: 1, 128>}, {pipeline_mode = #tpu.pipeline_mode<synchronous>, transform_indices = @transform_5, window_bounds = array<i64: 32, 128>}, {pipeline_mode = #tpu.pipeline_mode<synchronous>, transform_indices = @transform_6, window_bounds = array<i64: 1, 128>}, {pipeline_mode = #tpu.pipeline_mode<synchronous>, transform_indices = @transform_7, window_bounds = array<i64: 4, 128, 32>}, {transform_indices = @transform_8, window_bounds = array<i64: 1, 8, 32>}]} {
    %c0 = arith.constant 0 : index
    %c0_0 = arith.constant 0 : index
    %c0_1 = arith.constant 0 : index
    %0 = vector.load %arg1[%c0, %c0_0, %c0_1] : memref<1x32x32xf32, #tpu.memory_space<vmem>>, vector<1x32x32xf32>
    %1 = vector.shape_cast %0 : vector<1x32x32xf32> to vector<32x32xf32>
    %cst = arith.constant 0.000000e+00 : f32
    %2 = vector.broadcast %cst : f32 to vector<1x32xf32>
    %3 = tpu.concatenate %2, %1, %2 in 0 : vector<1x32xf32>, vector<32x32xf32>, vector<1x32xf32> -> vector<34x32xf32>
    %cst_2 = arith.constant 0.000000e+00 : f32
    %4 = vector.broadcast %cst_2 : f32 to vector<32x128xf32>
    %5 = vector.extract_strided_slice %3 {offsets = [0, 0], sizes = [32, 32], strides = [1, 1]} : vector<34x32xf32> to vector<32x32xf32>
    %6 = arith.truncf %5 : vector<32x32xf32> to vector<32x32xbf16>
    %c0_3 = arith.constant 0 : index
    %c0_4 = arith.constant 0 : index
    %c0_5 = arith.constant 0 : index
    %7 = vector.load %arg2[%c0_3, %c0_4, %c0_5] : memref<3x32x128xbf16, #tpu.memory_space<vmem>>, vector<1x32x128xbf16>
    %8 = vector.shape_cast %7 : vector<1x32x128xbf16> to vector<32x128xbf16>
    %cst_6 = arith.constant dense<0.000000e+00> : vector<32x128xf32>
    %9 = tpu.matmul %6, %8, %cst_6 {dimension_numbers = #tpu.dot_dimension_numbers<[1], [0], [0], [1], [0, 0, 1, 1], [], []>} : vector<32x32xbf16>, vector<32x128xbf16>, vector<32x128xf32> -> vector<32x128xf32>
    %10 = arith.addf %4, %9 : vector<32x128xf32>
    %11 = vector.extract_strided_slice %3 {offsets = [1, 0], sizes = [32, 32], strides = [1, 1]} : vector<34x32xf32> to vector<32x32xf32>
    %12 = arith.truncf %11 : vector<32x32xf32> to vector<32x32xbf16>
    %c1 = arith.constant 1 : index
    %c0_7 = arith.constant 0 : index
    %c0_8 = arith.constant 0 : index
    %13 = vector.load %arg2[%c1, %c0_7, %c0_8] : memref<3x32x128xbf16, #tpu.memory_space<vmem>>, vector<1x32x128xbf16>
    %14 = vector.shape_cast %13 : vector<1x32x128xbf16> to vector<32x128xbf16>
    %cst_9 = arith.constant dense<0.000000e+00> : vector<32x128xf32>
    %15 = tpu.matmul %12, %14, %cst_9 {dimension_numbers = #tpu.dot_dimension_numbers<[1], [0], [0], [1], [0, 0, 1, 1], [], []>} : vector<32x32xbf16>, vector<32x128xbf16>, vector<32x128xf32> -> vector<32x128xf32>
    %16 = arith.addf %10, %15 : vector<32x128xf32>
    %17 = vector.extract_strided_slice %3 {offsets = [2, 0], sizes = [32, 32], strides = [1, 1]} : vector<34x32xf32> to vector<32x32xf32>
    %18 = arith.truncf %17 : vector<32x32xf32> to vector<32x32xbf16>
    %c2 = arith.constant 2 : index
    %c0_10 = arith.constant 0 : index
    %c0_11 = arith.constant 0 : index
    %19 = vector.load %arg2[%c2, %c0_10, %c0_11] : memref<3x32x128xbf16, #tpu.memory_space<vmem>>, vector<1x32x128xbf16>
    %20 = vector.shape_cast %19 : vector<1x32x128xbf16> to vector<32x128xbf16>
    %cst_12 = arith.constant dense<0.000000e+00> : vector<32x128xf32>
    %21 = tpu.matmul %18, %20, %cst_12 {dimension_numbers = #tpu.dot_dimension_numbers<[1], [0], [0], [1], [0, 0, 1, 1], [], []>} : vector<32x32xbf16>, vector<32x128xbf16>, vector<32x128xf32> -> vector<32x128xf32>
    %22 = arith.addf %16, %21 : vector<32x128xf32>
    %c0_13 = arith.constant 0 : index
    %c0_14 = arith.constant 0 : index
    %23 = vector.load %arg3[%c0_13, %c0_14] : memref<1x128xf32, #tpu.memory_space<vmem>>, vector<1x128xf32>
    %24 = vector.broadcast %23 : vector<1x128xf32> to vector<32x128xf32>
    %25 = arith.addf %22, %24 : vector<32x128xf32>
    %cst_15 = arith.constant 0.000000e+00 : f32
    %26 = vector.broadcast %cst_15 : f32 to vector<32x128xf32>
    %27 = arith.maximumf %25, %26 : vector<32x128xf32>
    %cst_16 = arith.constant 0.000000e+00 : f32
    %28 = vector.broadcast %cst_16 : f32 to vector<1x128xf32>
    %29 = tpu.concatenate %28, %27, %28 in 0 : vector<1x128xf32>, vector<32x128xf32>, vector<1x128xf32> -> vector<34x128xf32>
    %cst_17 = arith.constant 0.000000e+00 : f32
    %30 = vector.broadcast %cst_17 : f32 to vector<32x128xf32>
    %31 = vector.extract_strided_slice %29 {offsets = [0, 0], sizes = [32, 128], strides = [1, 1]} : vector<34x128xf32> to vector<32x128xf32>
    %32 = arith.truncf %31 : vector<32x128xf32> to vector<32x128xbf16>
    %c0_18 = arith.constant 0 : index
    %c0_19 = arith.constant 0 : index
    %c0_20 = arith.constant 0 : index
    %33 = vector.load %arg4[%c0_18, %c0_19, %c0_20] : memref<3x128x128xbf16, #tpu.memory_space<vmem>>, vector<1x128x128xbf16>
    %34 = vector.shape_cast %33 : vector<1x128x128xbf16> to vector<128x128xbf16>
    %cst_21 = arith.constant dense<0.000000e+00> : vector<32x128xf32>
    %35 = tpu.matmul %32, %34, %cst_21 {dimension_numbers = #tpu.dot_dimension_numbers<[1], [0], [0], [1], [0, 0, 1, 1], [], []>} : vector<32x128xbf16>, vector<128x128xbf16>, vector<32x128xf32> -> vector<32x128xf32>
    %36 = arith.addf %30, %35 : vector<32x128xf32>
    %37 = vector.extract_strided_slice %29 {offsets = [1, 0], sizes = [32, 128], strides = [1, 1]} : vector<34x128xf32> to vector<32x128xf32>
    %38 = arith.truncf %37 : vector<32x128xf32> to vector<32x128xbf16>
    %c1_22 = arith.constant 1 : index
    %c0_23 = arith.constant 0 : index
    %c0_24 = arith.constant 0 : index
    %39 = vector.load %arg4[%c1_22, %c0_23, %c0_24] : memref<3x128x128xbf16, #tpu.memory_space<vmem>>, vector<1x128x128xbf16>
    %40 = vector.shape_cast %39 : vector<1x128x128xbf16> to vector<128x128xbf16>
    %cst_25 = arith.constant dense<0.000000e+00> : vector<32x128xf32>
    %41 = tpu.matmul %38, %40, %cst_25 {dimension_numbers = #tpu.dot_dimension_numbers<[1], [0], [0], [1], [0, 0, 1, 1], [], []>} : vector<32x128xbf16>, vector<128x128xbf16>, vector<32x128xf32> -> vector<32x128xf32>
    %42 = arith.addf %36, %41 : vector<32x128xf32>
    %43 = vector.extract_strided_slice %29 {offsets = [2, 0], sizes = [32, 128], strides = [1, 1]} : vector<34x128xf32> to vector<32x128xf32>
    %44 = arith.truncf %43 : vector<32x128xf32> to vector<32x128xbf16>
    %c2_26 = arith.constant 2 : index
    %c0_27 = arith.constant 0 : index
    %c0_28 = arith.constant 0 : index
    %45 = vector.load %arg4[%c2_26, %c0_27, %c0_28] : memref<3x128x128xbf16, #tpu.memory_space<vmem>>, vector<1x128x128xbf16>
    %46 = vector.shape_cast %45 : vector<1x128x128xbf16> to vector<128x128xbf16>
    %cst_29 = arith.constant dense<0.000000e+00> : vector<32x128xf32>
    %47 = tpu.matmul %44, %46, %cst_29 {dimension_numbers = #tpu.dot_dimension_numbers<[1], [0], [0], [1], [0, 0, 1, 1], [], []>} : vector<32x128xbf16>, vector<128x128xbf16>, vector<32x128xf32> -> vector<32x128xf32>
    %48 = arith.addf %42, %47 : vector<32x128xf32>
    %c0_30 = arith.constant 0 : index
    %c0_31 = arith.constant 0 : index
    %49 = vector.load %arg5[%c0_30, %c0_31] : memref<1x128xf32, #tpu.memory_space<vmem>>, vector<1x128xf32>
    %50 = vector.broadcast %49 : vector<1x128xf32> to vector<32x128xf32>
    %51 = arith.addf %48, %50 : vector<32x128xf32>
    %52 = arith.truncf %1 : vector<32x32xf32> to vector<32x32xbf16>
    %c0_32 = arith.constant 0 : index
    %c0_33 = arith.constant 0 : index
    %53 = vector.load %arg6[%c0_32, %c0_33] : memref<32x128xbf16, #tpu.memory_space<vmem>>, vector<32x128xbf16>
    %cst_34 = arith.constant dense<0.000000e+00> : vector<32x128xf32>
    %54 = tpu.matmul %52, %53, %cst_34 {dimension_numbers = #tpu.dot_dimension_numbers<[1], [0], [0], [1], [0, 0, 1, 1], [], []>} : vector<32x32xbf16>, vector<32x128xbf16>, vector<32x128xf32> -> vector<32x128xf32>
    %c0_35 = arith.constant 0 : index
    %c0_36 = arith.constant 0 : index
    %55 = vector.load %arg7[%c0_35, %c0_36] : memref<1x128xf32, #tpu.memory_space<vmem>>, vector<1x128xf32>
    %56 = vector.broadcast %55 : vector<1x128xf32> to vector<32x128xf32>
    %57 = arith.addf %54, %56 : vector<32x128xf32>
    %58 = arith.addf %51, %57 : vector<32x128xf32>
    %cst_37 = arith.constant 0.000000e+00 : f32
    %59 = vector.broadcast %cst_37 : f32 to vector<32x128xf32>
    %60 = arith.maximumf %58, %59 : vector<32x128xf32>
    %c0_38 = arith.constant 0 : index
    %c0_39 = arith.constant 0 : index
    %c0_40 = arith.constant 0 : index
    %61 = vector.load %arg8[%c0_38, %c0_39, %c0_40] : memref<4x128x32xf32, #tpu.memory_space<vmem>>, vector<1x128x32xf32>
    %62 = vector.shape_cast %61 : vector<1x128x32xf32> to vector<128x32xf32>
    %cst_41 = arith.constant dense<0.000000e+00> : vector<32x32xf32>
    %63 = tpu.matmul %60, %62, %cst_41 {dimension_numbers = #tpu.dot_dimension_numbers<[1], [0], [0], [1], [0, 0, 1, 1], [], []>} : vector<32x128xf32>, vector<128x32xf32>, vector<32x32xf32> -> vector<32x32xf32>
    %c1_42 = arith.constant 1 : index
    %c0_43 = arith.constant 0 : index
    %c0_44 = arith.constant 0 : index
    %64 = vector.load %arg8[%c1_42, %c0_43, %c0_44] : memref<4x128x32xf32, #tpu.memory_space<vmem>>, vector<1x128x32xf32>
    %65 = vector.shape_cast %64 : vector<1x128x32xf32> to vector<128x32xf32>
    %cst_45 = arith.constant dense<0.000000e+00> : vector<32x32xf32>
    %66 = tpu.matmul %60, %65, %cst_45 {dimension_numbers = #tpu.dot_dimension_numbers<[1], [0], [0], [1], [0, 0, 1, 1], [], []>} : vector<32x128xf32>, vector<128x32xf32>, vector<32x32xf32> -> vector<32x32xf32>
    %c2_46 = arith.constant 2 : index
    %c0_47 = arith.constant 0 : index
    %c0_48 = arith.constant 0 : index
    %67 = vector.load %arg8[%c2_46, %c0_47, %c0_48] : memref<4x128x32xf32, #tpu.memory_space<vmem>>, vector<1x128x32xf32>
    %68 = vector.shape_cast %67 : vector<1x128x32xf32> to vector<128x32xf32>
    %cst_49 = arith.constant dense<0.000000e+00> : vector<32x32xf32>
    %69 = tpu.matmul %60, %68, %cst_49 {dimension_numbers = #tpu.dot_dimension_numbers<[1], [0], [0], [1], [0, 0, 1, 1], [], []>} : vector<32x128xf32>, vector<128x32xf32>, vector<32x32xf32> -> vector<32x32xf32>
    %c3 = arith.constant 3 : index
    %c0_50 = arith.constant 0 : index
    %c0_51 = arith.constant 0 : index
    %70 = vector.load %arg8[%c3, %c0_50, %c0_51] : memref<4x128x32xf32, #tpu.memory_space<vmem>>, vector<1x128x32xf32>
    %71 = vector.shape_cast %70 : vector<1x128x32xf32> to vector<128x32xf32>
    %cst_52 = arith.constant dense<0.000000e+00> : vector<32x32xf32>
    %72 = tpu.matmul %60, %71, %cst_52 {dimension_numbers = #tpu.dot_dimension_numbers<[1], [0], [0], [1], [0, 0, 1, 1], [], []>} : vector<32x128xf32>, vector<128x32xf32>, vector<32x32xf32> -> vector<32x32xf32>
    %73 = arith.maximumf %63, %66 : vector<32x32xf32>
    %74 = arith.maximumf %69, %72 : vector<32x32xf32>
    %75 = arith.maximumf %73, %74 : vector<32x32xf32>
    %76 = vector.extract_strided_slice %75 {offsets = [0, 0], sizes = [4, 32], strides = [1, 1]} : vector<32x32xf32> to vector<4x32xf32>
    %77 = vector.extract_strided_slice %76 {offsets = [0, 0], sizes = [1, 32], strides = [1, 1]} : vector<4x32xf32> to vector<1x32xf32>
    %78 = vector.extract_strided_slice %76 {offsets = [1, 0], sizes = [1, 32], strides = [1, 1]} : vector<4x32xf32> to vector<1x32xf32>
    %79 = arith.maximumf %77, %78 : vector<1x32xf32>
    %80 = vector.extract_strided_slice %76 {offsets = [2, 0], sizes = [1, 32], strides = [1, 1]} : vector<4x32xf32> to vector<1x32xf32>
    %81 = vector.extract_strided_slice %76 {offsets = [3, 0], sizes = [1, 32], strides = [1, 1]} : vector<4x32xf32> to vector<1x32xf32>
    %82 = arith.maximumf %80, %81 : vector<1x32xf32>
    %83 = arith.maximumf %79, %82 : vector<1x32xf32>
    %84 = vector.extract_strided_slice %75 {offsets = [4, 0], sizes = [4, 32], strides = [1, 1]} : vector<32x32xf32> to vector<4x32xf32>
    %85 = vector.extract_strided_slice %84 {offsets = [0, 0], sizes = [1, 32], strides = [1, 1]} : vector<4x32xf32> to vector<1x32xf32>
    %86 = vector.extract_strided_slice %84 {offsets = [1, 0], sizes = [1, 32], strides = [1, 1]} : vector<4x32xf32> to vector<1x32xf32>
    %87 = arith.maximumf %85, %86 : vector<1x32xf32>
    %88 = vector.extract_strided_slice %84 {offsets = [2, 0], sizes = [1, 32], strides = [1, 1]} : vector<4x32xf32> to vector<1x32xf32>
    %89 = vector.extract_strided_slice %84 {offsets = [3, 0], sizes = [1, 32], strides = [1, 1]} : vector<4x32xf32> to vector<1x32xf32>
    %90 = arith.maximumf %88, %89 : vector<1x32xf32>
    %91 = arith.maximumf %87, %90 : vector<1x32xf32>
    %92 = vector.extract_strided_slice %75 {offsets = [8, 0], sizes = [4, 32], strides = [1, 1]} : vector<32x32xf32> to vector<4x32xf32>
    %93 = vector.extract_strided_slice %92 {offsets = [0, 0], sizes = [1, 32], strides = [1, 1]} : vector<4x32xf32> to vector<1x32xf32>
    %94 = vector.extract_strided_slice %92 {offsets = [1, 0], sizes = [1, 32], strides = [1, 1]} : vector<4x32xf32> to vector<1x32xf32>
    %95 = arith.maximumf %93, %94 : vector<1x32xf32>
    %96 = vector.extract_strided_slice %92 {offsets = [2, 0], sizes = [1, 32], strides = [1, 1]} : vector<4x32xf32> to vector<1x32xf32>
    %97 = vector.extract_strided_slice %92 {offsets = [3, 0], sizes = [1, 32], strides = [1, 1]} : vector<4x32xf32> to vector<1x32xf32>
    %98 = arith.maximumf %96, %97 : vector<1x32xf32>
    %99 = arith.maximumf %95, %98 : vector<1x32xf32>
    %100 = vector.extract_strided_slice %75 {offsets = [12, 0], sizes = [4, 32], strides = [1, 1]} : vector<32x32xf32> to vector<4x32xf32>
    %101 = vector.extract_strided_slice %100 {offsets = [0, 0], sizes = [1, 32], strides = [1, 1]} : vector<4x32xf32> to vector<1x32xf32>
    %102 = vector.extract_strided_slice %100 {offsets = [1, 0], sizes = [1, 32], strides = [1, 1]} : vector<4x32xf32> to vector<1x32xf32>
    %103 = arith.maximumf %101, %102 : vector<1x32xf32>
    %104 = vector.extract_strided_slice %100 {offsets = [2, 0], sizes = [1, 32], strides = [1, 1]} : vector<4x32xf32> to vector<1x32xf32>
    %105 = vector.extract_strided_slice %100 {offsets = [3, 0], sizes = [1, 32], strides = [1, 1]} : vector<4x32xf32> to vector<1x32xf32>
    %106 = arith.maximumf %104, %105 : vector<1x32xf32>
    %107 = arith.maximumf %103, %106 : vector<1x32xf32>
    %108 = vector.extract_strided_slice %75 {offsets = [16, 0], sizes = [4, 32], strides = [1, 1]} : vector<32x32xf32> to vector<4x32xf32>
    %109 = vector.extract_strided_slice %108 {offsets = [0, 0], sizes = [1, 32], strides = [1, 1]} : vector<4x32xf32> to vector<1x32xf32>
    %110 = vector.extract_strided_slice %108 {offsets = [1, 0], sizes = [1, 32], strides = [1, 1]} : vector<4x32xf32> to vector<1x32xf32>
    %111 = arith.maximumf %109, %110 : vector<1x32xf32>
    %112 = vector.extract_strided_slice %108 {offsets = [2, 0], sizes = [1, 32], strides = [1, 1]} : vector<4x32xf32> to vector<1x32xf32>
    %113 = vector.extract_strided_slice %108 {offsets = [3, 0], sizes = [1, 32], strides = [1, 1]} : vector<4x32xf32> to vector<1x32xf32>
    %114 = arith.maximumf %112, %113 : vector<1x32xf32>
    %115 = arith.maximumf %111, %114 : vector<1x32xf32>
    %116 = vector.extract_strided_slice %75 {offsets = [20, 0], sizes = [4, 32], strides = [1, 1]} : vector<32x32xf32> to vector<4x32xf32>
    %117 = vector.extract_strided_slice %116 {offsets = [0, 0], sizes = [1, 32], strides = [1, 1]} : vector<4x32xf32> to vector<1x32xf32>
    %118 = vector.extract_strided_slice %116 {offsets = [1, 0], sizes = [1, 32], strides = [1, 1]} : vector<4x32xf32> to vector<1x32xf32>
    %119 = arith.maximumf %117, %118 : vector<1x32xf32>
    %120 = vector.extract_strided_slice %116 {offsets = [2, 0], sizes = [1, 32], strides = [1, 1]} : vector<4x32xf32> to vector<1x32xf32>
    %121 = vector.extract_strided_slice %116 {offsets = [3, 0], sizes = [1, 32], strides = [1, 1]} : vector<4x32xf32> to vector<1x32xf32>
    %122 = arith.maximumf %120, %121 : vector<1x32xf32>
    %123 = arith.maximumf %119, %122 : vector<1x32xf32>
    %124 = vector.extract_strided_slice %75 {offsets = [24, 0], sizes = [4, 32], strides = [1, 1]} : vector<32x32xf32> to vector<4x32xf32>
    %125 = vector.extract_strided_slice %124 {offsets = [0, 0], sizes = [1, 32], strides = [1, 1]} : vector<4x32xf32> to vector<1x32xf32>
    %126 = vector.extract_strided_slice %124 {offsets = [1, 0], sizes = [1, 32], strides = [1, 1]} : vector<4x32xf32> to vector<1x32xf32>
    %127 = arith.maximumf %125, %126 : vector<1x32xf32>
    %128 = vector.extract_strided_slice %124 {offsets = [2, 0], sizes = [1, 32], strides = [1, 1]} : vector<4x32xf32> to vector<1x32xf32>
    %129 = vector.extract_strided_slice %124 {offsets = [3, 0], sizes = [1, 32], strides = [1, 1]} : vector<4x32xf32> to vector<1x32xf32>
    %130 = arith.maximumf %128, %129 : vector<1x32xf32>
    %131 = arith.maximumf %127, %130 : vector<1x32xf32>
    %132 = vector.extract_strided_slice %75 {offsets = [28, 0], sizes = [4, 32], strides = [1, 1]} : vector<32x32xf32> to vector<4x32xf32>
    %133 = vector.extract_strided_slice %132 {offsets = [0, 0], sizes = [1, 32], strides = [1, 1]} : vector<4x32xf32> to vector<1x32xf32>
    %134 = vector.extract_strided_slice %132 {offsets = [1, 0], sizes = [1, 32], strides = [1, 1]} : vector<4x32xf32> to vector<1x32xf32>
    %135 = arith.maximumf %133, %134 : vector<1x32xf32>
    %136 = vector.extract_strided_slice %132 {offsets = [2, 0], sizes = [1, 32], strides = [1, 1]} : vector<4x32xf32> to vector<1x32xf32>
    %137 = vector.extract_strided_slice %132 {offsets = [3, 0], sizes = [1, 32], strides = [1, 1]} : vector<4x32xf32> to vector<1x32xf32>
    %138 = arith.maximumf %136, %137 : vector<1x32xf32>
    %139 = arith.maximumf %135, %138 : vector<1x32xf32>
    %140 = tpu.concatenate %83, %91, %99, %107, %115, %123, %131, %139 in 0 : vector<1x32xf32>, vector<1x32xf32>, vector<1x32xf32>, vector<1x32xf32>, vector<1x32xf32>, vector<1x32xf32>, vector<1x32xf32>, vector<1x32xf32> -> vector<8x32xf32>
    %c0_53 = arith.constant 0 : index
    %c0_54 = arith.constant 0 : index
    %c0_55 = arith.constant 0 : index
    %141 = vector.load %arg9[%c0_53, %c0_54, %c0_55] : memref<1x8x32xf32, #tpu.memory_space<vmem>>, vector<1x8x32xf32>
    %142 = vector.shape_cast %141 : vector<1x8x32xf32> to vector<8x32xf32>
    %143 = vector.shape_cast %140 : vector<8x32xf32> to vector<1x8x32xf32>
    tpu.vector_store %arg9[%c0_53, %c0_54, %c0_55], %143 {strides = array<i32>} : memref<1x8x32xf32, #tpu.memory_space<vmem>>, vector<1x8x32xf32>,
    return
  }
  func.func @transform_0(%arg0: i32) -> (i32, i32, i32) {
    %c0_i32 = arith.constant 0 : i32
    %c0_i32_0 = arith.constant 0 : i32
    %c0_i32_1 = arith.constant 0 : i32
    return %arg0, %c0_i32, %c0_i32_0 : i32, i32, i32
  }
  func.func @transform_1(%arg0: i32) -> (i32, i32, i32) {
    %c0_i32 = arith.constant 0 : i32
    %c0_i32_0 = arith.constant 0 : i32
    %c0_i32_1 = arith.constant 0 : i32
    %c0_i32_2 = arith.constant 0 : i32
    return %c0_i32, %c0_i32_0, %c0_i32_1 : i32, i32, i32
  }
  func.func @transform_2(%arg0: i32) -> (i32, i32) {
    %c0_i32 = arith.constant 0 : i32
    %c0_i32_0 = arith.constant 0 : i32
    %c0_i32_1 = arith.constant 0 : i32
    return %c0_i32, %c0_i32_0 : i32, i32
  }
  func.func @transform_3(%arg0: i32) -> (i32, i32, i32) {
    %c0_i32 = arith.constant 0 : i32
    %c0_i32_0 = arith.constant 0 : i32
    %c0_i32_1 = arith.constant 0 : i32
    %c0_i32_2 = arith.constant 0 : i32
    return %c0_i32, %c0_i32_0, %c0_i32_1 : i32, i32, i32
  }
  func.func @transform_4(%arg0: i32) -> (i32, i32) {
    %c0_i32 = arith.constant 0 : i32
    %c0_i32_0 = arith.constant 0 : i32
    %c0_i32_1 = arith.constant 0 : i32
    return %c0_i32, %c0_i32_0 : i32, i32
  }
  func.func @transform_5(%arg0: i32) -> (i32, i32) {
    %c0_i32 = arith.constant 0 : i32
    %c0_i32_0 = arith.constant 0 : i32
    %c0_i32_1 = arith.constant 0 : i32
    return %c0_i32, %c0_i32_0 : i32, i32
  }
  func.func @transform_6(%arg0: i32) -> (i32, i32) {
    %c0_i32 = arith.constant 0 : i32
    %c0_i32_0 = arith.constant 0 : i32
    %c0_i32_1 = arith.constant 0 : i32
    return %c0_i32, %c0_i32_0 : i32, i32
  }
  func.func @transform_7(%arg0: i32) -> (i32, i32, i32) {
    %c0_i32 = arith.constant 0 : i32
    %c0_i32_0 = arith.constant 0 : i32
    %c0_i32_1 = arith.constant 0 : i32
    %c0_i32_2 = arith.constant 0 : i32
    return %c0_i32, %c0_i32_0, %c0_i32_1 : i32, i32, i32
  }
  func.func @transform_8(%arg0: i32) -> (i32, i32, i32) {
    %c0_i32 = arith.constant 0 : i32
    %c0_i32_0 = arith.constant 0 : i32
    %c0_i32_1 = arith.constant 0 : i32
    return %arg0, %c0_i32, %c0_i32_0 : i32, i32, i32
  }
}

module attributes {stable_mosaic.version = 11 : i64} {
  func.func @_head_kernel(%arg0: i32, %arg1: memref<1x2x16xf32, #tpu.memory_space<vmem>>, %arg2: memref<16x512xbf16, #tpu.memory_space<vmem>>, %arg3: memref<1x512xf32, #tpu.memory_space<vmem>>, %arg4: memref<2x512x1024xbf16, #tpu.memory_space<vmem>>, %arg5: memref<1x1024xf32, #tpu.memory_space<vmem>>, %arg6: memref<1024x8xbf16, #tpu.memory_space<vmem>>, %arg7: memref<1x8xf32, #tpu.memory_space<vmem>>, %arg8: memref<1x1x8xf32, #tpu.memory_space<vmem>>) attributes {dimension_semantics = [#tpu.dimension_semantics<parallel>], iteration_bounds = array<i64: 2>, scalar_prefetch = 0 : i64, scratch_operands = 0 : i64, tpu.core_type = #tpu.core_type<tc>, window_params = [{transform_indices = @transform_0, window_bounds = array<i64: 1, 2, 16>}, {pipeline_mode = #tpu.pipeline_mode<synchronous>, transform_indices = @transform_1, window_bounds = array<i64: 16, 512>}, {pipeline_mode = #tpu.pipeline_mode<synchronous>, transform_indices = @transform_2, window_bounds = array<i64: 1, 512>}, {pipeline_mode = #tpu.pipeline_mode<synchronous>, transform_indices = @transform_3, window_bounds = array<i64: 2, 512, 1024>}, {pipeline_mode = #tpu.pipeline_mode<synchronous>, transform_indices = @transform_4, window_bounds = array<i64: 1, 1024>}, {pipeline_mode = #tpu.pipeline_mode<synchronous>, transform_indices = @transform_5, window_bounds = array<i64: 1024, 8>}, {pipeline_mode = #tpu.pipeline_mode<synchronous>, transform_indices = @transform_6, window_bounds = array<i64: 1, 8>}, {transform_indices = @transform_7, window_bounds = array<i64: 1, 1, 8>}]} {
    %c0 = arith.constant 0 : index
    %c0_0 = arith.constant 0 : index
    %c0_1 = arith.constant 0 : index
    %0 = vector.load %arg1[%c0, %c0_0, %c0_1] : memref<1x2x16xf32, #tpu.memory_space<vmem>>, vector<1x2x16xf32>
    %1 = vector.shape_cast %0 : vector<1x2x16xf32> to vector<2x16xf32>
    %2 = arith.truncf %1 : vector<2x16xf32> to vector<2x16xbf16>
    %c0_2 = arith.constant 0 : index
    %c0_3 = arith.constant 0 : index
    %3 = vector.load %arg2[%c0_2, %c0_3] : memref<16x512xbf16, #tpu.memory_space<vmem>>, vector<16x512xbf16>
    %cst = arith.constant dense<0.000000e+00> : vector<2x512xf32>
    %4 = tpu.matmul %2, %3, %cst {dimension_numbers = #tpu.dot_dimension_numbers<[1], [0], [0], [1], [0, 0, 1, 1], [], []>} : vector<2x16xbf16>, vector<16x512xbf16>, vector<2x512xf32> -> vector<2x512xf32>
    %c0_4 = arith.constant 0 : index
    %c0_5 = arith.constant 0 : index
    %5 = vector.load %arg3[%c0_4, %c0_5] : memref<1x512xf32, #tpu.memory_space<vmem>>, vector<1x512xf32>
    %6 = vector.broadcast %5 : vector<1x512xf32> to vector<2x512xf32>
    %7 = arith.addf %4, %6 : vector<2x512xf32>
    %cst_6 = arith.constant 0.000000e+00 : f32
    %8 = vector.broadcast %cst_6 : f32 to vector<2x512xf32>
    %9 = arith.maximumf %7, %8 : vector<2x512xf32>
    %cst_7 = arith.constant 0.000000e+00 : f32
    %10 = vector.broadcast %cst_7 : f32 to vector<1x1024xf32>
    %11 = vector.extract_strided_slice %9 {offsets = [0, 0], sizes = [1, 512], strides = [1, 1]} : vector<2x512xf32> to vector<1x512xf32>
    %12 = arith.truncf %11 : vector<1x512xf32> to vector<1x512xbf16>
    %c0_8 = arith.constant 0 : index
    %c0_9 = arith.constant 0 : index
    %c0_10 = arith.constant 0 : index
    %13 = vector.load %arg4[%c0_8, %c0_9, %c0_10] : memref<2x512x1024xbf16, #tpu.memory_space<vmem>>, vector<1x512x1024xbf16>
    %14 = vector.shape_cast %13 : vector<1x512x1024xbf16> to vector<512x1024xbf16>
    %cst_11 = arith.constant dense<0.000000e+00> : vector<1x1024xf32>
    %15 = tpu.matmul %12, %14, %cst_11 {dimension_numbers = #tpu.dot_dimension_numbers<[1], [0], [0], [1], [0, 0, 1, 1], [], []>} : vector<1x512xbf16>, vector<512x1024xbf16>, vector<1x1024xf32> -> vector<1x1024xf32>
    %16 = arith.addf %10, %15 : vector<1x1024xf32>
    %17 = vector.extract_strided_slice %9 {offsets = [1, 0], sizes = [1, 512], strides = [1, 1]} : vector<2x512xf32> to vector<1x512xf32>
    %18 = arith.truncf %17 : vector<1x512xf32> to vector<1x512xbf16>
    %c1 = arith.constant 1 : index
    %c0_12 = arith.constant 0 : index
    %c0_13 = arith.constant 0 : index
    %19 = vector.load %arg4[%c1, %c0_12, %c0_13] : memref<2x512x1024xbf16, #tpu.memory_space<vmem>>, vector<1x512x1024xbf16>
    %20 = vector.shape_cast %19 : vector<1x512x1024xbf16> to vector<512x1024xbf16>
    %cst_14 = arith.constant dense<0.000000e+00> : vector<1x1024xf32>
    %21 = tpu.matmul %18, %20, %cst_14 {dimension_numbers = #tpu.dot_dimension_numbers<[1], [0], [0], [1], [0, 0, 1, 1], [], []>} : vector<1x512xbf16>, vector<512x1024xbf16>, vector<1x1024xf32> -> vector<1x1024xf32>
    %22 = arith.addf %16, %21 : vector<1x1024xf32>
    %c0_15 = arith.constant 0 : index
    %c0_16 = arith.constant 0 : index
    %23 = vector.load %arg5[%c0_15, %c0_16] : memref<1x1024xf32, #tpu.memory_space<vmem>>, vector<1x1024xf32>
    %24 = arith.addf %22, %23 : vector<1x1024xf32>
    %cst_17 = arith.constant 0.000000e+00 : f32
    %25 = vector.broadcast %cst_17 : f32 to vector<1x1024xf32>
    %26 = arith.maximumf %24, %25 : vector<1x1024xf32>
    %27 = arith.truncf %26 : vector<1x1024xf32> to vector<1x1024xbf16>
    %c0_18 = arith.constant 0 : index
    %c0_19 = arith.constant 0 : index
    %28 = vector.load %arg6[%c0_18, %c0_19] : memref<1024x8xbf16, #tpu.memory_space<vmem>>, vector<1024x8xbf16>
    %cst_20 = arith.constant dense<0.000000e+00> : vector<1x8xf32>
    %29 = tpu.matmul %27, %28, %cst_20 {dimension_numbers = #tpu.dot_dimension_numbers<[1], [0], [0], [1], [0, 0, 1, 1], [], []>} : vector<1x1024xbf16>, vector<1024x8xbf16>, vector<1x8xf32> -> vector<1x8xf32>
    %c0_21 = arith.constant 0 : index
    %c0_22 = arith.constant 0 : index
    %30 = vector.load %arg7[%c0_21, %c0_22] : memref<1x8xf32, #tpu.memory_space<vmem>>, vector<1x8xf32>
    %31 = arith.addf %29, %30 : vector<1x8xf32>
    %c0_23 = arith.constant 0 : index
    %c0_24 = arith.constant 0 : index
    %c0_25 = arith.constant 0 : index
    %32 = vector.load %arg8[%c0_23, %c0_24, %c0_25] : memref<1x1x8xf32, #tpu.memory_space<vmem>>, vector<1x1x8xf32>
    %33 = vector.shape_cast %32 : vector<1x1x8xf32> to vector<1x8xf32>
    %34 = vector.shape_cast %31 : vector<1x8xf32> to vector<1x1x8xf32>
    tpu.vector_store %arg8[%c0_23, %c0_24, %c0_25], %34 {strides = array<i32>} : memref<1x1x8xf32, #tpu.memory_space<vmem>>, vector<1x1x8xf32>,
    return
  }
  func.func @transform_0(%arg0: i32) -> (i32, i32, i32) {
    %c0_i32 = arith.constant 0 : i32
    %c0_i32_0 = arith.constant 0 : i32
    %c0_i32_1 = arith.constant 0 : i32
    return %arg0, %c0_i32, %c0_i32_0 : i32, i32, i32
  }
  func.func @transform_1(%arg0: i32) -> (i32, i32) {
    %c0_i32 = arith.constant 0 : i32
    %c0_i32_0 = arith.constant 0 : i32
    %c0_i32_1 = arith.constant 0 : i32
    return %c0_i32, %c0_i32_0 : i32, i32
  }
  func.func @transform_2(%arg0: i32) -> (i32, i32) {
    %c0_i32 = arith.constant 0 : i32
    %c0_i32_0 = arith.constant 0 : i32
    %c0_i32_1 = arith.constant 0 : i32
    return %c0_i32, %c0_i32_0 : i32, i32
  }
  func.func @transform_3(%arg0: i32) -> (i32, i32, i32) {
    %c0_i32 = arith.constant 0 : i32
    %c0_i32_0 = arith.constant 0 : i32
    %c0_i32_1 = arith.constant 0 : i32
    %c0_i32_2 = arith.constant 0 : i32
    return %c0_i32, %c0_i32_0, %c0_i32_1 : i32, i32, i32
  }
  func.func @transform_4(%arg0: i32) -> (i32, i32) {
    %c0_i32 = arith.constant 0 : i32
    %c0_i32_0 = arith.constant 0 : i32
    %c0_i32_1 = arith.constant 0 : i32
    return %c0_i32, %c0_i32_0 : i32, i32
  }
  func.func @transform_5(%arg0: i32) -> (i32, i32) {
    %c0_i32 = arith.constant 0 : i32
    %c0_i32_0 = arith.constant 0 : i32
    %c0_i32_1 = arith.constant 0 : i32
    return %c0_i32, %c0_i32_0 : i32, i32
  }
  func.func @transform_6(%arg0: i32) -> (i32, i32) {
    %c0_i32 = arith.constant 0 : i32
    %c0_i32_0 = arith.constant 0 : i32
    %c0_i32_1 = arith.constant 0 : i32
    return %c0_i32, %c0_i32_0 : i32, i32
  }
  func.func @transform_7(%arg0: i32) -> (i32, i32, i32) {
    %c0_i32 = arith.constant 0 : i32
    %c0_i32_0 = arith.constant 0 : i32
    %c0_i32_1 = arith.constant 0 : i32
    return %arg0, %c0_i32, %c0_i32_0 : i32, i32, i32
  }
}

</mosaic_0001>

<bundles_post_ra>
// kernel: skip_network_forward.4
= control target key start
LH: loop header
LB: loop body
LE: loop exit
PB: predicated region body
PF: predicated region fallthrough
CT: control target
= control target key end

     0   :  { %13 = vsyncpa [#allocation3], 0  ;;  %s1664_s0 = inlined_call_operand.vmem [shape: f32[2,8,32], index: 0, kind: input, shape index: {}]   ;;  %s1665_s1 = inlined_call_operand.hbm [shape: bf16[3,32,64], index: 1, kind: input, shape index: {}]   ;;  %s1666_s2 = inlined_call_operand.hbm [shape: f32[1,64], index: 2, kind: input, shape index: {}]   ;;  %s1667_s3 = inlined_call_operand.hbm [shape: bf16[3,64,64], index: 3, kind: input, shape index: {}]   ;;  %s1668_s4 = inlined_call_operand.hbm [shape: f32[1,64], index: 4, kind: input, shape index: {}]   ;;  %s1669_s5 = inlined_call_operand.hbm [shape: bf16[32,64], index: 5, kind: input, shape index: {}]   ;;  %s1670_s6 = inlined_call_operand.hbm [shape: f32[1,64], index: 6, kind: input, shape index: {}]   ;;  %s1671_s7 = inlined_call_operand.vmem [shape: f32[4,64,16], index: 7, kind: input, shape index: {}]   ;;  %s1672_s8 = inlined_call_operand.vmem [shape: f32[2,2,16], index: 8, kind: output, shape index: {}]  }
   0x1   :  { %14 = vsyncpa [#allocation5], 0 }
   0x2   :  { %15 = vsyncpa [#allocation8], 0 }
   0x3   :  { %16 = vsyncpa [#allocation11], 0  ;;  %s1463_s27 = smov 0  }
   0x4 LB: > { %s252_s30 = sshll.u32 %s1666_s2, 4  ;;  %s1472_s9 = sadd.s32 4294967295, %s1408_s27   ;;  %s1408_s27 = sphi %s1463_s27, %s22_s27   ;;  %s253_s30 = int_to_ptr.hbm [resolvable:$true] %s252_s30 }
   0x5   : > { %p978_p0 = scmp.ge.s32.totalorder %s1408_s27, 1  ;;  %p226_p1 = scmp.lt.s32.totalorder %s1408_s27, 3 }
   0x6   : > { %p1175_p2 = scmp.eq.s32.totalorder %s1472_s9, 0  ;;  %s1410_s11 = smov [#allocation4]  }
   0x7   : > { %p1477_p3 = pnand %p978_p0, %p226_p1  ;;  %s254_s12 = sshll.u32 %s1410_s11, 4  ;;  %s255_s12 = int_to_ptr.vmem [resolvable:$true] %s254_s12 }
   0x8   : > { %s278_s15 = sshll.u32 %s1668_s4, 4  ;;  %s237_s18 = sshll.u32 %s1665_s1, 4  ;;  %s279_s15 = int_to_ptr.hbm [resolvable:$true] %s278_s15  ;;  %s238_s18 = int_to_ptr.hbm [resolvable:$true] %s237_s18 }
   0x9   : > { %p1156_p4 = pneg %p1477_p3  ;;  %s1411_s20 = smov [#allocation7]  }
   0xa   : > { %s280_s21 = sshll.u32 %s1411_s20, 4  ;;  %s1412_s22 = smov [#allocation2]   ;;  %s281_s21 = int_to_ptr.vmem [resolvable:$true] %s280_s21 }
   0xb   : > { %p1491_p5 = pnand %p1175_p2, %p1156_p4  ;;  %s239_s23 = sshll.u32 %s1412_s22, 4  ;;  %s240_s23 = int_to_ptr.vmem [resolvable:$true] %s239_s23 }
   0xc   : > { %s1413_s24 = smov 64   ;;  %s1414_s25 = smov 4  }
   0xd   : > { %1162 = dma.hbm_to_vmem [thread:$0]  (!%p1491_p5), %s253_s30, 16, %s255_s12, [#allocation5]  }
   0xe   : > { %1168 = dma.hbm_to_vmem [thread:$0]  (!%p1491_p5), %s279_s15, 16, %s281_s21, [#allocation8]  }
   0xf   : > { %1159 = dma.hbm_to_vmem [thread:$0]  (!%p1491_p5), %s238_s18, 768, %s240_s23, [#allocation3], %s1413_s24, %s1413_s24, %s1414_s25  }
  0x10   : > { %s263_s29 = sshll.u32 %s1667_s3, 4  ;;  %s1415_s11 = smov [#allocation6]   ;;  %s264_s29 = int_to_ptr.hbm [resolvable:$true] %s263_s29 }
  0x11   : > { %s265_s13 = sshll.u32 %s1415_s11, 4  ;;  %s289_s14 = sshll.u32 %s1669_s5, 4  ;;  %s266_s13 = int_to_ptr.vmem [resolvable:$true] %s265_s13  ;;  %s290_s14 = int_to_ptr.hbm [resolvable:$true] %s289_s14 }
  0x12   : > { %1165 = dma.hbm_to_vmem [thread:$0]  (!%p1491_p5), %s264_s29, 1536, %s266_s13, [#allocation5], %s1413_s24, %s1413_s24, %s1414_s25  }
  0x13   : > { %s1416_s15 = smov [#allocation9]   ;;  %s304_s20 = sshll.u32 %s1670_s6, 4  ;;  %s305_s20 = int_to_ptr.hbm [resolvable:$true] %s304_s20 }
  0x14   : > { %s291_s16 = sshll.u32 %s1416_s15, 4  ;;  %s1417_s21 = smov [#allocation10]   ;;  %s292_s16 = int_to_ptr.vmem [resolvable:$true] %s291_s16 }
  0x15   : > { %1171 = dma.hbm_to_vmem [thread:$0]  (!%p1491_p5), %s290_s14, 256, %s292_s16, [#allocation8], %s1413_s24, %s1413_s24, %s1414_s25  }
  0x16   : > { %s306_s22 = sshll.u32 %s1417_s21, 4  ;;  %329 = sbr.rel (%p1477_p3) target bundleno = 487 (0x1e7), region = 52  ;;  %s307_s22 = int_to_ptr.vmem [resolvable:$true] %s306_s22 }
  0x17   : > { %1174 = dma.hbm_to_vmem [thread:$0]  (!%p1491_p5), %s305_s20, 16, %s307_s22, [#allocation11]  }
  0x1b   : > { %1391 = dma.done.wait (%p1175_p2), [#allocation3], 768  }
  0x1c   : > { %1393 = vsyncadd (%p1175_p2), [#allocation3], 4294966528 }
  0x1d   : > { %1395 = dma.done.wait (%p1175_p2), [#allocation5], 1552  }
  0x1e   : > { %1397 = vsyncadd (%p1175_p2), [#allocation5], 4294965744 }
  0x1f   : > { %1399 = dma.done.wait (%p1175_p2), [#allocation8], 272  }
  0x20   : > { %1401 = vsyncadd (%p1175_p2), [#allocation8], 4294967024 }
  0x21   : > { %1403 = dma.done.wait (%p1175_p2), [#allocation11], 16  }
  0x22   : > { %1405 = vsyncadd (%p1175_p2), [#allocation11], 4294967280  ;;  %p387_p6 = scmp.lt.s32.totalorder %s1472_s9, 1  ;;  %v1113_v0 = vld [vmem:[#allocation2 + $0x8] sm:$0xff]  ;;  %v1115_v2 = vld [vmem:[#allocation2 + $0x18] sm:$0xff]  ;;  %vm400_vm0 = vcmask 1040384  }
  0x23   : > { %v1117_v1 = vld [vmem:[#allocation2 + $0x28] sm:$0xff]  ;;  %v1112_v3 = vld [vmem:[#allocation2] sm:$0xff]  ;;  %471 = vmatpush.bf16.msra.mxu1 %v1113_v0  ;;  %443 = vmatpush.bf16.msra.mxu0 %v1115_v2  ;;  %v1114_v6 = vld [vmem:[#allocation2 + $0x10] sm:$0xff]  ;;  %vm433_vm1 = vcmask 261120   ;;  %vm575_vm2 = vcmask 523264   ;;  %vm861_vm3 = vcmask 123904  }
  0x24   : > { %s1676_s9 = smov (!%p387_p6, %s1472_s9), 1  ;;  %v1116_v4 = vld [vmem:[#allocation2 + $0x20] sm:$0xff]  ;;  %506 = vmatpush.bf16.msra.mxu2 %v1117_v1  ;;  %v1121_v17 = vld [vmem:[#allocation6 + $0x18] sm:$0xff]  ;;  %v1118_v26 = vld [vmem:[#allocation6] sm:$0xff] }
  0x25   : > { %s993_s10 = sshll.u32 %s1676_s9, 3  ;;  %v1129_v18 = vld [vmem:[#allocation6 + $0x58] sm:$0xff]  ;;  %v1120_v19 = vld [vmem:[#allocation6 + $0x10] sm:$0xff]  ;;  %v1119_v22 = vld [vmem:[#allocation6 + $0x8] sm:$0xff]  ;;  %s994_s11 = sshll.u32 %s1676_s9, 1 }
  0x26   : > { %s390_s24 = scalar_lea.vmem %s1664_s0, %s993_s10  ;;  %v1125_v20 = vld [vmem:[#allocation6 + $0x38] sm:$0xff]  ;;  %v1128_v21 = vld [vmem:[#allocation6 + $0x50] sm:$0xff]  ;;  %v1127_v25 = vld [vmem:[#allocation6 + $0x48] sm:$0xff]  ;;  %s394_s12 = scalar_lea.vmem %s1672_s8, %s994_s11 }
  0x27   : > { %v396_v5 = vld [vmem:[%s390_s24] sm:$0xff]  ;;  %472 = vmatpush.bf16.msra.mxu1 %v1112_v3  ;;  %444 = vmatpush.bf16.msra.mxu0 %v1114_v6  ;;  %v1126_v28 = vld [vmem:[#allocation6 + $0x40] sm:$0xff]  ;;  %v1203_v35 = vld [vmem:[#allocation4] ss:$0 sm:$0xff] }
  0x28   : > { %v398_v7 = vrot.slane %v396_v5, 7  ;;  %507 = vmatpush.bf16.msra.mxu2 %v1116_v4  ;;  %583 = vmatpush.bf16.msra.mxu3 %v1125_v20  ;;  %v1131_v23 = vld [vmem:[#allocation9 + $0x8] sm:$0xff]  ;;  %v1130_v29 = vld [vmem:[#allocation9] sm:$0xff]  ;;  %v689_v30 = vpack.c.bf16 %v396_v5, %v396_v5  ;;  %v733_v62 = vld [vmem:[%s1671_s7 + $0x28] sm:$0xff] }
  0x29   : > { %v1124_v24 = vld [vmem:[#allocation6 + $0x30] sm:$0xff]  ;;  %v1123_v27 = vld [vmem:[#allocation6 + $0x28] sm:$0xff]  ;;  %v1122_v31 = vld [vmem:[#allocation6 + $0x20] sm:$0xff] }
  0x2a   : > { %v401_v8 = vsel %vm400_vm0, 0.0, %v398_v7  ;;  %v402_v9 = vsel %vm400_vm0, %v398_v7, 0.0  ;;  %v735_v53 = vld [vmem:[%s1671_s7 + $0x38] sm:$0xff]  ;;  %v734_v58 = vld [vmem:[%s1671_s7 + $0x30] sm:$0xff]  ;;  %v1106_v63 = vld [vmem:[%s1671_s7 + $0xe8] sm:$0xff] }
  0x2b   : > { %v403_v10 = vpack.c.bf16 %v401_v8, %v401_v8  ;;  %v408_v11 = vpack.c.bf16 %v402_v9, %v401_v8  ;;  %623 = vmatpush.bf16.msrb.mxu0 %v1121_v17  ;;  %674 = vmatpush.bf16.msrb.mxu1 %v1129_v18  ;;  %v1108_v54 = vld [vmem:[%s1671_s7 + $0xf8] sm:$0xff]  ;;  %v1107_v59 = vld [vmem:[%s1671_s7 + $0xf0] sm:$0xff]  ;;  %v1088_v0 = vld [vmem:[%s1671_s7 + $0x68] sm:$0xff] }
  0x2c   : > { %719 = vmatpush.bf16.msrb.mxu2 %v1131_v23  ;;  %584 = vmatpush.bf16.msra.mxu3 %v1124_v24  ;;  %v1090_v55 = vld [vmem:[%s1671_s7 + $0x78] sm:$0xff]  ;;  %v1089_v60 = vld [vmem:[%s1671_s7 + $0x70] sm:$0xff]  ;;  %v1097_v1 = vld [vmem:[%s1671_s7 + $0xa8] sm:$0xff] }
  0x2d   : > { %v484_v12 = vrot.slane %v408_v11, 1  ;;  %v415_v13 = vshrl.u32 %v408_v11, 16  ;;  %v417_v14 = vshll.u32 %v408_v11, 16  ;;  %1012 = vmatmul.msk.bf16.vlgmr.msra.gmra.mxu1 %vm433_vm1, %v403_v10  ;;  %v1099_v56 = vld [vmem:[%s1671_s7 + $0xb8] sm:$0xff]  ;;  %v1098_v61 = vld [vmem:[%s1671_s7 + $0xb0] sm:$0xff]  ;;  %v732_v2 = vld [vmem:[%s1671_s7 + $0x20] sm:$0xff] }
  0x2e   : > { %v1105_v3 = vld [vmem:[%s1671_s7 + $0xe0] sm:$0xff]  ;;  %v731_v6 = vld [vmem:[%s1671_s7 + $0x18] sm:$0xff]  ;;  %v730_v11 = vld [vmem:[%s1671_s7 + $0x10] sm:$0xff] }
  0x2f   : > { %1021 = vmatmul.msk.bf16.vlgmr.msra.gmra.mxu2 %vm433_vm1, %v484_v12  ;;  %v419_v15 = vrot.slane %v417_v14, 1  ;;  %624 = vmatpush.bf16.msrb.mxu0 %v1120_v19  ;;  %v1087_v4 = vld [vmem:[%s1671_s7 + $0x60] sm:$0xff]  ;;  %v1104_v7 = vld [vmem:[%s1671_s7 + $0xd8] sm:$0xff]  ;;  %v1103_v12 = vld [vmem:[%s1671_s7 + $0xd0] sm:$0xff] }
  0x30   : > { %675 = vmatpush.bf16.msrb.mxu1 %v1128_v21  ;;  %585 = vmatpush.bf16.msra.mxu3 %v1123_v27  ;;  %v1096_v5 = vld [vmem:[%s1671_s7 + $0xa0] sm:$0xff]  ;;  %v1086_v8 = vld [vmem:[%s1671_s7 + $0x58] sm:$0xff]  ;;  %v1094_v14 = vld [vmem:[%s1671_s7 + $0x90] sm:$0xff] }
  0x31   : > { %v420_v16 = vor.u32 %v419_v15, %v415_v13  ;;  %720 = vmatpush.bf16.msrb.mxu2 %v1130_v29  ;;  %v1095_v10 = vld [vmem:[%s1671_s7 + $0x98] sm:$0xff]  ;;  %v1085_v13 = vld [vmem:[%s1671_s7 + $0x50] sm:$0xff]  ;;  %v729_v15 = vld [vmem:[%s1671_s7 + $0x8] sm:$0xff] }
  0x32   : > { %v1084_v17 = vld [vmem:[%s1671_s7 + $0x48] sm:$0xff]  ;;  %v728_v19 = vld [vmem:[%s1671_s7] sm:$0xff] }
  0x33   : > { %1003 = vmatmul.msk.bf16.vlgmr.msra.gmra.mxu0 %vm433_vm1, %v420_v16  ;;  %v1102_v16 = vld [vmem:[%s1671_s7 + $0xc8] sm:$0xff]  ;;  %v1101_v20 = vld [vmem:[%s1671_s7 + $0xc0] sm:$0xff] }
  0x34   : > { %625 = vmatpush.bf16.msrb.mxu0 %v1119_v22  ;;  %676 = vmatpush.bf16.msrb.mxu1 %v1127_v25  ;;  %v1093_v18 = vld [vmem:[%s1671_s7 + $0x88] sm:$0xff]  ;;  %v1083_v21 = vld [vmem:[%s1671_s7 + $0x40] sm:$0xff] }
  0x35   : > { %586 = vmatpush.bf16.msra.mxu3 %v1122_v31  ;;  %834 = vmatpush.msra.mxu2 %v1108_v54  ;;  %v1092_v22 = vld [vmem:[%s1671_s7 + $0x80] sm:$0xff] }
  0x36   : > { %v1204_v27 = vld [vmem:[#allocation10] ss:$0 sm:$0xff] }
  0x37   : > { %835 = vmatpush.msra.mxu2 %v1107_v59 }
  0x38   : > { %626 = vmatpush.bf16.msrb.mxu0 %v1118_v26  ;;  %677 = vmatpush.bf16.msrb.mxu1 %v1126_v28 }
  0x39   : > { %747 = vmatpush.msrb.mxu3 %v735_v53  ;;  %836 = vmatpush.msra.mxu2 %v1106_v63 }
  0x3b   : > { %748 = vmatpush.msrb.mxu3 %v734_v58  ;;  %837 = vmatpush.msra.mxu2 %v1105_v3 }
  0x3c   : > { %776 = vmatpush.msra.mxu0 %v1090_v55  ;;  %805 = vmatpush.msra.mxu1 %v1099_v56 }
  0x3d   : > { %749 = vmatpush.msrb.mxu3 %v733_v62  ;;  %838 = vmatpush.msra.mxu2 %v1104_v7 }
  0x3e   : > { %777 = vmatpush.msra.mxu0 %v1089_v60  ;;  %806 = vmatpush.msra.mxu1 %v1098_v61 }
  0x3f   : > { %1081 = vmatmul.msk.bf16.vlgmr.msrb.gmra.mxu2 %vm433_vm1, %v689_v30  ;;  %750 = vmatpush.msrb.mxu3 %v732_v2  ;;  %v1205_v30 = vld [vmem:[#allocation7] ss:$0 sm:$0xff] }
  0x40   : > { %778 = vmatpush.msra.mxu0 %v1088_v0  ;;  %807 = vmatpush.msra.mxu1 %v1097_v1 }
  0x41   : > { %751 = vmatpush.msrb.mxu3 %v731_v6  ;;  %839 = vmatpush.msra.mxu2 %v1103_v12 }
  0x42   : > { %779 = vmatpush.msra.mxu0 %v1087_v4  ;;  %808 = vmatpush.msra.mxu1 %v1096_v5 }
  0x43   : > { %752 = vmatpush.msrb.mxu3 %v730_v11  ;;  %840 = vmatpush.msra.mxu2 %v1102_v16 }
  0x44   : > { %780 = vmatpush.msra.mxu0 %v1086_v8  ;;  %809 = vmatpush.msra.mxu1 %v1095_v10 }
  0x45   : > { %753 = vmatpush.msrb.mxu3 %v729_v15  ;;  %841 = vmatpush.msra.mxu2 %v1101_v20 }
  0x46   : > { %781 = vmatpush.msra.mxu0 %v1085_v13  ;;  %810 = vmatpush.msra.mxu1 %v1094_v14 }
  0x47   : > { %754 = vmatpush.msrb.mxu3 %v728_v19 }
  0x48   : > { %782 = vmatpush.msra.mxu0 %v1084_v17  ;;  %811 = vmatpush.msra.mxu1 %v1093_v18 }
  0x4a   : > { %783 = vmatpush.msra.mxu0 %v1083_v21  ;;  %812 = vmatpush.msra.mxu1 %v1092_v22 }
  0xaa   : > { %v474_v32 = vpop.f32.mrf.mxu1 }
  0xb0   : > { %v446_v33 = vpop.f32.mrf.mxu0 }
  0xb1   : > { %v475_v34 = vadd.f32 %v474_v32, %v446_v33 }
  0xb2   : > { %v509_v36 = vpop.f32.mrf.mxu2  ;;  %v476_v38 = vpop.f32.mrf.mxu1 }
  0xb3   : > { %v513_v37 = vadd.f32 %v509_v36, %v475_v34 }
  0xb5   : > { %v518_v39 = vadd.f32 %v1203_v35, %v513_v37 }
  0xb7   : > { %v519_v40 = vmax.f32 %v518_v39, 0.0 }
  0xb8   : > { %v448_v41 = vpop.f32.mrf.mxu0 }
  0xb9   : > { %v521_v42 = vrot.slane %v519_v40, 7 }
  0xba   : > { %v511_v43 = vpop.f32.mrf.mxu2 }
  0xbb   : > { %v523_v44 = vsel %vm400_vm0, 0.0, %v521_v42  ;;  %v524_v45 = vsel %vm400_vm0, %v521_v42, 0.0 }
  0xbc   : > { %v525_v46 = vpack.c.bf16 %v523_v44, %v523_v44  ;;  %v534_v47 = vpack.c.bf16 %v524_v45, %v523_v44 }
  0xbe   : > { %1055 = vmatmul.msk.bf16.vlgmr.msrb.gmra.mxu0 %vm575_vm2, %v525_v46  ;;  %v642_v48 = vrot.slane %v534_v47, 1  ;;  %v547_v49 = vshll.u32 %v534_v47, 16  ;;  %v545_v50 = vshrl.u32 %v534_v47, 16 }
  0xc0   : > { %1072 = vmatmul.msk.bf16.vlgmr.msrb.gmra.mxu1 %vm575_vm2, %v642_v48  ;;  %v549_v51 = vrot.slane %v547_v49, 1 }
  0xc2   : > { %v550_v52 = vor.u32 %v549_v51, %v545_v50  ;;  %v1565_v57 = vpop.f32.mrf.mxu2 }
  0xc3   : > { %v723_v31 = vadd.f32 %v1204_v27, %v1565_v57 }
  0xc4   : > { %1038 = vmatmul.msk.bf16.vlgmr.msra.gmra.mxu3 %vm575_vm2, %v550_v52 }
  0xca   : > { %v724_v9 = vpop.f32.mrf.mxu2 }
 0x13b   : > { %v628_v23 = vpop.f32.mrf.mxu0 }
 0x13d   : > { %v679_v24 = vpop.f32.mrf.mxu1 }
 0x143   : > { %v630_v25 = vpop.f32.mrf.mxu0 }
 0x145   : > { %v681_v26 = vpop.f32.mrf.mxu1 }
 0x147   : > { %v588_v28 = vpop.f32.mrf.mxu3 }
 0x148   : > { %v629_v29 = vadd.f32 %v628_v23, %v588_v28 }
 0x14a   : > { %v683_v32 = vadd.f32 %v679_v24, %v629_v29 }
 0x14c   : > { %v688_v33 = vadd.f32 %v1205_v30, %v683_v32 }
 0x14e   : > { %v726_v34 = vadd.f32 %v723_v31, %v688_v33 }
 0x14f   : > { %v590_v35 = vpop.f32.mrf.mxu3 }
 0x150   : > { %v727_v36 = vmax.f32 %v726_v34, 0.0 }
 0x152   : > { %1082 = vmatmul.msk.f32.vlgmr.msrb.gmra.mxu3 %vm575_vm2, %v727_v36  ;;  %1091 = vmatmul.msk.f32.vlgmr.msra.gmra.mxu0 %vm575_vm2, %v727_v36 }
 0x153   : > { %1100 = vmatmul.msk.f32.vlgmr.msra.gmra.mxu1 %vm575_vm2, %v727_v36  ;;  %1109 = vmatmul.msk.f32.vlgmr.msra.gmra.mxu2 %vm575_vm2, %v727_v36 }
 0x1cf   : > { %v785_v37 = vpop.f32.mrf.mxu0 }
 0x1d0   : > { %v814_v39 = vpop.f32.mrf.mxu1 }
 0x1d5   : > { %v756_v38 = vpop.f32.mrf.mxu3 }
 0x1d6   : > { %v846_v40 = vmax.f32 %v756_v38, %v785_v37  ;;  %v843_v41 = vpop.f32.mrf.mxu2 }
 0x1d7   : > { %v847_v42 = vmax.f32 %v814_v39, %v843_v41 }
 0x1d9   : > { %v848_v43 = vmax.f32 %v846_v40, %v847_v42 }
 0x1db   : > { %v850_v44 = vrot.slane %v848_v43, 1 }
 0x1dd   : > { %v852_v45 = vmax.f32 %v848_v43, %v850_v44 }
 0x1df   : > { %v854_v46 = vrot.slane %v852_v45, 2 }
 0x1e1   : > { %v856_v47 = vmax.f32 %v852_v45, %v854_v46 }
 0x1e3   : > { %v858_v48 = vrot.slane %v856_v47, 3 }
 0x1e5   : > { %v860_v49 = vsel %vm400_vm0, %v856_v47, %v858_v48 }
 0x1e6   : > { %862 = vst.msk [vmem:[%s394_s12] sm:$0x3] %vm861_vm3, %v860_v49 }
 0x1e7 PF: > { %s22_s27 = sadd.s32 1, %s1408_s27  }
 0x1e8   : > { %p19_p7 = scmp.ge.s32.totalorder %s22_s27, 4  }
 0x1ea   :  { %21 = sbr.rel (!%p19_p7) target bundleno = 4 (0x4), region = 114 }
 0x1ef   :  { %882 = vsyncpa [#allocation3], 1 }
 0x1f0   :  { %884 = vsyncpa [#allocation3 + $0x1], 1 }
 0x1f1   :  { %885 = vsyncpa [#allocation5], 1 }
 0x1f2   :  { %886 = vsyncpa [#allocation8], 1 }
 0x1f3   :  { %887 = vsyncpa [#allocation11], 1 }

// kernel: skip_network_forward.3
= control target key start
LH: loop header
LB: loop body
LE: loop exit
PB: predicated region body
PF: predicated region fallthrough
CT: control target
= control target key end

     0   :  { %13 = vsyncpa [#allocation3], 0  ;;  %s2419_s0 = inlined_call_operand.hbm [shape: f32[2,32,32], index: 0, kind: input, shape index: {}]   ;;  %s2420_s1 = inlined_call_operand.hbm [shape: bf16[3,32,128], index: 1, kind: input, shape index: {}]   ;;  %s2421_s2 = inlined_call_operand.hbm [shape: f32[1,128], index: 2, kind: input, shape index: {}]   ;;  %s2422_s3 = inlined_call_operand.hbm [shape: bf16[3,128,128], index: 3, kind: input, shape index: {}]   ;;  %s2423_s4 = inlined_call_operand.hbm [shape: f32[1,128], index: 4, kind: input, shape index: {}]   ;;  %s2424_s5 = inlined_call_operand.hbm [shape: bf16[32,128], index: 5, kind: input, shape index: {}]   ;;  %s2425_s6 = inlined_call_operand.hbm [shape: f32[1,128], index: 6, kind: input, shape index: {}]   ;;  %s2426_s7 = inlined_call_operand.vmem [shape: f32[4,128,32], index: 7, kind: input, shape index: {}]   ;;  %s2427_s8 = inlined_call_operand.vmem [shape: f32[2,8,32], index: 8, kind: output, shape index: {}]  }
   0x1   :  { %15 = vsyncpa [#allocation3 + $0x1], 0 }
   0x2   :  { %16 = vsyncpa [#allocation5], 0 }
   0x3   :  { %17 = vsyncpa [#allocation8], 0 }
   0x4   :  { %18 = vsyncpa [#allocation11], 0  ;;  %s2034_s27 = smov 0   ;;  %s2036_s28 = smov 0  }
   0x5   :  { %s2038_s29 = smov 0   ;;  %s2040_s30 = smov 0  }
   0x6 LB: > { %s239_s11 = sshll.u32 %s2420_s1, 4  ;;  %s2058_s12 = sadd.s32 4294967295, %s1976_s30   ;;  %s1976_s30 = sphi %s2040_s30, %s2435_s30   ;;  %s1972_s29 = sphi %s2038_s29, %s2434_s29   ;;  %s1968_s28 = sphi %s2036_s28, %s2433_s28   ;;  %s1964_s27 = sphi %s2034_s27, %s2432_s27   ;;  %s240_s11 = int_to_ptr.hbm [resolvable:$true] %s239_s11 }
   0x7   : > { %p1369_p0 = scmp.ge.s32.totalorder %s1976_s30, 1  ;;  %p45_p1 = scmp.eq.s32.totalorder %s2058_s12, 0 }
   0x8   : > { %p228_p2 = scmp.lt.s32.totalorder %s1976_s30, 3  ;;  %s1978_s14 = smov [#allocation4]  }
   0x9   : > { %s241_s15 = sshll.u32 %s1978_s14, 4  ;;  %s265_s18 = sshll.u32 %s2422_s3, 4  ;;  %s242_s15 = int_to_ptr.vmem [resolvable:$true] %s241_s15  ;;  %s266_s18 = int_to_ptr.hbm [resolvable:$true] %s265_s18 }
   0xa   : > { %p2063_p3 = pnand %p1369_p0, %p228_p2  ;;  %s291_s22 = sshll.u32 %s2424_s5, 4  ;;  %s292_s22 = int_to_ptr.hbm [resolvable:$true] %s291_s22 }
   0xb   : > { %s1979_s23 = smov [#allocation7]   ;;  %s1980_s25 = smov 64  }
   0xc   : > { %p1638_p4 = pneg %p2063_p3  ;;  %s267_s24 = sshll.u32 %s1979_s23, 4  ;;  %s268_s24 = int_to_ptr.vmem [resolvable:$true] %s267_s24 }
   0xd   : > { %s1981_s26 = smov 4   ;;  %s254_s14 = sshll.u32 %s2421_s2, 4  ;;  %s255_s14 = int_to_ptr.hbm [resolvable:$true] %s254_s14 }
   0xe   : > { %p2074_p5 = pnand %p1638_p4, %p45_p1  ;;  %s1982_s16 = smov [#allocation10]  }
   0xf   : > { %s293_s17 = sshll.u32 %s1982_s16, 4  ;;  %s1983_s20 = smov [#allocation6]   ;;  %s294_s17 = int_to_ptr.vmem [resolvable:$true] %s293_s17 }
  0x10   : > { %1641 = dma.hbm_to_vmem [thread:$0]  (!%p2074_p5), %s240_s11, 768, %s242_s15, [#allocation5], %s1980_s25, %s1980_s25, %s1981_s26  }
  0x11   : > { %1647 = dma.hbm_to_vmem [thread:$0]  (!%p2074_p5), %s266_s18, 3072, %s268_s24, [#allocation8], %s1980_s25, %s1980_s25, %s1981_s26  }
  0x12   : > { %1653 = dma.hbm_to_vmem [thread:$0]  (!%p2074_p5), %s292_s22, 256, %s294_s17, [#allocation11], %s1980_s25, %s1980_s25, %s1981_s26  }
  0x13   : > { %s256_s21 = sshll.u32 %s1983_s20, 4  ;;  %s280_s18 = sshll.u32 %s2423_s4, 4  ;;  %s257_s21 = int_to_ptr.vmem [resolvable:$true] %s256_s21  ;;  %s281_s18 = int_to_ptr.hbm [resolvable:$true] %s280_s18 }
  0x14   : > { %1644 = dma.hbm_to_vmem [thread:$0]  (!%p2074_p5), %s255_s14, 16, %s257_s21, [#allocation5]  }
  0x15   : > { %s306_s22 = sshll.u32 %s2425_s6, 4  ;;  %s1984_s25 = smov [#allocation9]   ;;  %s307_s22 = int_to_ptr.hbm [resolvable:$true] %s306_s22 }
  0x16   : > { %s282_s26 = sshll.u32 %s1984_s25, 4  ;;  %s1985_s9 = smov [#allocation12]   ;;  %s283_s26 = int_to_ptr.vmem [resolvable:$true] %s282_s26 }
  0x17   : > { %1650 = dma.hbm_to_vmem [thread:$0]  (!%p2074_p5), %s281_s18, 16, %s283_s26, [#allocation8]  }
  0x18   : > { %s308_s10 = sshll.u32 %s1985_s9, 4  ;;  %s2103_s14 = sadd.s32 1, %s1976_s30   ;;  %s309_s10 = int_to_ptr.vmem [resolvable:$true] %s308_s10 }
  0x19   : > { %1656 = dma.hbm_to_vmem [thread:$0]  (!%p2074_p5), %s307_s22, 16, %s309_s10, [#allocation11]  }
  0x1a   : > { %s31_s16 = sadd.s32 1, %s1972_s29  ;;  %s28_s17 = ssub.s32 %s1976_s30, %s2103_s14 }
  0x1b   : > { %p38_p6 = scmp.ne.s32.totalorder %s1972_s29, %s1968_s28  ;;  %p29_p7 = scmp.eq.s32.totalorder %s28_s17, 0 }
  0x1c   : > { %p39_p8 = scmp.eq.s32.totalorder %s1976_s30, 0  ;;  %p44_p9 = scmp.ne.s32.totalorder %s1968_s28, %s1964_s27 }
  0x1d   : > { %p1667_p10 = scmp.lt.s32.totalorder %s1976_s30, 2  ;;  %s322_s19 = sand.u32 1, %s1972_s29  }
  0x1e   : > { %s2115_s20 = scalar_select %p29_p7, %s1972_s29, %s31_s16  }
  0x1f   : > { %p40_p11 = por %p39_p8, %p38_p6  ;;  %p2119_p12 = por %p45_p1, %p44_p9 }
  0x20   : > { %s1579_s11 = sshll.u32 %s1976_s30, 5  ;;  %s1377_s15 = sshll.u32 %s322_s19, 5 }
  0x21   : > { %s331_s24 = scalar_lea.hbm %s2419_s0, %s1579_s11  ;;  %s326_s25 = scalar_lea.vmem [#allocation2], %s1377_s15 }
  0x22   : > { %s332_s22 = sshll.u32 %s331_s24, 4  ;;  %s334_s26 = sshll.u32 %s326_s25, 4  ;;  %s333_s22 = int_to_ptr.hbm [resolvable:$true] %s332_s22  ;;  %s335_s26 = int_to_ptr.vmem [resolvable:$true] %s334_s26 }
  0x23   : > { %p2130_p13 = pnand %p1667_p10, %p40_p11  ;;  %s323_s9 = scalar_lea.sflag [#allocation3], %s322_s19 }
  0x24   : > { %s1900_s10 = sshra.s32 %s333_s22, 4  ;;  %s1907_s15 = scalar_lea.hbm %s2419_s0, 64  ;;  %s1901_s10 = int_to_ptr.hbm [resolvable:$true] %s1900_s10 }
  0x25   : > { %s1902_s16 = scalar_lea.hbm %s1901_s10, 32  ;;  %p1904_p2 = pneg %p2130_p13 }
  0x26   : > { %p1903_p0 = scmp.ne.s32.totalorder %s1901_s10, %s1902_s16  ;;  %p1908_p6 = scmp.lt.s32.totalorder %s1901_s10, %s2419_s0 }
  0x27   : > { %p1909_p7 = scmp.lt.s32.totalorder %s1907_s15, %s1902_s16 }
  0x28   : > { %p1905_p4 = pnand %p1904_p2, %p1903_p0 }
  0x29   : > { %p1910_p8 = por %p1909_p7, %p1908_p6 }
  0x2a   : > { %p1906_p5 = pneg %p1905_p4 }
  0x2c   : > { %p1911_p9 = pnand %p1910_p8, %p1906_p5 }
  0x2e   : > { %1914 = shalt.err (!%p1911_p9)
}
  0x2f   : > { %s1986_s19 = smov 128   ;;  %s1987_s23 = smov 8  }
  0x30   : > { %1660 = dma.hbm_to_vmem [thread:$0]  (!%p2130_p13), %s333_s22, 512, %s335_s26, %s323_s9, %s1986_s19, %s1986_s19, %s1987_s23  }
  0x31   : > { %346 = sbr.rel (%p2063_p3) target bundleno = 561 (0x231), region = 52  ;;  %s348_s24 = sand.u32 (!%p2063_p3), 1, %s1968_s28  }
  0x32   : > { %s1381_s25 = sshll.u32 (!%p2063_p3), %s348_s24, 5  ;;  %s349_s17 = scalar_lea.sflag (!%p2063_p3), [#allocation3], %s348_s24 }
  0x33   : > { %s352_s11 = scalar_lea.vmem (!%p2063_p3), [#allocation2], %s1381_s25 }
  0x36   : > { %1947 = dma.done.wait (%p2119_p12), %s349_s17, 512  }
  0x37   : > { %1949 = vsyncadd (%p2119_p12), %s349_s17, 4294966784 }
  0x38   : > { %1951 = dma.done.wait (%p45_p1), [#allocation5], 784  }
  0x39   : > { %1953 = vsyncadd (%p45_p1), [#allocation5], 4294966512 }
  0x3a   : > { %1955 = dma.done.wait (%p45_p1), [#allocation8], 3088  }
  0x3b   : > { %1957 = vsyncadd (%p45_p1), [#allocation8], 4294964208 }
  0x3c   : > { %1959 = dma.done.wait (%p45_p1), [#allocation11], 272  }
  0x3d   : > { %1961 = vsyncadd (%p45_p1), [#allocation11], 4294967024  ;;  %v1581_v0 = vld [vmem:[#allocation4 + $0x8] sm:$0xff]  ;;  %v1583_v2 = vld [vmem:[#allocation4 + $0x18] sm:$0xff]  ;;  %vm428_vm0 = vcmask 1040384   ;;  %vm488_vm1 = vcmask 261120  }
  0x3e   : > { %v1585_v1 = vld [vmem:[#allocation4 + $0x28] sm:$0xff]  ;;  %v1580_v3 = vld [vmem:[#allocation4] sm:$0xff]  ;;  %536 = vmatpush.bf16.msra.mxu1 %v1581_v0  ;;  %v2167_v7 = vld [vmem:[%s352_s11 + $0x10] sm:$0xff]  ;;  %501 = vmatpush.bf16.msra.mxu0 %v1583_v2  ;;  %vm557_vm2 = vcmask 1046528   ;;  %vm455_vm3 = vsmask.f32 7424 }
  0x3f   : > { %v1584_v4 = vld [vmem:[#allocation4 + $0x20] sm:$0xff]  ;;  %587 = vmatpush.bf16.msra.mxu2 %v1585_v1  ;;  %v2165_v6 = vld [vmem:[%s352_s11 + $0x8] sm:$0xff]  ;;  %v1582_v8 = vld [vmem:[#allocation4 + $0x10] sm:$0xff]  ;;  %v432_v12 = vrot.slane %v2167_v7, 7  ;;  %vm1988_vm5 = vmmov 1   ;;  %p415_p1 = scmp.lt.s32.totalorder %s2058_s12, 1 }
  0x40   : > { %v2163_v5 = vld [vmem:[%s352_s11] sm:$0xff]  ;;  %v430_v10 = vrot.slane %v2165_v6, 7  ;;  %v2171_v11 = vld [vmem:[%s352_s11 + $0x18] sm:$0xff]  ;;  %v1593_v14 = vld [vmem:[#allocation7 + $0x38] sm:$0xff]  ;;  %vm1233_vm7 = vcmask 1041408   ;;  %vm1235_vm8 = vcmask 1042432  }
  0x41   : > { %v429_v9 = vrot.slane %v2163_v5, 7  ;;  %v434_v13 = vrot.slane %v2171_v11, 7  ;;  %v1592_v24 = vld [vmem:[#allocation7 + $0x30] sm:$0xff]  ;;  %v1591_v41 = vld [vmem:[#allocation7 + $0x28] sm:$0xff]  ;;  %v1590_v42 = vld [vmem:[#allocation7 + $0x20] sm:$0xff]  ;;  %s2437_s12 = smov (!%p415_p1, %s2058_s12), 1 }
  0x42   : > { %v433_v17 = vsel %vm428_vm0, %v430_v10, %v432_v12  ;;  %537 = vmatpush.bf16.msra.mxu1 %v1580_v3  ;;  %502 = vmatpush.bf16.msra.mxu0 %v1582_v8  ;;  %v1589_v43 = vld [vmem:[#allocation7 + $0x18] sm:$0xff]  ;;  %v1588_v45 = vld [vmem:[#allocation7 + $0x10] sm:$0xff]  ;;  %v1587_v48 = vld [vmem:[#allocation7 + $0x8] sm:$0xff]  ;;  %vm1237_vm9 = vcmask 1043456   ;;  %vm1239_vm10 = vcmask 1044480   ;;  %s1388_s18 = sshll.u32 %s2437_s12, 3 }
  0x43   : > { %v431_v15 = vsel %vm428_vm0, %v429_v9, %v430_v10  ;;  %v441_v16 = vsel %vm428_vm0, 0.0, %v429_v9  ;;  %588 = vmatpush.bf16.msra.mxu2 %v1584_v4  ;;  %v435_v19 = vsel %vm428_vm0, %v432_v12, %v434_v13  ;;  %v442_v32 = vsel %vm428_vm0, %v434_v13, 0.0  ;;  %v1609_v44 = vld [vmem:[#allocation7 + $0xb8] sm:$0xff]  ;;  %v1608_v47 = vld [vmem:[#allocation7 + $0xb0] sm:$0xff]  ;;  %v1607_v50 = vld [vmem:[#allocation7 + $0xa8] sm:$0xff]  ;;  %s418_s23 = scalar_lea.vmem %s2427_s8, %s1388_s18 }
  0x44   : > { %v443_v18 = vpack.c.bf16 %v431_v15, %v441_v16  ;;  %v444_v20 = vpack.c.bf16 %v435_v19, %v433_v17  ;;  %v449_v33 = vpack.c.bf16 %v442_v32, %v442_v32  ;;  %v1601_v46 = vld [vmem:[#allocation7 + $0x78] sm:$0xff]  ;;  %v1600_v49 = vld [vmem:[#allocation7 + $0x70] sm:$0xff]  ;;  %v1586_v51 = vld [vmem:[#allocation7] sm:$0xff]  ;;  %v932_v10 = vpack.c.bf16 %v2165_v6, %v2163_v5 }
  0x45   : > { %740 = vmatpush.bf16.msra.mxu3 %v1601_v46  ;;  %v1599_v52 = vld [vmem:[#allocation7 + $0x68] sm:$0xff]  ;;  %v1606_v54 = vld [vmem:[#allocation7 + $0xa0] sm:$0xff]  ;;  %v1605_v56 = vld [vmem:[#allocation7 + $0x98] sm:$0xff]  ;;  %vm1241_vm11 = vcmask 1045504  }
  0x46   : > { %v558_v21 = vrot.slane %v443_v18, 1  ;;  %v457_v22 = vshrl.u32 %v443_v18, 16  ;;  %v459_v23 = vshll.u32 %v443_v18, 16  ;;  %807 = vmatpush.bf16.msrb.mxu0 %v1593_v14  ;;  %1407 = vmatmul.msk.bf16.vlgmr.msra.gmra.mxu1 %vm488_vm1, %v443_v18  ;;  %v559_v25 = vrot.slane %v444_v20, 1  ;;  %v1611_v53 = vld [vmem:[#allocation10 + $0x8] sm:$0xff]  ;;  %v1598_v55 = vld [vmem:[#allocation7 + $0x60] sm:$0xff]  ;;  %vm1483_vm4 = vmneg %vm428_vm0 }
  0x47   : > { %v464_v26 = vshll.u32 %v444_v20, 16  ;;  %v468_v34 = vshrl.u32 %v444_v20, 16  ;;  %v472_v35 = vshll.u32 %v449_v33, 16  ;;  %v561_v36 = vrot.slane %v449_v33, 1  ;;  %901 = vmatpush.bf16.msrb.mxu1 %v1609_v44  ;;  %966 = vmatpush.bf16.msrb.mxu2 %v1611_v53  ;;  %v1597_v58 = vld [vmem:[#allocation7 + $0x58] sm:$0xff]  ;;  %v1604_v59 = vld [vmem:[#allocation7 + $0x90] sm:$0xff]  ;;  %vm1484_vm6 = vmpackc.low %vm1988_vm5, %vm1483_vm4 }
  0x48   : > { %v461_v27 = vrot.slane %v459_v23, 1  ;;  %v560_v28 = vsel %vm557_vm2, %v558_v21, %v559_v25  ;;  %v1596_v60 = vld [vmem:[#allocation7 + $0x50] sm:$0xff]  ;;  %v1603_v62 = vld [vmem:[#allocation7 + $0x88] sm:$0xff]  ;;  %v1602_v4 = vld [vmem:[#allocation7 + $0x80] sm:$0xff] }
  0x49   : > { %v466_v29 = vrot.slane %v464_v26, 1  ;;  %1417 = vmatmul.msk.bf16.vlgmr.msra.gmra.mxu2 %vm488_vm1, %v560_v28  ;;  %v474_v38 = vrot.slane %v472_v35, 1  ;;  %v562_v39 = vsel %vm557_vm2, %v559_v25, %v561_v36  ;;  %741 = vmatpush.bf16.msra.mxu3 %v1600_v49  ;;  %v1610_v1 = vld [vmem:[#allocation10] sm:$0xff]  ;;  %v1717_v9 = vld [vmem:[#allocation6] ss:$0 sm:$0xff] }
  0x4a   : > { %v462_v30 = vor.u32 %v461_v27, %v457_v22  ;;  %808 = vmatpush.bf16.msrb.mxu0 %v1592_v24  ;;  %v1595_v2 = vld [vmem:[#allocation7 + $0x48] sm:$0xff]  ;;  %v1594_v12 = vld [vmem:[#allocation7 + $0x40] sm:$0xff]  ;;  %v933_v27 = vpack.c.bf16 %v2171_v11, %v2167_v7 }
  0x4b   : > { %v470_v37 = vor.u32 %v468_v34, %v466_v29  ;;  %902 = vmatpush.bf16.msrb.mxu1 %v1608_v47  ;;  %967 = vmatpush.bf16.msrb.mxu2 %v1610_v1  ;;  %v1560_v1 = vld [vmem:[%s2426_s7 + $0x178] sm:$0xff] }
  0x4c   : > { %v467_v31 = vsel %vm455_vm3, %v462_v30, %v466_v29 }
  0x4d   : > { %1397 = vmatmul.msk.bf16.vlgmr.msra.gmra.mxu0 %vm488_vm1, %v467_v31  ;;  %v475_v40 = vsel %vm455_vm3, %v470_v37, %v474_v38  ;;  %742 = vmatpush.bf16.msra.mxu3 %v1599_v52 }
  0x4e   : > { %809 = vmatpush.bf16.msrb.mxu0 %v1591_v41 }
  0x4f   : > { %903 = vmatpush.bf16.msrb.mxu1 %v1607_v50 }
  0x51   : > { %743 = vmatpush.bf16.msra.mxu3 %v1598_v55 }
  0x52   : > { %810 = vmatpush.bf16.msrb.mxu0 %v1590_v42 }
  0x53   : > { %904 = vmatpush.bf16.msrb.mxu1 %v1606_v54 }
  0x55   : > { %744 = vmatpush.bf16.msra.mxu3 %v1597_v58 }
  0x56   : > { %1408 = vmatmul.msk.bf16.gmra.mxu1 %vm488_vm1, %v444_v20  ;;  %811 = vmatpush.bf16.msrb.mxu0 %v1589_v43 }
  0x57   : > { %905 = vmatpush.bf16.msrb.mxu1 %v1605_v56 }
  0x59   : > { %1418 = vmatmul.msk.bf16.gmra.mxu2 %vm488_vm1, %v562_v39  ;;  %745 = vmatpush.bf16.msra.mxu3 %v1596_v60 }
  0x5a   : > { %812 = vmatpush.bf16.msrb.mxu0 %v1588_v45 }
  0x5b   : > { %906 = vmatpush.bf16.msrb.mxu1 %v1604_v59 }
  0x5d   : > { %1398 = vmatmul.msk.bf16.gmra.mxu0 %vm488_vm1, %v475_v40  ;;  %746 = vmatpush.bf16.msra.mxu3 %v1595_v2  ;;  %v1001_v2 = vld [vmem:[%s2426_s7 + $0x70] sm:$0xff] }
  0x5e   : > { %813 = vmatpush.bf16.msrb.mxu0 %v1587_v48 }
  0x5f   : > { %907 = vmatpush.bf16.msrb.mxu1 %v1603_v62  ;;  %v1002_v62 = vld [vmem:[%s2426_s7 + $0x78] sm:$0xff] }
  0x61   : > { %747 = vmatpush.bf16.msra.mxu3 %v1594_v12  ;;  %v1542_v12 = vld [vmem:[%s2426_s7 + $0xe8] sm:$0xff] }
  0x62   : > { %814 = vmatpush.bf16.msrb.mxu0 %v1586_v51 }
  0x63   : > { %908 = vmatpush.bf16.msrb.mxu1 %v1602_v4  ;;  %v1543_v4 = vld [vmem:[%s2426_s7 + $0xf0] sm:$0xff] }
  0x65   : > { %1003 = vmatpush.msrb.mxu3 %v1002_v62 }
  0x67   : > { %1095 = vmatpush.msra.mxu1 %v1560_v1  ;;  %1004 = vmatpush.msrb.mxu3 %v1001_v2  ;;  %v1718_v1 = vld [vmem:[#allocation12] ss:$0 sm:$0xff] }
  0x69   : > { %1527 = vmatmul.msk.bf16.vlgmr.msrb.gmra.mxu2 %vm488_vm1, %v932_v10  ;;  %v1574_v10 = vld [vmem:[%s2426_s7 + $0x1e8] sm:$0xff] }
  0x79   : > { %1528 = vmatmul.msk.bf16.gmra.mxu2 %vm488_vm1, %v933_v27  ;;  %v1554_v27 = vld [vmem:[%s2426_s7 + $0x148] sm:$0xff] }
  0xc3   : > { %v539_v57 = vpop.f32.mrf.mxu1 }
  0xca   : > { %v504_v61 = vpop.f32.mrf.mxu0 }
  0xcb   : > { %v540_v63 = vadd.f32 %v539_v57, %v504_v61  ;;  %v541_v3 = vpop.f32.mrf.mxu1 }
  0xcc   : > { %v590_v0 = vpop.f32.mrf.mxu2 }
  0xcd   : > { %v600_v8 = vadd.f32 %v590_v0, %v540_v63  ;;  %v1576_v63 = vld [vmem:[%s2426_s7 + $0x1f8] sm:$0xff] }
  0xce   : > { %v1544_v0 = vld [vmem:[%s2426_s7 + $0xf8] sm:$0xff]  ;;  %1141 = vmatpush.msra.mxu2 %v1576_v63 }
  0xcf   : > { %v608_v15 = vadd.f32 %v1717_v9, %v600_v8  ;;  %1049 = vmatpush.msra.mxu0 %v1544_v0  ;;  %v1559_v8 = vld [vmem:[%s2426_s7 + $0x170] sm:$0xff] }
  0xd0   : > { %1096 = vmatpush.msra.mxu1 %v1559_v8 }
  0xd1   : > { %v612_v18 = vmax.f32 %v608_v15, 0.0  ;;  %1050 = vmatpush.msra.mxu0 %v1543_v4  ;;  %v1573_v15 = vld [vmem:[%s2426_s7 + $0x1e0] sm:$0xff]  ;;  %v1719_v4 = vld [vmem:[#allocation9] ss:$0 sm:$0xff] }
  0xd2   : > { %v506_v13 = vpop.f32.mrf.mxu0 }
  0xd3   : > { %v542_v14 = vadd.f32 %v541_v3, %v506_v13  ;;  %v544_v20 = vpop.f32.mrf.mxu1  ;;  %v620_v24 = vrot.slane %v612_v18, 7  ;;  %v1575_v3 = vld [vmem:[%s2426_s7 + $0x1f0] sm:$0xff]  ;;  %v1558_v13 = vld [vmem:[%s2426_s7 + $0x168] sm:$0xff]  ;;  %1051 = vmatpush.msra.mxu0 %v1542_v12  ;;  %v998_v18 = vld [vmem:[%s2426_s7 + $0x58] sm:$0xff] }
  0xd4   : > { %v592_v16 = vpop.f32.mrf.mxu2  ;;  %1142 = vmatpush.msra.mxu2 %v1575_v3  ;;  %1097 = vmatpush.msra.mxu1 %v1558_v13 }
  0xd5   : > { %v601_v17 = vadd.f32 %v592_v16, %v542_v14  ;;  %v632_v34 = vsel %vm428_vm0, 0.0, %v620_v24  ;;  %v999_v14 = vld [vmem:[%s2426_s7 + $0x60] sm:$0xff] }
  0xd6   : > { %1143 = vmatpush.msra.mxu2 %v1574_v10  ;;  %v1541_v16 = vld [vmem:[%s2426_s7 + $0xe0] sm:$0xff] }
  0xd7   : > { %v609_v19 = vadd.f32 %v1717_v9, %v601_v17  ;;  %v1557_v17 = vld [vmem:[%s2426_s7 + $0x160] sm:$0xff]  ;;  %1052 = vmatpush.msra.mxu0 %v1541_v16 }
  0xd8   : > { %1144 = vmatpush.msra.mxu2 %v1573_v15  ;;  %1098 = vmatpush.msra.mxu1 %v1557_v17 }
  0xd9   : > { %v613_v21 = vmax.f32 %v609_v19, 0.0  ;;  %v1572_v19 = vld [vmem:[%s2426_s7 + $0x1d8] sm:$0xff] }
  0xda   : > { %v509_v22 = vpop.f32.mrf.mxu0  ;;  %1145 = vmatpush.msra.mxu2 %v1572_v19 }
  0xdb   : > { %v545_v23 = vadd.f32 %v544_v20, %v509_v22  ;;  %v621_v5 = vrot.slane %v613_v21, 7  ;;  %v546_v30 = vpop.f32.mrf.mxu1  ;;  %v1540_v20 = vld [vmem:[%s2426_s7 + $0xd8] sm:$0xff]  ;;  %v997_v22 = vld [vmem:[%s2426_s7 + $0x50] sm:$0xff] }
  0xdc   : > { %v595_v6 = vpop.f32.mrf.mxu2  ;;  %v1556_v21 = vld [vmem:[%s2426_s7 + $0x158] sm:$0xff]  ;;  %1053 = vmatpush.msra.mxu0 %v1540_v20 }
  0xdd   : > { %v622_v25 = vsel %vm428_vm0, %v620_v24, %v621_v5  ;;  %v602_v26 = vadd.f32 %v595_v6, %v545_v23  ;;  %1099 = vmatpush.msra.mxu1 %v1556_v21  ;;  %v1571_v23 = vld [vmem:[%s2426_s7 + $0x1d0] sm:$0xff]  ;;  %v996_v6 = vld [vmem:[%s2426_s7 + $0x48] sm:$0xff] }
  0xde   : > { %v1485_v28 = vpack.c.bf16 %v622_v25, %v620_v24  ;;  %v634_v37 = vpack.c.bf16 %v622_v25, %v632_v34  ;;  %v1539_v24 = vld [vmem:[%s2426_s7 + $0xd0] sm:$0xff]  ;;  %1146 = vmatpush.msra.mxu2 %v1571_v23  ;;  %v1570_v25 = vld [vmem:[%s2426_s7 + $0x1c8] sm:$0xff]  ;;  %v1536_v34 = vld [vmem:[%s2426_s7 + $0xb8] sm:$0xff] }
  0xdf   : > { %v610_v29 = vadd.f32 %v1717_v9, %v602_v26  ;;  %1054 = vmatpush.msra.mxu0 %v1539_v24  ;;  %v1538_v26 = vld [vmem:[%s2426_s7 + $0xc8] sm:$0xff] }
  0xe0   : > { %1486 = vmatmul.msk.bf16.vlgmr.msrb.gmra.mxu0 %vm1484_vm6, %v1485_v28  ;;  %v673_v41 = vshll.u32 %v634_v37, 16  ;;  %v846_v45 = vrot.slane %v634_v37, 1  ;;  %v671_v47 = vshrl.u32 %v634_v37, 16  ;;  %1147 = vmatpush.msra.mxu2 %v1570_v25  ;;  %v995_v28 = vld [vmem:[%s2426_s7 + $0x40] sm:$0xff]  ;;  %v1567_v37 = vld [vmem:[%s2426_s7 + $0x1b0] sm:$0xff] }
  0xe1   : > { %v614_v35 = vmax.f32 %v610_v29, 0.0  ;;  %1055 = vmatpush.msra.mxu0 %v1538_v26  ;;  %v1569_v29 = vld [vmem:[%s2426_s7 + $0x1c0] sm:$0xff] }
  0xe2   : > { %v511_v31 = vpop.f32.mrf.mxu0  ;;  %v675_v44 = vrot.slane %v673_v41, 1  ;;  %1148 = vmatpush.msra.mxu2 %v1569_v29  ;;  %v1566_v41 = vld [vmem:[%s2426_s7 + $0x1a8] sm:$0xff] }
  0xe3   : > { %v547_v32 = vadd.f32 %v546_v30, %v511_v31  ;;  %v623_v39 = vrot.slane %v614_v35, 7  ;;  %v1537_v30 = vld [vmem:[%s2426_s7 + $0xc0] sm:$0xff]  ;;  %v1552_v35 = vld [vmem:[%s2426_s7 + $0x138] sm:$0xff] }
  0xe4   : > { %v597_v33 = vpop.f32.mrf.mxu2  ;;  %v676_v50 = vor.u32 %v675_v44, %v671_v47  ;;  %v1553_v31 = vld [vmem:[%s2426_s7 + $0x140] sm:$0xff]  ;;  %1056 = vmatpush.msra.mxu0 %v1537_v30  ;;  %v1564_v47 = vld [vmem:[%s2426_s7 + $0x198] sm:$0xff] }
  0xe5   : > { %v603_v36 = vadd.f32 %v597_v33, %v547_v32  ;;  %v624_v7 = vsel %vm428_vm0, %v621_v5, %v623_v39  ;;  %v1555_v5 = vld [vmem:[%s2426_s7 + $0x150] sm:$0xff]  ;;  %v994_v32 = vld [vmem:[%s2426_s7 + $0x38] sm:$0xff]  ;;  %v1533_v44 = vld [vmem:[%s2426_s7 + $0xa0] sm:$0xff] }
  0xe6   : > { %1100 = vmatpush.msra.mxu1 %v1555_v5  ;;  %v1568_v33 = vld [vmem:[%s2426_s7 + $0x1b8] sm:$0xff]  ;;  %1057 = vmatpush.msra.mxu0 %v1536_v34 }
  0xe7   : > { %v611_v38 = vadd.f32 %v1717_v9, %v603_v36  ;;  %v1000_v9 = vld [vmem:[%s2426_s7 + $0x68] sm:$0xff]  ;;  %1149 = vmatpush.msra.mxu2 %v1568_v33  ;;  %v993_v36 = vld [vmem:[%s2426_s7 + $0x30] sm:$0xff] }
  0xe8   : > { %1005 = vmatpush.msrb.mxu3 %v1000_v9  ;;  %1101 = vmatpush.msra.mxu1 %v1554_v27 }
  0xe9   : > { %v615_v40 = vmax.f32 %v611_v38, 0.0  ;;  %v1535_v38 = vld [vmem:[%s2426_s7 + $0xb0] sm:$0xff]  ;;  %1150 = vmatpush.msra.mxu2 %v1567_v37 }
  0xea   : > { %1006 = vmatpush.msrb.mxu3 %v999_v14  ;;  %1102 = vmatpush.msra.mxu1 %v1553_v31 }
  0xeb   : > { %v625_v42 = vrot.slane %v615_v40, 7  ;;  %v992_v40 = vld [vmem:[%s2426_s7 + $0x28] sm:$0xff]  ;;  %1058 = vmatpush.msra.mxu0 %v1535_v38  ;;  %1151 = vmatpush.msra.mxu2 %v1566_v41 }
  0xec   : > { %1007 = vmatpush.msrb.mxu3 %v998_v18  ;;  %1103 = vmatpush.msra.mxu1 %v1552_v35  ;;  %v969_v63 = vpop.f32.mrf.mxu2 }
  0xed   : > { %v626_v11 = vsel %vm428_vm0, %v623_v39, %v625_v42  ;;  %v633_v53 = vsel %vm428_vm0, %v625_v42, 0.0  ;;  %v1551_v39 = vld [vmem:[%s2426_s7 + $0x130] sm:$0xff]  ;;  %v1534_v42 = vld [vmem:[%s2426_s7 + $0xa8] sm:$0xff]  ;;  %v970_v8 = vadd.f32 %v1718_v1, %v969_v63 }
  0xee   : > { %v635_v43 = vpack.c.bf16 %v626_v11, %v624_v7  ;;  %v652_v54 = vpack.c.bf16 %v633_v53, %v633_v53  ;;  %1008 = vmatpush.msrb.mxu3 %v997_v22  ;;  %1104 = vmatpush.msra.mxu1 %v1551_v39  ;;  %v1550_v7 = vld [vmem:[%s2426_s7 + $0x128] sm:$0xff]  ;;  %v991_v11 = vld [vmem:[%s2426_s7 + $0x20] sm:$0xff]  ;;  %v1547_v53 = vld [vmem:[%s2426_s7 + $0x110] sm:$0xff] }
  0xef   : > { %1059 = vmatpush.msra.mxu0 %v1534_v42 }
  0xf0   : > { %820 = vmatmul.bf16.gmra.mxu0 %v635_v43  ;;  %v847_v46 = vrot.slane %v635_v43, 1  ;;  %v678_v48 = vshll.u32 %v635_v43, 16  ;;  %v849_v55 = vrot.slane %v652_v54, 1  ;;  %v682_v56 = vshrl.u32 %v635_v43, 16  ;;  %1009 = vmatpush.msrb.mxu3 %v996_v6  ;;  %v1565_v43 = vld [vmem:[%s2426_s7 + $0x1a0] sm:$0xff] }
  0xf1   : > { %v686_v57 = vshll.u32 %v652_v54, 16  ;;  %1105 = vmatpush.msra.mxu1 %v1550_v7  ;;  %1152 = vmatpush.msra.mxu2 %v1565_v43  ;;  %v988_v54 = vld [vmem:[%s2426_s7 + $0x8] sm:$0xff] }
  0xf2   : > { %v848_v49 = vsel %vm557_vm2, %v846_v45, %v847_v46  ;;  %v680_v51 = vrot.slane %v678_v48, 1  ;;  %v850_v59 = vsel %vm557_vm2, %v847_v46, %v849_v55  ;;  %1010 = vmatpush.msrb.mxu3 %v995_v28  ;;  %v1549_v45 = vld [vmem:[%s2426_s7 + $0x120] sm:$0xff]  ;;  %1060 = vmatpush.msra.mxu0 %v1533_v44  ;;  %v990_v46 = vld [vmem:[%s2426_s7 + $0x18] sm:$0xff]  ;;  %v1562_v55 = vld [vmem:[%s2426_s7 + $0x188] sm:$0xff] }
  0xf3   : > { %909 = vmatmul.bf16.vlgmr.msrb.gmra.mxu1 %v848_v49  ;;  %v688_v60 = vrot.slane %v686_v57, 1  ;;  %v1532_v48 = vld [vmem:[%s2426_s7 + $0x98] sm:$0xff]  ;;  %1153 = vmatpush.msra.mxu2 %v1564_v47  ;;  %v1546_v57 = vld [vmem:[%s2426_s7 + $0x108] sm:$0xff] }
  0xf4   : > { %v681_v52 = vsel %vm455_vm3, %v676_v50, %v680_v51  ;;  %v684_v58 = vor.u32 %v682_v56, %v680_v51  ;;  %1011 = vmatpush.msrb.mxu3 %v994_v32  ;;  %1106 = vmatpush.msra.mxu1 %v1549_v45  ;;  %v1548_v49 = vld [vmem:[%s2426_s7 + $0x118] sm:$0xff]  ;;  %v989_v50 = vld [vmem:[%s2426_s7 + $0x10] sm:$0xff]  ;;  %v1530_v56 = vld [vmem:[%s2426_s7 + $0x88] sm:$0xff]  ;;  %v971_v13 = vpop.f32.mrf.mxu2 }
  0xf5   : > { %748 = vmatmul.bf16.vlgmr.msra.gmra.mxu3 %v681_v52  ;;  %1061 = vmatpush.msra.mxu0 %v1532_v48  ;;  %v1563_v51 = vld [vmem:[%s2426_s7 + $0x190] sm:$0xff]  ;;  %v972_v20 = vadd.f32 %v1718_v1, %v971_v13 }
  0xf6   : > { %v689_v61 = vsel %vm455_vm3, %v684_v58, %v688_v60  ;;  %1012 = vmatpush.msrb.mxu3 %v993_v36  ;;  %1107 = vmatpush.msra.mxu1 %v1548_v49  ;;  %v1531_v52 = vld [vmem:[%s2426_s7 + $0x90] sm:$0xff]  ;;  %v987_v58 = vld [vmem:[%s2426_s7] sm:$0xff] }
  0xf7   : > { %1154 = vmatpush.msra.mxu2 %v1563_v51  ;;  %1062 = vmatpush.msra.mxu0 %v1531_v52  ;;  %v1529_v60 = vld [vmem:[%s2426_s7 + $0x80] sm:$0xff] }
  0xf8   : > { %1013 = vmatpush.msrb.mxu3 %v992_v40  ;;  %1108 = vmatpush.msra.mxu1 %v1547_v53 }
  0xf9   : > { %1155 = vmatpush.msra.mxu2 %v1562_v55  ;;  %1063 = vmatpush.msra.mxu0 %v1530_v56 }
  0xfa   : > { %1014 = vmatpush.msrb.mxu3 %v991_v11  ;;  %1109 = vmatpush.msra.mxu1 %v1546_v57 }
  0xfb   : > { %1064 = vmatpush.msra.mxu0 %v1529_v60 }
  0xfc   : > { %1015 = vmatpush.msrb.mxu3 %v990_v46  ;;  %v974_v24 = vpop.f32.mrf.mxu2 }
  0xfd   : > { %v975_v27 = vadd.f32 %v1718_v1, %v974_v24 }
  0xfe   : > { %1016 = vmatpush.msrb.mxu3 %v989_v50 }
 0x100   : > { %1017 = vmatpush.msrb.mxu3 %v988_v54 }
 0x102   : > { %1018 = vmatpush.msrb.mxu3 %v987_v58 }
 0x103   : > { %914 = vmatmul.bf16.gmra.mxu1 %v850_v59  ;;  %v1561_v59 = vld [vmem:[%s2426_s7 + $0x180] sm:$0xff] }
 0x104   : > { %1156 = vmatpush.msra.mxu2 %v1561_v59  ;;  %v976_v36 = vpop.f32.mrf.mxu2 }
 0x105   : > { %753 = vmatmul.bf16.gmra.mxu3 %v689_v61  ;;  %v1545_v61 = vld [vmem:[%s2426_s7 + $0x100] sm:$0xff]  ;;  %v977_v38 = vadd.f32 %v1718_v1, %v976_v36 }
 0x106   : > { %1110 = vmatpush.msra.mxu1 %v1545_v61 }
 0x15d   : > { %v816_v62 = vpop.f32.mrf.mxu0 }
 0x165   : > { %v818_v10 = vpop.f32.mrf.mxu0 }
 0x16d   : > { %v821_v22 = vpop.f32.mrf.mxu0 }
 0x170   : > { %v910_v0 = vpop.f32.mrf.mxu1 }
 0x175   : > { %v823_v31 = vpop.f32.mrf.mxu0 }
 0x178   : > { %v749_v2 = vpop.f32.mrf.mxu3  ;;  %v912_v14 = vpop.f32.mrf.mxu1 }
 0x179   : > { %v817_v3 = vadd.f32 %v816_v62, %v749_v2 }
 0x17b   : > { %v920_v9 = vadd.f32 %v910_v0, %v817_v3 }
 0x17d   : > { %v928_v12 = vadd.f32 %v1719_v4, %v920_v9 }
 0x17f   : > { %v979_v15 = vadd.f32 %v970_v8, %v928_v12 }
 0x180   : > { %v751_v16 = vpop.f32.mrf.mxu3  ;;  %v915_v5 = vpop.f32.mrf.mxu1 }
 0x181   : > { %v983_v17 = vmax.f32 %v979_v15, 0.0  ;;  %v819_v18 = vadd.f32 %v818_v10, %v751_v16 }
 0x183   : > { %v921_v19 = vadd.f32 %v912_v14, %v819_v18  ;;  %1019 = vmatmul.f32.vlgmr.msrb.gmra.mxu3 %v983_v17  ;;  %1065 = vmatmul.f32.vlgmr.msra.gmra.mxu0 %v983_v17 }
 0x184   : > { %1111 = vmatmul.f32.vlgmr.msra.gmra.mxu1 %v983_v17  ;;  %1157 = vmatmul.f32.vlgmr.msra.gmra.mxu2 %v983_v17 }
 0x185   : > { %v929_v21 = vadd.f32 %v1719_v4, %v921_v19 }
 0x187   : > { %v980_v23 = vadd.f32 %v972_v20, %v929_v21 }
 0x188   : > { %v754_v6 = vpop.f32.mrf.mxu3  ;;  %v917_v35 = vpop.f32.mrf.mxu1 }
 0x189   : > { %v984_v25 = vmax.f32 %v980_v23, 0.0  ;;  %v822_v26 = vadd.f32 %v821_v22, %v754_v6 }
 0x18b   : > { %v922_v28 = vadd.f32 %v915_v5, %v822_v26  ;;  %1022 = vmatmul.f32.gmra.mxu3 %v984_v25  ;;  %1068 = vmatmul.f32.gmra.mxu0 %v984_v25 }
 0x18c   : > { %1114 = vmatmul.f32.gmra.mxu1 %v984_v25  ;;  %1160 = vmatmul.f32.gmra.mxu2 %v984_v25 }
 0x18d   : > { %v930_v29 = vadd.f32 %v1719_v4, %v922_v28 }
 0x18f   : > { %v981_v30 = vadd.f32 %v975_v27, %v930_v29 }
 0x190   : > { %v756_v32 = vpop.f32.mrf.mxu3 }
 0x191   : > { %v985_v33 = vmax.f32 %v981_v30, 0.0  ;;  %v824_v34 = vadd.f32 %v823_v31, %v756_v32 }
 0x193   : > { %v923_v37 = vadd.f32 %v917_v35, %v824_v34  ;;  %1025 = vmatmul.f32.gmra.mxu3 %v985_v33  ;;  %1071 = vmatmul.f32.gmra.mxu0 %v985_v33 }
 0x194   : > { %1117 = vmatmul.f32.gmra.mxu1 %v985_v33  ;;  %1163 = vmatmul.f32.gmra.mxu2 %v985_v33 }
 0x195   : > { %v931_v39 = vadd.f32 %v1719_v4, %v923_v37 }
 0x197   : > { %v982_v40 = vadd.f32 %v977_v38, %v931_v39 }
 0x199   : > { %v986_v41 = vmax.f32 %v982_v40, 0.0 }
 0x19b   : > { %1028 = vmatmul.f32.gmra.mxu3 %v986_v41  ;;  %1074 = vmatmul.f32.gmra.mxu0 %v986_v41 }
 0x19c   : > { %1120 = vmatmul.f32.gmra.mxu1 %v986_v41  ;;  %1166 = vmatmul.f32.gmra.mxu2 %v986_v41 }
 0x200   : > { %v1066_v42 = vpop.f32.mrf.mxu0 }
 0x201   : > { %v1112_v7 = vpop.f32.mrf.mxu1 }
 0x206   : > { %v1020_v11 = vpop.f32.mrf.mxu3 }
 0x207   : > { %v1158_v43 = vpop.f32.mrf.mxu2  ;;  %v1170_v44 = vmax.f32 %v1020_v11, %v1066_v42 }
 0x208   : > { %v1174_v45 = vmax.f32 %v1112_v7, %v1158_v43  ;;  %v1069_v46 = vpop.f32.mrf.mxu0 }
 0x209   : > { %v1115_v47 = vpop.f32.mrf.mxu1 }
 0x20a   : > { %v1178_v48 = vmax.f32 %v1170_v44, %v1174_v45 }
 0x20c   : > { %v1183_v53 = vrot.slane %v1178_v48, 1 }
 0x20e   : > { %v1023_v49 = vpop.f32.mrf.mxu3  ;;  %v1185_v57 = vmax.f32 %v1178_v48, %v1183_v53 }
 0x20f   : > { %v1171_v50 = vmax.f32 %v1023_v49, %v1069_v46  ;;  %v1161_v51 = vpop.f32.mrf.mxu2 }
 0x210   : > { %v1175_v52 = vmax.f32 %v1115_v47, %v1161_v51  ;;  %v1072_v56 = vpop.f32.mrf.mxu0  ;;  %v1187_v0 = vrot.slane %v1185_v57, 2 }
 0x211   : > { %v1118_v58 = vpop.f32.mrf.mxu1 }
 0x212   : > { %v1179_v54 = vmax.f32 %v1171_v50, %v1175_v52  ;;  %v1189_v4 = vmax.f32 %v1185_v57, %v1187_v0 }
 0x214   : > { %v1191_v55 = vrot.slane %v1179_v54, 1  ;;  %v1215_v18 = vrot.slane %v1189_v4, 3 }
 0x216   : > { %v1193_v59 = vmax.f32 %v1179_v54, %v1191_v55  ;;  %v1026_v60 = vpop.f32.mrf.mxu3  ;;  %v1232_v23 = vsel %vm428_vm0, %v1189_v4, %v1215_v18 }
 0x217   : > { %v1172_v61 = vmax.f32 %v1026_v60, %v1072_v56  ;;  %v1164_v62 = vpop.f32.mrf.mxu2 }
 0x218   : > { %v1176_v63 = vmax.f32 %v1118_v58, %v1164_v62  ;;  %v1195_v1 = vrot.slane %v1193_v59, 2  ;;  %v1075_v10 = vpop.f32.mrf.mxu0 }
 0x219   : > { %v1121_v13 = vpop.f32.mrf.mxu1 }
 0x21a   : > { %v1180_v2 = vmax.f32 %v1172_v61, %v1176_v63  ;;  %v1197_v8 = vmax.f32 %v1193_v59, %v1195_v1 }
 0x21c   : > { %v1199_v3 = vrot.slane %v1180_v2, 1  ;;  %v1218_v19 = vrot.slane %v1197_v8, 6  ;;  %v1220_v24 = vrot.slane %v1197_v8, 1 }
 0x21e   : > { %v1201_v9 = vmax.f32 %v1180_v2, %v1199_v3  ;;  %v1029_v12 = vpop.f32.mrf.mxu3  ;;  %v1234_v5 = vsel %vm1233_vm7, %v1232_v23, %v1218_v19 }
 0x21f   : > { %v1173_v14 = vmax.f32 %v1029_v12, %v1075_v10  ;;  %v1167_v15 = vpop.f32.mrf.mxu2  ;;  %v1236_v27 = vsel %vm1235_vm8, %v1234_v5, %v1220_v24 }
 0x220   : > { %v1203_v16 = vrot.slane %v1201_v9, 2  ;;  %v1177_v17 = vmax.f32 %v1121_v13, %v1167_v15 }
 0x222   : > { %v1205_v20 = vmax.f32 %v1201_v9, %v1203_v16  ;;  %v1181_v21 = vmax.f32 %v1173_v14, %v1177_v17 }
 0x224   : > { %v1207_v22 = vrot.slane %v1181_v21, 1  ;;  %v1223_v6 = vrot.slane %v1205_v20, 4  ;;  %v1225_v28 = vrot.slane %v1205_v20, 7 }
 0x226   : > { %v1209_v25 = vmax.f32 %v1181_v21, %v1207_v22  ;;  %v1238_v29 = vsel %vm1237_vm9, %v1236_v27, %v1223_v6 }
 0x227   : > { %v1240_v33 = vsel %vm1239_vm10, %v1238_v29, %v1225_v28 }
 0x228   : > { %v1211_v26 = vrot.slane %v1209_v25, 2 }
 0x22a   : > { %v1213_v30 = vmax.f32 %v1209_v25, %v1211_v26 }
 0x22c   : > { %v1228_v31 = vrot.slane %v1213_v30, 2  ;;  %v1230_v32 = vrot.slane %v1213_v30, 5 }
 0x22e   : > { %v1242_v34 = vsel %vm1241_vm11, %v1240_v33, %v1228_v31 }
 0x22f   : > { %v1244_v35 = vsel %vm557_vm2, %v1242_v34, %v1230_v32 }
 0x230   : > { %1245 = vst.msk [vmem:[%s418_s23] sm:$0xff] %vm488_vm1, %v1244_v35 }
 0x231 PF: > { %p21_p3 = scmp.ge.s32.totalorder %s2103_s14, 4   ;;  %s2432_s27 = smov %s1968_s28 }
 0x232   : > { %s2433_s28 = smov %s1972_s29  ;;  %s2434_s29 = smov %s2115_s20 }
 0x233   : > { %s2435_s30 = smov %s2103_s14  ;;  %23 = sbr.rel (!%p21_p3) target bundleno = 6 (0x6), region = 123 }
 0x238   :  { %1265 = vsyncpa [#allocation3], 1 }
 0x239   :  { %1267 = vsyncpa [#allocation3 + $0x1], 1 }
 0x23a   :  { %1268 = vsyncpa [#allocation5], 1 }
 0x23b   :  { %1269 = vsyncpa [#allocation8], 1 }
 0x23c   :  { %1270 = vsyncpa [#allocation11], 1 }

// kernel: skip_network_forward.5
= control target key start
LH: loop header
LB: loop body
LE: loop exit
PB: predicated region body
PF: predicated region fallthrough
CT: control target
= control target key end

     0   :  { %s8919_s0 = inlined_call_operand.vmem [shape: f32[2,2,16], index: 0, kind: input, shape index: {}]   ;;  %s8920_s1 = inlined_call_operand.hbm [shape: bf16[16,512], index: 1, kind: input, shape index: {}]   ;;  %s8921_s2 = inlined_call_operand.hbm [shape: f32[1,512], index: 2, kind: input, shape index: {}]   ;;  %s8922_s3 = inlined_call_operand.hbm [shape: bf16[2,512,1024], index: 3, kind: input, shape index: {}]   ;;  %s8923_s4 = inlined_call_operand.hbm [shape: f32[1,1024], index: 4, kind: input, shape index: {}]   ;;  %s8924_s5 = inlined_call_operand.vmem [shape: bf16[1024,8], index: 5, kind: input, shape index: {}]   ;;  %s8925_s6 = inlined_call_operand.hbm [shape: f32[1,8], index: 6, kind: input, shape index: {}]   ;;  %s8926_s7 = inlined_call_operand.hbm [shape: f32[2,1,8], index: 7, kind: output, shape index: {}]  }
   0x1   :  { %8927 = sst [smem:[#allocation16_spill]] %s8921_s2 }
   0x2   :  { %8928 = sst [smem:[#allocation17_spill]] %s8923_s4 }
   0x3   :  { %12 = vsyncpa [#allocation3], 0 }
   0x4   :  { %13 = vsyncpa [#allocation6], 0 }
   0x5   :  { %14 = vsyncpa [#allocation9], 0 }
   0x6   :  { %15 = vsyncpa [#allocation4], 0 }
   0x7   :  { %17 = vsyncpa [#allocation4 + $0x1], 0  ;;  %s8441_s24 = smov 0   ;;  %s8443_s25 = smov 0  }
   0x8   :  { %s8445_s26 = smov 0   ;;  %s8447_s27 = smov 0  }
   0x9 LB: > { %s8462_s28 = sadd.s32 4294967295, %s8390_s27   ;;  %s5151_s29 = sadd.s32 4294967294, %s8390_s27   ;;  %s8390_s27 = sphi %s8447_s27, %s8938_s27   ;;  %s8386_s26 = sphi %s8445_s26, %s8937_s26   ;;  %s8382_s25 = sphi %s8443_s25, %s8936_s25   ;;  %s8378_s24 = sphi %s8441_s24, %s8935_s24  }
   0xa   : > { %s8466_s30 = sadd.s32 1, %s8390_s27   ;;  %s182_s8 = sadd.s32 1, %s8386_s26 }
   0xb   : > { %s179_s9 = ssub.s32 %s8390_s27, %s8466_s30  ;;  %p192_p0 = scmp.ne.s32.totalorder %s8386_s26, %s8382_s25 }
   0xc   : > { %p180_p1 = scmp.eq.s32.totalorder %s179_s9, 0  ;;  %p193_p2 = scmp.eq.s32.totalorder %s8462_s28, 1 }
   0xd   : > { %p198_p3 = scmp.ne.s32.totalorder %s8382_s25, %s8378_s24  ;;  %p199_p4 = scmp.eq.s32.totalorder %s5151_s29, 1 }
   0xe   : > { %s8477_s10 = scalar_select %p180_p1, %s8386_s26, %s182_s8  }
   0xf   : > { %p8479_p5 = por %p193_p2, %p192_p0  ;;  %p8483_p6 = por %p199_p4, %p198_p3 }
  0x10   : > { %p5152_p7 = scmp.ge.s32.totalorder %s8390_s27, 1  ;;  %p206_p8 = scmp.lt.s32.totalorder %s8390_s27, 3 }
  0x11   : > { %p8114_p9 = scmp.eq.s32.totalorder %s8462_s28, 0  ;;  %s8932_s2 = sld [smem:[#allocation16_spill]] }
  0x12   : > { %p8490_p10 = pnand %p5152_p7, %p206_p8  ;;  %s8392_s17 = smov [#allocation5]  }
  0x13   : > { %s234_s18 = sshll.u32 %s8392_s17, 4  ;;  %s8933_s4 = sld [smem:[#allocation17_spill]]  ;;  %s235_s18 = int_to_ptr.vmem [resolvable:$true] %s234_s18 }
  0x14   : > { %p8094_p11 = pneg %p8490_p10  ;;  %s217_s8 = sshll.u32 %s8920_s1, 4  ;;  %s218_s8 = int_to_ptr.hbm [resolvable:$true] %s217_s8 }
  0x15   : > { %s8393_s9 = smov [#allocation8]   ;;  %s8394_s15 = smov [#allocation2]  }
  0x16   : > { %p8504_p12 = pnand %p8114_p9, %p8094_p11  ;;  %s260_s14 = sshll.u32 %s8393_s9, 4  ;;  %s261_s14 = int_to_ptr.vmem [resolvable:$true] %s260_s14 }
  0x17   : > { %s232_s16 = sshll.u32 %s8932_s2, 4  ;;  %s219_s17 = sshll.u32 %s8394_s15, 4  ;;  %s233_s16 = int_to_ptr.hbm [resolvable:$true] %s232_s16  ;;  %s220_s17 = int_to_ptr.vmem [resolvable:$true] %s219_s17 }
  0x18   : > { %8100 = dma.hbm_to_vmem [thread:$0]  (!%p8504_p12), %s233_s16, 64, %s235_s18, [#allocation6]  }
  0x19   : > { %s258_s21 = sshll.u32 %s8933_s4, 4  ;;  %s243_s2 = sshll.u32 %s8922_s3, 4  ;;  %s259_s21 = int_to_ptr.hbm [resolvable:$true] %s258_s21  ;;  %s244_s2 = int_to_ptr.hbm [resolvable:$true] %s243_s2 }
  0x1a   : > { %8106 = dma.hbm_to_vmem [thread:$0]  (!%p8504_p12), %s259_s21, 128, %s261_s14, [#allocation9]  }
  0x1b   : > { %s8395_s4 = smov 256   ;;  %s8396_s23 = smov 16  }
  0x1c   : > { %8097 = dma.hbm_to_vmem [thread:$0]  (!%p8504_p12), %s218_s8, 512, %s220_s17, [#allocation3], %s8395_s4, %s8395_s4, %s8396_s23  }
  0x1d   : > { %s8397_s29 = smov [#allocation7]   ;;  %s8398_s18 = smov 512  }
  0x1e   : > { %s245_s16 = sshll.u32 %s8397_s29, 4  ;;  %s8399_s9 = smov 32   ;;  %s246_s16 = int_to_ptr.vmem [resolvable:$true] %s245_s16 }
  0x1f   : > { %8103 = dma.hbm_to_vmem [thread:$0]  (!%p8504_p12), %s244_s2, 65536, %s246_s16, [#allocation6], %s8398_s18, %s8398_s18, %s8399_s9  }
  0x20   : > { %s273_s15 = sshll.u32 %s8925_s6, 4  ;;  %s8400_s19 = smov [#allocation10]   ;;  %s274_s15 = int_to_ptr.hbm [resolvable:$true] %s273_s15 }
  0x21   : > { %s275_s20 = sshll.u32 %s8400_s19, 4  ;;  %295 = sbr.rel (%p8490_p10) target bundleno = 925 (0x39d), region = 48  ;;  %s276_s20 = int_to_ptr.vmem [resolvable:$true] %s275_s20 }
  0x22   : > { %8109 = dma.hbm_to_vmem [thread:$0]  (!%p8504_p12), %s274_s15, 16, %s276_s20, [#allocation9]  }
  0x26   : > { %8361 = dma.done.wait (%p8114_p9), [#allocation3], 512  }
  0x27   : > { %8363 = vsyncadd (%p8114_p9), [#allocation3], 4294966784 }
  0x28   : > { %8365 = dma.done.wait (%p8114_p9), [#allocation6], 65600  }
  0x29   : > { %8367 = vsyncadd (%p8114_p9), [#allocation6], 4294901696 }
  0x2a   : > { %8369 = dma.done.wait (%p8114_p9), [#allocation9], 144  }
  0x2b   : > { %8371 = vsyncadd (%p8114_p9), [#allocation9], 4294967152  ;;  %p346_p13 = scmp.lt.s32.totalorder %s8462_s28, 1  ;;  %vm387_vm0 = vcmask 130048   ;;  %v5168_v0 = vld [vmem:[#allocation2] sm:$0xf]  ;;  %s5042_s16 = scalar_lea.hbm %s8926_s7, %s8462_s28 }
  0x2c   : > { %v7494_v1 = vld [vmem:[#allocation2 + $0xc] sm:$0xf0]  ;;  %v7492_v2 = vld [vmem:[#allocation2 + $0x4] sm:$0xf]  ;;  %v5170_v4 = vld [vmem:[#allocation2 + $0x10] sm:$0xf0] }
  0x2d   : > { %s347_s2 = scalar_select %p346_p13, %s8462_s28, 1  ;;  %v5169_v3 = vor.u32 %v7494_v1, %v5168_v0  ;;  %v5176_v5 = vld [vmem:[#allocation2 + $0x8] sm:$0xf]  ;;  %v7495_v6 = vld [vmem:[#allocation2 + $0x14] sm:$0xf0]  ;;  %v5173_v7 = vor.u32 %v7492_v2, %v5170_v4  ;;  %vm5031_vm1 = vcmask 57344  }
  0x2e   : > { %v5177_v8 = vor.u32 %v7495_v6, %v5176_v5  ;;  %v7493_v9 = vld [vmem:[#allocation2 + $0xc] sm:$0xf]  ;;  %v5178_v10 = vld [vmem:[#allocation2 + $0x18] sm:$0xf0]  ;;  %v5412_v14 = vld [vmem:[#allocation7 + $0x9c0] sm:$0xf] }
  0x2f   : > { %s5165_s4 = sshll.u32 %s347_s2, 1  ;;  %398 = vmatpush.bf16.msra.mxu0 %v5169_v3  ;;  %v5181_v12 = vor.u32 %v7493_v9, %v5178_v10  ;;  %v7812_v15 = vld [vmem:[#allocation7 + $0x9dc] sm:$0xf0]  ;;  %411 = vmatpush.bf16.msra.mxu1 %v5173_v7  ;;  %s344_s17 = sand.u32 1, %s8382_s25  }
  0x30   : > { %s349_s8 = scalar_lea.vmem %s8919_s0, %s5165_s4  ;;  %v5668_v16 = vld [vmem:[#allocation7 + $0xbc0] sm:$0xf]  ;;  %424 = vmatpush.bf16.msra.mxu2 %v5177_v8  ;;  %v5413_v17 = vor.u32 %v7812_v15, %v5412_v14  ;;  %s345_s18 = scalar_lea.vmem [#allocation11], %s344_s17 }
  0x31   : > { %v351_v11 = vld [vmem:[%s349_s8] sm:$0x3]  ;;  %v7876_v18 = vld [vmem:[#allocation7 + $0xbdc] sm:$0xf0]  ;;  %437 = vmatpush.bf16.msra.mxu3 %v5181_v12  ;;  %s5044_s9 = sshll.u32 %s345_s18, 4  ;;  %s5046_s21 = sshll.u32 %s5042_s16, 4  ;;  %s5045_s9 = int_to_ptr.vmem [resolvable:$true] %s5044_s9  ;;  %s5047_s21 = int_to_ptr.hbm [resolvable:$true] %s5046_s21 }
  0x32   : > { %v352_v13 = vpack.c.bf16 %v351_v11, %v351_v11  ;;  %v5380_v19 = vld [vmem:[#allocation7 + $0x980] sm:$0xf]  ;;  %v5669_v21 = vor.u32 %v7876_v18, %v5668_v16  ;;  %s5034_s14 = scalar_lea.sflag [#allocation4], %s344_s17  ;;  %s8330_s15 = sshra.s32 %s5047_s21, 4  ;;  %s8331_s15 = int_to_ptr.hbm [resolvable:$true] %s8330_s15 }
  0x33   : > { %v7804_v20 = vld [vmem:[#allocation7 + $0x99c] sm:$0xf0]  ;;  %2260 = vmatpush.bf16.msrb.mxu0 %v5413_v17  ;;  %s8332_s19 = scalar_lea.hbm %s8331_s15, 1  ;;  %s8336_s2 = scalar_lea.hbm %s8926_s7, 2 }
  0x34   : > { %v5636_v22 = vld [vmem:[#allocation7 + $0xb80] sm:$0xf]  ;;  %5182 = vmatmul.msk.bf16.vlgmr.msra.gmra.mxu0 %vm387_vm0, %v352_v13  ;;  %5183 = vmatmul.msk.bf16.vlgmr.msra.gmra.mxu1 %vm387_vm0, %v352_v13  ;;  %v5381_v30 = vor.u32 %v7804_v20, %v5380_v19  ;;  %p8333_p0 = scmp.ne.s32.totalorder %s8331_s15, %s8332_s19  ;;  %p8337_p3 = scmp.lt.s32.totalorder %s8331_s15, %s8926_s7 }
  0x35   : > { %v7868_v23 = vld [vmem:[#allocation7 + $0xb9c] sm:$0xf0]  ;;  %5184 = vmatmul.msk.bf16.vlgmr.msra.gmra.mxu2 %vm387_vm0, %v352_v13  ;;  %5185 = vmatmul.msk.bf16.vlgmr.msra.gmra.mxu3 %vm387_vm0, %v352_v13  ;;  %p8338_p4 = scmp.lt.s32.totalorder %s8336_s2, %s8332_s19 }
  0x36   : > { %v5924_v24 = vld [vmem:[#allocation7 + $0xdc0] sm:$0xf]  ;;  %2273 = vmatpush.bf16.msrb.mxu1 %v5669_v21  ;;  %v5637_v34 = vor.u32 %v7868_v23, %v5636_v22  ;;  %p8334_p1 = pnand %p8333_p0, %p8479_p5 }
  0x37   : > { %v7940_v25 = vld [vmem:[#allocation7 + $0xddc] sm:$0xf0]  ;;  %2261 = vmatpush.bf16.msrb.mxu0 %v5381_v30  ;;  %p8339_p7 = por %p8338_p4, %p8337_p3 }
  0x38   : > { %v6180_v26 = vld [vmem:[#allocation7 + $0xfc0] sm:$0xf]  ;;  %v5925_v28 = vor.u32 %v7940_v25, %v5924_v24  ;;  %p8335_p2 = pneg %p8334_p1 }
  0x39   : > { %v8004_v27 = vld [vmem:[#allocation7 + $0xfdc] sm:$0xf0] }
  0x3a   : > { %v6181_v29 = vor.u32 %v8004_v27, %v6180_v26  ;;  %v5348_v31 = vld [vmem:[#allocation7 + $0x940] sm:$0xf]  ;;  %2286 = vmatpush.bf16.msrb.mxu2 %v5925_v28  ;;  %2274 = vmatpush.bf16.msrb.mxu1 %v5637_v34  ;;  %p8340_p8 = pnand %p8339_p7, %p8335_p2 }
  0x3b   : > { %v5892_v32 = vld [vmem:[#allocation7 + $0xd80] sm:$0xf] }
  0x3c   : > { %v7932_v33 = vld [vmem:[#allocation7 + $0xd9c] sm:$0xf0]  ;;  %2299 = vmatpush.bf16.msrb.mxu3 %v6181_v29 }
  0x3d   : > { %v7796_v35 = vld [vmem:[#allocation7 + $0x95c] sm:$0xf0]  ;;  %v5893_v36 = vor.u32 %v7932_v33, %v5892_v32 }
  0x3e   : > { %v6148_v37 = vld [vmem:[#allocation7 + $0xf80] sm:$0xf]  ;;  %v5349_v45 = vor.u32 %v7796_v35, %v5348_v31 }
  0x3f   : > { %v7996_v38 = vld [vmem:[#allocation7 + $0xf9c] sm:$0xf0]  ;;  %2287 = vmatpush.bf16.msrb.mxu2 %v5893_v36  ;;  %v7808_v36 = vld [vmem:[#allocation7 + $0x9c4] sm:$0xf] }
  0x40   : > { %v5604_v39 = vld [vmem:[#allocation7 + $0xb40] sm:$0xf]  ;;  %v6149_v41 = vor.u32 %v7996_v38, %v6148_v37  ;;  %2262 = vmatpush.bf16.msrb.mxu0 %v5349_v45  ;;  %v5414_v38 = vld [vmem:[#allocation7 + $0x9e0] sm:$0xf0] }
  0x41   : > { %v7860_v40 = vld [vmem:[#allocation7 + $0xb5c] sm:$0xf0] }
  0x42   : > { %v5860_v42 = vld [vmem:[#allocation7 + $0xd40] sm:$0xf]  ;;  %v5605_v47 = vor.u32 %v7860_v40, %v5604_v39  ;;  %2300 = vmatpush.bf16.msrb.mxu3 %v6149_v41  ;;  %v7872_v39 = vld [vmem:[#allocation7 + $0xbc4] sm:$0xf] }
  0x43   : > { %v7924_v43 = vld [vmem:[#allocation7 + $0xd5c] sm:$0xf0]  ;;  %v5670_v40 = vld [vmem:[#allocation7 + $0xbe0] sm:$0xf0] }
  0x44   : > { %v6116_v44 = vld [vmem:[#allocation7 + $0xf40] sm:$0xf]  ;;  %v5861_v51 = vor.u32 %v7924_v43, %v5860_v42  ;;  %2275 = vmatpush.bf16.msrb.mxu1 %v5605_v47  ;;  %v7936_v47 = vld [vmem:[#allocation7 + $0xdc4] sm:$0xf] }
  0x45   : > { %v7988_v46 = vld [vmem:[#allocation7 + $0xf5c] sm:$0xf0] }
  0x46   : > { %v5316_v48 = vld [vmem:[#allocation7 + $0x900] sm:$0xf]  ;;  %v6117_v53 = vor.u32 %v7988_v46, %v6116_v44  ;;  %2288 = vmatpush.bf16.msrb.mxu2 %v5861_v51  ;;  %v8000_v51 = vld [vmem:[#allocation7 + $0xfc4] sm:$0xf] }
  0x47   : > { %v7788_v49 = vld [vmem:[#allocation7 + $0x91c] sm:$0xf0] }
  0x48   : > { %v5572_v50 = vld [vmem:[#allocation7 + $0xb00] sm:$0xf]  ;;  %v5317_v58 = vor.u32 %v7788_v49, %v5316_v48  ;;  %2301 = vmatpush.bf16.msrb.mxu3 %v6117_v53  ;;  %v5926_v48 = vld [vmem:[#allocation7 + $0xde0] sm:$0xf0]  ;;  %v5673_v53 = vor.u32 %v7872_v39, %v5670_v40 }
  0x49   : > { %v7852_v52 = vld [vmem:[#allocation7 + $0xb1c] sm:$0xf0]  ;;  %v5510_v40 = vld [vmem:[#allocation7 + $0xaa0] sm:$0xf0] }
  0x4a   : > { %v5828_v54 = vld [vmem:[#allocation7 + $0xd00] sm:$0xf]  ;;  %v5573_v59 = vor.u32 %v7852_v52, %v5572_v50  ;;  %2263 = vmatpush.bf16.msrb.mxu0 %v5317_v58  ;;  %v5417_v50 = vor.u32 %v7808_v36, %v5414_v38  ;;  %v6182_v52 = vld [vmem:[#allocation7 + $0xfe0] sm:$0xf0] }
  0x4b   : > { %v7916_v55 = vld [vmem:[#allocation7 + $0xd1c] sm:$0xf0]  ;;  %v5638_v58 = vld [vmem:[#allocation7 + $0xba0] sm:$0xf0] }
  0x4c   : > { %v6084_v56 = vld [vmem:[#allocation7 + $0xf00] sm:$0xf]  ;;  %v5829_v63 = vor.u32 %v7916_v55, %v5828_v54  ;;  %2276 = vmatpush.bf16.msrb.mxu1 %v5573_v59  ;;  %v7800_v54 = vld [vmem:[#allocation7 + $0x984] sm:$0xf] }
  0x4d   : > { %v7980_v57 = vld [vmem:[#allocation7 + $0xf1c] sm:$0xf0]  ;;  %v5382_v55 = vld [vmem:[#allocation7 + $0x9a0] sm:$0xf0] }
  0x4e   : > { %v5284_v60 = vld [vmem:[#allocation7 + $0x8c0] sm:$0xf]  ;;  %v6085_v1 = vor.u32 %v7980_v57, %v6084_v56  ;;  %2289 = vmatpush.bf16.msrb.mxu2 %v5829_v63  ;;  %v7864_v57 = vld [vmem:[#allocation7 + $0xb84] sm:$0xf] }
  0x4f   : > { %v7780_v61 = vld [vmem:[#allocation7 + $0x8dc] sm:$0xf0]  ;;  %v5894_v63 = vld [vmem:[#allocation7 + $0xda0] sm:$0xf0] }
  0x50   : > { %v5540_v62 = vld [vmem:[#allocation7 + $0xac0] sm:$0xf]  ;;  %v5285_v6 = vor.u32 %v7780_v61, %v5284_v60  ;;  %2302 = vmatpush.bf16.msrb.mxu3 %v6085_v1  ;;  %v5929_v60 = vor.u32 %v7936_v47, %v5926_v48  ;;  %v6185_v61 = vor.u32 %v8000_v51, %v6182_v52  ;;  %v7992_v1 = vld [vmem:[#allocation7 + $0xf84] sm:$0xf] }
  0x51   : > { %v7844_v0 = vld [vmem:[#allocation7 + $0xadc] sm:$0xf0]  ;;  %v7768_v36 = vld [vmem:[#allocation7 + $0x884] sm:$0xf] }
  0x52   : > { %v5796_v2 = vld [vmem:[#allocation7 + $0xcc0] sm:$0xf]  ;;  %v5541_v7 = vor.u32 %v7844_v0, %v5540_v62  ;;  %2264 = vmatpush.bf16.msrb.mxu0 %v5285_v6  ;;  %v7928_v62 = vld [vmem:[#allocation7 + $0xd84] sm:$0xf]  ;;  %v5385_v0 = vor.u32 %v7800_v54, %v5382_v55 }
  0x53   : > { %v7908_v3 = vld [vmem:[#allocation7 + $0xcdc] sm:$0xf0]  ;;  %v7856_v6 = vld [vmem:[#allocation7 + $0xb44] sm:$0xf] }
  0x54   : > { %v6052_v4 = vld [vmem:[#allocation7 + $0xec0] sm:$0xf]  ;;  %v5797_v11 = vor.u32 %v7908_v3, %v5796_v2  ;;  %2277 = vmatpush.bf16.msrb.mxu1 %v5541_v7  ;;  %v6150_v2 = vld [vmem:[#allocation7 + $0xfa0] sm:$0xf0]  ;;  %v5641_v3 = vor.u32 %v7864_v57, %v5638_v58 }
  0x55   : > { %v7972_v5 = vld [vmem:[#allocation7 + $0xedc] sm:$0xf0]  ;;  %v5606_v7 = vld [vmem:[#allocation7 + $0xb60] sm:$0xf0] }
  0x56   : > { %v5252_v8 = vld [vmem:[#allocation7 + $0x880] sm:$0xf]  ;;  %v6053_v13 = vor.u32 %v7972_v5, %v6052_v4  ;;  %2290 = vmatpush.bf16.msrb.mxu2 %v5797_v11  ;;  %v7792_v4 = vld [vmem:[#allocation7 + $0x944] sm:$0xf] }
  0x57   : > { %v7772_v9 = vld [vmem:[#allocation7 + $0x89c] sm:$0xf0]  ;;  %v5350_v5 = vld [vmem:[#allocation7 + $0x960] sm:$0xf0] }
  0x58   : > { %v5508_v10 = vld [vmem:[#allocation7 + $0xa80] sm:$0xf]  ;;  %v5253_v18 = vor.u32 %v7772_v9, %v5252_v8  ;;  %2303 = vmatpush.bf16.msrb.mxu3 %v6053_v13  ;;  %v5897_v8 = vor.u32 %v7928_v62, %v5894_v63  ;;  %v6153_v9 = vor.u32 %v7992_v1, %v6150_v2  ;;  %v5862_v11 = vld [vmem:[#allocation7 + $0xd60] sm:$0xf0] }
  0x59   : > { %v7836_v12 = vld [vmem:[#allocation7 + $0xa9c] sm:$0xf0]  ;;  %v7984_v13 = vld [vmem:[#allocation7 + $0xf44] sm:$0xf] }
  0x5a   : > { %v5764_v14 = vld [vmem:[#allocation7 + $0xc80] sm:$0xf]  ;;  %v5509_v19 = vor.u32 %v7836_v12, %v5508_v10  ;;  %2265 = vmatpush.bf16.msrb.mxu0 %v5253_v18  ;;  %v7920_v10 = vld [vmem:[#allocation7 + $0xd44] sm:$0xf]  ;;  %v5353_v12 = vor.u32 %v7792_v4, %v5350_v5 }
  0x5b   : > { %v7900_v15 = vld [vmem:[#allocation7 + $0xc9c] sm:$0xf0]  ;;  %v7848_v18 = vld [vmem:[#allocation7 + $0xb04] sm:$0xf] }
  0x5c   : > { %v6020_v16 = vld [vmem:[#allocation7 + $0xe80] sm:$0xf]  ;;  %v5765_v23 = vor.u32 %v7900_v15, %v5764_v14  ;;  %2278 = vmatpush.bf16.msrb.mxu1 %v5509_v19  ;;  %v6118_v14 = vld [vmem:[#allocation7 + $0xf60] sm:$0xf0]  ;;  %v5609_v15 = vor.u32 %v7856_v6, %v5606_v7 }
  0x5d   : > { %v7964_v17 = vld [vmem:[#allocation7 + $0xe9c] sm:$0xf0]  ;;  %v5574_v19 = vld [vmem:[#allocation7 + $0xb20] sm:$0xf0] }
  0x5e   : > { %v5220_v20 = vld [vmem:[#allocation7 + $0x840] sm:$0xf]  ;;  %v6021_v25 = vor.u32 %v7964_v17, %v6020_v16  ;;  %2291 = vmatpush.bf16.msrb.mxu2 %v5765_v23  ;;  %v7784_v16 = vld [vmem:[#allocation7 + $0x904] sm:$0xf] }
  0x5f   : > { %v7764_v21 = vld [vmem:[#allocation7 + $0x85c] sm:$0xf0]  ;;  %v5318_v17 = vld [vmem:[#allocation7 + $0x920] sm:$0xf0] }
  0x60   : > { %v5476_v22 = vld [vmem:[#allocation7 + $0xa40] sm:$0xf]  ;;  %v5221_v30 = vor.u32 %v7764_v21, %v5220_v20  ;;  %2304 = vmatpush.bf16.msrb.mxu3 %v6021_v25  ;;  %v5865_v20 = vor.u32 %v7920_v10, %v5862_v11  ;;  %v6121_v21 = vor.u32 %v7984_v13, %v6118_v14  ;;  %v5830_v23 = vld [vmem:[#allocation7 + $0xd20] sm:$0xf0]  ;;  %v357_v14 = vld [vmem:[#allocation5] sm:$0xf] }
  0x61   : > { %v7828_v24 = vld [vmem:[#allocation7 + $0xa5c] sm:$0xf0]  ;;  %v7976_v25 = vld [vmem:[#allocation7 + $0xf04] sm:$0xf] }
  0x62   : > { %v5732_v26 = vld [vmem:[#allocation7 + $0xc40] sm:$0xf]  ;;  %v5477_v33 = vor.u32 %v7828_v24, %v5476_v22  ;;  %2266 = vmatpush.bf16.msrb.mxu0 %v5221_v30  ;;  %v7912_v22 = vld [vmem:[#allocation7 + $0xd04] sm:$0xf]  ;;  %v5321_v24 = vor.u32 %v7784_v16, %v5318_v17  ;;  %v360_v16 = vperm.slane %v357_v14, 1 }
  0x63   : > { %v7892_v27 = vld [vmem:[#allocation7 + $0xc5c] sm:$0xf0]  ;;  %v7840_v30 = vld [vmem:[#allocation7 + $0xac4] sm:$0xf] }
  0x64   : > { %v5988_v28 = vld [vmem:[#allocation7 + $0xe40] sm:$0xf]  ;;  %v5733_v37 = vor.u32 %v7892_v27, %v5732_v26  ;;  %2279 = vmatpush.bf16.msrb.mxu1 %v5477_v33  ;;  %v6086_v26 = vld [vmem:[#allocation7 + $0xf20] sm:$0xf0]  ;;  %v5577_v27 = vor.u32 %v7848_v18, %v5574_v19 }
  0x65   : > { %v7956_v29 = vld [vmem:[#allocation7 + $0xe5c] sm:$0xf0]  ;;  %v6089_v33 = vor.u32 %v7976_v25, %v6086_v26  ;;  %v7832_v38 = vld [vmem:[#allocation7 + $0xa84] sm:$0xf]  ;;  %v361_v25 = vperm.slane %v357_v14, 2 }
  0x66   : > { %v5188_v31 = vld [vmem:[#allocation7 + $0x800] sm:$0xf]  ;;  %v5989_v41 = vor.u32 %v7956_v29, %v5988_v28  ;;  %2292 = vmatpush.bf16.msrb.mxu2 %v5733_v37  ;;  %v7776_v28 = vld [vmem:[#allocation7 + $0x8c4] sm:$0xf]  ;;  %v5676_v26 = vld [vmem:[#allocation7 + $0xbc8] sm:$0xf] }
  0x67   : > { %v7756_v32 = vld [vmem:[#allocation7 + $0x81c] sm:$0xf0]  ;;  %v5286_v29 = vld [vmem:[#allocation7 + $0x8e0] sm:$0xf0] }
  0x68   : > { %v5444_v34 = vld [vmem:[#allocation7 + $0xa00] sm:$0xf]  ;;  %v5189_v45 = vor.u32 %v7756_v32, %v5188_v31  ;;  %2305 = vmatpush.bf16.msrb.mxu3 %v5989_v41  ;;  %v5542_v31 = vld [vmem:[#allocation7 + $0xae0] sm:$0xf0]  ;;  %v5833_v32 = vor.u32 %v7912_v22, %v5830_v23  ;;  %v5513_v41 = vor.u32 %v7832_v38, %v5510_v40  ;;  %v5420_v22 = vld [vmem:[#allocation7 + $0x9c8] sm:$0xf] }
  0x69   : > { %v7820_v35 = vld [vmem:[#allocation7 + $0xa1c] sm:$0xf0]  ;;  %v5254_v37 = vld [vmem:[#allocation7 + $0x8a0] sm:$0xf0]  ;;  %v7813_v23 = vld [vmem:[#allocation7 + $0x9e4] sm:$0xf0] }
  0x6a   : > { %v5700_v42 = vld [vmem:[#allocation7 + $0xc00] sm:$0xf]  ;;  %v5445_v49 = vor.u32 %v7820_v35, %v5444_v34  ;;  %2267 = vmatpush.bf16.msrb.mxu0 %v5189_v45  ;;  %v5289_v34 = vor.u32 %v7776_v28, %v5286_v29  ;;  %v5545_v35 = vor.u32 %v7840_v30, %v5542_v31  ;;  %v5257_v39 = vor.u32 %v7768_v36, %v5254_v37  ;;  %v7968_v45 = vld [vmem:[#allocation7 + $0xec4] sm:$0xf]  ;;  %v7805_v36 = vld [vmem:[#allocation7 + $0x9a4] sm:$0xf0] }
  0x6b   : > { %v7884_v43 = vld [vmem:[#allocation7 + $0xc1c] sm:$0xf0]  ;;  %v7760_v48 = vld [vmem:[#allocation7 + $0x844] sm:$0xf]  ;;  %v362_v29 = vperm.slane %v357_v14, 3  ;;  %v5421_v31 = vor.u32 %v7813_v23, %v5420_v22 }
  0x6c   : > { %v5956_v44 = vld [vmem:[#allocation7 + $0xe00] sm:$0xf]  ;;  %v5701_v56 = vor.u32 %v7884_v43, %v5700_v42  ;;  %2280 = vmatpush.bf16.msrb.mxu1 %v5445_v49  ;;  %v7904_v42 = vld [vmem:[#allocation7 + $0xcc4] sm:$0xf]  ;;  %v7845_v22 = vld [vmem:[#allocation7 + $0xae4] sm:$0xf0] }
  0x6d   : > { %v7948_v46 = vld [vmem:[#allocation7 + $0xe1c] sm:$0xf0]  ;;  %v5798_v43 = vld [vmem:[#allocation7 + $0xce0] sm:$0xf0] }
  0x6e   : > { %v5957_v59 = vor.u32 %v7948_v46, %v5956_v44  ;;  %2312 = vmatpush.bf16.msra.mxu0 %v5417_v50  ;;  %2293 = vmatpush.bf16.msrb.mxu2 %v5701_v56  ;;  %v5801_v44 = vor.u32 %v7904_v42, %v5798_v43  ;;  %v6054_v46 = vld [vmem:[#allocation7 + $0xee0] sm:$0xf0]  ;;  %v7869_v42 = vld [vmem:[#allocation7 + $0xba4] sm:$0xf0] }
  0x6f   : > { %v6057_v47 = vor.u32 %v7968_v45, %v6054_v46  ;;  %v5222_v49 = vld [vmem:[#allocation7 + $0x860] sm:$0xf0]  ;;  %v5932_v45 = vld [vmem:[#allocation7 + $0xdc8] sm:$0xf] }
  0x70   : > { %2325 = vmatpush.bf16.msra.mxu1 %v5673_v53  ;;  %2306 = vmatpush.bf16.msrb.mxu3 %v5957_v59  ;;  %v7824_v50 = vld [vmem:[#allocation7 + $0xa44] sm:$0xf]  ;;  %v5225_v51 = vor.u32 %v7760_v48, %v5222_v49  ;;  %v7941_v46 = vld [vmem:[#allocation7 + $0xde4] sm:$0xf0] }
  0x71   : > { %v5478_v52 = vld [vmem:[#allocation7 + $0xa60] sm:$0xf0]  ;;  %v6188_v49 = vld [vmem:[#allocation7 + $0xfc8] sm:$0xf] }
  0x72   : > { %2338 = vmatpush.bf16.msra.mxu2 %v5929_v60  ;;  %2313 = vmatpush.bf16.msra.mxu0 %v5385_v0  ;;  %v5481_v53 = vor.u32 %v7824_v50, %v5478_v52  ;;  %v7896_v54 = vld [vmem:[#allocation7 + $0xc84] sm:$0xf]  ;;  %v8005_v50 = vld [vmem:[#allocation7 + $0xfe4] sm:$0xf0] }
  0x73   : > { %v5766_v55 = vld [vmem:[#allocation7 + $0xca0] sm:$0xf0] }
  0x74   : > { %2351 = vmatpush.bf16.msra.mxu3 %v6185_v61  ;;  %2326 = vmatpush.bf16.msra.mxu1 %v5641_v3  ;;  %v7960_v56 = vld [vmem:[#allocation7 + $0xe84] sm:$0xf]  ;;  %v5769_v57 = vor.u32 %v7896_v54, %v5766_v55  ;;  %v7797_v54 = vld [vmem:[#allocation7 + $0x964] sm:$0xf0] }
  0x75   : > { %v6022_v58 = vld [vmem:[#allocation7 + $0xea0] sm:$0xf0] }
  0x76   : > { %2339 = vmatpush.bf16.msra.mxu2 %v5897_v8  ;;  %2314 = vmatpush.bf16.msra.mxu0 %v5353_v12  ;;  %v6025_v59 = vor.u32 %v7960_v56, %v6022_v58  ;;  %v7752_v60 = vld [vmem:[#allocation7 + $0x804] sm:$0xf]  ;;  %v5612_v56 = vld [vmem:[#allocation7 + $0xb48] sm:$0xf] }
  0x77   : > { %v5190_v61 = vld [vmem:[#allocation7 + $0x820] sm:$0xf0] }
  0x78   : > { %2352 = vmatpush.bf16.msra.mxu3 %v6153_v9  ;;  %2327 = vmatpush.bf16.msra.mxu1 %v5609_v15  ;;  %v5193_v62 = vor.u32 %v7752_v60, %v5190_v61  ;;  %v7816_v63 = vld [vmem:[#allocation7 + $0xa04] sm:$0xf]  ;;  %v359_v15 = vperm.slane %v357_v14, 0  ;;  %v5900_v60 = vld [vmem:[#allocation7 + $0xd88] sm:$0xf] }
  0x79   : > { %v5446_v0 = vld [vmem:[#allocation7 + $0xa20] sm:$0xf0]  ;;  %v7933_v61 = vld [vmem:[#allocation7 + $0xda4] sm:$0xf0] }
  0x7a   : > { %2340 = vmatpush.bf16.msra.mxu2 %v5865_v20  ;;  %2315 = vmatpush.bf16.msra.mxu0 %v5321_v24  ;;  %v5449_v1 = vor.u32 %v7816_v63, %v5446_v0  ;;  %v7888_v2 = vld [vmem:[#allocation7 + $0xc44] sm:$0xf]  ;;  %v6189_v63 = vor.u32 %v8005_v50, %v6188_v49  ;;  %v5868_v14 = vld [vmem:[#allocation7 + $0xd48] sm:$0xf] }
  0x7b   : > { %v5734_v3 = vld [vmem:[#allocation7 + $0xc60] sm:$0xf0]  ;;  %v5484_v49 = vld [vmem:[#allocation7 + $0xa48] sm:$0xf] }
  0x7c   : > { %2353 = vmatpush.bf16.msra.mxu3 %v6121_v21  ;;  %2328 = vmatpush.bf16.msra.mxu1 %v5577_v27  ;;  %v7952_v4 = vld [vmem:[#allocation7 + $0xe44] sm:$0xf]  ;;  %v5737_v5 = vor.u32 %v7888_v2, %v5734_v3  ;;  %v7877_v27 = vld [vmem:[#allocation7 + $0xbe4] sm:$0xf0] }
  0x7d   : > { %v5990_v6 = vld [vmem:[#allocation7 + $0xe60] sm:$0xf0]  ;;  %v7997_v2 = vld [vmem:[#allocation7 + $0xfa4] sm:$0xf0] }
  0x7e   : > { %2341 = vmatpush.bf16.msra.mxu2 %v5833_v32  ;;  %2316 = vmatpush.bf16.msra.mxu0 %v5289_v34  ;;  %v5993_v7 = vor.u32 %v7952_v4, %v5990_v6  ;;  %v7880_v8 = vld [vmem:[#allocation7 + $0xc04] sm:$0xf]  ;;  %v5677_v34 = vor.u32 %v7877_v27, %v5676_v26  ;;  %v5324_v6 = vld [vmem:[#allocation7 + $0x908] sm:$0xf] }
  0x7f   : > { %v5702_v9 = vld [vmem:[#allocation7 + $0xc20] sm:$0xf0]  ;;  %v7917_v26 = vld [vmem:[#allocation7 + $0xd24] sm:$0xf0] }
  0x80   : > { %2354 = vmatpush.bf16.msra.mxu3 %v6089_v33  ;;  %2329 = vmatpush.bf16.msra.mxu1 %v5545_v35  ;;  %v5705_v10 = vor.u32 %v7880_v8, %v5702_v9  ;;  %v7944_v11 = vld [vmem:[#allocation7 + $0xe04] sm:$0xf]  ;;  %v5388_v35 = vld [vmem:[#allocation7 + $0x988] sm:$0xf] }
  0x81   : > { %v5958_v12 = vld [vmem:[#allocation7 + $0xe20] sm:$0xf0]  ;;  %v5389_v48 = vor.u32 %v7805_v36, %v5388_v35  ;;  %v5580_v9 = vld [vmem:[#allocation7 + $0xb08] sm:$0xf] }
  0x82   : > { %2317 = vmatpush.bf16.msra.mxu0 %v5257_v39  ;;  %2342 = vmatpush.bf16.msra.mxu2 %v5801_v44  ;;  %v5961_v13 = vor.u32 %v7944_v11, %v5958_v12  ;;  %v5901_v11 = vor.u32 %v7933_v61, %v5900_v60  ;;  %v7773_v35 = vld [vmem:[#allocation7 + $0x8a4] sm:$0xf0] }
  0x83   : > { %v5516_v36 = vld [vmem:[#allocation7 + $0xa88] sm:$0xf] }
  0x84   : > { %2330 = vmatpush.bf16.msra.mxu1 %v5513_v41  ;;  %2355 = vmatpush.bf16.msra.mxu3 %v6057_v47  ;;  %v5644_v41 = vld [vmem:[#allocation7 + $0xb88] sm:$0xf] }
  0x85   : > { %v5645_v52 = vor.u32 %v7869_v42, %v5644_v41  ;;  %v5804_v41 = vld [vmem:[#allocation7 + $0xcc8] sm:$0xf] }
  0x86   : > { %2318 = vmatpush.bf16.msra.mxu0 %v5225_v51  ;;  %2343 = vmatpush.bf16.msra.mxu2 %v5769_v57  ;;  %v7861_v57 = vld [vmem:[#allocation7 + $0xb64] sm:$0xf0] }
  0x87   : > { %v7909_v42 = vld [vmem:[#allocation7 + $0xce4] sm:$0xf0] }
  0x88   : > { %2331 = vmatpush.bf16.msra.mxu1 %v5481_v53  ;;  %2356 = vmatpush.bf16.msra.mxu3 %v6025_v59  ;;  %v5356_v53 = vld [vmem:[#allocation7 + $0x948] sm:$0xf]  ;;  %v5933_v59 = vor.u32 %v7941_v46, %v5932_v45 }
  0x89   : > { %v5357_v0 = vor.u32 %v7797_v54, %v5356_v53  ;;  %v6060_v45 = vld [vmem:[#allocation7 + $0xec8] sm:$0xf] }
  0x8a   : > { %2319 = vmatpush.bf16.msra.mxu0 %v5193_v62  ;;  %2344 = vmatpush.bf16.msra.mxu2 %v5737_v5  ;;  %v5613_v5 = vor.u32 %v7861_v57, %v5612_v56  ;;  %v7973_v46 = vld [vmem:[#allocation7 + $0xee4] sm:$0xf0] }
  0x8b   : > { %v7829_v50 = vld [vmem:[#allocation7 + $0xa64] sm:$0xf0] }
  0x8c   : > { %2332 = vmatpush.bf16.msra.mxu1 %v5449_v1  ;;  %2357 = vmatpush.bf16.msra.mxu3 %v5993_v7  ;;  %v6156_v1 = vld [vmem:[#allocation7 + $0xf88] sm:$0xf] }
  0x8d   : > { %v7789_v7 = vld [vmem:[#allocation7 + $0x924] sm:$0xf0]  ;;  %v6157_v12 = vor.u32 %v7997_v2, %v6156_v1  ;;  %v7809_v2 = vld [vmem:[#allocation7 + $0x9cc] sm:$0xf] }
  0x8e   : > { %2345 = vmatpush.bf16.msra.mxu2 %v5705_v10  ;;  %v7853_v10 = vld [vmem:[#allocation7 + $0xb24] sm:$0xf0] }
  0x8f   : > { %v5772_v53 = vld [vmem:[#allocation7 + $0xc88] sm:$0xf] }
  0x90   : > { %2358 = vmatpush.bf16.msra.mxu3 %v5961_v13  ;;  %v5325_v13 = vor.u32 %v7789_v7, %v5324_v6  ;;  %v7901_v54 = vld [vmem:[#allocation7 + $0xca4] sm:$0xf0]  ;;  %v7873_v6 = vld [vmem:[#allocation7 + $0xbcc] sm:$0xf] }
  0x91   : > { %v6028_v56 = vld [vmem:[#allocation7 + $0xe88] sm:$0xf]  ;;  %v5678_v7 = vld [vmem:[#allocation7 + $0xbe8] sm:$0xf0] }
  0x92   : > { %v7965_v60 = vld [vmem:[#allocation7 + $0xea4] sm:$0xf0] }
  0x93   : > { %v5196_v61 = vld [vmem:[#allocation7 + $0x808] sm:$0xf] }
  0x94   : > { %v7821_v1 = vld [vmem:[#allocation7 + $0xa24] sm:$0xf0] }
  0xb1   : > { %v400_v17 = vpop.f32.mrf.mxu0  ;;  %v413_v19 = vpop.f32.mrf.mxu1 }
  0xb2   : > { %v401_v18 = vadd.f32 %v400_v17, %v359_v15  ;;  %v414_v20 = vadd.f32 %v413_v19, %v360_v16  ;;  %v7925_v15 = vld [vmem:[#allocation7 + $0xd64] sm:$0xf0]  ;;  %v5581_v16 = vor.u32 %v7853_v10, %v5580_v9 }
  0xb3   : > { %v6124_v17 = vld [vmem:[#allocation7 + $0xf48] sm:$0xf]  ;;  %v5869_v23 = vor.u32 %v7925_v15, %v5868_v14 }
  0xb4   : > { %v443_v21 = vmax.f32 %v401_v18, 0.0  ;;  %v444_v24 = vmax.f32 %v414_v20, 0.0  ;;  %v7989_v18 = vld [vmem:[#allocation7 + $0xf64] sm:$0xf0] }
  0xb5   : > { %v5292_v19 = vld [vmem:[#allocation7 + $0x8c8] sm:$0xf] }
  0xb6   : > { %v8550_v28 = vpack.c.bf16 %v443_v21, %v443_v21  ;;  %v8552_v30 = vpack.c.bf16 %v444_v24, %v444_v24  ;;  %v7781_v20 = vld [vmem:[#allocation7 + $0x8e4] sm:$0xf0]  ;;  %v6125_v24 = vor.u32 %v7989_v18, %v6124_v17  ;;  %v7801_v17 = vld [vmem:[#allocation7 + $0x98c] sm:$0xf] }
  0xb7   : > { %v5548_v21 = vld [vmem:[#allocation7 + $0xac8] sm:$0xf]  ;;  %v5293_v27 = vor.u32 %v7781_v20, %v5292_v19  ;;  %v5390_v19 = vld [vmem:[#allocation7 + $0x9a8] sm:$0xf0] }
  0xb8   : > { %v426_v32 = vpop.f32.mrf.mxu2  ;;  %v8555_v33 = vshrl.u32 %v8550_v28, 16  ;;  %v439_v38 = vpop.f32.mrf.mxu3  ;;  %v8558_v40 = vshrl.u32 %v8552_v30, 16  ;;  %v5740_v9 = vld [vmem:[#allocation7 + $0xc48] sm:$0xf]  ;;  %v7865_v20 = vld [vmem:[#allocation7 + $0xb8c] sm:$0xf] }
  0xb9   : > { %v427_v37 = vadd.f32 %v426_v32, %v361_v25  ;;  %v402_v39 = vpop.f32.mrf.mxu0  ;;  %v440_v43 = vadd.f32 %v439_v38, %v362_v29  ;;  %v415_v44 = vpop.f32.mrf.mxu1  ;;  %v5836_v25 = vld [vmem:[#allocation7 + $0xd08] sm:$0xf]  ;;  %v5549_v29 = vor.u32 %v7845_v22, %v5548_v21  ;;  %v5646_v21 = vld [vmem:[#allocation7 + $0xba8] sm:$0xf0] }
  0xba   : > { %2268 = vmatmul.bf16.vlgmr.msrb.gmra.mxu0 %v8555_v33  ;;  %2281 = vmatmul.bf16.vlgmr.msrb.gmra.mxu1 %v8558_v40  ;;  %v7981_v32 = vld [vmem:[#allocation7 + $0xf24] sm:$0xf0]  ;;  %v5837_v38 = vor.u32 %v7917_v26, %v5836_v25 }
  0xbb   : > { %v445_v47 = vmax.f32 %v427_v37, 0.0  ;;  %2364 = vmatpush.bf16.msrb.mxu0 %v5421_v31  ;;  %v446_v51 = vmax.f32 %v440_v43, 0.0  ;;  %2377 = vmatpush.bf16.msrb.mxu1 %v5677_v34  ;;  %v6092_v31 = vld [vmem:[#allocation7 + $0xf08] sm:$0xf] }
  0xbc   : > { %v5260_v34 = vld [vmem:[#allocation7 + $0x888] sm:$0xf]  ;;  %v6093_v39 = vor.u32 %v7981_v32, %v6092_v31  ;;  %v5393_v31 = vor.u32 %v7801_v17, %v5390_v19  ;;  %v5649_v32 = vor.u32 %v7865_v20, %v5646_v21  ;;  %v7833_v17 = vld [vmem:[#allocation7 + $0xa8c] sm:$0xf] }
  0xbd   : > { %v8562_v55 = vpack.c.bf16 %v445_v47, %v445_v47  ;;  %v8564_v58 = vpack.c.bf16 %v446_v51, %v446_v51  ;;  %v7837_v37 = vld [vmem:[#allocation7 + $0xaa4] sm:$0xf0]  ;;  %v5261_v43 = vor.u32 %v7773_v35, %v5260_v34  ;;  %v5805_v51 = vor.u32 %v7909_v42, %v5804_v41  ;;  %v8001_v34 = vld [vmem:[#allocation7 + $0xfcc] sm:$0xf] }
  0xbe   : > { %v5517_v44 = vor.u32 %v7837_v37, %v5516_v36  ;;  %v5228_v47 = vld [vmem:[#allocation7 + $0x848] sm:$0xf]  ;;  %v6190_v35 = vld [vmem:[#allocation7 + $0xfe8] sm:$0xf0] }
  0xbf   : > { %2365 = vmatpush.bf16.msrb.mxu0 %v5389_v48  ;;  %v8567_v62 = vshrl.u32 %v8562_v55, 16  ;;  %2378 = vmatpush.bf16.msrb.mxu1 %v5645_v52  ;;  %v8570_v4 = vshrl.u32 %v8564_v58, 16  ;;  %v7765_v48 = vld [vmem:[#allocation7 + $0x864] sm:$0xf0]  ;;  %v6061_v52 = vor.u32 %v7973_v46, %v6060_v45  ;;  %v7793_v36 = vld [vmem:[#allocation7 + $0x94c] sm:$0xf] }
  0xc0   : > { %v428_v3 = vpop.f32.mrf.mxu2  ;;  %v441_v8 = vpop.f32.mrf.mxu3  ;;  %v5229_v57 = vor.u32 %v7765_v48, %v5228_v47  ;;  %v7893_v10 = vld [vmem:[#allocation7 + $0xc64] sm:$0xf0]  ;;  %v5614_v41 = vld [vmem:[#allocation7 + $0xb68] sm:$0xf0] }
  0xc1   : > { %2294 = vmatmul.bf16.vlgmr.msrb.gmra.mxu2 %v8567_v62  ;;  %2307 = vmatmul.bf16.vlgmr.msrb.gmra.mxu3 %v8570_v4  ;;  %v5773_v3 = vor.u32 %v7901_v54, %v5772_v53  ;;  %v6029_v8 = vor.u32 %v7965_v60, %v6028_v56  ;;  %v7957_v14 = vld [vmem:[#allocation7 + $0xe64] sm:$0xf0]  ;;  %v5741_v18 = vor.u32 %v7893_v10, %v5740_v9  ;;  %v7929_v45 = vld [vmem:[#allocation7 + $0xd8c] sm:$0xf] }
  0xc2   : > { %2390 = vmatpush.bf16.msrb.mxu2 %v5933_v59  ;;  %2403 = vmatpush.bf16.msrb.mxu3 %v6189_v63  ;;  %v5485_v59 = vor.u32 %v7829_v50, %v5484_v49  ;;  %v7757_v63 = vld [vmem:[#allocation7 + $0x824] sm:$0xf0]  ;;  %v5902_v46 = vld [vmem:[#allocation7 + $0xda8] sm:$0xf0] }
  0xc3   : > { %2366 = vmatpush.bf16.msrb.mxu0 %v5357_v0  ;;  %2379 = vmatpush.bf16.msrb.mxu1 %v5613_v5  ;;  %v5452_v0 = vld [vmem:[#allocation7 + $0xa08] sm:$0xf]  ;;  %v5422_v5 = vld [vmem:[#allocation7 + $0x9e8] sm:$0xf0]  ;;  %v5905_v56 = vor.u32 %v7929_v45, %v5902_v46 }
  0xc4   : > { %v5425_v15 = vor.u32 %v7809_v2, %v5422_v5  ;;  %v5964_v25 = vld [vmem:[#allocation7 + $0xe08] sm:$0xf]  ;;  %v7993_v49 = vld [vmem:[#allocation7 + $0xf8c] sm:$0xf] }
  0xc5   : > { %v7949_v26 = vld [vmem:[#allocation7 + $0xe24] sm:$0xf0]  ;;  %v6158_v50 = vld [vmem:[#allocation7 + $0xfa8] sm:$0xf0] }
  0xc6   : > { %2391 = vmatpush.bf16.msrb.mxu2 %v5901_v11  ;;  %2404 = vmatpush.bf16.msrb.mxu3 %v6157_v12  ;;  %v5197_v11 = vor.u32 %v7757_v63, %v5196_v61  ;;  %v5453_v12 = vor.u32 %v7821_v1, %v5452_v0  ;;  %v5965_v42 = vor.u32 %v7949_v26, %v5964_v25  ;;  %v7849_v53 = vld [vmem:[#allocation7 + $0xb0c] sm:$0xf] }
  0xc7   : > { %2367 = vmatpush.bf16.msrb.mxu0 %v5325_v13  ;;  %2380 = vmatpush.bf16.msrb.mxu1 %v5581_v16  ;;  %v5996_v13 = vld [vmem:[#allocation7 + $0xe48] sm:$0xf]  ;;  %v5681_v16 = vor.u32 %v7873_v6, %v5678_v7  ;;  %v5582_v54 = vld [vmem:[#allocation7 + $0xb28] sm:$0xf0] }
  0xc8   : > { %v5997_v22 = vor.u32 %v7957_v14, %v5996_v13  ;;  %v5870_v60 = vld [vmem:[#allocation7 + $0xd68] sm:$0xf0]  ;;  %v5585_v63 = vor.u32 %v7849_v53, %v5582_v54 }
  0xc9   : > { %v7985_v0 = vld [vmem:[#allocation7 + $0xf4c] sm:$0xf] }
  0xca   : > { %2392 = vmatpush.bf16.msrb.mxu2 %v5869_v23  ;;  %2320 = vmatmul.bf16.vlgmr.msra.gmra.mxu0 %v8555_v33  ;;  %v5708_v23 = vld [vmem:[#allocation7 + $0xc08] sm:$0xf]  ;;  %v6126_v1 = vld [vmem:[#allocation7 + $0xf68] sm:$0xf0] }
  0xcb   : > { %2405 = vmatpush.bf16.msrb.mxu3 %v6125_v24  ;;  %2333 = vmatmul.bf16.vlgmr.msra.gmra.mxu1 %v8558_v40  ;;  %v7885_v24 = vld [vmem:[#allocation7 + $0xc24] sm:$0xf0]  ;;  %v7777_v2 = vld [vmem:[#allocation7 + $0x8cc] sm:$0xf] }
  0xcc   : > { %2368 = vmatpush.bf16.msrb.mxu0 %v5293_v27  ;;  %2381 = vmatpush.bf16.msrb.mxu1 %v5549_v29  ;;  %v7937_v27 = vld [vmem:[#allocation7 + $0xdcc] sm:$0xf]  ;;  %v5709_v37 = vor.u32 %v7885_v24, %v5708_v23 }
  0xcd   : > { %v5934_v29 = vld [vmem:[#allocation7 + $0xde8] sm:$0xf0] }
  0xce   : > { %2393 = vmatpush.bf16.msrb.mxu2 %v5837_v38  ;;  %v5358_v38 = vld [vmem:[#allocation7 + $0x968] sm:$0xf0] }
  0xcf   : > { %2406 = vmatpush.bf16.msrb.mxu3 %v6093_v39  ;;  %v7857_v39 = vld [vmem:[#allocation7 + $0xb4c] sm:$0xf]  ;;  %v5361_v47 = vor.u32 %v7793_v36, %v5358_v38 }
  0xd0   : > { %2369 = vmatpush.bf16.msrb.mxu0 %v5261_v43  ;;  %2382 = vmatpush.bf16.msrb.mxu1 %v5517_v44  ;;  %v5937_v43 = vor.u32 %v7937_v27, %v5934_v29  ;;  %v6193_v44 = vor.u32 %v8001_v34, %v6190_v35  ;;  %v5617_v48 = vor.u32 %v7857_v39, %v5614_v41  ;;  %v7841_v5 = vld [vmem:[#allocation7 + $0xacc] sm:$0xf] }
  0xd1   : > { %2346 = vmatmul.bf16.vlgmr.msra.gmra.mxu2 %v8567_v62  ;;  %2359 = vmatmul.bf16.vlgmr.msra.gmra.mxu3 %v8570_v4  ;;  %v5550_v6 = vld [vmem:[#allocation7 + $0xae8] sm:$0xf0] }
  0xd2   : > { %2394 = vmatpush.bf16.msrb.mxu2 %v5805_v51  ;;  %v7785_v51 = vld [vmem:[#allocation7 + $0x90c] sm:$0xf] }
  0xd3   : > { %2407 = vmatpush.bf16.msrb.mxu3 %v6061_v52  ;;  %v5326_v52 = vld [vmem:[#allocation7 + $0x928] sm:$0xf0] }
  0xd4   : > { %2370 = vmatpush.bf16.msrb.mxu0 %v5229_v57  ;;  %2383 = vmatpush.bf16.msrb.mxu1 %v5485_v59  ;;  %v6161_v57 = vor.u32 %v7993_v49, %v6158_v50  ;;  %v7921_v59 = vld [vmem:[#allocation7 + $0xd4c] sm:$0xf]  ;;  %v5329_v61 = vor.u32 %v7785_v51, %v5326_v52  ;;  %v7814_v49 = vld [vmem:[#allocation7 + $0x9ec] sm:$0xf0] }
  0xd5   : > { %v5873_v7 = vor.u32 %v7921_v59, %v5870_v60  ;;  %v7913_v9 = vld [vmem:[#allocation7 + $0xd0c] sm:$0xf]  ;;  %v5684_v50 = vld [vmem:[#allocation7 + $0xbd0] sm:$0xf] }
  0xd6   : > { %2395 = vmatpush.bf16.msrb.mxu2 %v5773_v3  ;;  %v5294_v3 = vld [vmem:[#allocation7 + $0x8e8] sm:$0xf0]  ;;  %v7878_v51 = vld [vmem:[#allocation7 + $0xbec] sm:$0xf0] }
  0xd7   : > { %2408 = vmatpush.bf16.msrb.mxu3 %v6029_v8  ;;  %v6129_v8 = vor.u32 %v7985_v0, %v6126_v1  ;;  %v5838_v10 = vld [vmem:[#allocation7 + $0xd28] sm:$0xf0]  ;;  %v5396_v0 = vld [vmem:[#allocation7 + $0x990] sm:$0xf] }
  0xd8   : > { %2371 = vmatpush.bf16.msrb.mxu0 %v5197_v11  ;;  %2384 = vmatpush.bf16.msrb.mxu1 %v5453_v12  ;;  %v5297_v11 = vor.u32 %v7777_v2, %v5294_v3  ;;  %v5553_v12 = vor.u32 %v7841_v5, %v5550_v6  ;;  %v7977_v13 = vld [vmem:[#allocation7 + $0xf0c] sm:$0xf]  ;;  %v5841_v19 = vor.u32 %v7913_v9, %v5838_v10  ;;  %v7806_v2 = vld [vmem:[#allocation7 + $0x9ac] sm:$0xf0] }
  0xd9   : > { %v6094_v14 = vld [vmem:[#allocation7 + $0xf28] sm:$0xf0]  ;;  %v5652_v3 = vld [vmem:[#allocation7 + $0xb90] sm:$0xf] }
  0xda   : > { %2396 = vmatpush.bf16.msrb.mxu2 %v5741_v18  ;;  %v5518_v18 = vld [vmem:[#allocation7 + $0xaa8] sm:$0xf0]  ;;  %v6097_v20 = vor.u32 %v7977_v13, %v6094_v14  ;;  %v7870_v5 = vld [vmem:[#allocation7 + $0xbac] sm:$0xf0]  ;;  %v5397_v13 = vor.u32 %v7806_v2, %v5396_v0 }
  0xdb   : > { %2409 = vmatpush.bf16.msrb.mxu3 %v5997_v22  ;;  %2372 = vmatmul.bf16.vlgmr.msrb.gmra.mxu0 %v8555_v33  ;;  %v7905_v21 = vld [vmem:[#allocation7 + $0xccc] sm:$0xf]  ;;  %v5521_v24 = vor.u32 %v7833_v17, %v5518_v18  ;;  %v5653_v14 = vor.u32 %v7870_v5, %v5652_v3  ;;  %v5364_v18 = vld [vmem:[#allocation7 + $0x950] sm:$0xf] }
  0xdc   : > { %2416 = vmatpush.bf16.msra.mxu0 %v5425_v15  ;;  %2429 = vmatpush.bf16.msra.mxu1 %v5681_v16  ;;  %v7769_v15 = vld [vmem:[#allocation7 + $0x88c] sm:$0xf]  ;;  %v7838_v2 = vld [vmem:[#allocation7 + $0xaac] sm:$0xf0] }
  0xdd   : > { %2385 = vmatmul.bf16.vlgmr.msrb.gmra.mxu1 %v8558_v40  ;;  %v5262_v16 = vld [vmem:[#allocation7 + $0x8a8] sm:$0xf0]  ;;  %v5812_v5 = vld [vmem:[#allocation7 + $0xcd0] sm:$0xf] }
  0xde   : > { %2397 = vmatpush.bf16.msrb.mxu2 %v5709_v37  ;;  %v5806_v22 = vld [vmem:[#allocation7 + $0xce8] sm:$0xf0]  ;;  %v5265_v23 = vor.u32 %v7769_v15, %v5262_v16  ;;  %v6196_v15 = vld [vmem:[#allocation7 + $0xfd0] sm:$0xf] }
  0xdf   : > { %2410 = vmatpush.bf16.msrb.mxu3 %v5965_v42  ;;  %v7969_v25 = vld [vmem:[#allocation7 + $0xecc] sm:$0xf]  ;;  %v5809_v34 = vor.u32 %v7905_v21, %v5806_v22  ;;  %v8006_v16 = vld [vmem:[#allocation7 + $0xfec] sm:$0xf0] }
  0xe0   : > { %2417 = vmatpush.bf16.msra.mxu0 %v5393_v31  ;;  %2430 = vmatpush.bf16.msra.mxu1 %v5649_v32  ;;  %v6062_v26 = vld [vmem:[#allocation7 + $0xee8] sm:$0xf0]  ;;  %v5620_v22 = vld [vmem:[#allocation7 + $0xb50] sm:$0xf] }
  0xe1   : > { %2398 = vmatmul.bf16.vlgmr.msrb.gmra.mxu2 %v8567_v62  ;;  %v7761_v27 = vld [vmem:[#allocation7 + $0x84c] sm:$0xf]  ;;  %v6065_v35 = vor.u32 %v7969_v25, %v6062_v26  ;;  %v5908_v25 = vld [vmem:[#allocation7 + $0xd90] sm:$0xf] }
  0xe2   : > { %2442 = vmatpush.bf16.msra.mxu2 %v5937_v43  ;;  %2411 = vmatmul.bf16.vlgmr.msrb.gmra.mxu3 %v8570_v4  ;;  %v5230_v29 = vld [vmem:[#allocation7 + $0x868] sm:$0xf0]  ;;  %v7934_v26 = vld [vmem:[#allocation7 + $0xdac] sm:$0xf0] }
  0xe3   : > { %2455 = vmatpush.bf16.msra.mxu3 %v6193_v44  ;;  %v7825_v31 = vld [vmem:[#allocation7 + $0xa4c] sm:$0xf]  ;;  %v5233_v39 = vor.u32 %v7761_v27, %v5230_v29  ;;  %v6164_v29 = vld [vmem:[#allocation7 + $0xf90] sm:$0xf] }
  0xe4   : > { %2418 = vmatpush.bf16.msra.mxu0 %v5361_v47  ;;  %2431 = vmatpush.bf16.msra.mxu1 %v5617_v48  ;;  %v5486_v32 = vld [vmem:[#allocation7 + $0xa68] sm:$0xf0]  ;;  %v5428_v47 = vld [vmem:[#allocation7 + $0x9d0] sm:$0xf] }
  0xe5   : > { %v7897_v36 = vld [vmem:[#allocation7 + $0xc8c] sm:$0xf]  ;;  %v5489_v41 = vor.u32 %v7825_v31, %v5486_v32  ;;  %v7998_v31 = vld [vmem:[#allocation7 + $0xfac] sm:$0xf0] }
  0xe6   : > { %2443 = vmatpush.bf16.msra.mxu2 %v5905_v56  ;;  %v5774_v37 = vld [vmem:[#allocation7 + $0xca8] sm:$0xf0] }
  0xe7   : > { %2456 = vmatpush.bf16.msra.mxu3 %v6161_v57  ;;  %v7961_v38 = vld [vmem:[#allocation7 + $0xe8c] sm:$0xf]  ;;  %v5777_v48 = vor.u32 %v7897_v36, %v5774_v37  ;;  %v5909_v36 = vor.u32 %v7934_v26, %v5908_v25  ;;  %v5588_v37 = vld [vmem:[#allocation7 + $0xb10] sm:$0xf] }
  0xe8   : > { %2419 = vmatpush.bf16.msra.mxu0 %v5329_v61  ;;  %2432 = vmatpush.bf16.msra.mxu1 %v5585_v63  ;;  %v6030_v42 = vld [vmem:[#allocation7 + $0xea8] sm:$0xf0]  ;;  %v5429_v61 = vor.u32 %v7814_v49, %v5428_v47  ;;  %v5685_v63 = vor.u32 %v7878_v51, %v5684_v50  ;;  %v5300_v47 = vld [vmem:[#allocation7 + $0x8d0] sm:$0xf] }
  0xe9   : > { %v7753_v43 = vld [vmem:[#allocation7 + $0x80c] sm:$0xf]  ;;  %v6033_v52 = vor.u32 %v7961_v38, %v6030_v42  ;;  %v7854_v38 = vld [vmem:[#allocation7 + $0xb2c] sm:$0xf0] }
  0xea   : > { %2444 = vmatpush.bf16.msra.mxu2 %v5873_v7  ;;  %v5198_v44 = vld [vmem:[#allocation7 + $0x828] sm:$0xf0]  ;;  %v7926_v42 = vld [vmem:[#allocation7 + $0xd6c] sm:$0xf0] }
  0xeb   : > { %2457 = vmatpush.bf16.msra.mxu3 %v6129_v8  ;;  %v7817_v45 = vld [vmem:[#allocation7 + $0xa0c] sm:$0xf]  ;;  %v5201_v56 = vor.u32 %v7753_v43, %v5198_v44  ;;  %v6132_v44 = vld [vmem:[#allocation7 + $0xf50] sm:$0xf] }
  0xec   : > { %2420 = vmatpush.bf16.msra.mxu0 %v5297_v11  ;;  %2433 = vmatpush.bf16.msra.mxu1 %v5553_v12  ;;  %v5454_v46 = vld [vmem:[#allocation7 + $0xa28] sm:$0xf0]  ;;  %v5940_v11 = vld [vmem:[#allocation7 + $0xdd0] sm:$0xf] }
  0xed   : > { %v7889_v53 = vld [vmem:[#allocation7 + $0xc4c] sm:$0xf]  ;;  %v5457_v57 = vor.u32 %v7817_v45, %v5454_v46  ;;  %v7942_v12 = vld [vmem:[#allocation7 + $0xdec] sm:$0xf0]  ;;  %v5589_v46 = vor.u32 %v7854_v38, %v5588_v37 }
  0xee   : > { %2445 = vmatpush.bf16.msra.mxu2 %v5841_v19  ;;  %v5742_v54 = vld [vmem:[#allocation7 + $0xc68] sm:$0xf0]  ;;  %v7798_v19 = vld [vmem:[#allocation7 + $0x96c] sm:$0xf0]  ;;  %v5941_v21 = vor.u32 %v7942_v12, %v5940_v11 }
  0xef   : > { %2458 = vmatpush.bf16.msra.mxu3 %v6097_v20  ;;  %v7953_v59 = vld [vmem:[#allocation7 + $0xe4c] sm:$0xf]  ;;  %v5745_v1 = vor.u32 %v7889_v53, %v5742_v54  ;;  %v5365_v27 = vor.u32 %v7798_v19, %v5364_v18  ;;  %v7990_v45 = vld [vmem:[#allocation7 + $0xf6c] sm:$0xf0] }
  0xf0   : > { %2421 = vmatpush.bf16.msra.mxu0 %v5265_v23  ;;  %2434 = vmatpush.bf16.msra.mxu1 %v5521_v24  ;;  %v5998_v60 = vld [vmem:[#allocation7 + $0xe68] sm:$0xf0]  ;;  %v7862_v23 = vld [vmem:[#allocation7 + $0xb6c] sm:$0xf0]  ;;  %v6197_v24 = vor.u32 %v8006_v16, %v6196_v15 }
  0xf1   : > { %v6001_v6 = vor.u32 %v7953_v59, %v5998_v60  ;;  %v7881_v7 = vld [vmem:[#allocation7 + $0xc0c] sm:$0xf]  ;;  %v5621_v32 = vor.u32 %v7862_v23, %v5620_v22  ;;  %v5556_v50 = vld [vmem:[#allocation7 + $0xad0] sm:$0xf] }
  0xf2   : > { %2446 = vmatpush.bf16.msra.mxu2 %v5809_v34  ;;  %v5710_v8 = vld [vmem:[#allocation7 + $0xc28] sm:$0xf0]  ;;  %v5332_v34 = vld [vmem:[#allocation7 + $0x910] sm:$0xf] }
  0xf3   : > { %2459 = vmatpush.bf16.msra.mxu3 %v6065_v35  ;;  %v7945_v9 = vld [vmem:[#allocation7 + $0xe0c] sm:$0xf]  ;;  %v5713_v17 = vor.u32 %v7881_v7, %v5710_v8  ;;  %v7790_v35 = vld [vmem:[#allocation7 + $0x92c] sm:$0xf0] }
  0xf4   : > { %2422 = vmatpush.bf16.msra.mxu0 %v5233_v39  ;;  %2435 = vmatpush.bf16.msra.mxu1 %v5489_v41  ;;  %v5966_v10 = vld [vmem:[#allocation7 + $0xe28] sm:$0xf0]  ;;  %v6165_v39 = vor.u32 %v7998_v31, %v6164_v29  ;;  %v5876_v41 = vld [vmem:[#allocation7 + $0xd50] sm:$0xf]  ;;  %v5333_v43 = vor.u32 %v7790_v35, %v5332_v34  ;;  %v7810_v29 = vld [vmem:[#allocation7 + $0x9d4] sm:$0xf] }
  0xf5   : > { %v5969_v20 = vor.u32 %v7945_v9, %v5966_v10  ;;  %v5877_v49 = vor.u32 %v7926_v42, %v5876_v41  ;;  %v7846_v51 = vld [vmem:[#allocation7 + $0xaec] sm:$0xf0]  ;;  %v5430_v31 = vld [vmem:[#allocation7 + $0x9f0] sm:$0xf0] }
  0xf6   : > { %2447 = vmatpush.bf16.msra.mxu2 %v5777_v48  ;;  %v7782_v48 = vld [vmem:[#allocation7 + $0x8ec] sm:$0xf0]  ;;  %v5557_v60 = vor.u32 %v7846_v51, %v5556_v50  ;;  %v5686_v35 = vld [vmem:[#allocation7 + $0xbf0] sm:$0xf0] }
  0xf7   : > { %2460 = vmatpush.bf16.msra.mxu3 %v6033_v52  ;;  %v6133_v52 = vor.u32 %v7990_v45, %v6132_v44  ;;  %v5844_v53 = vld [vmem:[#allocation7 + $0xd10] sm:$0xf]  ;;  %v7802_v44 = vld [vmem:[#allocation7 + $0x994] sm:$0xf] }
  0xf8   : > { %2423 = vmatpush.bf16.msra.mxu0 %v5201_v56  ;;  %2436 = vmatpush.bf16.msra.mxu1 %v5457_v57  ;;  %v7918_v54 = vld [vmem:[#allocation7 + $0xd2c] sm:$0xf0]  ;;  %v5301_v56 = vor.u32 %v7782_v48, %v5300_v47  ;;  %v5398_v47 = vld [vmem:[#allocation7 + $0x9b0] sm:$0xf0] }
  0xf9   : > { %v6100_v57 = vld [vmem:[#allocation7 + $0xf10] sm:$0xf]  ;;  %v5845_v0 = vor.u32 %v7918_v54, %v5844_v53  ;;  %v7866_v48 = vld [vmem:[#allocation7 + $0xb94] sm:$0xf] }
  0xfa   : > { %2448 = vmatpush.bf16.msra.mxu2 %v5745_v1  ;;  %v7982_v59 = vld [vmem:[#allocation7 + $0xf2c] sm:$0xf0] }
  0xfb   : > { %2461 = vmatpush.bf16.msra.mxu3 %v6001_v6  ;;  %2424 = vmatmul.bf16.vlgmr.msra.gmra.mxu0 %v8555_v33  ;;  %v5524_v1 = vld [vmem:[#allocation7 + $0xa90] sm:$0xf]  ;;  %v6101_v3 = vor.u32 %v7982_v59, %v6100_v57  ;;  %v5942_v57 = vld [vmem:[#allocation7 + $0xdf0] sm:$0xf0]  ;;  %v5401_v59 = vor.u32 %v7802_v44, %v5398_v47 }
  0xfc   : > { %2468 = vmatpush.bf16.msrb.mxu0 %v5429_v61  ;;  %2481 = vmatpush.bf16.msrb.mxu1 %v5685_v63  ;;  %v5268_v61 = vld [vmem:[#allocation7 + $0x890] sm:$0xf]  ;;  %v5525_v10 = vor.u32 %v7838_v2, %v5524_v1  ;;  %v7794_v1 = vld [vmem:[#allocation7 + $0x954] sm:$0xf] }
  0xfd   : > { %2437 = vmatmul.bf16.vlgmr.msra.gmra.mxu1 %v8558_v40  ;;  %v7774_v63 = vld [vmem:[#allocation7 + $0x8ac] sm:$0xf0]  ;;  %v5366_v2 = vld [vmem:[#allocation7 + $0x970] sm:$0xf0] }
  0xfe   : > { %2449 = vmatpush.bf16.msra.mxu2 %v5713_v17  ;;  %v7910_v6 = vld [vmem:[#allocation7 + $0xcec] sm:$0xf0]  ;;  %v5269_v7 = vor.u32 %v7774_v63, %v5268_v61  ;;  %v6198_v61 = vld [vmem:[#allocation7 + $0xff0] sm:$0xf0] }
  0xff   : > { %2462 = vmatpush.bf16.msra.mxu3 %v5969_v20  ;;  %v6068_v8 = vld [vmem:[#allocation7 + $0xed0] sm:$0xf]  ;;  %v5270_v44 = vld [vmem:[#allocation7 + $0x8b0] sm:$0xf0] }
 0x100   : > { %2469 = vmatpush.bf16.msrb.mxu0 %v5397_v13  ;;  %2482 = vmatpush.bf16.msrb.mxu1 %v5653_v14  ;;  %v7974_v9 = vld [vmem:[#allocation7 + $0xeec] sm:$0xf0]  ;;  %v5813_v13 = vor.u32 %v7910_v6, %v5812_v5  ;;  %v7858_v6 = vld [vmem:[#allocation7 + $0xb54] sm:$0xf] }
 0x101   : > { %2450 = vmatmul.bf16.vlgmr.msra.gmra.mxu2 %v8567_v62  ;;  %v5236_v11 = vld [vmem:[#allocation7 + $0x850] sm:$0xf]  ;;  %v6069_v16 = vor.u32 %v7974_v9, %v6068_v8  ;;  %v7930_v9 = vld [vmem:[#allocation7 + $0xd94] sm:$0xf] }
 0x102   : > { %2494 = vmatpush.bf16.msrb.mxu2 %v5941_v21  ;;  %2463 = vmatmul.bf16.vlgmr.msra.gmra.mxu3 %v8570_v4  ;;  %v7766_v12 = vld [vmem:[#allocation7 + $0x86c] sm:$0xf0]  ;;  %v5526_v47 = vld [vmem:[#allocation7 + $0xab0] sm:$0xf0] }
 0x103   : > { %2507 = vmatpush.bf16.msrb.mxu3 %v6197_v24  ;;  %v5492_v14 = vld [vmem:[#allocation7 + $0xa50] sm:$0xf]  ;;  %v5237_v19 = vor.u32 %v7766_v12, %v5236_v11  ;;  %v5369_v11 = vor.u32 %v7794_v1, %v5366_v2  ;;  %v7994_v12 = vld [vmem:[#allocation7 + $0xf94] sm:$0xf] }
 0x104   : > { %2470 = vmatpush.bf16.msrb.mxu0 %v5365_v27  ;;  %2483 = vmatpush.bf16.msrb.mxu1 %v5621_v32  ;;  %v7830_v15 = vld [vmem:[#allocation7 + $0xa6c] sm:$0xf0]  ;;  %v7874_v32 = vld [vmem:[#allocation7 + $0xbd4] sm:$0xf] }
 0x105   : > { %v5780_v17 = vld [vmem:[#allocation7 + $0xc90] sm:$0xf]  ;;  %v5493_v23 = vor.u32 %v7830_v15, %v5492_v14  ;;  %v5689_v45 = vor.u32 %v7874_v32, %v5686_v35  ;;  %v7786_v15 = vld [vmem:[#allocation7 + $0x914] sm:$0xf] }
 0x106   : > { %2495 = vmatpush.bf16.msrb.mxu2 %v5909_v36  ;;  %v7902_v18 = vld [vmem:[#allocation7 + $0xcac] sm:$0xf0]  ;;  %v7842_v32 = vld [vmem:[#allocation7 + $0xad4] sm:$0xf] }
 0x107   : > { %2508 = vmatpush.bf16.msrb.mxu3 %v6165_v39  ;;  %v6036_v20 = vld [vmem:[#allocation7 + $0xe90] sm:$0xf]  ;;  %v5781_v27 = vor.u32 %v7902_v18, %v5780_v17  ;;  %v7850_v18 = vld [vmem:[#allocation7 + $0xb14] sm:$0xf] }
 0x108   : > { %2471 = vmatpush.bf16.msrb.mxu0 %v5333_v43  ;;  %2484 = vmatpush.bf16.msrb.mxu1 %v5589_v46  ;;  %v7966_v21 = vld [vmem:[#allocation7 + $0xeac] sm:$0xf0]  ;;  %v5433_v43 = vor.u32 %v7810_v29, %v5430_v31  ;;  %v5302_v29 = vld [vmem:[#allocation7 + $0x8f0] sm:$0xf0] }
 0x109   : > { %v5204_v22 = vld [vmem:[#allocation7 + $0x810] sm:$0xf]  ;;  %v6037_v34 = vor.u32 %v7966_v21, %v6036_v20  ;;  %v7922_v21 = vld [vmem:[#allocation7 + $0xd54] sm:$0xf] }
 0x10a   : > { %2496 = vmatpush.bf16.msrb.mxu2 %v5877_v49  ;;  %v7758_v24 = vld [vmem:[#allocation7 + $0x82c] sm:$0xf0]  ;;  %v5654_v49 = vld [vmem:[#allocation7 + $0xbb0] sm:$0xf0] }
 0x10b   : > { %2509 = vmatpush.bf16.msrb.mxu3 %v6133_v52  ;;  %v5460_v25 = vld [vmem:[#allocation7 + $0xa10] sm:$0xf]  ;;  %v5205_v38 = vor.u32 %v7758_v24, %v5204_v22  ;;  %v5657_v63 = vor.u32 %v7866_v48, %v5654_v49  ;;  %v5878_v22 = vld [vmem:[#allocation7 + $0xd70] sm:$0xf0] }
 0x10c   : > { %2472 = vmatpush.bf16.msrb.mxu0 %v5301_v56  ;;  %2485 = vmatpush.bf16.msrb.mxu1 %v5557_v60  ;;  %v7822_v26 = vld [vmem:[#allocation7 + $0xa2c] sm:$0xf0]  ;;  %v7938_v56 = vld [vmem:[#allocation7 + $0xdd4] sm:$0xf]  ;;  %v5881_v31 = vor.u32 %v7922_v21, %v5878_v22 }
 0x10d   : > { %v5748_v36 = vld [vmem:[#allocation7 + $0xc50] sm:$0xf]  ;;  %v5461_v42 = vor.u32 %v7822_v26, %v5460_v25  ;;  %v8002_v60 = vld [vmem:[#allocation7 + $0xfd4] sm:$0xf]  ;;  %v5945_v5 = vor.u32 %v7938_v56, %v5942_v57 }
 0x10e   : > { %2497 = vmatpush.bf16.msrb.mxu2 %v5845_v0  ;;  %v7894_v37 = vld [vmem:[#allocation7 + $0xc6c] sm:$0xf0]  ;;  %v6201_v8 = vor.u32 %v8002_v60, %v6198_v61  ;;  %v7986_v24 = vld [vmem:[#allocation7 + $0xf54] sm:$0xf] }
 0x10f   : > { %2510 = vmatpush.bf16.msrb.mxu3 %v6101_v3  ;;  %v6004_v39 = vld [vmem:[#allocation7 + $0xe50] sm:$0xf]  ;;  %v5749_v46 = vor.u32 %v7894_v37, %v5748_v36  ;;  %v6134_v25 = vld [vmem:[#allocation7 + $0xf70] sm:$0xf0] }
 0x110   : > { %2473 = vmatpush.bf16.msrb.mxu0 %v5269_v7  ;;  %2486 = vmatpush.bf16.msrb.mxu1 %v5525_v10  ;;  %v7958_v41 = vld [vmem:[#allocation7 + $0xe6c] sm:$0xf0]  ;;  %v5622_v7 = vld [vmem:[#allocation7 + $0xb70] sm:$0xf0]  ;;  %v6137_v35 = vor.u32 %v7986_v24, %v6134_v25  ;;  %v5404_v24 = vld [vmem:[#allocation7 + $0x998] sm:$0xf] }
 0x111   : > { %v6005_v50 = vor.u32 %v7958_v41, %v6004_v39  ;;  %v5716_v51 = vld [vmem:[#allocation7 + $0xc10] sm:$0xf]  ;;  %v5910_v10 = vld [vmem:[#allocation7 + $0xdb0] sm:$0xf0]  ;;  %v5625_v14 = vor.u32 %v7858_v6, %v5622_v7 }
 0x112   : > { %2498 = vmatpush.bf16.msrb.mxu2 %v5813_v13  ;;  %v7886_v52 = vld [vmem:[#allocation7 + $0xc2c] sm:$0xf0]  ;;  %v6166_v13 = vld [vmem:[#allocation7 + $0xfb0] sm:$0xf0]  ;;  %v5913_v17 = vor.u32 %v7930_v9, %v5910_v10 }
 0x113   : > { %2511 = vmatpush.bf16.msrb.mxu3 %v6069_v16  ;;  %v5972_v53 = vld [vmem:[#allocation7 + $0xe10] sm:$0xf]  ;;  %v5717_v0 = vor.u32 %v7886_v52, %v5716_v51  ;;  %v5334_v16 = vld [vmem:[#allocation7 + $0x930] sm:$0xf0]  ;;  %v6169_v20 = vor.u32 %v7994_v12, %v6166_v13  ;;  %v5436_v12 = vld [vmem:[#allocation7 + $0x9d8] sm:$0xf] }
 0x114   : > { %2474 = vmatpush.bf16.msrb.mxu0 %v5237_v19  ;;  %2487 = vmatpush.bf16.msrb.mxu1 %v5493_v23  ;;  %v7950_v54 = vld [vmem:[#allocation7 + $0xe2c] sm:$0xf0]  ;;  %v5590_v19 = vld [vmem:[#allocation7 + $0xb30] sm:$0xf0]  ;;  %v5337_v23 = vor.u32 %v7786_v15, %v5334_v16  ;;  %v7815_v13 = vld [vmem:[#allocation7 + $0x9f4] sm:$0xf0] }
 0x115   : > { %v5973_v3 = vor.u32 %v7950_v54, %v5972_v53  ;;  %v5593_v26 = vor.u32 %v7850_v18, %v5590_v19  ;;  %v7914_v36 = vld [vmem:[#allocation7 + $0xd14] sm:$0xf]  ;;  %v7879_v16 = vld [vmem:[#allocation7 + $0xbf4] sm:$0xf0] }
 0x116   : > { %2499 = vmatpush.bf16.msrb.mxu2 %v5781_v27  ;;  %v7778_v27 = vld [vmem:[#allocation7 + $0x8d4] sm:$0xf] }
 0x117   : > { %2512 = vmatpush.bf16.msrb.mxu3 %v6037_v34  ;;  %v5558_v34 = vld [vmem:[#allocation7 + $0xaf0] sm:$0xf0] }
 0x118   : > { %2475 = vmatpush.bf16.msrb.mxu0 %v5205_v38  ;;  %2488 = vmatpush.bf16.msrb.mxu1 %v5461_v42  ;;  %v5846_v37 = vld [vmem:[#allocation7 + $0xd30] sm:$0xf0]  ;;  %v5305_v38 = vor.u32 %v7778_v27, %v5302_v29  ;;  %v5561_v42 = vor.u32 %v7842_v32, %v5558_v34  ;;  %v7807_v27 = vld [vmem:[#allocation7 + $0x9b4] sm:$0xf0] }
 0x119   : > { %v7978_v39 = vld [vmem:[#allocation7 + $0xf14] sm:$0xf]  ;;  %v5660_v29 = vld [vmem:[#allocation7 + $0xb98] sm:$0xf] }
 0x11a   : > { %2500 = vmatpush.bf16.msrb.mxu2 %v5749_v46  ;;  %v6102_v41 = vld [vmem:[#allocation7 + $0xf30] sm:$0xf0] }
 0x11b   : > { %2513 = vmatpush.bf16.msrb.mxu3 %v6005_v50  ;;  %2476 = vmatmul.bf16.vlgmr.msrb.gmra.mxu0 %v8555_v33  ;;  %v7834_v46 = vld [vmem:[#allocation7 + $0xa94] sm:$0xf]  ;;  %v6105_v48 = vor.u32 %v7978_v39, %v6102_v41  ;;  %v7943_v39 = vld [vmem:[#allocation7 + $0xdf4] sm:$0xf0]  ;;  %v5405_v41 = vor.u32 %v7807_v27, %v5404_v24 }
 0x11c   : > { %2520 = vmatpush.bf16.msra.mxu0 %v5433_v43  ;;  %2533 = vmatpush.bf16.msra.mxu1 %v5689_v45  ;;  %v7770_v43 = vld [vmem:[#allocation7 + $0x894] sm:$0xf]  ;;  %v5849_v45 = vor.u32 %v7914_v36, %v5846_v37  ;;  %v5529_v54 = vor.u32 %v7834_v46, %v5526_v47  ;;  %v5372_v46 = vld [vmem:[#allocation7 + $0x958] sm:$0xf] }
 0x11d   : > { %2489 = vmatmul.bf16.vlgmr.msrb.gmra.mxu1 %v8558_v40  ;;  %v7906_v49 = vld [vmem:[#allocation7 + $0xcd4] sm:$0xf]  ;;  %v5273_v51 = vor.u32 %v7770_v43, %v5270_v44  ;;  %v8007_v43 = vld [vmem:[#allocation7 + $0xff4] sm:$0xf0] }
 0x11e   : > { %2501 = vmatpush.bf16.msrb.mxu2 %v5717_v0  ;;  %v5814_v50 = vld [vmem:[#allocation7 + $0xcf0] sm:$0xf0]  ;;  %v7799_v47 = vld [vmem:[#allocation7 + $0x974] sm:$0xf0] }
 0x11f   : > { %2514 = vmatpush.bf16.msrb.mxu3 %v5973_v3  ;;  %v7970_v52 = vld [vmem:[#allocation7 + $0xed4] sm:$0xf]  ;;  %v7983_v24 = vld [vmem:[#allocation7 + $0xf34] sm:$0xf0] }
 0x120   : > { %2521 = vmatpush.bf16.msra.mxu0 %v5401_v59  ;;  %2534 = vmatpush.bf16.msra.mxu1 %v5657_v63  ;;  %v6070_v53 = vld [vmem:[#allocation7 + $0xef0] sm:$0xf0]  ;;  %v5817_v59 = vor.u32 %v7906_v49, %v5814_v50  ;;  %v5628_v50 = vld [vmem:[#allocation7 + $0xb58] sm:$0xf] }
 0x121   : > { %2502 = vmatmul.bf16.vlgmr.msrb.gmra.mxu2 %v8567_v62  ;;  %v7762_v56 = vld [vmem:[#allocation7 + $0x854] sm:$0xf]  ;;  %v6073_v63 = vor.u32 %v7970_v52, %v6070_v53  ;;  %v5916_v53 = vld [vmem:[#allocation7 + $0xd98] sm:$0xf] }
 0x122   : > { %2546 = vmatpush.bf16.msra.mxu2 %v5945_v5  ;;  %2515 = vmatmul.bf16.vlgmr.msrb.gmra.mxu3 %v8570_v4  ;;  %v5238_v57 = vld [vmem:[#allocation7 + $0x870] sm:$0xf0]  ;;  %v7775_v27 = vld [vmem:[#allocation7 + $0x8b4] sm:$0xf0] }
 0x123   : > { %2559 = vmatpush.bf16.msra.mxu3 %v6201_v8  ;;  %v7826_v60 = vld [vmem:[#allocation7 + $0xa54] sm:$0xf]  ;;  %v5241_v2 = vor.u32 %v7762_v56, %v5238_v57  ;;  %v5373_v56 = vor.u32 %v7799_v47, %v5372_v46  ;;  %v6172_v57 = vld [vmem:[#allocation7 + $0xf98] sm:$0xf] }
 0x124   : > { %2522 = vmatpush.bf16.msra.mxu0 %v5369_v11  ;;  %2535 = vmatpush.bf16.msra.mxu1 %v5625_v14  ;;  %v5494_v61 = vld [vmem:[#allocation7 + $0xa70] sm:$0xf0]  ;;  %v5692_v14 = vld [vmem:[#allocation7 + $0xbd8] sm:$0xf] }
 0x125   : > { %v7898_v0 = vld [vmem:[#allocation7 + $0xc94] sm:$0xf]  ;;  %v5497_v7 = vor.u32 %v7826_v60, %v5494_v61  ;;  %v5693_v25 = vor.u32 %v7879_v16, %v5692_v14  ;;  %v5340_v61 = vld [vmem:[#allocation7 + $0x918] sm:$0xf] }
 0x126   : > { %2547 = vmatpush.bf16.msra.mxu2 %v5913_v17  ;;  %v5782_v1 = vld [vmem:[#allocation7 + $0xcb0] sm:$0xf0]  ;;  %v5308_v14 = vld [vmem:[#allocation7 + $0x8d8] sm:$0xf] }
 0x127   : > { %2560 = vmatpush.bf16.msra.mxu3 %v6169_v20  ;;  %v7962_v3 = vld [vmem:[#allocation7 + $0xe94] sm:$0xf]  ;;  %v5785_v11 = vor.u32 %v7898_v0, %v5782_v1  ;;  %v5596_v1 = vld [vmem:[#allocation7 + $0xb18] sm:$0xf] }
 0x128   : > { %2523 = vmatpush.bf16.msra.mxu0 %v5337_v23  ;;  %2536 = vmatpush.bf16.msra.mxu1 %v5593_v26  ;;  %v6038_v5 = vld [vmem:[#allocation7 + $0xeb0] sm:$0xf0]  ;;  %v5437_v23 = vor.u32 %v7815_v13, %v5436_v12  ;;  %v5500_v47 = vld [vmem:[#allocation7 + $0xa58] sm:$0xf] }
 0x129   : > { %v7754_v6 = vld [vmem:[#allocation7 + $0x814] sm:$0xf]  ;;  %v6041_v15 = vor.u32 %v7962_v3, %v6038_v5 }
 0x12a   : > { %2548 = vmatpush.bf16.msra.mxu2 %v5881_v31  ;;  %v5206_v8 = vld [vmem:[#allocation7 + $0x830] sm:$0xf0]  ;;  %v7871_v31 = vld [vmem:[#allocation7 + $0xbb4] sm:$0xf0] }
 0x12b   : > { %2561 = vmatpush.bf16.msra.mxu3 %v6137_v35  ;;  %v7818_v9 = vld [vmem:[#allocation7 + $0xa14] sm:$0xf]  ;;  %v5209_v19 = vor.u32 %v7754_v6, %v5206_v8  ;;  %v5661_v44 = vor.u32 %v7871_v31, %v5660_v29  ;;  %v5884_v6 = vld [vmem:[#allocation7 + $0xd58] sm:$0xf] }
 0x12c   : > { %2524 = vmatpush.bf16.msra.mxu0 %v5305_v38  ;;  %2537 = vmatpush.bf16.msra.mxu1 %v5561_v42  ;;  %v5462_v10 = vld [vmem:[#allocation7 + $0xa30] sm:$0xf0]  ;;  %v5948_v38 = vld [vmem:[#allocation7 + $0xdd8] sm:$0xf] }
 0x12d   : > { %v7890_v17 = vld [vmem:[#allocation7 + $0xc54] sm:$0xf]  ;;  %v5465_v22 = vor.u32 %v7818_v9, %v5462_v10  ;;  %v6204_v42 = vld [vmem:[#allocation7 + $0xfd8] sm:$0xf]  ;;  %v5949_v49 = vor.u32 %v7943_v39, %v5948_v38 }
 0x12e   : > { %2549 = vmatpush.bf16.msra.mxu2 %v5849_v45  ;;  %v5750_v18 = vld [vmem:[#allocation7 + $0xc70] sm:$0xf0]  ;;  %v6205_v52 = vor.u32 %v8007_v43, %v6204_v42  ;;  %v6140_v10 = vld [vmem:[#allocation7 + $0xf58] sm:$0xf] }
 0x12f   : > { %2562 = vmatpush.bf16.msra.mxu3 %v6105_v48  ;;  %v7954_v20 = vld [vmem:[#allocation7 + $0xe54] sm:$0xf]  ;;  %v5753_v26 = vor.u32 %v7890_v17, %v5750_v18  ;;  %v5564_v17 = vld [vmem:[#allocation7 + $0xad8] sm:$0xf] }
 0x130   : > { %2525 = vmatpush.bf16.msra.mxu0 %v5273_v51  ;;  %2538 = vmatpush.bf16.msra.mxu1 %v5529_v54  ;;  %v6006_v21 = vld [vmem:[#allocation7 + $0xe70] sm:$0xf0]  ;;  %v7863_v51 = vld [vmem:[#allocation7 + $0xb74] sm:$0xf0] }
 0x131   : > { %v6009_v32 = vor.u32 %v7954_v20, %v6006_v21  ;;  %v7882_v34 = vld [vmem:[#allocation7 + $0xc14] sm:$0xf]  ;;  %v7935_v54 = vld [vmem:[#allocation7 + $0xdb4] sm:$0xf0]  ;;  %v5629_v60 = vor.u32 %v7863_v51, %v5628_v50 }
 0x132   : > { %2550 = vmatpush.bf16.msra.mxu2 %v5817_v59  ;;  %v5718_v35 = vld [vmem:[#allocation7 + $0xc30] sm:$0xf0]  ;;  %v7999_v59 = vld [vmem:[#allocation7 + $0xfb4] sm:$0xf0]  ;;  %v5917_v0 = vor.u32 %v7935_v54, %v5916_v53 }
 0x133   : > { %2563 = vmatpush.bf16.msra.mxu3 %v6073_v63  ;;  %v7946_v36 = vld [vmem:[#allocation7 + $0xe14] sm:$0xf]  ;;  %v5721_v45 = vor.u32 %v7882_v34, %v5718_v35  ;;  %v7791_v63 = vld [vmem:[#allocation7 + $0x934] sm:$0xf0]  ;;  %v6173_v5 = vor.u32 %v7999_v59, %v6172_v57 }
 0x134   : > { %2526 = vmatpush.bf16.msra.mxu0 %v5241_v2  ;;  %2539 = vmatpush.bf16.msra.mxu1 %v5497_v7  ;;  %v5974_v37 = vld [vmem:[#allocation7 + $0xe30] sm:$0xf0]  ;;  %v7855_v2 = vld [vmem:[#allocation7 + $0xb34] sm:$0xf0]  ;;  %v5341_v9 = vor.u32 %v7791_v63, %v5340_v61 }
 0x135   : > { %v5977_v48 = vor.u32 %v7946_v36, %v5974_v37  ;;  %v7927_v7 = vld [vmem:[#allocation7 + $0xd74] sm:$0xf0]  ;;  %v5597_v13 = vor.u32 %v7855_v2, %v5596_v1 }
 0x136   : > { %2551 = vmatpush.bf16.msra.mxu2 %v5785_v11  ;;  %v7991_v11 = vld [vmem:[#allocation7 + $0xf74] sm:$0xf0]  ;;  %v5885_v16 = vor.u32 %v7927_v7, %v5884_v6  ;;  %v7875_v6 = vld [vmem:[#allocation7 + $0xbdc] sm:$0xf] }
 0x137   : > { %2564 = vmatpush.bf16.msra.mxu3 %v6041_v15  ;;  %v2269_v3 = vpop.f32.mrf.mxu0  ;;  %v2282_v8 = vpop.f32.mrf.mxu1  ;;  %v7783_v15 = vld [vmem:[#allocation7 + $0x8f4] sm:$0xf0] }
 0x138   : > { %2527 = vmatpush.bf16.msra.mxu0 %v5209_v19  ;;  %2540 = vmatpush.bf16.msra.mxu1 %v5465_v22  ;;  %v2283_v12 = vadd.f32 %v2282_v8, %v2269_v3  ;;  %v7847_v18 = vld [vmem:[#allocation7 + $0xaf4] sm:$0xf0]  ;;  %v6141_v19 = vor.u32 %v7991_v11, %v6140_v10  ;;  %v5309_v22 = vor.u32 %v7783_v15, %v5308_v14  ;;  %v7811_v3 = vld [vmem:[#allocation7 + $0x9dc] sm:$0xf] }
 0x139   : > { %v5852_v20 = vld [vmem:[#allocation7 + $0xd18] sm:$0xf]  ;;  %v5694_v10 = vld [vmem:[#allocation7 + $0xbf8] sm:$0xf0] }
 0x13a   : > { %2552 = vmatpush.bf16.msra.mxu2 %v5753_v26  ;;  %v7919_v21 = vld [vmem:[#allocation7 + $0xd34] sm:$0xf0] }
 0x13b   : > { %2565 = vmatpush.bf16.msra.mxu3 %v6009_v32  ;;  %2528 = vmatmul.bf16.vlgmr.msra.gmra.mxu0 %v8555_v33  ;;  %v5276_v26 = vld [vmem:[#allocation7 + $0x898] sm:$0xf]  ;;  %v5853_v29 = vor.u32 %v7919_v21, %v5852_v20  ;;  %v7803_v20 = vld [vmem:[#allocation7 + $0x99c] sm:$0xf]  ;;  %v5697_v21 = vor.u32 %v7875_v6, %v5694_v10 }
 0x13c   : > { %2572 = vmatpush.bf16.msrb.mxu0 %v5437_v23  ;;  %2585 = vmatpush.bf16.msrb.mxu1 %v5693_v25  ;;  %v6108_v23 = vld [vmem:[#allocation7 + $0xf18] sm:$0xf]  ;;  %v5565_v25 = vor.u32 %v7847_v18, %v5564_v17  ;;  %v5277_v39 = vor.u32 %v7775_v27, %v5276_v26  ;;  %v7923_v6 = vld [vmem:[#allocation7 + $0xd5c] sm:$0xf] }
 0x13d   : > { %2541 = vmatmul.bf16.vlgmr.msra.gmra.mxu1 %v8558_v40  ;;  %v5532_v31 = vld [vmem:[#allocation7 + $0xa98] sm:$0xf]  ;;  %v6109_v35 = vor.u32 %v7983_v24, %v6108_v23  ;;  %v5406_v23 = vld [vmem:[#allocation7 + $0x9b8] sm:$0xf0] }
 0x13e   : > { %2553 = vmatpush.bf16.msra.mxu2 %v5721_v45  ;;  %v7839_v32 = vld [vmem:[#allocation7 + $0xab4] sm:$0xf0]  ;;  %v7867_v24 = vld [vmem:[#allocation7 + $0xb9c] sm:$0xf] }
 0x13f   : > { %2566 = vmatpush.bf16.msra.mxu3 %v5977_v48  ;;  %v2271_v34 = vpop.f32.mrf.mxu0  ;;  %v5820_v36 = vld [vmem:[#allocation7 + $0xcd8] sm:$0xf]  ;;  %v2284_v38 = vpop.f32.mrf.mxu1  ;;  %v5533_v43 = vor.u32 %v7839_v32, %v5532_v31 }
 0x140   : > { %2573 = vmatpush.bf16.msrb.mxu0 %v5405_v41  ;;  %2586 = vmatpush.bf16.msrb.mxu1 %v5661_v44  ;;  %v7911_v37 = vld [vmem:[#allocation7 + $0xcf4] sm:$0xf0]  ;;  %v5409_v38 = vor.u32 %v7803_v20, %v5406_v23  ;;  %v7843_v20 = vld [vmem:[#allocation7 + $0xadc] sm:$0xf] }
 0x141   : > { %2554 = vmatmul.bf16.vlgmr.msra.gmra.mxu2 %v8567_v62  ;;  %v6076_v41 = vld [vmem:[#allocation7 + $0xed8] sm:$0xf]  ;;  %v5821_v46 = vor.u32 %v7911_v37, %v5820_v36  ;;  %v5950_v36 = vld [vmem:[#allocation7 + $0xdf8] sm:$0xf0] }
 0x142   : > { %2598 = vmatpush.bf16.msrb.mxu2 %v5949_v49  ;;  %2567 = vmatmul.bf16.vlgmr.msra.gmra.mxu3 %v8570_v4  ;;  %v7975_v42 = vld [vmem:[#allocation7 + $0xef4] sm:$0xf0]  ;;  %v7915_v23 = vld [vmem:[#allocation7 + $0xd1c] sm:$0xf] }
 0x143   : > { %2611 = vmatpush.bf16.msrb.mxu3 %v6205_v52  ;;  %v5244_v44 = vld [vmem:[#allocation7 + $0x858] sm:$0xf]  ;;  %v6077_v49 = vor.u32 %v7975_v42, %v6076_v41  ;;  %v6206_v41 = vld [vmem:[#allocation7 + $0xff8] sm:$0xf0] }
 0x144   : > { %2574 = vmatpush.bf16.msrb.mxu0 %v5373_v56  ;;  %2587 = vmatpush.bf16.msrb.mxu1 %v5629_v60  ;;  %v7767_v45 = vld [vmem:[#allocation7 + $0x874] sm:$0xf0]  ;;  %v2295_v52 = vpop.f32.mrf.mxu2  ;;  %v2308_v60 = vpop.f32.mrf.mxu3 }
 0x145   : > { %v7831_v48 = vld [vmem:[#allocation7 + $0xa74] sm:$0xf0]  ;;  %v5245_v53 = vor.u32 %v7767_v45, %v5244_v44  ;;  %v2296_v59 = vadd.f32 %v2295_v52, %v2283_v12  ;;  %v7795_v44 = vld [vmem:[#allocation7 + $0x95c] sm:$0xf] }
 0x146   : > { %2599 = vmatpush.bf16.msrb.mxu2 %v5917_v0  ;;  %v5788_v50 = vld [vmem:[#allocation7 + $0xc98] sm:$0xf]  ;;  %v5501_v61 = vor.u32 %v7831_v48, %v5500_v47  ;;  %v5374_v45 = vld [vmem:[#allocation7 + $0x978] sm:$0xf0] }
 0x147   : > { %2612 = vmatpush.bf16.msrb.mxu3 %v6173_v5  ;;  %v7903_v51 = vld [vmem:[#allocation7 + $0xcb4] sm:$0xf0]  ;;  %v5438_v5 = vld [vmem:[#allocation7 + $0x9f8] sm:$0xf0]  ;;  %v8594_v7 = vadd.f32 %v2308_v60, %v2296_v59  ;;  %v2321_v8 = vpop.f32.mrf.mxu0 }
 0x148   : > { %2575 = vmatpush.bf16.msrb.mxu0 %v5341_v9  ;;  %2588 = vmatpush.bf16.msrb.mxu1 %v5597_v13  ;;  %v6044_v54 = vld [vmem:[#allocation7 + $0xe98] sm:$0xf]  ;;  %v5789_v2 = vor.u32 %v7903_v51, %v5788_v50  ;;  %v2334_v12 = vpop.f32.mrf.mxu1  ;;  %v5630_v50 = vld [vmem:[#allocation7 + $0xb78] sm:$0xf0] }
 0x149   : > { %v7967_v56 = vld [vmem:[#allocation7 + $0xeb4] sm:$0xf0]  ;;  %v8596_v17 = vadd.f32 %v2334_v12, %v2321_v8  ;;  %v6174_v59 = vld [vmem:[#allocation7 + $0xfb8] sm:$0xf0] }
 0x14a   : > { %2600 = vmatpush.bf16.msrb.mxu2 %v5885_v16  ;;  %v5212_v57 = vld [vmem:[#allocation7 + $0x818] sm:$0xf]  ;;  %v6045_v9 = vor.u32 %v7967_v56, %v6044_v54  ;;  %v5918_v54 = vld [vmem:[#allocation7 + $0xdb8] sm:$0xf0]  ;;  %v5377_v56 = vor.u32 %v7795_v44, %v5374_v45 }
 0x14b   : > { %2613 = vmatpush.bf16.msrb.mxu3 %v6141_v19  ;;  %v7759_v63 = vld [vmem:[#allocation7 + $0x834] sm:$0xf0]  ;;  %v5441_v19 = vor.u32 %v7811_v3, %v5438_v5  ;;  %v5886_v8 = vld [vmem:[#allocation7 + $0xd78] sm:$0xf0] }
 0x14c   : > { %2576 = vmatpush.bf16.msrb.mxu0 %v5309_v22  ;;  %2589 = vmatpush.bf16.msrb.mxu1 %v5565_v25  ;;  %v5468_v0 = vld [vmem:[#allocation7 + $0xa18] sm:$0xf]  ;;  %v5213_v14 = vor.u32 %v7759_v63, %v5212_v57  ;;  %v5662_v25 = vld [vmem:[#allocation7 + $0xbb8] sm:$0xf0]  ;;  %v2297_v32 = vpop.f32.mrf.mxu2  ;;  %v2310_v37 = vpop.f32.mrf.mxu3 }
 0x14d   : > { %v7823_v1 = vld [vmem:[#allocation7 + $0xa34] sm:$0xf0]  ;;  %v5665_v42 = vor.u32 %v7867_v24, %v5662_v25  ;;  %v7995_v57 = vld [vmem:[#allocation7 + $0xf9c] sm:$0xf] }
 0x14e   : > { %2601 = vmatpush.bf16.msrb.mxu2 %v5853_v29  ;;  %v5756_v11 = vld [vmem:[#allocation7 + $0xc58] sm:$0xf]  ;;  %v5469_v18 = vor.u32 %v7823_v1, %v5468_v0  ;;  %v5342_v63 = vld [vmem:[#allocation7 + $0x938] sm:$0xf0]  ;;  %v6177_v5 = vor.u32 %v7995_v57, %v6174_v59 }
 0x14f   : > { %2614 = vmatpush.bf16.msrb.mxu3 %v6109_v35  ;;  %v7895_v13 = vld [vmem:[#allocation7 + $0xc74] sm:$0xf0]  ;;  %v7939_v35 = vld [vmem:[#allocation7 + $0xddc] sm:$0xf] }
 0x150   : > { %2577 = vmatpush.bf16.msrb.mxu0 %v5277_v39  ;;  %2590 = vmatpush.bf16.msrb.mxu1 %v5533_v43  ;;  %v6012_v15 = vld [vmem:[#allocation7 + $0xe58] sm:$0xf]  ;;  %v5757_v22 = vor.u32 %v7895_v13, %v5756_v11  ;;  %v8003_v39 = vld [vmem:[#allocation7 + $0xfdc] sm:$0xf]  ;;  %v5953_v48 = vor.u32 %v7939_v35, %v5950_v36  ;;  %v2336_v51 = vpop.f32.mrf.mxu1 }
 0x151   : > { %v7959_v16 = vld [vmem:[#allocation7 + $0xe74] sm:$0xf0]  ;;  %v6209_v52 = vor.u32 %v8003_v39, %v6206_v41  ;;  %v7851_v1 = vld [vmem:[#allocation7 + $0xb1c] sm:$0xf] }
 0x152   : > { %2602 = vmatpush.bf16.msrb.mxu2 %v5821_v46  ;;  %v6013_v26 = vor.u32 %v7959_v16, %v6012_v15  ;;  %v5724_v27 = vld [vmem:[#allocation7 + $0xc18] sm:$0xf]  ;;  %v2323_v46 = vpop.f32.mrf.mxu0  ;;  %v7987_v13 = vld [vmem:[#allocation7 + $0xf5c] sm:$0xf] }
 0x153   : > { %2615 = vmatpush.bf16.msrb.mxu3 %v6077_v49  ;;  %v7887_v29 = vld [vmem:[#allocation7 + $0xc34] sm:$0xf0]  ;;  %v7859_v49 = vld [vmem:[#allocation7 + $0xb5c] sm:$0xf] }
 0x154   : > { %2578 = vmatpush.bf16.msrb.mxu0 %v5245_v53  ;;  %2591 = vmatpush.bf16.msrb.mxu1 %v5501_v61  ;;  %v5980_v31 = vld [vmem:[#allocation7 + $0xe18] sm:$0xf]  ;;  %v5725_v43 = vor.u32 %v7887_v29, %v5724_v27  ;;  %v7931_v53 = vld [vmem:[#allocation7 + $0xd9c] sm:$0xf]  ;;  %v5633_v60 = vor.u32 %v7859_v49, %v5630_v50  ;;  %v2347_v3 = vpop.f32.mrf.mxu2  ;;  %v2360_v10 = vpop.f32.mrf.mxu3 }
 0x155   : > { %v7951_v34 = vld [vmem:[#allocation7 + $0xe34] sm:$0xf0]  ;;  %v7787_v61 = vld [vmem:[#allocation7 + $0x91c] sm:$0xf]  ;;  %v5921_v0 = vor.u32 %v7931_v53, %v5918_v54 }
 0x156   : > { %2603 = vmatpush.bf16.msrb.mxu2 %v5789_v2  ;;  %v5981_v47 = vor.u32 %v7951_v34, %v5980_v31  ;;  %v5598_v2 = vld [vmem:[#allocation7 + $0xb38] sm:$0xf0]  ;;  %v5345_v11 = vor.u32 %v7787_v61, %v5342_v63 }
 0x157   : > { %2616 = vmatpush.bf16.msrb.mxu3 %v6045_v9  ;;  %v2348_v9 = vadd.f32 %v2347_v3, %v8596_v17  ;;  %v6142_v12 = vld [vmem:[#allocation7 + $0xf78] sm:$0xf0] }
 0x158   : > { %2579 = vmatpush.bf16.msrb.mxu0 %v5213_v14  ;;  %2592 = vmatpush.bf16.msrb.mxu1 %v5469_v18  ;;  %v5601_v14 = vor.u32 %v7851_v1, %v5598_v2  ;;  %v7779_v15 = vld [vmem:[#allocation7 + $0x8dc] sm:$0xf] }
 0x159   : > { %v5310_v16 = vld [vmem:[#allocation7 + $0x8f8] sm:$0xf0]  ;;  %v8603_v18 = vadd.f32 %v2360_v10, %v2348_v9  ;;  %v6436_v9 = vld [vmem:[#allocation7 + $0x1c0] sm:$0xf] }
 0x15a   : > { %2604 = vmatpush.bf16.msrb.mxu2 %v5757_v22  ;;  %v2373_v17 = vpop.f32.mrf.mxu0  ;;  %v6145_v22 = vor.u32 %v7987_v13, %v6142_v12  ;;  %v5854_v24 = vld [vmem:[#allocation7 + $0xd38] sm:$0xf0]  ;;  %v2386_v25 = vpop.f32.mrf.mxu1  ;;  %v7556_v10 = vld [vmem:[#allocation7 + $0x1dc] sm:$0xf0] }
 0x15b   : > { %2617 = vmatpush.bf16.msrb.mxu3 %v6013_v26  ;;  %2580 = vmatmul.bf16.vlgmr.msrb.gmra.mxu0 %v8555_v33  ;;  %v5313_v26 = vor.u32 %v7779_v15, %v5310_v16  ;;  %v7979_v27 = vld [vmem:[#allocation7 + $0xf1c] sm:$0xf]  ;;  %v2387_v31 = vadd.f32 %v2386_v25, %v2373_v17  ;;  %v5857_v36 = vor.u32 %v7915_v23, %v5854_v24  ;;  %v7620_v12 = vld [vmem:[#allocation7 + $0x3dc] sm:$0xf0] }
 0x15c   : > { %2624 = vmatpush.bf16.msra.mxu0 %v5441_v19  ;;  %2637 = vmatpush.bf16.msra.mxu1 %v5697_v21  ;;  %v5889_v19 = vor.u32 %v7923_v6, %v5886_v8  ;;  %v5566_v21 = vld [vmem:[#allocation7 + $0xaf8] sm:$0xf0]  ;;  %v2349_v39 = vpop.f32.mrf.mxu2  ;;  %v2362_v44 = vpop.f32.mrf.mxu3  ;;  %v6437_v24 = vor.u32 %v7556_v10, %v6436_v9  ;;  %v6404_v25 = vld [vmem:[#allocation7 + $0x180] sm:$0xf] }
 0x15d   : > { %2593 = vmatmul.bf16.vlgmr.msrb.gmra.mxu1 %v8558_v40  ;;  %v6110_v29 = vld [vmem:[#allocation7 + $0xf38] sm:$0xf0]  ;;  %v5569_v32 = vor.u32 %v7843_v20, %v5566_v21  ;;  %v7204_v44 = vld [vmem:[#allocation7 + $0x7c0] sm:$0xf] }
 0x15e   : > { %2605 = vmatpush.bf16.msrb.mxu2 %v5725_v43  ;;  %v7771_v34 = vld [vmem:[#allocation7 + $0x89c] sm:$0xf]  ;;  %v6113_v41 = vor.u32 %v7979_v27, %v6110_v29  ;;  %v7548_v29 = vld [vmem:[#allocation7 + $0x19c] sm:$0xf0] }
 0x15f   : > { %2618 = vmatpush.bf16.msrb.mxu3 %v5981_v47  ;;  %v5278_v35 = vld [vmem:[#allocation7 + $0x8b8] sm:$0xf0]  ;;  %v7668_v9 = vld [vmem:[#allocation7 + $0x55c] sm:$0xf0] }
 0x160   : > { %2625 = vmatpush.bf16.msra.mxu0 %v5409_v38  ;;  %2638 = vmatpush.bf16.msra.mxu1 %v5665_v42  ;;  %v7835_v37 = vld [vmem:[#allocation7 + $0xa9c] sm:$0xf]  ;;  %v5281_v45 = vor.u32 %v7771_v34, %v5278_v35  ;;  %v7612_v34 = vld [vmem:[#allocation7 + $0x39c] sm:$0xf0] }
 0x161   : > { %2606 = vmatmul.bf16.vlgmr.msrb.gmra.mxu2 %v8567_v62  ;;  %v5534_v38 = vld [vmem:[#allocation7 + $0xab8] sm:$0xf0] }
 0x162   : > { %2650 = vmatpush.bf16.msra.mxu2 %v5953_v48  ;;  %2619 = vmatmul.bf16.vlgmr.msrb.gmra.mxu3 %v8570_v4  ;;  %v7907_v42 = vld [vmem:[#allocation7 + $0xcdc] sm:$0xf]  ;;  %v5537_v48 = vor.u32 %v7835_v37, %v5534_v38  ;;  %v2375_v54 = vpop.f32.mrf.mxu0 }
 0x163   : > { %2663 = vmatpush.bf16.msra.mxu3 %v6209_v52  ;;  %v5822_v43 = vld [vmem:[#allocation7 + $0xcf8] sm:$0xf0] }
 0x164   : > { %2626 = vmatpush.bf16.msra.mxu0 %v5377_v56  ;;  %2639 = vmatpush.bf16.msra.mxu1 %v5633_v60  ;;  %v7971_v46 = vld [vmem:[#allocation7 + $0xedc] sm:$0xf]  ;;  %v5825_v51 = vor.u32 %v7907_v42, %v5822_v43  ;;  %v2388_v60 = vpop.f32.mrf.mxu1  ;;  %v2399_v16 = vpop.f32.mrf.mxu2  ;;  %v7684_v42 = vld [vmem:[#allocation7 + $0x5dc] sm:$0xf0]  ;;  %v6405_v43 = vor.u32 %v7548_v29, %v6404_v25 }
 0x165   : > { %v6078_v47 = vld [vmem:[#allocation7 + $0xef8] sm:$0xf0]  ;;  %v7676_v60 = vld [vmem:[#allocation7 + $0x59c] sm:$0xf0] }
 0x166   : > { %2651 = vmatpush.bf16.msra.mxu2 %v5921_v0  ;;  %v7763_v49 = vld [vmem:[#allocation7 + $0x85c] sm:$0xf]  ;;  %v6081_v56 = vor.u32 %v7971_v46, %v6078_v47  ;;  %v7108_v25 = vld [vmem:[#allocation7 + $0x700] sm:$0xf] }
 0x167   : > { %2664 = vmatpush.bf16.msra.mxu3 %v6177_v5  ;;  %v5246_v50 = vld [vmem:[#allocation7 + $0x878] sm:$0xf0]  ;;  %v6276_v29 = vld [vmem:[#allocation7 + $0x80] sm:$0xf] }
 0x168   : > { %2627 = vmatpush.bf16.msra.mxu0 %v5345_v11  ;;  %2640 = vmatpush.bf16.msra.mxu1 %v5601_v14  ;;  %v7827_v52 = vld [vmem:[#allocation7 + $0xa5c] sm:$0xf]  ;;  %v5249_v61 = vor.u32 %v7763_v49, %v5246_v50  ;;  %v6692_v11 = vld [vmem:[#allocation7 + $0x3c0] sm:$0xf] }
 0x169   : > { %v5502_v53 = vld [vmem:[#allocation7 + $0xa78] sm:$0xf0]  ;;  %v7540_v49 = vld [vmem:[#allocation7 + $0x15c] sm:$0xf0] }
 0x16a   : > { %2652 = vmatpush.bf16.msra.mxu2 %v5889_v19  ;;  %v7899_v57 = vld [vmem:[#allocation7 + $0xc9c] sm:$0xf]  ;;  %v5505_v2 = vor.u32 %v7827_v52, %v5502_v53  ;;  %v2412_v19 = vpop.f32.mrf.mxu3  ;;  %v6628_v52 = vld [vmem:[#allocation7 + $0x340] sm:$0xf] }
 0x16b   : > { %2665 = vmatpush.bf16.msra.mxu3 %v6145_v22  ;;  %v5790_v59 = vld [vmem:[#allocation7 + $0xcb8] sm:$0xf0]  ;;  %v2400_v22 = vadd.f32 %v2399_v16, %v2387_v31  ;;  %v6948_v31 = vld [vmem:[#allocation7 + $0x5c0] sm:$0xf] }
 0x16c   : > { %2628 = vmatpush.bf16.msra.mxu0 %v5313_v26  ;;  %2641 = vmatpush.bf16.msra.mxu1 %v5569_v32  ;;  %v7963_v63 = vld [vmem:[#allocation7 + $0xe9c] sm:$0xf]  ;;  %v5793_v8 = vor.u32 %v7899_v57, %v5790_v59  ;;  %v6693_v26 = vor.u32 %v7620_v12, %v6692_v11  ;;  %v6660_v32 = vld [vmem:[#allocation7 + $0x380] sm:$0xf]  ;;  %v2401_v54 = vpop.f32.mrf.mxu2 }
 0x16d   : > { %v6046_v0 = vld [vmem:[#allocation7 + $0xeb8] sm:$0xf0]  ;;  %v8605_v35 = vadd.f32 %v2412_v19, %v2400_v22  ;;  %v6661_v46 = vor.u32 %v7612_v34, %v6660_v32  ;;  %v7604_v53 = vld [vmem:[#allocation7 + $0x35c] sm:$0xf0] }
 0x16e   : > { %2653 = vmatpush.bf16.msra.mxu2 %v5857_v36  ;;  %v7755_v1 = vld [vmem:[#allocation7 + $0x81c] sm:$0xf]  ;;  %v6049_v13 = vor.u32 %v7963_v63, %v6046_v0  ;;  %v6916_v59 = vld [vmem:[#allocation7 + $0x580] sm:$0xf] }
 0x16f   : > { %2666 = vmatpush.bf16.msra.mxu3 %v6113_v41  ;;  %v5214_v3 = vld [vmem:[#allocation7 + $0x838] sm:$0xf0]  ;;  %v7172_v63 = vld [vmem:[#allocation7 + $0x780] sm:$0xf] }
 0x170   : > { %2629 = vmatpush.bf16.msra.mxu0 %v5281_v45  ;;  %2642 = vmatpush.bf16.msra.mxu1 %v5537_v48  ;;  %v7819_v5 = vld [vmem:[#allocation7 + $0xa1c] sm:$0xf]  ;;  %v5217_v20 = vor.u32 %v7755_v1, %v5214_v3  ;;  %v7748_v45 = vld [vmem:[#allocation7 + $0x7dc] sm:$0xf0]  ;;  %v6629_v1 = vor.u32 %v7604_v53, %v6628_v52  ;;  %v6917_v3 = vor.u32 %v7676_v60, %v6916_v59 }
 0x171   : > { %v5470_v6 = vld [vmem:[#allocation7 + $0xa38] sm:$0xf0]  ;;  %v6372_v48 = vld [vmem:[#allocation7 + $0x140] sm:$0xf]  ;;  %v7205_v57 = vor.u32 %v7748_v45, %v7204_v44 }
 0x172   : > { %2654 = vmatpush.bf16.msra.mxu2 %v5825_v51  ;;  %v7891_v14 = vld [vmem:[#allocation7 + $0xc5c] sm:$0xf]  ;;  %v5473_v23 = vor.u32 %v7819_v5, %v5470_v6  ;;  %v6949_v51 = vor.u32 %v7684_v42, %v6948_v31  ;;  %v7740_v0 = vld [vmem:[#allocation7 + $0x79c] sm:$0xf0] }
 0x173   : > { %2667 = vmatpush.bf16.msra.mxu3 %v6081_v56  ;;  %v5758_v15 = vld [vmem:[#allocation7 + $0xc78] sm:$0xf0]  ;;  %v2414_v56 = vpop.f32.mrf.mxu3  ;;  %v6596_v5 = vld [vmem:[#allocation7 + $0x300] sm:$0xf] }
 0x174   : > { %2630 = vmatpush.bf16.msra.mxu0 %v5249_v61  ;;  %v7955_v21 = vld [vmem:[#allocation7 + $0xe5c] sm:$0xf]  ;;  %2643 = vmatpush.bf16.msra.mxu1 %v5505_v2  ;;  %v5761_v27 = vor.u32 %v7891_v14, %v5758_v15  ;;  %v6373_v61 = vor.u32 %v7540_v49, %v6372_v48  ;;  %v6340_v2 = vld [vmem:[#allocation7 + $0x100] sm:$0xf] }
 0x175   : > { %v6014_v17 = vld [vmem:[#allocation7 + $0xe78] sm:$0xf0]  ;;  %v7596_v6 = vld [vmem:[#allocation7 + $0x31c] sm:$0xf0] }
 0x176   : > { %2655 = vmatpush.bf16.msra.mxu2 %v5793_v8  ;;  %v6017_v36 = vor.u32 %v7955_v21, %v6014_v17  ;;  %v7883_v37 = vld [vmem:[#allocation7 + $0xc1c] sm:$0xf]  ;;  %v6884_v8 = vld [vmem:[#allocation7 + $0x540] sm:$0xf]  ;;  %v6597_v12 = vor.u32 %v7596_v6, %v6596_v5  ;;  %v7616_v5 = vld [vmem:[#allocation7 + $0x3c4] sm:$0xf] }
 0x177   : > { %2668 = vmatpush.bf16.msra.mxu3 %v6049_v13  ;;  %v5726_v38 = vld [vmem:[#allocation7 + $0xc38] sm:$0xf0]  ;;  %v7140_v11 = vld [vmem:[#allocation7 + $0x740] sm:$0xf]  ;;  %v6885_v16 = vor.u32 %v7668_v9, %v6884_v8  ;;  %v6694_v8 = vld [vmem:[#allocation7 + $0x3e0] sm:$0xf0] }
 0x178   : > { %v7947_v39 = vld [vmem:[#allocation7 + $0xe1c] sm:$0xf]  ;;  %2631 = vmatpush.bf16.msra.mxu0 %v5217_v20  ;;  %2644 = vmatpush.bf16.msra.mxu1 %v5473_v23  ;;  %v5729_v47 = vor.u32 %v7883_v37, %v5726_v38  ;;  %v7732_v13 = vld [vmem:[#allocation7 + $0x75c] sm:$0xf0]  ;;  %v2425_v21 = vpop.f32.mrf.mxu0 }
 0x179   : > { %v5982_v41 = vld [vmem:[#allocation7 + $0xe38] sm:$0xf0]  ;;  %v6308_v14 = vld [vmem:[#allocation7 + $0xc0] sm:$0xf]  ;;  %v7141_v17 = vor.u32 %v7732_v13, %v7140_v11 }
 0x17a   : > { %2656 = vmatpush.bf16.msra.mxu2 %v5761_v27  ;;  %v5985_v50 = vor.u32 %v7947_v39, %v5982_v41  ;;  %v7524_v15 = vld [vmem:[#allocation7 + $0xdc] sm:$0xf0] }
 0x17b   : > { %2669 = vmatpush.bf16.msra.mxu3 %v6017_v36  ;;  %2632 = vmatmul.bf16.vlgmr.msra.gmra.mxu0 %v8555_v33  ;;  %v7532_v33 = vld [vmem:[#allocation7 + $0x11c] sm:$0xf0] }
 0x17c   : > { %3956 = vmatpush.bf16.msrb.mxu0 %v6437_v24  ;;  %3969 = vmatpush.bf16.msrb.mxu1 %v6693_v26  ;;  %v6341_v10 = vor.u32 %v7532_v33, %v6340_v2  ;;  %v6564_v19 = vld [vmem:[#allocation7 + $0x2c0] sm:$0xf]  ;;  %v6309_v24 = vor.u32 %v7524_v15, %v6308_v14  ;;  %v7552_v33 = vld [vmem:[#allocation7 + $0x1c4] sm:$0xf] }
 0x17d   : > { %2645 = vmatmul.bf16.vlgmr.msra.gmra.mxu1 %v8558_v40  ;;  %v7173_v40 = vor.u32 %v7740_v0, %v7172_v63  ;;  %v7588_v20 = vld [vmem:[#allocation7 + $0x2dc] sm:$0xf0] }
 0x17e   : > { %2657 = vmatpush.bf16.msra.mxu2 %v5729_v47  ;;  %v6852_v22 = vld [vmem:[#allocation7 + $0x500] sm:$0xf] }
 0x17f   : > { %2670 = vmatpush.bf16.msra.mxu3 %v5985_v50  ;;  %v7660_v23 = vld [vmem:[#allocation7 + $0x51c] sm:$0xf0] }
 0x180   : > { %3957 = vmatpush.bf16.msrb.mxu0 %v6405_v43  ;;  %3970 = vmatpush.bf16.msrb.mxu1 %v6661_v46  ;;  %v7724_v26 = vld [vmem:[#allocation7 + $0x71c] sm:$0xf0]  ;;  %v6853_v34 = vor.u32 %v7660_v23, %v6852_v22  ;;  %v2427_v50 = vpop.f32.mrf.mxu0  ;;  %v6406_v23 = vld [vmem:[#allocation7 + $0x1a0] sm:$0xf0] }
 0x181   : > { %2658 = vmatmul.bf16.vlgmr.msra.gmra.mxu2 %v8567_v62  ;;  %v2438_v62 = vpop.f32.mrf.mxu1  ;;  %v7516_v32 = vld [vmem:[#allocation7 + $0x9c] sm:$0xf0]  ;;  %v7109_v38 = vor.u32 %v7724_v26, %v7108_v25  ;;  %v7672_v50 = vld [vmem:[#allocation7 + $0x584] sm:$0xf] }
 0x182   : > { %3982 = vmatpush.bf16.msrb.mxu2 %v6949_v51  ;;  %2671 = vmatmul.bf16.vlgmr.msra.gmra.mxu3 %v8570_v4  ;;  %v2439_v27 = vadd.f32 %v2438_v62, %v2425_v21  ;;  %v6565_v4 = vor.u32 %v7588_v20, %v6564_v19  ;;  %v6532_v36 = vld [vmem:[#allocation7 + $0x280] sm:$0xf]  ;;  %v6277_v31 = vor.u32 %v7516_v32, %v6276_v29  ;;  %v7544_v20 = vld [vmem:[#allocation7 + $0x184] sm:$0xf] }
 0x183   : > { %3995 = vmatpush.bf16.msrb.mxu3 %v7205_v57  ;;  %v7580_v37 = vld [vmem:[#allocation7 + $0x29c] sm:$0xf0]  ;;  %v7608_v62 = vld [vmem:[#allocation7 + $0x384] sm:$0xf] }
 0x184   : > { %3958 = vmatpush.bf16.msrb.mxu0 %v6373_v61  ;;  %3971 = vmatpush.bf16.msrb.mxu1 %v6629_v1  ;;  %v6820_v39 = vld [vmem:[#allocation7 + $0x4c0] sm:$0xf]  ;;  %v6533_v44 = vor.u32 %v7580_v37, %v6532_v36  ;;  %v2451_v6 = vpop.f32.mrf.mxu2  ;;  %v7680_v32 = vld [vmem:[#allocation7 + $0x5c4] sm:$0xf]  ;;  %v6409_v36 = vor.u32 %v7544_v20, %v6406_v23 }
 0x185   : > { %v7652_v41 = vld [vmem:[#allocation7 + $0x4dc] sm:$0xf0]  ;;  %v2452_v11 = vadd.f32 %v2451_v6, %v2439_v27  ;;  %v2464_v13 = vpop.f32.mrf.mxu3  ;;  %v7744_v37 = vld [vmem:[#allocation7 + $0x7c4] sm:$0xf] }
 0x186   : > { %3983 = vmatpush.bf16.msrb.mxu2 %v6917_v3  ;;  %v7076_v42 = vld [vmem:[#allocation7 + $0x6c0] sm:$0xf]  ;;  %v6821_v47 = vor.u32 %v7652_v41, %v6820_v39  ;;  %v6438_v3 = vld [vmem:[#allocation7 + $0x1e0] sm:$0xf0] }
 0x187   : > { %3996 = vmatpush.bf16.msrb.mxu3 %v7173_v40  ;;  %v7716_v43 = vld [vmem:[#allocation7 + $0x6dc] sm:$0xf0]  ;;  %v6441_v19 = vor.u32 %v7552_v33, %v6438_v3  ;;  %v8611_v21 = vadd.f32 %v2464_v13, %v2452_v11  ;;  %v7728_v3 = vld [vmem:[#allocation7 + $0x744] sm:$0xf] }
 0x188   : > { %3959 = vmatpush.bf16.msrb.mxu0 %v6341_v10  ;;  %3972 = vmatpush.bf16.msrb.mxu1 %v6597_v12  ;;  %v6244_v45 = vld [vmem:[#allocation7 + $0x40] sm:$0xf]  ;;  %v7077_v51 = vor.u32 %v7716_v43, %v7076_v42  ;;  %v6374_v42 = vld [vmem:[#allocation7 + $0x160] sm:$0xf0] }
 0x189   : > { %v7508_v46 = vld [vmem:[#allocation7 + $0x5c] sm:$0xf0]  ;;  %v2440_v54 = vpop.f32.mrf.mxu1  ;;  %v6566_v11 = vld [vmem:[#allocation7 + $0x2e0] sm:$0xf0] }
 0x18a   : > { %3984 = vmatpush.bf16.msrb.mxu2 %v6885_v16  ;;  %v6500_v48 = vld [vmem:[#allocation7 + $0x240] sm:$0xf]  ;;  %v6245_v56 = vor.u32 %v7508_v46, %v6244_v45  ;;  %v7600_v46 = vld [vmem:[#allocation7 + $0x344] sm:$0xf] }
 0x18b   : > { %3997 = vmatpush.bf16.msrb.mxu3 %v7141_v17  ;;  %v7572_v49 = vld [vmem:[#allocation7 + $0x25c] sm:$0xf0]  ;;  %v6697_v17 = vor.u32 %v7616_v5, %v6694_v8  ;;  %v7174_v54 = vld [vmem:[#allocation7 + $0x7a0] sm:$0xf0] }
 0x18c   : > { %3960 = vmatpush.bf16.msrb.mxu0 %v6309_v24  ;;  %3973 = vmatpush.bf16.msrb.mxu1 %v6565_v4  ;;  %v6788_v52 = vld [vmem:[#allocation7 + $0x480] sm:$0xf]  ;;  %v6501_v61 = vor.u32 %v7572_v49, %v6500_v48  ;;  %v6662_v24 = vld [vmem:[#allocation7 + $0x3a0] sm:$0xf0]  ;;  %v2453_v43 = vpop.f32.mrf.mxu2 }
 0x18d   : > { %v7644_v53 = vld [vmem:[#allocation7 + $0x49c] sm:$0xf0]  ;;  %v6665_v39 = vor.u32 %v7608_v62, %v6662_v24  ;;  %v2466_v48 = vpop.f32.mrf.mxu3  ;;  %v7142_v5 = vld [vmem:[#allocation7 + $0x760] sm:$0xf0] }
 0x18e   : > { %3985 = vmatpush.bf16.msrb.mxu2 %v6853_v34  ;;  %v7044_v57 = vld [vmem:[#allocation7 + $0x680] sm:$0xf]  ;;  %v6789_v2 = vor.u32 %v7644_v53, %v6788_v52  ;;  %v6950_v34 = vld [vmem:[#allocation7 + $0x5e0] sm:$0xf0] }
 0x18f   : > { %3998 = vmatpush.bf16.msrb.mxu3 %v7109_v38  ;;  %v7708_v59 = vld [vmem:[#allocation7 + $0x69c] sm:$0xf0]  ;;  %v7206_v38 = vld [vmem:[#allocation7 + $0x7e0] sm:$0xf0]  ;;  %v6953_v45 = vor.u32 %v7680_v32, %v6950_v34 }
 0x190   : > { %3961 = vmatpush.bf16.msrb.mxu0 %v6277_v31  ;;  %v6212_v60 = vld [vmem:[#allocation7] sm:$0xf]  ;;  %3974 = vmatpush.bf16.msrb.mxu1 %v6533_v44  ;;  %v7045_v40 = vor.u32 %v7708_v59, %v7044_v57  ;;  %v7536_v31 = vld [vmem:[#allocation7 + $0x144] sm:$0xf]  ;;  %v7209_v49 = vor.u32 %v7744_v37, %v7206_v38 }
 0x191   : > { %v7500_v63 = vld [vmem:[#allocation7 + $0x1c] sm:$0xf0]  ;;  %v6377_v52 = vor.u32 %v7536_v31, %v6374_v42  ;;  %v7736_v53 = vld [vmem:[#allocation7 + $0x784] sm:$0xf] }
 0x192   : > { %v6468_v0 = vld [vmem:[#allocation7 + $0x200] sm:$0xf]  ;;  %3986 = vmatpush.bf16.msrb.mxu2 %v6821_v47  ;;  %v6213_v12 = vor.u32 %v7500_v63, %v6212_v60  ;;  %v6630_v47 = vld [vmem:[#allocation7 + $0x360] sm:$0xf0] }
 0x193   : > { %v7564_v1 = vld [vmem:[#allocation7 + $0x21c] sm:$0xf0]  ;;  %3999 = vmatpush.bf16.msrb.mxu3 %v7077_v51  ;;  %v6918_v51 = vld [vmem:[#allocation7 + $0x5a0] sm:$0xf0] }
 0x194   : > { %v6756_v9 = vld [vmem:[#allocation7 + $0x440] sm:$0xf]  ;;  %3962 = vmatpush.bf16.msrb.mxu0 %v6245_v56  ;;  %3975 = vmatpush.bf16.msrb.mxu1 %v6501_v61  ;;  %v6469_v16 = vor.u32 %v7564_v1, %v6468_v0  ;;  %v6633_v56 = vor.u32 %v7600_v46, %v6630_v47  ;;  %v7528_v57 = vld [vmem:[#allocation7 + $0x104] sm:$0xf]  ;;  %v6921_v60 = vor.u32 %v7672_v50, %v6918_v51 }
 0x195   : > { %v7636_v10 = vld [vmem:[#allocation7 + $0x45c] sm:$0xf0]  ;;  %v6342_v59 = vld [vmem:[#allocation7 + $0x120] sm:$0xf0]  ;;  %v7177_v0 = vor.u32 %v7736_v53, %v7174_v54 }
 0x196   : > { %v7012_v14 = vld [vmem:[#allocation7 + $0x640] sm:$0xf]  ;;  %3987 = vmatpush.bf16.msrb.mxu2 %v6789_v2  ;;  %v6757_v22 = vor.u32 %v7636_v10, %v6756_v9  ;;  %v7592_v61 = vld [vmem:[#allocation7 + $0x304] sm:$0xf]  ;;  %v6345_v33 = vor.u32 %v7528_v57, %v6342_v59 }
 0x197   : > { %v7700_v15 = vld [vmem:[#allocation7 + $0x65c] sm:$0xf0]  ;;  %4000 = vmatpush.bf16.msrb.mxu3 %v7045_v40  ;;  %v6598_v63 = vld [vmem:[#allocation7 + $0x320] sm:$0xf0] }
 0x198   : > { %v7013_v25 = vor.u32 %v7700_v15, %v7012_v14  ;;  %v6724_v26 = vld [vmem:[#allocation7 + $0x400] sm:$0xf]  ;;  %3963 = vmatpush.bf16.msrb.mxu0 %v6213_v12  ;;  %3976 = vmatpush.bf16.msrb.mxu1 %v6469_v16  ;;  %v7664_v1 = vld [vmem:[#allocation7 + $0x544] sm:$0xf]  ;;  %v6601_v6 = vor.u32 %v7592_v61, %v6598_v63  ;;  %v2477_v13 = vpop.f32.mrf.mxu0  ;;  %v7145_v12 = vor.u32 %v7728_v3, %v7142_v5  ;;  %v7557_v61 = vld [vmem:[#allocation7 + $0x1e4] sm:$0xf0] }
 0x199   : > { %v7628_v27 = vld [vmem:[#allocation7 + $0x41c] sm:$0xf0]  ;;  %v6886_v2 = vld [vmem:[#allocation7 + $0x560] sm:$0xf0]  ;;  %v6700_v63 = vld [vmem:[#allocation7 + $0x3c8] sm:$0xf] }
 0x19a   : > { %v6980_v4 = vld [vmem:[#allocation7 + $0x600] sm:$0xf]  ;;  %3988 = vmatpush.bf16.msrb.mxu2 %v6757_v22  ;;  %v6725_v41 = vor.u32 %v7628_v27, %v6724_v26  ;;  %v7520_v40 = vld [vmem:[#allocation7 + $0xc4] sm:$0xf]  ;;  %v6889_v9 = vor.u32 %v7664_v1, %v6886_v2  ;;  %v2490_v16 = vpop.f32.mrf.mxu1  ;;  %v7621_v2 = vld [vmem:[#allocation7 + $0x3e4] sm:$0xf0] }
 0x19b   : > { %v7692_v29 = vld [vmem:[#allocation7 + $0x61c] sm:$0xf0]  ;;  %4001 = vmatpush.bf16.msrb.mxu3 %v7013_v25  ;;  %3964 = vmatmul.bf16.vlgmr.msrb.gmra.mxu0 %v8550_v28  ;;  %v6310_v8 = vld [vmem:[#allocation7 + $0xe0] sm:$0xf0]  ;;  %v2491_v22 = vadd.f32 %v2490_v16, %v2477_v13  ;;  %v6412_v13 = vld [vmem:[#allocation7 + $0x188] sm:$0xf] }
 0x19c   : > { %4008 = vmatpush.bf16.msra.mxu0 %v6441_v19  ;;  %4021 = vmatpush.bf16.msra.mxu1 %v6697_v17  ;;  %v6981_v44 = vor.u32 %v7692_v29, %v6980_v4  ;;  %v7584_v10 = vld [vmem:[#allocation7 + $0x2c4] sm:$0xf]  ;;  %v6313_v19 = vor.u32 %v7520_v40, %v6310_v8  ;;  %v7549_v16 = vld [vmem:[#allocation7 + $0x1a4] sm:$0xf0] }
 0x19d   : > { %3977 = vmatmul.bf16.vlgmr.msrb.gmra.mxu1 %v8552_v30  ;;  %v7656_v14 = vld [vmem:[#allocation7 + $0x504] sm:$0xf]  ;;  %v6569_v23 = vor.u32 %v7584_v10, %v6566_v11 }
 0x19e   : > { %3989 = vmatpush.bf16.msrb.mxu2 %v6725_v41  ;;  %v6854_v15 = vld [vmem:[#allocation7 + $0x520] sm:$0xf0] }
 0x19f   : > { %4002 = vmatpush.bf16.msrb.mxu3 %v6981_v44  ;;  %v7720_v20 = vld [vmem:[#allocation7 + $0x704] sm:$0xf]  ;;  %v6857_v25 = vor.u32 %v7656_v14, %v6854_v15  ;;  %v6701_v14 = vor.u32 %v7621_v2, %v6700_v63  ;;  %v7148_v63 = vld [vmem:[#allocation7 + $0x748] sm:$0xf] }
 0x1a0   : > { %4009 = vmatpush.bf16.msra.mxu0 %v6409_v36  ;;  %4022 = vmatpush.bf16.msra.mxu1 %v6665_v39  ;;  %v7110_v17 = vld [vmem:[#allocation7 + $0x720] sm:$0xf0]  ;;  %v2479_v44 = vpop.f32.mrf.mxu0  ;;  %v6316_v2 = vld [vmem:[#allocation7 + $0xc8] sm:$0xf] }
 0x1a1   : > { %3990 = vmatmul.bf16.vlgmr.msrb.gmra.mxu2 %v8562_v55  ;;  %v7512_v62 = vld [vmem:[#allocation7 + $0x84] sm:$0xf]  ;;  %v7113_v4 = vor.u32 %v7720_v20, %v7110_v17  ;;  %v7613_v20 = vld [vmem:[#allocation7 + $0x3a4] sm:$0xf0] }
 0x1a2   : > { %4034 = vmatpush.bf16.msra.mxu2 %v6953_v45  ;;  %4003 = vmatmul.bf16.vlgmr.msrb.gmra.mxu3 %v8564_v58  ;;  %v6278_v24 = vld [vmem:[#allocation7 + $0xa0] sm:$0xf0]  ;;  %v2492_v48 = vpop.f32.mrf.mxu1 }
 0x1a3   : > { %4047 = vmatpush.bf16.msra.mxu3 %v7209_v49  ;;  %v7576_v26 = vld [vmem:[#allocation7 + $0x284] sm:$0xf]  ;;  %v6281_v34 = vor.u32 %v7512_v62, %v6278_v24  ;;  %v7180_v48 = vld [vmem:[#allocation7 + $0x788] sm:$0xf] }
 0x1a4   : > { %4010 = vmatpush.bf16.msra.mxu0 %v6377_v52  ;;  %4023 = vmatpush.bf16.msra.mxu1 %v6633_v56  ;;  %v6534_v27 = vld [vmem:[#allocation7 + $0x2a0] sm:$0xf0] }
 0x1a5   : > { %v7648_v29 = vld [vmem:[#allocation7 + $0x4c4] sm:$0xf]  ;;  %v6537_v38 = vor.u32 %v7576_v26, %v6534_v27  ;;  %v7685_v26 = vld [vmem:[#allocation7 + $0x5e4] sm:$0xf0]  ;;  %v6413_v27 = vor.u32 %v7549_v16, %v6412_v13 }
 0x1a6   : > { %4035 = vmatpush.bf16.msra.mxu2 %v6921_v60  ;;  %v6822_v32 = vld [vmem:[#allocation7 + $0x4e0] sm:$0xf0]  ;;  %v6444_v60 = vld [vmem:[#allocation7 + $0x1c8] sm:$0xf] }
 0x1a7   : > { %4048 = vmatpush.bf16.msra.mxu3 %v7177_v0  ;;  %v7712_v36 = vld [vmem:[#allocation7 + $0x6c4] sm:$0xf]  ;;  %v6825_v31 = vor.u32 %v7648_v29, %v6822_v32  ;;  %v2503_v0 = vpop.f32.mrf.mxu2  ;;  %v6445_v11 = vor.u32 %v7557_v61, %v6444_v60  ;;  %v7749_v29 = vld [vmem:[#allocation7 + $0x7e4] sm:$0xf0] }
 0x1a8   : > { %4011 = vmatpush.bf16.msra.mxu0 %v6345_v33  ;;  %4024 = vmatpush.bf16.msra.mxu1 %v6601_v6  ;;  %v7078_v37 = vld [vmem:[#allocation7 + $0x6e0] sm:$0xf0]  ;;  %v2504_v5 = vadd.f32 %v2503_v0, %v2491_v22  ;;  %v2516_v6 = vpop.f32.mrf.mxu3  ;;  %v7669_v60 = vld [vmem:[#allocation7 + $0x564] sm:$0xf0] }
 0x1a9   : > { %v7504_v39 = vld [vmem:[#allocation7 + $0x44] sm:$0xf]  ;;  %v7081_v45 = vor.u32 %v7712_v36, %v7078_v37  ;;  %v6380_v36 = vld [vmem:[#allocation7 + $0x148] sm:$0xf] }
 0x1aa   : > { %4036 = vmatpush.bf16.msra.mxu2 %v6889_v9  ;;  %v6246_v41 = vld [vmem:[#allocation7 + $0x60] sm:$0xf0]  ;;  %v7541_v37 = vld [vmem:[#allocation7 + $0x164] sm:$0xf0] }
 0x1ab   : > { %4049 = vmatpush.bf16.msra.mxu3 %v7145_v12  ;;  %v7568_v42 = vld [vmem:[#allocation7 + $0x244] sm:$0xf]  ;;  %v6249_v49 = vor.u32 %v7504_v39, %v6246_v41  ;;  %v8617_v12 = vadd.f32 %v2516_v6, %v2504_v5  ;;  %v7733_v0 = vld [vmem:[#allocation7 + $0x764] sm:$0xf0] }
 0x1ac   : > { %4012 = vmatpush.bf16.msra.mxu0 %v6313_v19  ;;  %4025 = vmatpush.bf16.msra.mxu1 %v6569_v23  ;;  %v6502_v43 = vld [vmem:[#allocation7 + $0x260] sm:$0xf0]  ;;  %v6668_v19 = vld [vmem:[#allocation7 + $0x388] sm:$0xf] }
 0x1ad   : > { %v7640_v46 = vld [vmem:[#allocation7 + $0x484] sm:$0xf]  ;;  %v6505_v53 = vor.u32 %v7568_v42, %v6502_v43  ;;  %v6669_v32 = vor.u32 %v7613_v20, %v6668_v19  ;;  %v7605_v42 = vld [vmem:[#allocation7 + $0x364] sm:$0xf0] }
 0x1ae   : > { %4037 = vmatpush.bf16.msra.mxu2 %v6857_v25  ;;  %v6790_v47 = vld [vmem:[#allocation7 + $0x4a0] sm:$0xf0]  ;;  %v6956_v25 = vld [vmem:[#allocation7 + $0x5c8] sm:$0xf] }
 0x1af   : > { %4050 = vmatpush.bf16.msra.mxu3 %v7113_v4  ;;  %v7704_v50 = vld [vmem:[#allocation7 + $0x684] sm:$0xf]  ;;  %v6793_v59 = vor.u32 %v7640_v46, %v6790_v47  ;;  %v7212_v4 = vld [vmem:[#allocation7 + $0x7c8] sm:$0xf]  ;;  %v6957_v41 = vor.u32 %v7685_v26, %v6956_v25  ;;  %v6381_v47 = vor.u32 %v7541_v37, %v6380_v36 }
 0x1b0   : > { %4013 = vmatpush.bf16.msra.mxu0 %v6281_v34  ;;  %v7046_v51 = vld [vmem:[#allocation7 + $0x6a0] sm:$0xf0]  ;;  %4026 = vmatpush.bf16.msra.mxu1 %v6537_v38  ;;  %v2505_v38 = vpop.f32.mrf.mxu2  ;;  %v2518_v43 = vpop.f32.mrf.mxu3  ;;  %v7213_v44 = vor.u32 %v7749_v29, %v7212_v4  ;;  %v7677_v46 = vld [vmem:[#allocation7 + $0x5a4] sm:$0xf0] }
 0x1b1   : > { %v7496_v52 = vld [vmem:[#allocation7 + $0x4] sm:$0xf]  ;;  %v7049_v1 = vor.u32 %v7704_v50, %v7046_v51  ;;  %v6348_v51 = vld [vmem:[#allocation7 + $0x108] sm:$0xf] }
 0x1b2   : > { %v6214_v54 = vld [vmem:[#allocation7 + $0x20] sm:$0xf0]  ;;  %4038 = vmatpush.bf16.msra.mxu2 %v6825_v31  ;;  %v6636_v31 = vld [vmem:[#allocation7 + $0x348] sm:$0xf] }
 0x1b3   : > { %v7560_v56 = vld [vmem:[#allocation7 + $0x204] sm:$0xf]  ;;  %4051 = vmatpush.bf16.msra.mxu3 %v7081_v45  ;;  %v6217_v40 = vor.u32 %v7496_v52, %v6214_v54  ;;  %v6924_v45 = vld [vmem:[#allocation7 + $0x588] sm:$0xf]  ;;  %v6637_v50 = vor.u32 %v7605_v42, %v6636_v31 }
 0x1b4   : > { %v6470_v57 = vld [vmem:[#allocation7 + $0x220] sm:$0xf0]  ;;  %4014 = vmatpush.bf16.msra.mxu0 %v6249_v49  ;;  %4027 = vmatpush.bf16.msra.mxu1 %v6505_v53  ;;  %v7741_v49 = vld [vmem:[#allocation7 + $0x7a4] sm:$0xf0]  ;;  %v6925_v53 = vor.u32 %v7677_v46, %v6924_v45 }
 0x1b5   : > { %v7632_v33 = vld [vmem:[#allocation7 + $0x444] sm:$0xf]  ;;  %v6473_v10 = vor.u32 %v7560_v56, %v6470_v57  ;;  %v7533_v52 = vld [vmem:[#allocation7 + $0x124] sm:$0xf0]  ;;  %v7181_v57 = vor.u32 %v7741_v49, %v7180_v48 }
 0x1b6   : > { %v6758_v3 = vld [vmem:[#allocation7 + $0x460] sm:$0xf0]  ;;  %4039 = vmatpush.bf16.msra.mxu2 %v6793_v59  ;;  %v6604_v54 = vld [vmem:[#allocation7 + $0x308] sm:$0xf]  ;;  %v6349_v61 = vor.u32 %v7533_v52, %v6348_v51 }
 0x1b7   : > { %v7696_v8 = vld [vmem:[#allocation7 + $0x644] sm:$0xf]  ;;  %v6761_v15 = vor.u32 %v7632_v33, %v6758_v3  ;;  %4052 = vmatpush.bf16.msra.mxu3 %v7049_v1  ;;  %v7597_v56 = vld [vmem:[#allocation7 + $0x324] sm:$0xf0] }
 0x1b8   : > { %v7014_v9 = vld [vmem:[#allocation7 + $0x660] sm:$0xf0]  ;;  %4015 = vmatpush.bf16.msra.mxu0 %v6217_v40  ;;  %4028 = vmatpush.bf16.msra.mxu1 %v6473_v10  ;;  %v6892_v59 = vld [vmem:[#allocation7 + $0x548] sm:$0xf]  ;;  %v6605_v1 = vor.u32 %v7597_v56, %v6604_v54  ;;  %v2529_v40 = vpop.f32.mrf.mxu0  ;;  %v7553_v54 = vld [vmem:[#allocation7 + $0x1cc] sm:$0xf] }
 0x1b9   : > { %v7017_v17 = vor.u32 %v7696_v8, %v7014_v9  ;;  %v7624_v22 = vld [vmem:[#allocation7 + $0x404] sm:$0xf]  ;;  %v7525_v33 = vld [vmem:[#allocation7 + $0xe4] sm:$0xf0]  ;;  %v6893_v3 = vor.u32 %v7669_v60, %v6892_v59  ;;  %v7149_v8 = vor.u32 %v7733_v0, %v7148_v63  ;;  %v6446_v56 = vld [vmem:[#allocation7 + $0x1e8] sm:$0xf0] }
 0x1ba   : > { %v6726_v23 = vld [vmem:[#allocation7 + $0x420] sm:$0xf0]  ;;  %4040 = vmatpush.bf16.msra.mxu2 %v6761_v15  ;;  %v6572_v5 = vld [vmem:[#allocation7 + $0x2c8] sm:$0xf]  ;;  %v6317_v13 = vor.u32 %v7525_v33, %v6316_v2 }
 0x1bb   : > { %v7688_v62 = vld [vmem:[#allocation7 + $0x604] sm:$0xf]  ;;  %v6729_v34 = vor.u32 %v7624_v22, %v6726_v23  ;;  %4053 = vmatpush.bf16.msra.mxu3 %v7017_v17  ;;  %4016 = vmatmul.bf16.vlgmr.msra.gmra.mxu0 %v8550_v28  ;;  %v7589_v6 = vld [vmem:[#allocation7 + $0x2e4] sm:$0xf0] }
 0x1bc   : > { %v6982_v24 = vld [vmem:[#allocation7 + $0x620] sm:$0xf0]  ;;  %4060 = vmatpush.bf16.msrb.mxu0 %v6445_v11  ;;  %4073 = vmatpush.bf16.msrb.mxu1 %v6701_v14  ;;  %v6860_v9 = vld [vmem:[#allocation7 + $0x508] sm:$0xf]  ;;  %v2542_v11 = vpop.f32.mrf.mxu1  ;;  %v6573_v19 = vor.u32 %v7589_v6, %v6572_v5 }
 0x1bd   : > { %v6985_v39 = vor.u32 %v7688_v62, %v6982_v24  ;;  %4029 = vmatmul.bf16.vlgmr.msra.gmra.mxu1 %v8552_v30  ;;  %v7661_v10 = vld [vmem:[#allocation7 + $0x524] sm:$0xf0]  ;;  %v2543_v16 = vadd.f32 %v2542_v11, %v2529_v40  ;;  %v6449_v40 = vor.u32 %v7553_v54, %v6446_v56  ;;  %v7665_v54 = vld [vmem:[#allocation7 + $0x54c] sm:$0xf] }
 0x1be   : > { %4041 = vmatpush.bf16.msra.mxu2 %v6729_v34  ;;  %v7116_v14 = vld [vmem:[#allocation7 + $0x708] sm:$0xf]  ;;  %v6861_v22 = vor.u32 %v7661_v10, %v6860_v9  ;;  %v6894_v56 = vld [vmem:[#allocation7 + $0x568] sm:$0xf0] }
 0x1bf   : > { %4054 = vmatpush.bf16.msra.mxu3 %v6985_v39  ;;  %v7725_v15 = vld [vmem:[#allocation7 + $0x724] sm:$0xf0] }
 0x1c0   : > { %4061 = vmatpush.bf16.msrb.mxu0 %v6413_v27  ;;  %4074 = vmatpush.bf16.msrb.mxu1 %v6669_v32  ;;  %v6284_v20 = vld [vmem:[#allocation7 + $0x88] sm:$0xf]  ;;  %v7117_v24 = vor.u32 %v7725_v15, %v7116_v14  ;;  %v7609_v14 = vld [vmem:[#allocation7 + $0x38c] sm:$0xf] }
 0x1c1   : > { %4042 = vmatmul.bf16.vlgmr.msra.gmra.mxu2 %v8562_v55  ;;  %v7517_v17 = vld [vmem:[#allocation7 + $0xa4] sm:$0xf0]  ;;  %v6670_v15 = vld [vmem:[#allocation7 + $0x3a8] sm:$0xf0] }
 0x1c2   : > { %4086 = vmatpush.bf16.msrb.mxu2 %v6957_v41  ;;  %4055 = vmatmul.bf16.vlgmr.msra.gmra.mxu3 %v8564_v58  ;;  %v6540_v23 = vld [vmem:[#allocation7 + $0x288] sm:$0xf]  ;;  %v6285_v27 = vor.u32 %v7517_v17, %v6284_v20  ;;  %v2531_v41 = vpop.f32.mrf.mxu0 }
 0x1c3   : > { %4099 = vmatpush.bf16.msrb.mxu3 %v7213_v44  ;;  %v7581_v62 = vld [vmem:[#allocation7 + $0x2a4] sm:$0xf0] }
 0x1c4   : > { %4062 = vmatpush.bf16.msrb.mxu0 %v6381_v47  ;;  %4075 = vmatpush.bf16.msrb.mxu1 %v6637_v50  ;;  %v6828_v25 = vld [vmem:[#allocation7 + $0x4c8] sm:$0xf]  ;;  %v6541_v32 = vor.u32 %v7581_v62, %v6540_v23  ;;  %v2544_v44 = vpop.f32.mrf.mxu1  ;;  %v2555_v59 = vpop.f32.mrf.mxu2  ;;  %v7681_v23 = vld [vmem:[#allocation7 + $0x5cc] sm:$0xf] }
 0x1c5   : > { %v7653_v26 = vld [vmem:[#allocation7 + $0x4e4] sm:$0xf0]  ;;  %v2568_v2 = vpop.f32.mrf.mxu3  ;;  %v6958_v62 = vld [vmem:[#allocation7 + $0x5e8] sm:$0xf0] }
 0x1c6   : > { %4087 = vmatpush.bf16.msrb.mxu2 %v6925_v53  ;;  %v7084_v4 = vld [vmem:[#allocation7 + $0x6c8] sm:$0xf]  ;;  %v6829_v37 = vor.u32 %v7653_v26, %v6828_v25  ;;  %v7745_v25 = vld [vmem:[#allocation7 + $0x7cc] sm:$0xf] }
 0x1c7   : > { %4100 = vmatpush.bf16.msrb.mxu3 %v7181_v57  ;;  %v7717_v29 = vld [vmem:[#allocation7 + $0x6e4] sm:$0xf0]  ;;  %v7617_v57 = vld [vmem:[#allocation7 + $0x3cc] sm:$0xf] }
 0x1c8   : > { %4063 = vmatpush.bf16.msrb.mxu0 %v6349_v61  ;;  %4076 = vmatpush.bf16.msrb.mxu1 %v6605_v1  ;;  %v6252_v34 = vld [vmem:[#allocation7 + $0x48] sm:$0xf]  ;;  %v7085_v31 = vor.u32 %v7717_v29, %v7084_v4  ;;  %v6702_v61 = vld [vmem:[#allocation7 + $0x3e8] sm:$0xf0]  ;;  %v2556_v1 = vadd.f32 %v2555_v59, %v2543_v16 }
 0x1c9   : > { %v7509_v36 = vld [vmem:[#allocation7 + $0x64] sm:$0xf0]  ;;  %v6705_v10 = vor.u32 %v7617_v57, %v6702_v61  ;;  %v7214_v26 = vld [vmem:[#allocation7 + $0x7e8] sm:$0xf0] }
 0x1ca   : > { %4088 = vmatpush.bf16.msrb.mxu2 %v6893_v3  ;;  %v6508_v38 = vld [vmem:[#allocation7 + $0x248] sm:$0xf]  ;;  %v6253_v45 = vor.u32 %v7509_v36, %v6252_v34  ;;  %v8623_v9 = vadd.f32 %v2568_v2, %v2556_v1  ;;  %v7537_v29 = vld [vmem:[#allocation7 + $0x14c] sm:$0xf]  ;;  %v6897_v1 = vor.u32 %v7665_v54, %v6894_v56  ;;  %v6708_v54 = vld [vmem:[#allocation7 + $0x3d0] sm:$0xf] }
 0x1cb   : > { %4101 = vmatpush.bf16.msrb.mxu3 %v7149_v8  ;;  %v7573_v39 = vld [vmem:[#allocation7 + $0x264] sm:$0xf0]  ;;  %v7545_v8 = vld [vmem:[#allocation7 + $0x18c] sm:$0xf] }
 0x1cc   : > { %4064 = vmatpush.bf16.msrb.mxu0 %v6317_v13  ;;  %4077 = vmatpush.bf16.msrb.mxu1 %v6573_v19  ;;  %v6796_v42 = vld [vmem:[#allocation7 + $0x488] sm:$0xf]  ;;  %v6509_v49 = vor.u32 %v7573_v39, %v6508_v38  ;;  %v6414_v13 = vld [vmem:[#allocation7 + $0x1a8] sm:$0xf0]  ;;  %v2557_v34 = vpop.f32.mrf.mxu2 }
 0x1cd   : > { %v7645_v43 = vld [vmem:[#allocation7 + $0x4a4] sm:$0xf0]  ;;  %v7601_v38 = vld [vmem:[#allocation7 + $0x34c] sm:$0xf]  ;;  %v2570_v41 = vpop.f32.mrf.mxu3 }
 0x1ce   : > { %4089 = vmatpush.bf16.msrb.mxu2 %v6861_v22  ;;  %v7052_v46 = vld [vmem:[#allocation7 + $0x688] sm:$0xf]  ;;  %v6797_v53 = vor.u32 %v7645_v43, %v6796_v42  ;;  %v6638_v39 = vld [vmem:[#allocation7 + $0x368] sm:$0xf0] }
 0x1cf   : > { %4102 = vmatpush.bf16.msrb.mxu3 %v7117_v24  ;;  %v7709_v47 = vld [vmem:[#allocation7 + $0x6a4] sm:$0xf0]  ;;  %v6417_v24 = vor.u32 %v7545_v8, %v6414_v13  ;;  %v7673_v42 = vld [vmem:[#allocation7 + $0x58c] sm:$0xf] }
 0x1d0   : > { %4065 = vmatpush.bf16.msrb.mxu0 %v6285_v27  ;;  %v6220_v48 = vld [vmem:[#allocation7 + $0x8] sm:$0xf]  ;;  %4078 = vmatpush.bf16.msrb.mxu1 %v6541_v32  ;;  %v7053_v60 = vor.u32 %v7709_v47, %v7052_v46  ;;  %v6673_v27 = vor.u32 %v7609_v14, %v6670_v15  ;;  %v6382_v32 = vld [vmem:[#allocation7 + $0x168] sm:$0xf0]  ;;  %v6641_v47 = vor.u32 %v7601_v38, %v6638_v39 }
 0x1d1   : > { %v7501_v50 = vld [vmem:[#allocation7 + $0x24] sm:$0xf0]  ;;  %v6926_v43 = vld [vmem:[#allocation7 + $0x5a8] sm:$0xf0]  ;;  %v6385_v44 = vor.u32 %v7537_v29, %v6382_v32 }
 0x1d2   : > { %v6476_v51 = vld [vmem:[#allocation7 + $0x208] sm:$0xf]  ;;  %4090 = vmatpush.bf16.msrb.mxu2 %v6829_v37  ;;  %v6221_v33 = vor.u32 %v7501_v50, %v6220_v48  ;;  %v6961_v37 = vor.u32 %v7681_v23, %v6958_v62  ;;  %v7182_v46 = vld [vmem:[#allocation7 + $0x7a8] sm:$0xf0]  ;;  %v6929_v50 = vor.u32 %v7673_v42, %v6926_v43 }
 0x1d3   : > { %v7565_v52 = vld [vmem:[#allocation7 + $0x224] sm:$0xf0]  ;;  %4103 = vmatpush.bf16.msrb.mxu3 %v7085_v31  ;;  %v7217_v31 = vor.u32 %v7745_v25, %v7214_v26  ;;  %v7529_v48 = vld [vmem:[#allocation7 + $0x10c] sm:$0xf] }
 0x1d4   : > { %v6764_v63 = vld [vmem:[#allocation7 + $0x448] sm:$0xf]  ;;  %4066 = vmatpush.bf16.msrb.mxu0 %v6253_v45  ;;  %4079 = vmatpush.bf16.msrb.mxu1 %v6509_v49  ;;  %v6477_v6 = vor.u32 %v7565_v52, %v6476_v51  ;;  %v7737_v45 = vld [vmem:[#allocation7 + $0x78c] sm:$0xf] }
 0x1d5   : > { %v7637_v0 = vld [vmem:[#allocation7 + $0x464] sm:$0xf0]  ;;  %v6350_v49 = vld [vmem:[#allocation7 + $0x128] sm:$0xf0] }
 0x1d6   : > { %v7020_v3 = vld [vmem:[#allocation7 + $0x648] sm:$0xf]  ;;  %4091 = vmatpush.bf16.msrb.mxu2 %v6797_v53  ;;  %v6765_v11 = vor.u32 %v7637_v0, %v6764_v63  ;;  %v7593_v51 = vld [vmem:[#allocation7 + $0x30c] sm:$0xf]  ;;  %v7185_v53 = vor.u32 %v7737_v45, %v7182_v46  ;;  %v6353_v57 = vor.u32 %v7529_v48, %v6350_v49 }
 0x1d7   : > { %v7701_v5 = vld [vmem:[#allocation7 + $0x664] sm:$0xf0]  ;;  %4104 = vmatpush.bf16.msrb.mxu3 %v7053_v60  ;;  %v6606_v52 = vld [vmem:[#allocation7 + $0x328] sm:$0xf0] }
 0x1d8   : > { %v7021_v19 = vor.u32 %v7701_v5, %v7020_v3  ;;  %v6732_v16 = vld [vmem:[#allocation7 + $0x408] sm:$0xf]  ;;  %4067 = vmatpush.bf16.msrb.mxu0 %v6221_v33  ;;  %4080 = vmatpush.bf16.msrb.mxu1 %v6477_v6  ;;  %v7729_v59 = vld [vmem:[#allocation7 + $0x74c] sm:$0xf]  ;;  %v6609_v61 = vor.u32 %v7593_v51, %v6606_v52  ;;  %v2581_v3 = vpop.f32.mrf.mxu0  ;;  %v6452_v52 = vld [vmem:[#allocation7 + $0x1d0] sm:$0xf] }
 0x1d9   : > { %v7629_v20 = vld [vmem:[#allocation7 + $0x424] sm:$0xf0]  ;;  %v7150_v60 = vld [vmem:[#allocation7 + $0x768] sm:$0xf0] }
 0x1da   : > { %v6988_v17 = vld [vmem:[#allocation7 + $0x608] sm:$0xf]  ;;  %4092 = vmatpush.bf16.msrb.mxu2 %v6765_v11  ;;  %v6733_v4 = vor.u32 %v7629_v20, %v6732_v16  ;;  %v7521_v63 = vld [vmem:[#allocation7 + $0xcc] sm:$0xf]  ;;  %v7153_v5 = vor.u32 %v7729_v59, %v7150_v60  ;;  %v2594_v8 = vpop.f32.mrf.mxu1  ;;  %v7622_v59 = vld [vmem:[#allocation7 + $0x3ec] sm:$0xf0] }
 0x1db   : > { %v7693_v22 = vld [vmem:[#allocation7 + $0x624] sm:$0xf0]  ;;  %4105 = vmatpush.bf16.msrb.mxu3 %v7021_v19  ;;  %4068 = vmatmul.bf16.vlgmr.msrb.gmra.mxu0 %v8550_v28  ;;  %v6318_v0 = vld [vmem:[#allocation7 + $0xe8] sm:$0xf0]  ;;  %v2595_v14 = vadd.f32 %v2594_v8, %v2581_v3  ;;  %v6709_v8 = vor.u32 %v7622_v59, %v6708_v54  ;;  %v7670_v54 = vld [vmem:[#allocation7 + $0x56c] sm:$0xf0] }
 0x1dc   : > { %4112 = vmatpush.bf16.msra.mxu0 %v6449_v40  ;;  %4125 = vmatpush.bf16.msra.mxu1 %v6705_v10  ;;  %v6989_v36 = vor.u32 %v7693_v22, %v6988_v17  ;;  %v7585_v2 = vld [vmem:[#allocation7 + $0x2cc] sm:$0xf]  ;;  %v6321_v10 = vor.u32 %v7521_v63, %v6318_v0  ;;  %v7734_v59 = vld [vmem:[#allocation7 + $0x76c] sm:$0xf0] }
 0x1dd   : > { %4081 = vmatmul.bf16.vlgmr.msrb.gmra.mxu1 %v8552_v30  ;;  %v6574_v33 = vld [vmem:[#allocation7 + $0x2e8] sm:$0xf0] }
 0x1de   : > { %4093 = vmatpush.bf16.msrb.mxu2 %v6733_v4  ;;  %v7657_v6 = vld [vmem:[#allocation7 + $0x50c] sm:$0xf]  ;;  %v6577_v15 = vor.u32 %v7585_v2, %v6574_v33 }
 0x1df   : > { %4106 = vmatpush.bf16.msrb.mxu3 %v6989_v36  ;;  %v6862_v40 = vld [vmem:[#allocation7 + $0x528] sm:$0xf0] }
 0x1e0   : > { %4113 = vmatpush.bf16.msra.mxu0 %v6417_v24  ;;  %4126 = vmatpush.bf16.msra.mxu1 %v6673_v27  ;;  %v7721_v11 = vld [vmem:[#allocation7 + $0x70c] sm:$0xf]  ;;  %v6865_v20 = vor.u32 %v7657_v6, %v6862_v40  ;;  %v2583_v38 = vpop.f32.mrf.mxu0  ;;  %v6420_v6 = vld [vmem:[#allocation7 + $0x190] sm:$0xf] }
 0x1e1   : > { %4094 = vmatmul.bf16.vlgmr.msrb.gmra.mxu2 %v8562_v55  ;;  %v7118_v13 = vld [vmem:[#allocation7 + $0x728] sm:$0xf0]  ;;  %v7606_v38 = vld [vmem:[#allocation7 + $0x36c] sm:$0xf0] }
 0x1e2   : > { %4138 = vmatpush.bf16.msra.mxu2 %v6961_v37  ;;  %4107 = vmatmul.bf16.vlgmr.msrb.gmra.mxu3 %v8564_v58  ;;  %v7513_v19 = vld [vmem:[#allocation7 + $0x8c] sm:$0xf]  ;;  %v7121_v23 = vor.u32 %v7721_v11, %v7118_v13  ;;  %v2596_v42 = vpop.f32.mrf.mxu1  ;;  %v7550_v11 = vld [vmem:[#allocation7 + $0x1ac] sm:$0xf0] }
 0x1e3   : > { %4151 = vmatpush.bf16.msra.mxu3 %v7217_v31  ;;  %v6286_v16 = vld [vmem:[#allocation7 + $0xa8] sm:$0xf0]  ;;  %v6676_v13 = vld [vmem:[#allocation7 + $0x390] sm:$0xf] }
 0x1e4   : > { %4114 = vmatpush.bf16.msra.mxu0 %v6385_v44  ;;  %4127 = vmatpush.bf16.msra.mxu1 %v6641_v47  ;;  %v7577_v17 = vld [vmem:[#allocation7 + $0x28c] sm:$0xf]  ;;  %v6289_v25 = vor.u32 %v7513_v19, %v6286_v16  ;;  %v2607_v56 = vpop.f32.mrf.mxu2  ;;  %v7678_v42 = vld [vmem:[#allocation7 + $0x5ac] sm:$0xf0] }
 0x1e5   : > { %v6542_v22 = vld [vmem:[#allocation7 + $0x2a8] sm:$0xf0]  ;;  %v2608_v63 = vadd.f32 %v2607_v56, %v2595_v14  ;;  %v2620_v0 = vpop.f32.mrf.mxu3 }
 0x1e6   : > { %4139 = vmatpush.bf16.msra.mxu2 %v6929_v50  ;;  %v7649_v62 = vld [vmem:[#allocation7 + $0x4cc] sm:$0xf]  ;;  %v6545_v4 = vor.u32 %v7577_v17, %v6542_v22  ;;  %v6964_v22 = vld [vmem:[#allocation7 + $0x5d0] sm:$0xf] }
 0x1e7   : > { %4152 = vmatpush.bf16.msra.mxu3 %v7185_v53  ;;  %v6830_v24 = vld [vmem:[#allocation7 + $0x4e8] sm:$0xf0]  ;;  %v7558_v53 = vld [vmem:[#allocation7 + $0x1ec] sm:$0xf0]  ;;  %v8629_v40 = vadd.f32 %v2620_v0, %v2608_v63 }
 0x1e8   : > { %4115 = vmatpush.bf16.msra.mxu0 %v6353_v57  ;;  %4128 = vmatpush.bf16.msra.mxu1 %v6609_v61  ;;  %v7713_v26 = vld [vmem:[#allocation7 + $0x6cc] sm:$0xf]  ;;  %v6833_v34 = vor.u32 %v7649_v62, %v6830_v24  ;;  %v6421_v62 = vor.u32 %v7550_v11, %v6420_v6  ;;  %v7220_v24 = vld [vmem:[#allocation7 + $0x7d0] sm:$0xf] }
 0x1e9   : > { %v7086_v27 = vld [vmem:[#allocation7 + $0x6e8] sm:$0xf0]  ;;  %v7526_v63 = vld [vmem:[#allocation7 + $0xec] sm:$0xf0] }
 0x1ea   : > { %4140 = vmatpush.bf16.msra.mxu2 %v6897_v1  ;;  %v7505_v29 = vld [vmem:[#allocation7 + $0x4c] sm:$0xf]  ;;  %v7089_v39 = vor.u32 %v7713_v26, %v7086_v27  ;;  %v7662_v6 = vld [vmem:[#allocation7 + $0x52c] sm:$0xf0] }
 0x1eb   : > { %4153 = vmatpush.bf16.msra.mxu3 %v7153_v5  ;;  %v6254_v32 = vld [vmem:[#allocation7 + $0x68] sm:$0xf0]  ;;  %v6453_v5 = vor.u32 %v7558_v53, %v6452_v52  ;;  %v6900_v53 = vld [vmem:[#allocation7 + $0x550] sm:$0xf] }
 0x1ec   : > { %4116 = vmatpush.bf16.msra.mxu0 %v6321_v10  ;;  %4129 = vmatpush.bf16.msra.mxu1 %v6577_v15  ;;  %v7569_v36 = vld [vmem:[#allocation7 + $0x24c] sm:$0xf]  ;;  %v6257_v43 = vor.u32 %v7505_v29, %v6254_v32  ;;  %v7614_v15 = vld [vmem:[#allocation7 + $0x3ac] sm:$0xf0]  ;;  %v2609_v32 = vpop.f32.mrf.mxu2  ;;  %v6901_v0 = vor.u32 %v7670_v54, %v6900_v53  ;;  %v6454_v53 = vld [vmem:[#allocation7 + $0x1f0] sm:$0xf0] }
 0x1ed   : > { %v6510_v37 = vld [vmem:[#allocation7 + $0x268] sm:$0xf0]  ;;  %v6677_v26 = vor.u32 %v7614_v15, %v6676_v13  ;;  %v7542_v29 = vld [vmem:[#allocation7 + $0x16c] sm:$0xf0]  ;;  %v7618_v54 = vld [vmem:[#allocation7 + $0x3d4] sm:$0xf] }
 0x1ee   : > { %4141 = vmatpush.bf16.msra.mxu2 %v6865_v20  ;;  %v7641_v41 = vld [vmem:[#allocation7 + $0x48c] sm:$0xf]  ;;  %v6513_v47 = vor.u32 %v7569_v36, %v6510_v37  ;;  %v6644_v37 = vld [vmem:[#allocation7 + $0x350] sm:$0xf] }
 0x1ef   : > { %4154 = vmatpush.bf16.msra.mxu3 %v7121_v23  ;;  %v6798_v31 = vld [vmem:[#allocation7 + $0x4a8] sm:$0xf0]  ;;  %v7686_v23 = vld [vmem:[#allocation7 + $0x5ec] sm:$0xf0] }
 0x1f0   : > { %4117 = vmatpush.bf16.msra.mxu0 %v6289_v25  ;;  %v7705_v44 = vld [vmem:[#allocation7 + $0x68c] sm:$0xf]  ;;  %4130 = vmatpush.bf16.msra.mxu1 %v6545_v4  ;;  %v6801_v51 = vor.u32 %v7641_v41, %v6798_v31  ;;  %v7750_v25 = vld [vmem:[#allocation7 + $0x7ec] sm:$0xf0]  ;;  %v6965_v36 = vor.u32 %v7686_v23, %v6964_v22 }
 0x1f1   : > { %v7054_v45 = vld [vmem:[#allocation7 + $0x6a8] sm:$0xf0]  ;;  %v6388_v4 = vld [vmem:[#allocation7 + $0x150] sm:$0xf]  ;;  %v7221_v41 = vor.u32 %v7750_v25, %v7220_v24 }
 0x1f2   : > { %v7497_v46 = vld [vmem:[#allocation7 + $0xc] sm:$0xf]  ;;  %4142 = vmatpush.bf16.msra.mxu2 %v6833_v34  ;;  %v7057_v57 = vor.u32 %v7705_v44, %v7054_v45  ;;  %v6932_v31 = vld [vmem:[#allocation7 + $0x590] sm:$0xf] }
 0x1f3   : > { %v6222_v48 = vld [vmem:[#allocation7 + $0x28] sm:$0xf0]  ;;  %4155 = vmatpush.bf16.msra.mxu3 %v7089_v39  ;;  %v2622_v39 = vpop.f32.mrf.mxu3  ;;  %v7188_v44 = vld [vmem:[#allocation7 + $0x790] sm:$0xf] }
 0x1f4   : > { %v7561_v49 = vld [vmem:[#allocation7 + $0x20c] sm:$0xf]  ;;  %4118 = vmatpush.bf16.msra.mxu0 %v6257_v43  ;;  %v6225_v1 = vor.u32 %v7497_v46, %v6222_v48  ;;  %4131 = vmatpush.bf16.msra.mxu1 %v6513_v47  ;;  %v6389_v43 = vor.u32 %v7542_v29, %v6388_v4  ;;  %v7742_v45 = vld [vmem:[#allocation7 + $0x7ac] sm:$0xf0]  ;;  %v6645_v46 = vor.u32 %v7606_v38, %v6644_v37 }
 0x1f5   : > { %v6478_v50 = vld [vmem:[#allocation7 + $0x228] sm:$0xf0]  ;;  %v6356_v47 = vld [vmem:[#allocation7 + $0x110] sm:$0xf]  ;;  %v7189_v52 = vor.u32 %v7742_v45, %v7188_v44 }
 0x1f6   : > { %v7633_v60 = vld [vmem:[#allocation7 + $0x44c] sm:$0xf]  ;;  %v6481_v3 = vor.u32 %v7561_v49, %v6478_v50  ;;  %4143 = vmatpush.bf16.msra.mxu2 %v6801_v51  ;;  %v7534_v48 = vld [vmem:[#allocation7 + $0x12c] sm:$0xf0]  ;;  %v6933_v49 = vor.u32 %v7678_v42, %v6932_v31 }
 0x1f7   : > { %v6766_v61 = vld [vmem:[#allocation7 + $0x468] sm:$0xf0]  ;;  %4156 = vmatpush.bf16.msra.mxu3 %v7057_v57  ;;  %v6612_v50 = vld [vmem:[#allocation7 + $0x310] sm:$0xf]  ;;  %v6357_v56 = vor.u32 %v7534_v48, %v6356_v47 }
 0x1f8   : > { %v7697_v2 = vld [vmem:[#allocation7 + $0x64c] sm:$0xf]  ;;  %v6769_v10 = vor.u32 %v7633_v60, %v6766_v61  ;;  %4119 = vmatpush.bf16.msra.mxu0 %v6225_v1  ;;  %4132 = vmatpush.bf16.msra.mxu1 %v6481_v3  ;;  %v7598_v51 = vld [vmem:[#allocation7 + $0x32c] sm:$0xf0] }
 0x1f9   : > { %v7022_v33 = vld [vmem:[#allocation7 + $0x668] sm:$0xf0]  ;;  %v7156_v57 = vld [vmem:[#allocation7 + $0x750] sm:$0xf]  ;;  %v6613_v60 = vor.u32 %v7598_v51, %v6612_v50 }
 0x1fa   : > { %v7025_v19 = vor.u32 %v7697_v2, %v7022_v33  ;;  %v7625_v14 = vld [vmem:[#allocation7 + $0x40c] sm:$0xf]  ;;  %4144 = vmatpush.bf16.msra.mxu2 %v6769_v10  ;;  %v6324_v61 = vld [vmem:[#allocation7 + $0xd0] sm:$0xf]  ;;  %v2633_v33 = vpop.f32.mrf.mxu0  ;;  %v7157_v3 = vor.u32 %v7734_v59, %v7156_v57  ;;  %v6710_v59 = vld [vmem:[#allocation7 + $0x3f0] sm:$0xf0] }
 0x1fb   : > { %v6734_v16 = vld [vmem:[#allocation7 + $0x428] sm:$0xf0]  ;;  %4120 = vmatmul.bf16.vlgmr.msra.gmra.mxu0 %v8550_v28  ;;  %4133 = vmatmul.bf16.vlgmr.msra.gmra.mxu1 %v8552_v30  ;;  %v6580_v1 = vld [vmem:[#allocation7 + $0x2d0] sm:$0xf]  ;;  %v6325_v10 = vor.u32 %v7526_v63, %v6324_v61 }
 0x1fc   : > { %v7689_v20 = vld [vmem:[#allocation7 + $0x60c] sm:$0xf]  ;;  %4164 = vmatpush.bf16.msrb.mxu0 %v6453_v5  ;;  %4177 = vmatpush.bf16.msrb.mxu1 %v6709_v8  ;;  %v6737_v27 = vor.u32 %v7625_v14, %v6734_v16  ;;  %v7590_v2 = vld [vmem:[#allocation7 + $0x2ec] sm:$0xf0]  ;;  %v2646_v8 = vpop.f32.mrf.mxu1 }
 0x1fd   : > { %v6990_v17 = vld [vmem:[#allocation7 + $0x628] sm:$0xf0]  ;;  %4157 = vmatpush.bf16.msra.mxu3 %v7025_v19  ;;  %v6868_v5 = vld [vmem:[#allocation7 + $0x510] sm:$0xf]  ;;  %v2647_v15 = vadd.f32 %v2646_v8, %v2633_v33  ;;  %v6581_v19 = vor.u32 %v7590_v2, %v6580_v1 }
 0x1fe   : > { %v6993_v34 = vor.u32 %v7689_v20, %v6990_v17  ;;  %4145 = vmatpush.bf16.msra.mxu2 %v6737_v27  ;;  %v7124_v11 = vld [vmem:[#allocation7 + $0x710] sm:$0xf]  ;;  %v6869_v20 = vor.u32 %v7662_v6, %v6868_v5  ;;  %v7546_v6 = vld [vmem:[#allocation7 + $0x194] sm:$0xf] }
 0x1ff   : > { %v7726_v13 = vld [vmem:[#allocation7 + $0x72c] sm:$0xf0] }
 0x200   : > { %4165 = vmatpush.bf16.msrb.mxu0 %v6421_v62  ;;  %4178 = vmatpush.bf16.msrb.mxu1 %v6677_v26  ;;  %v6292_v14 = vld [vmem:[#allocation7 + $0x90] sm:$0xf]  ;;  %v7125_v23 = vor.u32 %v7726_v13, %v7124_v11  ;;  %v6422_v13 = vld [vmem:[#allocation7 + $0x1b0] sm:$0xf0] }
 0x201   : > { %4158 = vmatpush.bf16.msra.mxu3 %v6993_v34  ;;  %4146 = vmatmul.bf16.vlgmr.msra.gmra.mxu2 %v8562_v55  ;;  %v7518_v16 = vld [vmem:[#allocation7 + $0xac] sm:$0xf0] }
 0x202   : > { %4190 = vmatpush.bf16.msrb.mxu2 %v6965_v36  ;;  %v6548_v17 = vld [vmem:[#allocation7 + $0x290] sm:$0xf]  ;;  %v6293_v25 = vor.u32 %v7518_v16, %v6292_v14  ;;  %v2635_v38 = vpop.f32.mrf.mxu0  ;;  %v6678_v14 = vld [vmem:[#allocation7 + $0x3b0] sm:$0xf0] }
 0x203   : > { %v7582_v22 = vld [vmem:[#allocation7 + $0x2ac] sm:$0xf0]  ;;  %v7602_v38 = vld [vmem:[#allocation7 + $0x354] sm:$0xf] }
 0x204   : > { %4166 = vmatpush.bf16.msrb.mxu0 %v6389_v43  ;;  %4159 = vmatmul.bf16.vlgmr.msra.gmra.mxu3 %v8564_v58  ;;  %v6836_v62 = vld [vmem:[#allocation7 + $0x4d0] sm:$0xf]  ;;  %v6549_v4 = vor.u32 %v7582_v22, %v6548_v17  ;;  %v2648_v42 = vpop.f32.mrf.mxu1 }
 0x205   : > { %4203 = vmatpush.bf16.msrb.mxu3 %v7221_v41  ;;  %4179 = vmatpush.bf16.msrb.mxu1 %v6645_v46  ;;  %v7654_v24 = vld [vmem:[#allocation7 + $0x4ec] sm:$0xf0]  ;;  %v7674_v42 = vld [vmem:[#allocation7 + $0x594] sm:$0xf] }
 0x206   : > { %4191 = vmatpush.bf16.msrb.mxu2 %v6933_v49  ;;  %v7092_v26 = vld [vmem:[#allocation7 + $0x6d0] sm:$0xf]  ;;  %v6837_v34 = vor.u32 %v7654_v24, %v6836_v62  ;;  %v6966_v62 = vld [vmem:[#allocation7 + $0x5f0] sm:$0xf0]  ;;  %v6425_v24 = vor.u32 %v7546_v6, %v6422_v13 }
 0x207   : > { %v7718_v27 = vld [vmem:[#allocation7 + $0x6ec] sm:$0xf0]  ;;  %v7658_v6 = vld [vmem:[#allocation7 + $0x514] sm:$0xf] }
 0x208   : > { %4167 = vmatpush.bf16.msrb.mxu0 %v6357_v56  ;;  %v6260_v29 = vld [vmem:[#allocation7 + $0x50] sm:$0xf]  ;;  %v7093_v39 = vor.u32 %v7718_v27, %v7092_v26  ;;  %v2659_v56 = vpop.f32.mrf.mxu2  ;;  %v7222_v26 = vld [vmem:[#allocation7 + $0x7f0] sm:$0xf0] }
 0x209   : > { %4204 = vmatpush.bf16.msrb.mxu3 %v7189_v52  ;;  %4180 = vmatpush.bf16.msrb.mxu1 %v6613_v60  ;;  %v7510_v32 = vld [vmem:[#allocation7 + $0x6c] sm:$0xf0]  ;;  %v7554_v52 = vld [vmem:[#allocation7 + $0x1d4] sm:$0xf]  ;;  %v2660_v63 = vadd.f32 %v2659_v56, %v2647_v15 }
 0x20a   : > { %4192 = vmatpush.bf16.msrb.mxu2 %v6901_v0  ;;  %v6516_v36 = vld [vmem:[#allocation7 + $0x250] sm:$0xf]  ;;  %v6261_v43 = vor.u32 %v7510_v32, %v6260_v29  ;;  %v2672_v0 = vpop.f32.mrf.mxu3  ;;  %v6457_v5 = vor.u32 %v7554_v52, %v6454_v53  ;;  %v7538_v29 = vld [vmem:[#allocation7 + $0x154] sm:$0xf] }
 0x20b   : > { %v7574_v37 = vld [vmem:[#allocation7 + $0x26c] sm:$0xf0]  ;;  %v8635_v8 = vadd.f32 %v2672_v0, %v2660_v63  ;;  %v6390_v32 = vld [vmem:[#allocation7 + $0x170] sm:$0xf0] }
 0x20c   : > { %4168 = vmatpush.bf16.msrb.mxu0 %v6325_v10  ;;  %v6804_v41 = vld [vmem:[#allocation7 + $0x490] sm:$0xf]  ;;  %v6517_v47 = vor.u32 %v7574_v37, %v6516_v36  ;;  %v6713_v10 = vor.u32 %v7618_v54, %v6710_v59  ;;  %v6614_v52 = vld [vmem:[#allocation7 + $0x330] sm:$0xf0] }
 0x20d   : > { %4205 = vmatpush.bf16.msrb.mxu3 %v7157_v3  ;;  %4181 = vmatpush.bf16.msrb.mxu1 %v6581_v19  ;;  %v7646_v31 = vld [vmem:[#allocation7 + $0x4ac] sm:$0xf0]  ;;  %v7610_v19 = vld [vmem:[#allocation7 + $0x394] sm:$0xf] }
 0x20e   : > { %4193 = vmatpush.bf16.msrb.mxu2 %v6869_v20  ;;  %v7060_v44 = vld [vmem:[#allocation7 + $0x690] sm:$0xf]  ;;  %v6805_v51 = vor.u32 %v7646_v31, %v6804_v41  ;;  %v6681_v27 = vor.u32 %v7610_v19, %v6678_v14  ;;  %v7666_v54 = vld [vmem:[#allocation7 + $0x554] sm:$0xf] }
 0x20f   : > { %v7710_v45 = vld [vmem:[#allocation7 + $0x6ac] sm:$0xf0]  ;;  %v6902_v56 = vld [vmem:[#allocation7 + $0x570] sm:$0xf0] }
 0x210   : > { %4169 = vmatpush.bf16.msrb.mxu0 %v6293_v25  ;;  %v6228_v46 = vld [vmem:[#allocation7 + $0x10] sm:$0xf]  ;;  %v7061_v57 = vor.u32 %v7710_v45, %v7060_v44  ;;  %v7746_v25 = vld [vmem:[#allocation7 + $0x7d4] sm:$0xf]  ;;  %v6393_v44 = vor.u32 %v7538_v29, %v6390_v32 }
 0x211   : > { %4206 = vmatpush.bf16.msrb.mxu3 %v7125_v23  ;;  %4182 = vmatpush.bf16.msrb.mxu1 %v6549_v4  ;;  %v7502_v48 = vld [vmem:[#allocation7 + $0x2c] sm:$0xf0]  ;;  %v7682_v23 = vld [vmem:[#allocation7 + $0x5d4] sm:$0xf]  ;;  %v7225_v31 = vor.u32 %v7746_v25, %v7222_v26 }
 0x212   : > { %v6484_v49 = vld [vmem:[#allocation7 + $0x210] sm:$0xf]  ;;  %4194 = vmatpush.bf16.msrb.mxu2 %v6837_v34  ;;  %v6229_v1 = vor.u32 %v7502_v48, %v6228_v46  ;;  %v2661_v34 = vpop.f32.mrf.mxu2  ;;  %v6969_v37 = vor.u32 %v7682_v23, %v6966_v62  ;;  %v2674_v41 = vpop.f32.mrf.mxu3  ;;  %v7738_v45 = vld [vmem:[#allocation7 + $0x794] sm:$0xf] }
 0x213   : > { %v7566_v50 = vld [vmem:[#allocation7 + $0x22c] sm:$0xf0]  ;;  %v7190_v46 = vld [vmem:[#allocation7 + $0x7b0] sm:$0xf0] }
 0x214   : > { %v6772_v60 = vld [vmem:[#allocation7 + $0x450] sm:$0xf]  ;;  %4170 = vmatpush.bf16.msrb.mxu0 %v6261_v43  ;;  %v6485_v3 = vor.u32 %v7566_v50, %v6484_v49  ;;  %v6934_v43 = vld [vmem:[#allocation7 + $0x5b0] sm:$0xf0]  ;;  %v7193_v53 = vor.u32 %v7738_v45, %v7190_v46 }
 0x215   : > { %4207 = vmatpush.bf16.msrb.mxu3 %v7093_v39  ;;  %v7638_v61 = vld [vmem:[#allocation7 + $0x46c] sm:$0xf0]  ;;  %4183 = vmatpush.bf16.msrb.mxu1 %v6517_v47  ;;  %v6646_v39 = vld [vmem:[#allocation7 + $0x370] sm:$0xf0]  ;;  %v6937_v50 = vor.u32 %v7674_v42, %v6934_v43 }
 0x216   : > { %v7028_v2 = vld [vmem:[#allocation7 + $0x650] sm:$0xf]  ;;  %4195 = vmatpush.bf16.msrb.mxu2 %v6805_v51  ;;  %v6773_v11 = vor.u32 %v7638_v61, %v6772_v60  ;;  %v6649_v47 = vor.u32 %v7602_v38, %v6646_v39  ;;  %v7530_v48 = vld [vmem:[#allocation7 + $0x114] sm:$0xf] }
 0x217   : > { %v7702_v33 = vld [vmem:[#allocation7 + $0x66c] sm:$0xf0]  ;;  %v6358_v49 = vld [vmem:[#allocation7 + $0x130] sm:$0xf0] }
 0x218   : > { %v7029_v16 = vor.u32 %v7702_v33, %v7028_v2  ;;  %v6740_v15 = vld [vmem:[#allocation7 + $0x410] sm:$0xf]  ;;  %4171 = vmatpush.bf16.msrb.mxu0 %v6229_v1  ;;  %v7594_v51 = vld [vmem:[#allocation7 + $0x314] sm:$0xf]  ;;  %v6905_v1 = vor.u32 %v7666_v54, %v6902_v56  ;;  %v6460_v54 = vld [vmem:[#allocation7 + $0x1d8] sm:$0xf] }
 0x219   : > { %4208 = vmatpush.bf16.msrb.mxu3 %v7061_v57  ;;  %v7630_v20 = vld [vmem:[#allocation7 + $0x42c] sm:$0xf0]  ;;  %4184 = vmatpush.bf16.msrb.mxu1 %v6485_v3  ;;  %v6361_v57 = vor.u32 %v7530_v48, %v6358_v49  ;;  %v7730_v59 = vld [vmem:[#allocation7 + $0x754] sm:$0xf]  ;;  %v6617_v61 = vor.u32 %v7594_v51, %v6614_v52  ;;  %v3965_v3 = vpop.f32.mrf.mxu0  ;;  %v7559_v56 = vld [vmem:[#allocation7 + $0x1f4] sm:$0xf0] }
 0x21a   : > { %v6996_v17 = vld [vmem:[#allocation7 + $0x610] sm:$0xf]  ;;  %4196 = vmatpush.bf16.msrb.mxu2 %v6773_v11  ;;  %v6741_v4 = vor.u32 %v7630_v20, %v6740_v15  ;;  %v7158_v60 = vld [vmem:[#allocation7 + $0x770] sm:$0xf0]  ;;  %v3966_v11 = vadd.f32 %v3965_v3, %v8594_v7  ;;  %v3978_v13 = vpop.f32.mrf.mxu1 }
 0x21b   : > { %v7694_v22 = vld [vmem:[#allocation7 + $0x62c] sm:$0xf0]  ;;  %4172 = vmatmul.bf16.vlgmr.msrb.gmra.mxu0 %v8550_v28  ;;  %v7522_v63 = vld [vmem:[#allocation7 + $0xd4] sm:$0xf] }
 0x21c   : > { %4216 = vmatpush.bf16.msra.mxu0 %v6457_v5  ;;  %v6997_v36 = vor.u32 %v7694_v22, %v6996_v17  ;;  %4185 = vmatmul.bf16.vlgmr.msrb.gmra.mxu1 %v8552_v30  ;;  %v6326_v0 = vld [vmem:[#allocation7 + $0xf0] sm:$0xf0]  ;;  %v7161_v5 = vor.u32 %v7730_v59, %v7158_v60  ;;  %v3979_v22 = vadd.f32 %v3978_v13, %v3966_v11  ;;  %v6428_v11 = vld [vmem:[#allocation7 + $0x198] sm:$0xf] }
 0x21d   : > { %4229 = vmatpush.bf16.msra.mxu1 %v6713_v10  ;;  %4209 = vmatpush.bf16.msrb.mxu3 %v7029_v16  ;;  %v7586_v2 = vld [vmem:[#allocation7 + $0x2d4] sm:$0xf]  ;;  %v6329_v19 = vor.u32 %v7522_v63, %v6326_v0 }
 0x21e   : > { %4197 = vmatpush.bf16.msrb.mxu2 %v6741_v4  ;;  %v6582_v33 = vld [vmem:[#allocation7 + $0x2f0] sm:$0xf0] }
 0x21f   : > { %v6870_v10 = vld [vmem:[#allocation7 + $0x530] sm:$0xf0]  ;;  %v6585_v15 = vor.u32 %v7586_v2, %v6582_v33 }
 0x220   : > { %4217 = vmatpush.bf16.msra.mxu0 %v6425_v24  ;;  %v7722_v14 = vld [vmem:[#allocation7 + $0x714] sm:$0xf]  ;;  %v6873_v23 = vor.u32 %v7658_v6, %v6870_v10  ;;  %v6461_v10 = vor.u32 %v7559_v56, %v6460_v54  ;;  %v7599_v54 = vld [vmem:[#allocation7 + $0x334] sm:$0xf0] }
 0x221   : > { %4230 = vmatpush.bf16.msra.mxu1 %v6681_v27  ;;  %4210 = vmatpush.bf16.msrb.mxu3 %v6997_v36  ;;  %v7126_v16 = vld [vmem:[#allocation7 + $0x730] sm:$0xf0]  ;;  %v3967_v41 = vpop.f32.mrf.mxu0 }
 0x222   : > { %4242 = vmatpush.bf16.msra.mxu2 %v6969_v37  ;;  %v7514_v20 = vld [vmem:[#allocation7 + $0x94] sm:$0xf]  ;;  %v7129_v25 = vor.u32 %v7722_v14, %v7126_v16  ;;  %v7551_v16 = vld [vmem:[#allocation7 + $0x1b4] sm:$0xf0] }
 0x223   : > { %4198 = vmatmul.bf16.vlgmr.msrb.gmra.mxu2 %v8562_v55  ;;  %v6294_v17 = vld [vmem:[#allocation7 + $0xb0] sm:$0xf0]  ;;  %v6652_v41 = vld [vmem:[#allocation7 + $0x358] sm:$0xf] }
 0x224   : > { %4218 = vmatpush.bf16.msra.mxu0 %v6393_v44  ;;  %4211 = vmatmul.bf16.vlgmr.msrb.gmra.mxu3 %v8564_v58  ;;  %v7578_v62 = vld [vmem:[#allocation7 + $0x294] sm:$0xf]  ;;  %v6297_v7 = vor.u32 %v7514_v20, %v6294_v17  ;;  %v3980_v44 = vpop.f32.mrf.mxu1  ;;  %v3991_v59 = vpop.f32.mrf.mxu2  ;;  %v7615_v20 = vld [vmem:[#allocation7 + $0x3b4] sm:$0xf0] }
 0x225   : > { %4255 = vmatpush.bf16.msra.mxu3 %v7225_v31  ;;  %4231 = vmatpush.bf16.msra.mxu1 %v6649_v47  ;;  %v6550_v24 = vld [vmem:[#allocation7 + $0x2b0] sm:$0xf0]  ;;  %v4004_v2 = vpop.f32.mrf.mxu3  ;;  %v6940_v44 = vld [vmem:[#allocation7 + $0x598] sm:$0xf] }
 0x226   : > { %4243 = vmatpush.bf16.msra.mxu2 %v6937_v50  ;;  %v7650_v26 = vld [vmem:[#allocation7 + $0x4d4] sm:$0xf]  ;;  %v6553_v32 = vor.u32 %v7578_v62, %v6550_v24 }
 0x227   : > { %v6838_v27 = vld [vmem:[#allocation7 + $0x4f0] sm:$0xf0] }
 0x228   : > { %4219 = vmatpush.bf16.msra.mxu0 %v6361_v57  ;;  %v7714_v4 = vld [vmem:[#allocation7 + $0x6d4] sm:$0xf]  ;;  %v6841_v37 = vor.u32 %v7650_v26, %v6838_v27  ;;  %v6716_v57 = vld [vmem:[#allocation7 + $0x3d8] sm:$0xf]  ;;  %v6429_v27 = vor.u32 %v7551_v16, %v6428_v11 }
 0x229   : > { %4256 = vmatpush.bf16.msra.mxu3 %v7193_v53  ;;  %4232 = vmatpush.bf16.msra.mxu1 %v6617_v61  ;;  %v7094_v29 = vld [vmem:[#allocation7 + $0x6f0] sm:$0xf0]  ;;  %v7623_v61 = vld [vmem:[#allocation7 + $0x3f4] sm:$0xf0] }
 0x22a   : > { %4244 = vmatpush.bf16.msra.mxu2 %v6905_v1  ;;  %v7506_v34 = vld [vmem:[#allocation7 + $0x54] sm:$0xf]  ;;  %v7097_v31 = vor.u32 %v7714_v4, %v7094_v29  ;;  %v3992_v1 = vadd.f32 %v3991_v59, %v3979_v22  ;;  %v7687_v26 = vld [vmem:[#allocation7 + $0x5f4] sm:$0xf0] }
 0x22b   : > { %v6262_v36 = vld [vmem:[#allocation7 + $0x70] sm:$0xf0]  ;;  %v7751_v4 = vld [vmem:[#allocation7 + $0x7f4] sm:$0xf0] }
 0x22c   : > { %4220 = vmatpush.bf16.msra.mxu0 %v6329_v19  ;;  %v7570_v38 = vld [vmem:[#allocation7 + $0x254] sm:$0xf]  ;;  %v6265_v45 = vor.u32 %v7506_v34, %v6262_v36  ;;  %v8642_v13 = vadd.f32 %v4004_v2, %v3992_v1  ;;  %v6717_v19 = vor.u32 %v7623_v61, %v6716_v57  ;;  %v6396_v34 = vld [vmem:[#allocation7 + $0x158] sm:$0xf] }
 0x22d   : > { %4257 = vmatpush.bf16.msra.mxu3 %v7161_v5  ;;  %4233 = vmatpush.bf16.msra.mxu1 %v6585_v15  ;;  %v6518_v39 = vld [vmem:[#allocation7 + $0x270] sm:$0xf0]  ;;  %v6684_v15 = vld [vmem:[#allocation7 + $0x398] sm:$0xf] }
 0x22e   : > { %4245 = vmatpush.bf16.msra.mxu2 %v6873_v23  ;;  %v7642_v42 = vld [vmem:[#allocation7 + $0x494] sm:$0xf]  ;;  %v6521_v49 = vor.u32 %v7570_v38, %v6518_v39  ;;  %v6685_v29 = vor.u32 %v7615_v20, %v6684_v15  ;;  %v7543_v36 = vld [vmem:[#allocation7 + $0x174] sm:$0xf0] }
 0x22f   : > { %v6806_v43 = vld [vmem:[#allocation7 + $0x4b0] sm:$0xf0]  ;;  %v6908_v57 = vld [vmem:[#allocation7 + $0x558] sm:$0xf] }
 0x230   : > { %4221 = vmatpush.bf16.msra.mxu0 %v6297_v7  ;;  %v7706_v46 = vld [vmem:[#allocation7 + $0x694] sm:$0xf]  ;;  %v6809_v53 = vor.u32 %v7642_v42, %v6806_v43  ;;  %v7228_v7 = vld [vmem:[#allocation7 + $0x7d8] sm:$0xf]  ;;  %v4006_v42 = vpop.f32.mrf.mxu3 }
 0x231   : > { %4258 = vmatpush.bf16.msra.mxu3 %v7129_v25  ;;  %v7062_v47 = vld [vmem:[#allocation7 + $0x6b0] sm:$0xf0]  ;;  %4234 = vmatpush.bf16.msra.mxu1 %v6553_v32  ;;  %v6972_v25 = vld [vmem:[#allocation7 + $0x5d8] sm:$0xf]  ;;  %v7229_v43 = vor.u32 %v7751_v4, %v7228_v7 }
 0x232   : > { %v7498_v48 = vld [vmem:[#allocation7 + $0x14] sm:$0xf]  ;;  %4246 = vmatpush.bf16.msra.mxu2 %v6841_v37  ;;  %v7065_v60 = vor.u32 %v7706_v46, %v7062_v47  ;;  %v3993_v37 = vpop.f32.mrf.mxu2  ;;  %v6973_v39 = vor.u32 %v7687_v26, %v6972_v25  ;;  %v6397_v46 = vor.u32 %v7543_v36, %v6396_v34  ;;  %v7196_v47 = vld [vmem:[#allocation7 + $0x798] sm:$0xf] }
 0x233   : > { %v6230_v50 = vld [vmem:[#allocation7 + $0x30] sm:$0xf0]  ;;  %v7671_v59 = vld [vmem:[#allocation7 + $0x574] sm:$0xf0] }
 0x234   : > { %v7562_v51 = vld [vmem:[#allocation7 + $0x214] sm:$0xf]  ;;  %4222 = vmatpush.bf16.msra.mxu0 %v6265_v45  ;;  %v6233_v33 = vor.u32 %v7498_v48, %v6230_v50  ;;  %v7679_v45 = vld [vmem:[#allocation7 + $0x5b4] sm:$0xf0] }
 0x235   : > { %v6486_v52 = vld [vmem:[#allocation7 + $0x230] sm:$0xf0]  ;;  %4259 = vmatpush.bf16.msra.mxu3 %v7097_v31  ;;  %4235 = vmatpush.bf16.msra.mxu1 %v6521_v49  ;;  %v7607_v31 = vld [vmem:[#allocation7 + $0x374] sm:$0xf0] }
 0x236   : > { %v7634_v63 = vld [vmem:[#allocation7 + $0x454] sm:$0xf]  ;;  %v6489_v6 = vor.u32 %v7562_v51, %v6486_v52  ;;  %4247 = vmatpush.bf16.msra.mxu2 %v6809_v53  ;;  %v7743_v48 = vld [vmem:[#allocation7 + $0x7b4] sm:$0xf0]  ;;  %v6653_v49 = vor.u32 %v7607_v31, %v6652_v41  ;;  %v6941_v52 = vor.u32 %v7679_v45, %v6940_v44 }
 0x237   : > { %v6774_v0 = vld [vmem:[#allocation7 + $0x470] sm:$0xf0]  ;;  %v6364_v50 = vld [vmem:[#allocation7 + $0x118] sm:$0xf]  ;;  %v7197_v56 = vor.u32 %v7743_v48, %v7196_v47 }
 0x238   : > { %v7698_v3 = vld [vmem:[#allocation7 + $0x654] sm:$0xf]  ;;  %v6777_v14 = vor.u32 %v7634_v63, %v6774_v0  ;;  %4223 = vmatpush.bf16.msra.mxu0 %v6233_v33  ;;  %v7535_v51 = vld [vmem:[#allocation7 + $0x134] sm:$0xf0]  ;;  %v6909_v33 = vor.u32 %v7671_v59, %v6908_v57  ;;  %v7555_v57 = vld [vmem:[#allocation7 + $0x1dc] sm:$0xf] }
 0x239   : > { %v7030_v5 = vld [vmem:[#allocation7 + $0x670] sm:$0xf0]  ;;  %4260 = vmatpush.bf16.msra.mxu3 %v7065_v60  ;;  %4236 = vmatpush.bf16.msra.mxu1 %v6489_v6  ;;  %v6620_v53 = vld [vmem:[#allocation7 + $0x318] sm:$0xf]  ;;  %v6365_v60 = vor.u32 %v7535_v51, %v6364_v50  ;;  %v4017_v6 = vpop.f32.mrf.mxu0  ;;  %v6462_v59 = vld [vmem:[#allocation7 + $0x1f8] sm:$0xf0] }
 0x23a   : > { %v7033_v17 = vor.u32 %v7698_v3, %v7030_v5  ;;  %v7626_v22 = vld [vmem:[#allocation7 + $0x414] sm:$0xf]  ;;  %4248 = vmatpush.bf16.msra.mxu2 %v6777_v14  ;;  %v7164_v61 = vld [vmem:[#allocation7 + $0x758] sm:$0xf]  ;;  %v6621_v0 = vor.u32 %v7599_v54, %v6620_v53  ;;  %v4018_v14 = vadd.f32 %v4017_v6, %v8603_v18  ;;  %v4030_v16 = vpop.f32.mrf.mxu1 }
 0x23b   : > { %v6742_v23 = vld [vmem:[#allocation7 + $0x430] sm:$0xf0]  ;;  %4224 = vmatmul.bf16.vlgmr.msra.gmra.mxu0 %v8550_v28  ;;  %v7735_v63 = vld [vmem:[#allocation7 + $0x774] sm:$0xf0] }
 0x23c   : > { %v7690_v62 = vld [vmem:[#allocation7 + $0x614] sm:$0xf]  ;;  %4268 = vmatpush.bf16.msrb.mxu0 %v6461_v10  ;;  %v6745_v32 = vor.u32 %v7626_v22, %v6742_v23  ;;  %4237 = vmatmul.bf16.vlgmr.msra.gmra.mxu1 %v8552_v30  ;;  %v6332_v1 = vld [vmem:[#allocation7 + $0xd8] sm:$0xf]  ;;  %v7165_v10 = vor.u32 %v7735_v63, %v7164_v61 }
 0x23d   : > { %v6998_v24 = vld [vmem:[#allocation7 + $0x630] sm:$0xf0]  ;;  %4281 = vmatpush.bf16.msrb.mxu1 %v6717_v19  ;;  %4261 = vmatpush.bf16.msra.mxu3 %v7033_v17  ;;  %v7527_v2 = vld [vmem:[#allocation7 + $0xf4] sm:$0xf0] }
 0x23e   : > { %v7001_v38 = vor.u32 %v7690_v62, %v6998_v24  ;;  %4249 = vmatpush.bf16.msra.mxu2 %v6745_v32  ;;  %v6588_v3 = vld [vmem:[#allocation7 + $0x2d8] sm:$0xf]  ;;  %v6333_v15 = vor.u32 %v7527_v2, %v6332_v1  ;;  %v8649_v24 = vadd.f32 %v4030_v16, %v4018_v14 }
 0x23f   : > { %v7591_v5 = vld [vmem:[#allocation7 + $0x2f4] sm:$0xf0] }
 0x240   : > { %4269 = vmatpush.bf16.msrb.mxu0 %v6429_v27  ;;  %v6876_v11 = vld [vmem:[#allocation7 + $0x518] sm:$0xf]  ;;  %v6589_v22 = vor.u32 %v7591_v5, %v6588_v3 }
 0x241   : > { %4282 = vmatpush.bf16.msrb.mxu1 %v6685_v29  ;;  %4262 = vmatpush.bf16.msra.mxu3 %v7001_v38  ;;  %v7663_v19 = vld [vmem:[#allocation7 + $0x534] sm:$0xf0]  ;;  %v4019_v42 = vpop.f32.mrf.mxu0 }
 0x242   : > { %4294 = vmatpush.bf16.msrb.mxu2 %v6973_v39  ;;  %v7132_v20 = vld [vmem:[#allocation7 + $0x718] sm:$0xf]  ;;  %v6877_v25 = vor.u32 %v7663_v19, %v6876_v11  ;;  %v6465_v11 = vor.u32 %v7555_v57, %v6462_v59  ;;  %v7547_v19 = vld [vmem:[#allocation7 + $0x19c] sm:$0xf] }
 0x243   : > { %4250 = vmatmul.bf16.vlgmr.msra.gmra.mxu2 %v8562_v55  ;;  %v7727_v17 = vld [vmem:[#allocation7 + $0x734] sm:$0xf0]  ;;  %v6654_v42 = vld [vmem:[#allocation7 + $0x378] sm:$0xf0] }
 0x244   : > { %4270 = vmatpush.bf16.msrb.mxu0 %v6397_v46  ;;  %4263 = vmatmul.bf16.vlgmr.msra.gmra.mxu3 %v8564_v58  ;;  %v6300_v23 = vld [vmem:[#allocation7 + $0x98] sm:$0xf]  ;;  %v7133_v7 = vor.u32 %v7727_v17, %v7132_v20  ;;  %v4032_v46 = vpop.f32.mrf.mxu1  ;;  %v8651_v61 = vpop.f32.mrf.mxu2  ;;  %v7611_v20 = vld [vmem:[#allocation7 + $0x39c] sm:$0xf] }
 0x245   : > { %4307 = vmatpush.bf16.msrb.mxu3 %v7229_v43  ;;  %4283 = vmatpush.bf16.msrb.mxu1 %v6653_v49  ;;  %v7519_v62 = vld [vmem:[#allocation7 + $0xb4] sm:$0xf0]  ;;  %v6686_v17 = vld [vmem:[#allocation7 + $0x3b8] sm:$0xf0] }
 0x246   : > { %4295 = vmatpush.bf16.msrb.mxu2 %v6941_v52  ;;  %v6556_v26 = vld [vmem:[#allocation7 + $0x298] sm:$0xf]  ;;  %v6301_v18 = vor.u32 %v7519_v62, %v6300_v23  ;;  %v6942_v46 = vld [vmem:[#allocation7 + $0x5b8] sm:$0xf0] }
 0x247   : > { %v7583_v27 = vld [vmem:[#allocation7 + $0x2b4] sm:$0xf0]  ;;  %v7667_v59 = vld [vmem:[#allocation7 + $0x55c] sm:$0xf] }
 0x248   : > { %4271 = vmatpush.bf16.msrb.mxu0 %v6365_v60  ;;  %v6844_v4 = vld [vmem:[#allocation7 + $0x4d8] sm:$0xf]  ;;  %v6557_v36 = vor.u32 %v7583_v27, %v6556_v26  ;;  %v7619_v60 = vld [vmem:[#allocation7 + $0x3dc] sm:$0xf] }
 0x249   : > { %4308 = vmatpush.bf16.msrb.mxu3 %v7197_v56  ;;  %4284 = vmatpush.bf16.msrb.mxu1 %v6621_v0  ;;  %v7655_v29 = vld [vmem:[#allocation7 + $0x4f4] sm:$0xf0]  ;;  %v6718_v0 = vld [vmem:[#allocation7 + $0x3f8] sm:$0xf0] }
 0x24a   : > { %4296 = vmatpush.bf16.msrb.mxu2 %v6909_v33  ;;  %v7100_v32 = vld [vmem:[#allocation7 + $0x6d8] sm:$0xf]  ;;  %v6845_v39 = vor.u32 %v7655_v29, %v6844_v4  ;;  %v8653_v33 = vpop.f32.mrf.mxu3  ;;  %v6721_v14 = vor.u32 %v7619_v60, %v6718_v0  ;;  %v7683_v27 = vld [vmem:[#allocation7 + $0x5dc] sm:$0xf] }
 0x24b   : > { %v7719_v34 = vld [vmem:[#allocation7 + $0x6f4] sm:$0xf0]  ;;  %v7747_v29 = vld [vmem:[#allocation7 + $0x7dc] sm:$0xf] }
 0x24c   : > { %4272 = vmatpush.bf16.msrb.mxu0 %v6333_v15  ;;  %v6268_v37 = vld [vmem:[#allocation7 + $0x58] sm:$0xf]  ;;  %v7101_v43 = vor.u32 %v7719_v34, %v7100_v32  ;;  %v6430_v15 = vld [vmem:[#allocation7 + $0x1b8] sm:$0xf0]  ;;  %v6689_v32 = vor.u32 %v7611_v20, %v6686_v17 }
 0x24d   : > { %4309 = vmatpush.bf16.msrb.mxu3 %v7165_v10  ;;  %4285 = vmatpush.bf16.msrb.mxu1 %v6589_v22  ;;  %v7511_v38 = vld [vmem:[#allocation7 + $0x74] sm:$0xf0]  ;;  %v6433_v4 = vor.u32 %v7547_v19, %v6430_v15  ;;  %v6910_v60 = vld [vmem:[#allocation7 + $0x578] sm:$0xf0] }
 0x24e   : > { %4297 = vmatpush.bf16.msrb.mxu2 %v6877_v25  ;;  %v6524_v41 = vld [vmem:[#allocation7 + $0x258] sm:$0xf]  ;;  %v6269_v47 = vor.u32 %v7511_v38, %v6268_v37  ;;  %v6398_v37 = vld [vmem:[#allocation7 + $0x178] sm:$0xf0]  ;;  %v4045_v38 = vpop.f32.mrf.mxu2 }
 0x24f   : > { %v7575_v31 = vld [vmem:[#allocation7 + $0x274] sm:$0xf0]  ;;  %v7731_v0 = vld [vmem:[#allocation7 + $0x75c] sm:$0xf] }
 0x250   : > { %v6812_v44 = vld [vmem:[#allocation7 + $0x498] sm:$0xf]  ;;  %4273 = vmatpush.bf16.msrb.mxu0 %v6301_v18  ;;  %v6525_v51 = vor.u32 %v7575_v31, %v6524_v41  ;;  %v7230_v18 = vld [vmem:[#allocation7 + $0x7f8] sm:$0xf0] }
 0x251   : > { %4310 = vmatpush.bf16.msrb.mxu3 %v7133_v7  ;;  %v7647_v45 = vld [vmem:[#allocation7 + $0x4b4] sm:$0xf0]  ;;  %4286 = vmatpush.bf16.msrb.mxu1 %v6557_v36  ;;  %v6974_v7 = vld [vmem:[#allocation7 + $0x5f8] sm:$0xf0] }
 0x252   : > { %v7068_v48 = vld [vmem:[#allocation7 + $0x698] sm:$0xf]  ;;  %4298 = vmatpush.bf16.msrb.mxu2 %v6845_v39  ;;  %v6813_v56 = vor.u32 %v7647_v45, %v6812_v44  ;;  %v7539_v36 = vld [vmem:[#allocation7 + $0x15c] sm:$0xf]  ;;  %v6977_v41 = vor.u32 %v7683_v27, %v6974_v7  ;;  %v7233_v44 = vor.u32 %v7747_v29, %v7230_v18 }
 0x253   : > { %v7711_v49 = vld [vmem:[#allocation7 + $0x6b4] sm:$0xf0]  ;;  %v7603_v31 = vld [vmem:[#allocation7 + $0x35c] sm:$0xf] }
 0x254   : > { %v6236_v50 = vld [vmem:[#allocation7 + $0x18] sm:$0xf]  ;;  %v7069_v63 = vor.u32 %v7711_v49, %v7068_v48  ;;  %4274 = vmatpush.bf16.msrb.mxu0 %v6269_v47  ;;  %v7675_v45 = vld [vmem:[#allocation7 + $0x59c] sm:$0xf]  ;;  %v6401_v47 = vor.u32 %v7539_v36, %v6398_v37 }
 0x255   : > { %v7503_v52 = vld [vmem:[#allocation7 + $0x34] sm:$0xf0]  ;;  %4311 = vmatpush.bf16.msrb.mxu3 %v7101_v43  ;;  %4287 = vmatpush.bf16.msrb.mxu1 %v6525_v51  ;;  %v4058_v43 = vpop.f32.mrf.mxu3  ;;  %v7739_v48 = vld [vmem:[#allocation7 + $0x79c] sm:$0xf] }
 0x256   : > { %v6492_v53 = vld [vmem:[#allocation7 + $0x218] sm:$0xf]  ;;  %v6237_v3 = vor.u32 %v7503_v52, %v6236_v50  ;;  %4299 = vmatpush.bf16.msrb.mxu2 %v6813_v56  ;;  %v7198_v49 = vld [vmem:[#allocation7 + $0x7b8] sm:$0xf0]  ;;  %v6657_v50 = vor.u32 %v7603_v31, %v6654_v42 }
 0x257   : > { %v7567_v54 = vld [vmem:[#allocation7 + $0x234] sm:$0xf0]  ;;  %v7531_v51 = vld [vmem:[#allocation7 + $0x11c] sm:$0xf]  ;;  %v7201_v57 = vor.u32 %v7739_v48, %v7198_v49 }
 0x258   : > { %v6780_v1 = vld [vmem:[#allocation7 + $0x458] sm:$0xf]  ;;  %v6493_v10 = vor.u32 %v7567_v54, %v6492_v53  ;;  %4275 = vmatpush.bf16.msrb.mxu0 %v6237_v3  ;;  %v6366_v52 = vld [vmem:[#allocation7 + $0x138] sm:$0xf0]  ;;  %v6945_v53 = vor.u32 %v7675_v45, %v6942_v46  ;;  %v8659_v19 = vpop.f32.mrf.mxu0 }
 0x259   : > { %v7639_v2 = vld [vmem:[#allocation7 + $0x474] sm:$0xf0]  ;;  %4312 = vmatpush.bf16.msrb.mxu3 %v7069_v63  ;;  %v7595_v54 = vld [vmem:[#allocation7 + $0x31c] sm:$0xf]  ;;  %v6369_v63 = vor.u32 %v7531_v51, %v6366_v52 }
 0x25a   : > { %v7036_v5 = vld [vmem:[#allocation7 + $0x658] sm:$0xf]  ;;  %v6781_v16 = vor.u32 %v7639_v2, %v6780_v1  ;;  %4288 = vmatpush.bf16.msrb.mxu1 %v6493_v10  ;;  %v6622_v56 = vld [vmem:[#allocation7 + $0x338] sm:$0xf0]  ;;  %v8661_v20 = vpop.f32.mrf.mxu1 }
 0x25b   : > { %v7703_v6 = vld [vmem:[#allocation7 + $0x674] sm:$0xf0]  ;;  %4276 = vmatmul.bf16.vlgmr.msrb.gmra.mxu0 %v8550_v28  ;;  %v7166_v1 = vld [vmem:[#allocation7 + $0x778] sm:$0xf0]  ;;  %v6625_v2 = vor.u32 %v7595_v54, %v6622_v56 }
 0x25c   : > { %v7037_v22 = vor.u32 %v7703_v6, %v7036_v5  ;;  %v6748_v23 = vld [vmem:[#allocation7 + $0x418] sm:$0xf]  ;;  %4320 = vmatpush.bf16.msra.mxu0 %v6465_v11  ;;  %4300 = vmatpush.bf16.msrb.mxu2 %v6781_v16  ;;  %v7523_v3 = vld [vmem:[#allocation7 + $0xdc] sm:$0xf]  ;;  %v6913_v6 = vor.u32 %v7667_v59, %v6910_v60 }
 0x25d   : > { %v7631_v62 = vld [vmem:[#allocation7 + $0x434] sm:$0xf0]  ;;  %4289 = vmatmul.bf16.vlgmr.msrb.gmra.mxu1 %v8552_v30  ;;  %v6334_v5 = vld [vmem:[#allocation7 + $0xf8] sm:$0xf0] }
 0x25e   : > { %v7004_v25 = vld [vmem:[#allocation7 + $0x618] sm:$0xf]  ;;  %4333 = vmatpush.bf16.msra.mxu1 %v6721_v14  ;;  %v6749_v34 = vor.u32 %v7631_v62, %v6748_v23  ;;  %4313 = vmatpush.bf16.msrb.mxu3 %v7037_v22  ;;  %v7587_v10 = vld [vmem:[#allocation7 + $0x2dc] sm:$0xf]  ;;  %v7169_v14 = vor.u32 %v7731_v0, %v7166_v1  ;;  %v6337_v17 = vor.u32 %v7523_v3, %v6334_v5 }
 0x25f   : > { %v7695_v26 = vld [vmem:[#allocation7 + $0x634] sm:$0xf0]  ;;  %v6590_v11 = vld [vmem:[#allocation7 + $0x2f8] sm:$0xf0] }
 0x260   : > { %v7005_v39 = vor.u32 %v7695_v26, %v7004_v25  ;;  %4321 = vmatpush.bf16.msra.mxu0 %v6433_v4  ;;  %4301 = vmatpush.bf16.msrb.mxu2 %v6749_v34  ;;  %v7659_v16 = vld [vmem:[#allocation7 + $0x51c] sm:$0xf]  ;;  %v6593_v62 = vor.u32 %v7587_v10, %v6590_v11  ;;  %v8015_v11 = vld [vmem:[%s8924_s5 + $0x38] sm:$0xff] }
 0x261   : > { %v6878_v15 = vld [vmem:[#allocation7 + $0x538] sm:$0xf0] }
 0x262   : > { %4334 = vmatpush.bf16.msra.mxu1 %v6689_v32  ;;  %4314 = vmatpush.bf16.msrb.mxu3 %v7005_v39  ;;  %v7723_v22 = vld [vmem:[#allocation7 + $0x71c] sm:$0xf]  ;;  %v6881_v27 = vor.u32 %v7659_v16, %v6878_v15  ;;  %v4084_v48 = vpop.f32.mrf.mxu1 }
 0x263   : > { %4302 = vmatmul.bf16.vlgmr.msrb.gmra.mxu2 %v8562_v55  ;;  %v7134_v23 = vld [vmem:[#allocation7 + $0x738] sm:$0xf0] }
 0x264   : > { %4346 = vmatpush.bf16.msra.mxu2 %v6977_v41  ;;  %4322 = vmatpush.bf16.msra.mxu0 %v6401_v47  ;;  %v7515_v25 = vld [vmem:[#allocation7 + $0x9c] sm:$0xf]  ;;  %v7137_v29 = vor.u32 %v7723_v22, %v7134_v23  ;;  %v8663_v60 = vpop.f32.mrf.mxu2 }
 0x265   : > { %4315 = vmatmul.bf16.vlgmr.msrb.gmra.mxu3 %v8564_v58  ;;  %v6302_v26 = vld [vmem:[#allocation7 + $0xb8] sm:$0xf0] }
 0x266   : > { %4359 = vmatpush.bf16.msra.mxu3 %v7233_v44  ;;  %4335 = vmatpush.bf16.msra.mxu1 %v6657_v50  ;;  %v7579_v7 = vld [vmem:[#allocation7 + $0x29c] sm:$0xf]  ;;  %v6305_v34 = vor.u32 %v7515_v25, %v6302_v26  ;;  %v4071_v44 = vpop.f32.mrf.mxu0  ;;  %v8014_v25 = vld [vmem:[%s8924_s5 + $0x30] sm:$0xff] }
 0x267   : > { %v6558_v4 = vld [vmem:[#allocation7 + $0x2b8] sm:$0xf0]  ;;  %v8022_v26 = vld [vmem:[%s8924_s5 + $0x70] sm:$0xff]  ;;  %v8721_v44 = vld [vmem:[#allocation8] sm:$0xff] }
 0x268   : > { %4347 = vmatpush.bf16.msra.mxu2 %v6945_v53  ;;  %4323 = vmatpush.bf16.msra.mxu0 %v6369_v63  ;;  %v7651_v18 = vld [vmem:[#allocation7 + $0x4dc] sm:$0xf]  ;;  %v6561_v38 = vor.u32 %v7579_v7, %v6558_v4 }
 0x269   : > { %v6846_v32 = vld [vmem:[#allocation7 + $0x4f8] sm:$0xf0] }
 0x26a   : > { %4360 = vmatpush.bf16.msra.mxu3 %v7201_v57  ;;  %4336 = vmatpush.bf16.msra.mxu1 %v6625_v2  ;;  %v7715_v36 = vld [vmem:[#allocation7 + $0x6dc] sm:$0xf]  ;;  %v6849_v31 = vor.u32 %v7651_v18, %v6846_v32  ;;  %v8665_v2 = vpop.f32.mrf.mxu3  ;;  %v8039_v32 = vld [vmem:[%s8924_s5 + $0xf8] sm:$0xff] }
 0x26b   : > { %v7102_v37 = vld [vmem:[#allocation7 + $0x6f8] sm:$0xf0] }
 0x26c   : > { %4348 = vmatpush.bf16.msra.mxu2 %v6913_v6  ;;  %4324 = vmatpush.bf16.msra.mxu0 %v6337_v17  ;;  %v7507_v39 = vld [vmem:[#allocation7 + $0x5c] sm:$0xf]  ;;  %v7105_v45 = vor.u32 %v7715_v36, %v7102_v37  ;;  %v4097_v7 = vpop.f32.mrf.mxu2  ;;  %v8038_v36 = vld [vmem:[%s8924_s5 + $0xf0] sm:$0xff] }
 0x26d   : > { %v6270_v41 = vld [vmem:[#allocation7 + $0x78] sm:$0xf0] }
 0x26e   : > { %4361 = vmatpush.bf16.msra.mxu3 %v7169_v14  ;;  %4337 = vmatpush.bf16.msra.mxu1 %v6593_v62  ;;  %v7571_v42 = vld [vmem:[#allocation7 + $0x25c] sm:$0xf]  ;;  %v6273_v49 = vor.u32 %v7507_v39, %v6270_v41  ;;  %v8023_v14 = vld [vmem:[%s8924_s5 + $0x78] sm:$0xff]  ;;  %v8029_v39 = vld [vmem:[%s8924_s5 + $0xa8] sm:$0xff] }
 0x26f   : > { %v6526_v43 = vld [vmem:[#allocation7 + $0x278] sm:$0xf0] }
 0x270   : > { %4349 = vmatpush.bf16.msra.mxu2 %v6881_v27  ;;  %v7643_v46 = vld [vmem:[#allocation7 + $0x49c] sm:$0xf]  ;;  %4325 = vmatpush.bf16.msra.mxu0 %v6305_v34  ;;  %v6529_v52 = vor.u32 %v7571_v42, %v6526_v43  ;;  %v8013_v34 = vld [vmem:[%s8924_s5 + $0x28] sm:$0xff]  ;;  %v4070_v42 = vadd.f32 %v8659_v19, %v8605_v35  ;;  %v8019_v43 = vld [vmem:[%s8924_s5 + $0x58] sm:$0xff] }
 0x271   : > { %v6814_v47 = vld [vmem:[#allocation7 + $0x4b8] sm:$0xf0]  ;;  %v8010_v19 = vld [vmem:[%s8924_s5 + $0x10] sm:$0xff] }
 0x272   : > { %4362 = vmatpush.bf16.msra.mxu3 %v7137_v29  ;;  %v7707_v50 = vld [vmem:[#allocation7 + $0x69c] sm:$0xf]  ;;  %4338 = vmatpush.bf16.msra.mxu1 %v6561_v38  ;;  %v6817_v56 = vor.u32 %v7643_v46, %v6814_v47  ;;  %v8031_v29 = vld [vmem:[%s8924_s5 + $0xb8] sm:$0xff]  ;;  %v4110_v18 = vpop.f32.mrf.mxu3  ;;  %v4374_v47 = vperm.slane %v8721_v44, 0  ;;  %v4083_v48 = vadd.f32 %v8661_v20, %v4070_v42 }
 0x273   : > { %v7070_v51 = vld [vmem:[#allocation7 + $0x6b8] sm:$0xf0]  ;;  %v8043_v42 = vld [vmem:[%s8924_s5 + $0x118] sm:$0xff] }
 0x274   : > { %v7499_v53 = vld [vmem:[#allocation7 + $0x1c] sm:$0xf]  ;;  %4350 = vmatpush.bf16.msra.mxu2 %v6849_v31  ;;  %v7073_v63 = vor.u32 %v7707_v50, %v7070_v51  ;;  %4326 = vmatpush.bf16.msra.mxu0 %v6273_v49  ;;  %v4375_v49 = vperm.slane %v8721_v44, 1  ;;  %v8027_v51 = vld [vmem:[%s8924_s5 + $0x98] sm:$0xff] }
 0x275   : > { %v6238_v54 = vld [vmem:[#allocation7 + $0x38] sm:$0xf0] }
 0x276   : > { %v7563_v57 = vld [vmem:[#allocation7 + $0x21c] sm:$0xf]  ;;  %4363 = vmatpush.bf16.msra.mxu3 %v7105_v45  ;;  %v6241_v3 = vor.u32 %v7499_v53, %v6238_v54  ;;  %4339 = vmatpush.bf16.msra.mxu1 %v6529_v52  ;;  %v4044_v45 = vadd.f32 %v8651_v61, %v8649_v24  ;;  %v8018_v24 = vld [vmem:[%s8924_s5 + $0x50] sm:$0xff]  ;;  %v4096_v52 = vadd.f32 %v8663_v60, %v4083_v48  ;;  %v8035_v53 = vld [vmem:[%s8924_s5 + $0xd8] sm:$0xff] }
 0x277   : > { %v6494_v59 = vld [vmem:[#allocation7 + $0x238] sm:$0xf0]  ;;  %v8026_v60 = vld [vmem:[%s8924_s5 + $0x90] sm:$0xff]  ;;  %v8041_v48 = vld [vmem:[%s8924_s5 + $0x108] sm:$0xff] }
 0x278   : > { %v7635_v0 = vld [vmem:[#allocation7 + $0x45c] sm:$0xf]  ;;  %v6497_v10 = vor.u32 %v7563_v57, %v6494_v59  ;;  %4351 = vmatpush.bf16.msra.mxu2 %v6817_v56  ;;  %4327 = vmatpush.bf16.msra.mxu0 %v6241_v3  ;;  %v4121_v41 = vpop.f32.mrf.mxu0  ;;  %v4134_v31 = vpop.f32.mrf.mxu1  ;;  %v4057_v61 = vadd.f32 %v8653_v33, %v4044_v45  ;;  %v8009_v33 = vld [vmem:[%s8924_s5 + $0x8] sm:$0xff]  ;;  %v8042_v45 = vld [vmem:[%s8924_s5 + $0x110] sm:$0xff] }
 0x279   : > { %v6782_v1 = vld [vmem:[#allocation7 + $0x478] sm:$0xf0]  ;;  %v4122_v50 = vadd.f32 %v4121_v41, %v8611_v21  ;;  %v4390_v21 = vadd.f32 %v4374_v47, %v8642_v13  ;;  %v8017_v56 = vld [vmem:[%s8924_s5 + $0x48] sm:$0xff]  ;;  %v8034_v13 = vld [vmem:[%s8924_s5 + $0xd0] sm:$0xff] }
 0x27a   : > { %v7699_v5 = vld [vmem:[#allocation7 + $0x65c] sm:$0xf]  ;;  %v6785_v16 = vor.u32 %v7635_v0, %v6782_v1  ;;  %4364 = vmatpush.bf16.msra.mxu3 %v7073_v63  ;;  %4340 = vmatpush.bf16.msra.mxu1 %v6497_v10  ;;  %v4391_v57 = vadd.f32 %v4375_v49, %v4057_v61  ;;  %v4109_v63 = vadd.f32 %v8665_v2, %v4096_v52  ;;  %v4376_v0 = vperm.slane %v8721_v44, 2  ;;  %v8049_v49 = vld [vmem:[%s8924_s5 + $0x148] sm:$0xff] }
 0x27b   : > { %v7038_v6 = vld [vmem:[#allocation7 + $0x678] sm:$0xf0]  ;;  %4328 = vmatmul.bf16.vlgmr.msra.gmra.mxu0 %v8550_v28  ;;  %v8021_v28 = vld [vmem:[%s8924_s5 + $0x68] sm:$0xff]  ;;  %v4135_v59 = vadd.f32 %v4134_v31, %v4122_v50 }
 0x27c   : > { %v7041_v15 = vor.u32 %v7699_v5, %v7038_v6  ;;  %v7627_v17 = vld [vmem:[#allocation7 + $0x41c] sm:$0xf]  ;;  %4927 = vmatpush.bf16.msrb.mxu0 %v8015_v11  ;;  %4352 = vmatpush.bf16.msra.mxu2 %v6785_v16  ;;  %v4377_v6 = vperm.slane %v8721_v44, 3  ;;  %v4398_v11 = vmax.f32 %v4390_v21, 0.0  ;;  %v4399_v16 = vmax.f32 %v4391_v57, 0.0  ;;  %v8062_v57 = vld [vmem:[%s8924_s5 + $0x1b0] sm:$0xff] }
 0x27d   : > { %v6750_v22 = vld [vmem:[#allocation7 + $0x438] sm:$0xf0]  ;;  %4341 = vmatmul.bf16.vlgmr.msra.gmra.mxu1 %v8552_v30  ;;  %v8030_v30 = vld [vmem:[%s8924_s5 + $0xb0] sm:$0xff] }
 0x27e   : > { %v7691_v23 = vld [vmem:[#allocation7 + $0x61c] sm:$0xf]  ;;  %4940 = vmatpush.bf16.msrb.mxu1 %v8023_v14  ;;  %v6753_v27 = vor.u32 %v7627_v17, %v6750_v22  ;;  %4365 = vmatpush.bf16.msra.mxu3 %v7041_v15  ;;  %v8047_v14 = vld [vmem:[%s8924_s5 + $0x138] sm:$0xff]  ;;  %v8025_v17 = vld [vmem:[%s8924_s5 + $0x88] sm:$0xff]  ;;  %v4392_v22 = vadd.f32 %v4376_v0, %v4109_v63  ;;  %v4407_v7 = vpack.c.bf16 %v4399_v16, %v4399_v16 }
 0x27f   : > { %v7006_v62 = vld [vmem:[#allocation7 + $0x638] sm:$0xf0]  ;;  %v8061_v63 = vld [vmem:[%s8924_s5 + $0x1a8] sm:$0xff] }
 0x280   : > { %v7009_v4 = vor.u32 %v7691_v23, %v7006_v62  ;;  %4928 = vmatpush.bf16.msrb.mxu0 %v8014_v25  ;;  %4353 = vmatpush.bf16.msra.mxu2 %v6753_v27  ;;  %v8012_v37 = vld [vmem:[%s8924_s5 + $0x20] sm:$0xff]  ;;  %v4123_v20 = vpop.f32.mrf.mxu0  ;;  %v4136_v54 = vpop.f32.mrf.mxu1  ;;  %v8033_v23 = vld [vmem:[%s8924_s5 + $0xc8] sm:$0xff]  ;;  %v8055_v25 = vld [vmem:[%s8924_s5 + $0x178] sm:$0xff] }
 0x281   : > { %v8020_v38 = vld [vmem:[%s8924_s5 + $0x60] sm:$0xff]  ;;  %v8046_v27 = vld [vmem:[%s8924_s5 + $0x130] sm:$0xff]  ;;  %v8057_v16 = vld [vmem:[%s8924_s5 + $0x188] sm:$0xff] }
 0x282   : > { %4941 = vmatpush.bf16.msrb.mxu1 %v8022_v26  ;;  %4366 = vmatpush.bf16.msra.mxu3 %v7009_v4  ;;  %v8028_v46 = vld [vmem:[%s8924_s5 + $0xa0] sm:$0xff]  ;;  %v4406_v26 = vpack.c.bf16 %v4398_v11, %v4398_v11 }
 0x283   : > { %4354 = vmatmul.bf16.vlgmr.msra.gmra.mxu2 %v8562_v55  ;;  %v8037_v55 = vld [vmem:[%s8924_s5 + $0xe8] sm:$0xff]  ;;  %v8036_v35 = vld [vmem:[%s8924_s5 + $0xe0] sm:$0xff] }
 0x284   : > { %4953 = vmatpush.bf16.msrb.mxu2 %v8031_v29  ;;  %4929 = vmatpush.bf16.msrb.mxu0 %v8013_v34  ;;  %v4147_v1 = vpop.f32.mrf.mxu2  ;;  %v8008_v10 = vld [vmem:[%s8924_s5] sm:$0xff]  ;;  %v4400_v29 = vmax.f32 %v4392_v22, 0.0  ;;  %v8054_v34 = vld [vmem:[%s8924_s5 + $0x170] sm:$0xff]  ;;  %v4379_v22 = vperm.slane %v8721_v44, 5 }
 0x285   : > { %4367 = vmatmul.bf16.vlgmr.msra.gmra.mxu3 %v8564_v58  ;;  %v8011_v58 = vld [vmem:[%s8924_s5 + $0x18] sm:$0xff]  ;;  %v4148_v3 = vadd.f32 %v4147_v1, %v4135_v59  ;;  %v8016_v2 = vld [vmem:[%s8924_s5 + $0x40] sm:$0xff] }
 0x286   : > { %4966 = vmatpush.bf16.msrb.mxu3 %v8039_v32  ;;  %4942 = vmatpush.bf16.msrb.mxu1 %v8021_v28  ;;  %v8024_v4 = vld [vmem:[%s8924_s5 + $0x80] sm:$0xff] }
 0x287   : > { %v4160_v5 = vpop.f32.mrf.mxu3  ;;  %v8032_v32 = vld [vmem:[%s8924_s5 + $0xc0] sm:$0xff] }
 0x288   : > { %4954 = vmatpush.bf16.msrb.mxu2 %v8030_v30  ;;  %4930 = vmatpush.bf16.msrb.mxu0 %v8012_v37  ;;  %v4161_v15 = vadd.f32 %v4160_v5, %v4148_v3  ;;  %v4408_v37 = vpack.c.bf16 %v4400_v29, %v4400_v29  ;;  %v8044_v41 = vld [vmem:[%s8924_s5 + $0x120] sm:$0xff]  ;;  %v8059_v3 = vld [vmem:[%s8924_s5 + $0x198] sm:$0xff] }
 0x289   : > { %v8052_v31 = vld [vmem:[%s8924_s5 + $0x160] sm:$0xff] }
 0x28a   : > { %4967 = vmatpush.bf16.msrb.mxu3 %v8038_v36  ;;  %4943 = vmatpush.bf16.msrb.mxu1 %v8020_v38  ;;  %v4393_v62 = vadd.f32 %v4377_v6, %v4161_v15  ;;  %v8045_v36 = vld [vmem:[%s8924_s5 + $0x128] sm:$0xff]  ;;  %v8040_v52 = vld [vmem:[%s8924_s5 + $0x100] sm:$0xff] }
 0x28b   : > { %v8060_v1 = vld [vmem:[%s8924_s5 + $0x1a0] sm:$0xff] }
 0x28c   : > { %4955 = vmatpush.bf16.msrb.mxu2 %v8029_v39  ;;  %4931 = vmatpush.bf16.msrb.mxu0 %v8011_v58  ;;  %v4149_v18 = vpop.f32.mrf.mxu2  ;;  %v4401_v28 = vmax.f32 %v4393_v62, 0.0  ;;  %v8053_v39 = vld [vmem:[%s8924_s5 + $0x168] sm:$0xff] }
 0x28d   : > { %v8069_v18 = vld [vmem:[%s8924_s5 + $0x1e8] sm:$0xff] }
 0x28e   : > { %4968 = vmatpush.bf16.msrb.mxu3 %v8037_v55  ;;  %4944 = vmatpush.bf16.msrb.mxu1 %v8019_v43  ;;  %v4409_v38 = vpack.c.bf16 %v4401_v28, %v4401_v28  ;;  %v8051_v43 = vld [vmem:[%s8924_s5 + $0x158] sm:$0xff] }
 0x28f   : > { %v4162_v30 = vpop.f32.mrf.mxu3 }
 0x290   : > { %4956 = vmatpush.bf16.msrb.mxu2 %v8028_v46  ;;  %4932 = vmatpush.bf16.msrb.mxu0 %v8010_v19  ;;  %v8050_v19 = vld [vmem:[%s8924_s5 + $0x150] sm:$0xff]  ;;  %v8067_v30 = vld [vmem:[%s8924_s5 + $0x1d8] sm:$0xff] }
 0x292   : > { %4969 = vmatpush.bf16.msrb.mxu3 %v8036_v35  ;;  %4945 = vmatpush.bf16.msrb.mxu1 %v8018_v24 }
 0x294   : > { %4957 = vmatpush.bf16.msrb.mxu2 %v8027_v51  ;;  %4933 = vmatpush.bf16.msrb.mxu0 %v8009_v33  ;;  %v4378_v51 = vperm.slane %v8721_v44, 4  ;;  %v8063_v33 = vld [vmem:[%s8924_s5 + $0x1b8] sm:$0xff] }
 0x296   : > { %4970 = vmatpush.bf16.msrb.mxu3 %v8035_v53  ;;  %4946 = vmatpush.bf16.msrb.mxu1 %v8017_v56  ;;  %v8048_v53 = vld [vmem:[%s8924_s5 + $0x140] sm:$0xff] }
 0x298   : > { %4958 = vmatpush.bf16.msrb.mxu2 %v8026_v60  ;;  %4934 = vmatpush.bf16.msrb.mxu0 %v8008_v10  ;;  %v4173_v55 = vpop.f32.mrf.mxu0  ;;  %v8058_v10 = vld [vmem:[%s8924_s5 + $0x190] sm:$0xff] }
 0x299   : > { %v4186_v58 = vpop.f32.mrf.mxu1  ;;  %v4174_v46 = vadd.f32 %v4173_v55, %v8617_v12 }
 0x29a   : > { %4971 = vmatpush.bf16.msrb.mxu3 %v8034_v13  ;;  %4947 = vmatpush.bf16.msrb.mxu1 %v8016_v2 }
 0x29b   : > { %4935 = vmatmul.bf16.vlgmr.msrb.gmra.mxu0 %v4406_v26  ;;  %v4187_v24 = vadd.f32 %v4186_v58, %v4174_v46 }
 0x29c   : > { %4979 = vmatpush.bf16.msra.mxu0 %v8047_v14  ;;  %4959 = vmatpush.bf16.msrb.mxu2 %v8025_v17 }
 0x29d   : > { %4948 = vmatmul.bf16.vlgmr.msrb.gmra.mxu1 %v4407_v7  ;;  %v8070_v7 = vld [vmem:[%s8924_s5 + $0x1f0] sm:$0xff] }
 0x29e   : > { %4992 = vmatpush.bf16.msra.mxu1 %v8055_v25  ;;  %4972 = vmatpush.bf16.msrb.mxu3 %v8033_v23  ;;  %v8071_v25 = vld [vmem:[%s8924_s5 + $0x1f8] sm:$0xff] }
 0x2a0   : > { %4980 = vmatpush.bf16.msra.mxu0 %v8046_v27  ;;  %4960 = vmatpush.bf16.msrb.mxu2 %v8024_v4  ;;  %v4175_v35 = vpop.f32.mrf.mxu0 }
 0x2a1   : > { %v4188_v47 = vpop.f32.mrf.mxu1 }
 0x2a2   : > { %4993 = vmatpush.bf16.msra.mxu1 %v8054_v34  ;;  %4973 = vmatpush.bf16.msrb.mxu3 %v8032_v32  ;;  %v8068_v34 = vld [vmem:[%s8924_s5 + $0x1e0] sm:$0xff] }
 0x2a3   : > { %4961 = vmatmul.bf16.vlgmr.msrb.gmra.mxu2 %v4408_v37 }
 0x2a4   : > { %4981 = vmatpush.bf16.msra.mxu0 %v8045_v36  ;;  %5005 = vmatpush.bf16.msra.mxu2 %v8063_v33 }
 0x2a5   : > { %4974 = vmatmul.bf16.vlgmr.msrb.gmra.mxu3 %v4409_v38  ;;  %v8066_v38 = vld [vmem:[%s8924_s5 + $0x1d0] sm:$0xff] }
 0x2a6   : > { %4994 = vmatpush.bf16.msra.mxu1 %v8053_v39  ;;  %v4199_v61 = vpop.f32.mrf.mxu2  ;;  %5018 = vmatpush.bf16.msra.mxu3 %v8071_v25 }
 0x2a7   : > { %v4200_v50 = vadd.f32 %v4199_v61, %v4187_v24  ;;  %v4212_v12 = vpop.f32.mrf.mxu3 }
 0x2a8   : > { %4982 = vmatpush.bf16.msra.mxu0 %v8044_v41  ;;  %5006 = vmatpush.bf16.msra.mxu2 %v8062_v57 }
 0x2a9   : > { %v4213_v20 = vadd.f32 %v4212_v12, %v4200_v50 }
 0x2aa   : > { %4995 = vmatpush.bf16.msra.mxu1 %v8052_v31  ;;  %5019 = vmatpush.bf16.msra.mxu3 %v8070_v7  ;;  %v8065_v31 = vld [vmem:[%s8924_s5 + $0x1c8] sm:$0xff] }
 0x2ab   : > { %v4394_v54 = vadd.f32 %v4378_v51, %v4213_v20 }
 0x2ac   : > { %4983 = vmatpush.bf16.msra.mxu0 %v8043_v42  ;;  %5007 = vmatpush.bf16.msra.mxu2 %v8061_v63  ;;  %v4542_v63 = vld [vmem:[#allocation10] sm:$0x1] }
 0x2ad   : > { %v4402_v21 = vmax.f32 %v4394_v54, 0.0  ;;  %v4381_v54 = vperm.slane %v8721_v44, 7 }
 0x2ae   : > { %4996 = vmatpush.bf16.msra.mxu1 %v8051_v43  ;;  %v4201_v56 = vpop.f32.mrf.mxu2  ;;  %5020 = vmatpush.bf16.msra.mxu3 %v8069_v18  ;;  %v4380_v43 = vperm.slane %v8721_v44, 6 }
 0x2af   : > { %v4410_v59 = vpack.c.bf16 %v4402_v21, %v4402_v21  ;;  %v4214_v60 = vpop.f32.mrf.mxu3 }
 0x2b0   : > { %4984 = vmatpush.bf16.msra.mxu0 %v8042_v45  ;;  %5008 = vmatpush.bf16.msra.mxu2 %v8060_v1 }
 0x2b2   : > { %4997 = vmatpush.bf16.msra.mxu1 %v8050_v19  ;;  %5021 = vmatpush.bf16.msra.mxu3 %v8068_v34 }
 0x2b4   : > { %4985 = vmatpush.bf16.msra.mxu0 %v8041_v48  ;;  %5009 = vmatpush.bf16.msra.mxu2 %v8059_v3 }
 0x2b6   : > { %4998 = vmatpush.bf16.msra.mxu1 %v8049_v49  ;;  %5022 = vmatpush.bf16.msra.mxu3 %v8067_v30 }
 0x2b8   : > { %4986 = vmatpush.bf16.msra.mxu0 %v8040_v52  ;;  %v4225_v0 = vpop.f32.mrf.mxu0  ;;  %5010 = vmatpush.bf16.msra.mxu2 %v8058_v10 }
 0x2b9   : > { %v4238_v13 = vpop.f32.mrf.mxu1  ;;  %v4226_v5 = vadd.f32 %v4225_v0, %v8623_v9  ;;  %v8056_v9 = vld [vmem:[%s8924_s5 + $0x180] sm:$0xff] }
 0x2ba   : > { %4999 = vmatpush.bf16.msra.mxu1 %v8048_v53  ;;  %5023 = vmatpush.bf16.msra.mxu3 %v8066_v38 }
 0x2bb   : > { %4987 = vmatmul.bf16.vlgmr.msra.gmra.mxu0 %v4410_v59  ;;  %v4239_v2 = vadd.f32 %v4238_v13, %v4226_v5 }
 0x2bc   : > { %5011 = vmatpush.bf16.msra.mxu2 %v8057_v16 }
 0x2be   : > { %5024 = vmatpush.bf16.msra.mxu3 %v8065_v31 }
 0x2c0   : > { %v4227_v6 = vpop.f32.mrf.mxu0  ;;  %5012 = vmatpush.bf16.msra.mxu2 %v8056_v9 }
 0x2c1   : > { %v4240_v11 = vpop.f32.mrf.mxu1 }
 0x2c6   : > { %v4251_v14 = vpop.f32.mrf.mxu2 }
 0x2c7   : > { %v4252_v15 = vadd.f32 %v4251_v14, %v4239_v2  ;;  %v4264_v17 = vpop.f32.mrf.mxu3 }
 0x2c9   : > { %v4265_v23 = vadd.f32 %v4264_v17, %v4252_v15 }
 0x2cb   : > { %v4395_v62 = vadd.f32 %v4379_v22, %v4265_v23 }
 0x2cd   : > { %v4403_v26 = vmax.f32 %v4395_v62, 0.0 }
 0x2ce   : > { %v4253_v27 = vpop.f32.mrf.mxu2 }
 0x2cf   : > { %v4411_v4 = vpack.c.bf16 %v4403_v26, %v4403_v26  ;;  %v4266_v29 = vpop.f32.mrf.mxu3 }
 0x2d1   : > { %5000 = vmatmul.bf16.vlgmr.msra.gmra.mxu1 %v4411_v4 }
 0x2d8   : > { %v4277_v32 = vpop.f32.mrf.mxu0 }
 0x2d9   : > { %v4278_v36 = vadd.f32 %v4277_v32, %v8629_v40  ;;  %v8064_v40 = vld [vmem:[%s8924_s5 + $0x1c0] sm:$0xff] }
 0x2da   : > { %v4290_v28 = vpop.f32.mrf.mxu1  ;;  %5025 = vmatpush.bf16.msra.mxu3 %v8064_v40 }
 0x2db   : > { %v4291_v41 = vadd.f32 %v4290_v28, %v4278_v36 }
 0x2e0   : > { %v4279_v37 = vpop.f32.mrf.mxu0 }
 0x2e2   : > { %v4292_v39 = vpop.f32.mrf.mxu1 }
 0x2e6   : > { %v4303_v55 = vpop.f32.mrf.mxu2 }
 0x2e7   : > { %v4304_v58 = vadd.f32 %v4303_v55, %v4291_v41 }
 0x2e8   : > { %v4316_v42 = vpop.f32.mrf.mxu3 }
 0x2e9   : > { %v4317_v45 = vadd.f32 %v4316_v42, %v4304_v58 }
 0x2eb   : > { %v4396_v46 = vadd.f32 %v4380_v43, %v4317_v45 }
 0x2ed   : > { %v4404_v35 = vmax.f32 %v4396_v46, 0.0 }
 0x2ee   : > { %v4305_v19 = vpop.f32.mrf.mxu2 }
 0x2ef   : > { %v4412_v47 = vpack.c.bf16 %v4404_v35, %v4404_v35 }
 0x2f0   : > { %v4318_v48 = vpop.f32.mrf.mxu3 }
 0x2f1   : > { %5013 = vmatmul.bf16.vlgmr.msra.gmra.mxu2 %v4412_v47 }
 0x2f8   : > { %v4329_v24 = vpop.f32.mrf.mxu0 }
 0x2f9   : > { %v4330_v49 = vadd.f32 %v4329_v24, %v8635_v8 }
 0x2fa   : > { %v4342_v61 = vpop.f32.mrf.mxu1 }
 0x2fb   : > { %v4343_v51 = vadd.f32 %v4342_v61, %v4330_v49 }
 0x300   : > { %v4331_v50 = vpop.f32.mrf.mxu0 }
 0x302   : > { %v4344_v12 = vpop.f32.mrf.mxu1 }
 0x306   : > { %v4355_v52 = vpop.f32.mrf.mxu2 }
 0x307   : > { %v4356_v20 = vadd.f32 %v4355_v52, %v4343_v51 }
 0x308   : > { %v4368_v53 = vpop.f32.mrf.mxu3 }
 0x309   : > { %v4369_v33 = vadd.f32 %v4368_v53, %v4356_v20 }
 0x30b   : > { %v4397_v21 = vadd.f32 %v4381_v54, %v4369_v33 }
 0x30d   : > { %v4405_v56 = vmax.f32 %v4397_v21, 0.0 }
 0x30e   : > { %v4357_v57 = vpop.f32.mrf.mxu2 }
 0x30f   : > { %v4413_v59 = vpack.c.bf16 %v4405_v56, %v4405_v56 }
 0x310   : > { %v4370_v60 = vpop.f32.mrf.mxu3 }
 0x311   : > { %5026 = vmatmul.bf16.vlgmr.msra.gmra.mxu3 %v4413_v59 }
 0x318   : > { %v4936_v0 = vpop.f32.mrf.mxu0 }
 0x319   : > { %v4937_v1 = vadd.f32 %v4936_v0, %v4542_v63 }
 0x31a   : > { %v4949_v13 = vpop.f32.mrf.mxu1 }
 0x31b   : > { %v4950_v8 = vadd.f32 %v4949_v13, %v4937_v1 }
 0x320   : > { %v4938_v3 = vpop.f32.mrf.mxu0 }
 0x322   : > { %v4951_v5 = vpop.f32.mrf.mxu1 }
 0x326   : > { %v4962_v6 = vpop.f32.mrf.mxu2 }
 0x327   : > { %v4963_v10 = vadd.f32 %v4962_v6, %v4950_v8 }
 0x328   : > { %v4975_v11 = vpop.f32.mrf.mxu3 }
 0x329   : > { %v4976_v44 = vadd.f32 %v4975_v11, %v4963_v10 }
 0x32e   : > { %v4964_v2 = vpop.f32.mrf.mxu2 }
 0x330   : > { %v4977_v14 = vpop.f32.mrf.mxu3 }
 0x338   : > { %v4988_v16 = vpop.f32.mrf.mxu0 }
 0x339   : > { %v4989_v15 = vadd.f32 %v4988_v16, %v4976_v44 }
 0x340   : > { %v4990_v17 = vpop.f32.mrf.mxu0 }
 0x34e   : > { %v5001_v22 = vpop.f32.mrf.mxu1 }
 0x34f   : > { %v5002_v25 = vadd.f32 %v5001_v22, %v4989_v15 }
 0x356   : > { %v5003_v23 = vpop.f32.mrf.mxu1 }
 0x374   : > { %v5014_v9 = vpop.f32.mrf.mxu2 }
 0x375   : > { %v5015_v26 = vadd.f32 %v5014_v9, %v5002_v25 }
 0x37c   : > { %v5016_v62 = vpop.f32.mrf.mxu2 }
 0x394   : > { %v5027_v27 = vpop.f32.mrf.mxu3 }
 0x395   : > { %v5028_v7 = vadd.f32 %v5027_v27, %v5015_v26 }
 0x397   : > { %5032 = vst.msk [vmem:[%s345_s18] sm:$0x1] %vm5031_vm1, %v5028_v7 }
 0x398   : > { %8343 = shalt.err (!%p8340_p8)
}
 0x399   : > { %8092 = dma.vmem_to_hbm [thread:$0]  (%p8479_p5), %s5045_s9, 16, %s5047_s21, %s5034_s14  }
 0x39c   : > { %v5029_v4 = vpop.f32.mrf.mxu3 }
 0x39d PF: > { %p8124_p9 = scmp.ge.s32.totalorder %s8390_s27, 2  ;;  %s5058_s22 = sand.u32 1, %s8378_s24  }
 0x39e   : > { %s5059_s8 = scalar_lea.sflag [#allocation4], %s5058_s22 }
 0x39f   : > { %p8111_p10 = pnand %p8124_p9, %p8483_p6 }
 0x3a1   : > { %p8112_p11 = pneg %p8111_p10 }
 0x3a3   : > { %8373 = dma.done.wait (%p8112_p11), %s5059_s8, 16  }
 0x3a4   : > { %8375 = vsyncadd (%p8112_p11), %s5059_s8, 4294967280  ;;  %p20_p12 = scmp.ge.s32.totalorder %s8466_s30, 4   ;;  %s8935_s24 = smov %s8382_s25 }
 0x3a5   : > { %s8936_s25 = smov %s8386_s26  ;;  %s8937_s26 = smov %s8477_s10 }
 0x3a6   : > { %s8938_s27 = smov %s8466_s30  ;;  %22 = sbr.rel (!%p20_p12) target bundleno = 9 (0x9), region = 105 }
 0x3ab   :  { %5064 = vsyncpa [#allocation3], 1 }
 0x3ac   :  { %5066 = vsyncpa [#allocation3 + $0x1], 1 }
 0x3ad   :  { %5067 = vsyncpa [#allocation6], 1 }
 0x3ae   :  { %5068 = vsyncpa [#allocation9], 1 }
 0x3af   :  { %5069 = vsyncpa [#allocation4], 1 }
 0x3b0   :  { %5071 = vsyncpa [#allocation4 + $0x1], 1 }

</bundles_post_ra>
